<compile_context>
chip_gen: v6e
topology: v6e:2x2x1
jax: 0.10.0
libtpu: 0.0.40
codegen_flags: <defaults>
</compile_context>

<pallas_src>
import functools
import math

import jax
import jax.numpy as jnp
from jax.experimental import pallas as pl
from jax.experimental.pallas import tpu as pltpu


MATMUL_WEIGHT_DTYPE = jnp.bfloat16   # MXU-native; f32 accumulation everywhere.
_HAAR_SCALE = 1.0 / (2.0 * math.sqrt(2.0))


# --------------------------------------------------------------------------
# helpers
# --------------------------------------------------------------------------

def _round_up(x, m):
    return ((x + m - 1) // m) * m


def _cdiv(a, b):
    return (a + b - 1) // b


def _pick_tile(M):
    """Token-row tile: aim for >= 8 grid tiles (v7x dual-TC + pipelining)."""
    if M >= 8 * 256:
        tm = 256
    elif M >= 8 * 128:
        tm = 128
    else:
        tm = max(8, _round_up(_cdiv(M, 8), 8))
    return _round_up(max(M, 1), tm), tm


def _block_diag(wl, wh):
    dl_in, dl_out = wl.shape
    dh_in, dh_out = wh.shape
    top = jnp.concatenate([wl, jnp.zeros((dl_in, dh_out), wl.dtype)], axis=1)
    bot = jnp.concatenate([jnp.zeros((dh_in, dl_out), wh.dtype), wh], axis=1)
    return jnp.concatenate([top, bot], axis=0)


def _haar_mix(x, chan):
    """Orthonormal 3D Haar mix over the corner/subband axis.

    x: (rows, 8*chan) with column = d*chan + c, d = dt*4 + dh*2 + dw.
    Pure +/- butterfly in f32 (exact, self-inverse since H is symmetric
    orthonormal).  Usable both inside Pallas kernels and as plain jnp.
    """
    parts = [x[:, d * chan:(d + 1) * chan] for d in range(8)]
    for bit in (1, 2, 4):            # w, h, t parity stages (order irrelevant)
        nxt = list(parts)
        for d in range(8):
            if d & bit == 0:
                a = parts[d]
                b = parts[d | bit]
                nxt[d] = a + b
                nxt[d | bit] = a - b
        parts = nxt
    return jnp.concatenate(parts, axis=1) * _HAAR_SCALE


# --------------------------------------------------------------------------
# fused encoder kernel: Haar DWT + in_proj + MLP blocks + latent proj + sample
# --------------------------------------------------------------------------

def _encoder_kernel(ctok_ref, eps_ref, w_in_ref, b_in_ref, w1_ref, b1_ref,
                    w2_ref, b2_ref, zw_ref, zb_ref, o_ref,
                    *, n_blocks, lat, chan):
    wd = w_in_ref.dtype
    ctok = ctok_ref[...].astype(jnp.float32)
    tok = _haar_mix(ctok, chan)                       # DWT subband tokens (tm, 8*chan)

    # in_proj (block-diagonal low/high channel mixer) + gelu
    # TODO(synk): PyTorch nn.GELU default is exact erf; tanh approximation used.
    p = jnp.dot(tok.astype(wd), w_in_ref[...], preferred_element_type=jnp.float32)
    p = jax.nn.gelu(p + b_in_ref[...], approximate=True)

    # sep blocks (block-diagonal) then fusion blocks, all emb-wide residual MLPs
    for j in range(n_blocks):
        h = jnp.dot(p.astype(wd), w1_ref[j], preferred_element_type=jnp.float32)
        h = jax.nn.gelu(h + b1_ref[j], approximate=True)
        p = p + jnp.dot(h.astype(wd), w2_ref[j],
                        preferred_element_type=jnp.float32) + b2_ref[j]

    # fused [z_mean | z_logvar] projection + reparameterized sample
    acc = jnp.dot(p.astype(wd), zw_ref[...],
                  preferred_element_type=jnp.float32) + zb_ref[...]
    mean = acc[:, :lat]
    logvar = jnp.clip(acc[:, lat:], -30.0, 20.0)
    zs = mean + jnp.exp(0.5 * logvar) * eps_ref[...]

    o_ref[...] = jnp.concatenate([tok, mean, logvar, zs], axis=1).astype(o_ref.dtype)


def encoder_forward_pallas(ctok, eps, enc, Mp, tm, lat):
    C8 = ctok.shape[1]
    emb = enc["w_in"].shape[1]
    n_blk = enc["w1"].shape[0]
    out_w = C8 + 3 * lat
    kern = functools.partial(_encoder_kernel, n_blocks=n_blk, lat=lat, chan=C8 // 8)
    return pl.pallas_call(
        kern,
        out_shape=jax.ShapeDtypeStruct((Mp, out_w), jnp.float32),
        grid=(Mp // tm,),
        in_specs=[
            pl.BlockSpec((tm, C8), lambda i: (i, 0)),
            pl.BlockSpec((tm, lat), lambda i: (i, 0)),
            pl.BlockSpec((C8, emb), lambda i: (0, 0)),
            pl.BlockSpec((1, emb), lambda i: (0, 0)),
            pl.BlockSpec((n_blk, emb, emb), lambda i: (0, 0, 0)),
            pl.BlockSpec((n_blk, 1, emb), lambda i: (0, 0, 0)),
            pl.BlockSpec((n_blk, emb, emb), lambda i: (0, 0, 0)),
            pl.BlockSpec((n_blk, 1, emb), lambda i: (0, 0, 0)),
            pl.BlockSpec((emb, 2 * lat), lambda i: (0, 0)),
            pl.BlockSpec((1, 2 * lat), lambda i: (0, 0)),
        ],
        out_specs=pl.BlockSpec((tm, out_w), lambda i: (i, 0)),
        compiler_params=pltpu.CompilerParams(dimension_semantics=("parallel",)),
    )(ctok, eps, enc["w_in"], enc["b_in"], enc["w1"], enc["b1"],
      enc["w2"], enc["b2"], enc["zw"], enc["zb"])


# --------------------------------------------------------------------------
# fused decoder kernel: ISTA recon + MLP blocks + out_proj + inverse Haar
# --------------------------------------------------------------------------

def _decoder_kernel(z_ref, winit_ref, back_ref, A_ref, w1_ref, b1_ref,
                    w2_ref, b2_ref, wout_ref, bout_ref, o_ref,
                    *, n_blocks, steps, thetas, iter_num, chan):
    wd = winit_ref.dtype
    z = z_ref[...].astype(jnp.float32)
    z16 = z.astype(wd)

    # ISTA recon: x@phi_l@back_l collapsed into one dense emb x emb matmul
    # (A_l precomputed) and z@back_l hoisted out of the iteration loop.
    x = jnp.dot(z16, winit_ref[...], preferred_element_type=jnp.float32)
    for l in range(len(steps)):
        step = steps[l]
        theta = thetas[l]
        zb = step * jnp.dot(z16, back_ref[l], preferred_element_type=jnp.float32)
        for _ in range(iter_num):
            u = x - step * jnp.dot(x.astype(wd), A_ref[l],
                                   preferred_element_type=jnp.float32) + zb
            x = jnp.maximum(u - theta, 0.0) - jnp.maximum(-u - theta, 0.0)

    # fusion blocks then sep blocks (block-diagonal), emb-wide residual MLPs
    for j in range(n_blocks):
        h = jnp.dot(x.astype(wd), w1_ref[j], preferred_element_type=jnp.float32)
        h = jax.nn.gelu(h + b1_ref[j], approximate=True)
        x = x + jnp.dot(h.astype(wd), w2_ref[j],
                        preferred_element_type=jnp.float32) + b2_ref[j]

    dtok = jnp.dot(x.astype(wd), wout_ref[...],
                   preferred_element_type=jnp.float32) + bout_ref[...]
    ctok_rec = _haar_mix(dtok, chan)                  # inverse Haar (self-inverse)
    o_ref[...] = jnp.concatenate([dtok, ctok_rec], axis=1).astype(o_ref.dtype)


def decoder_forward_pallas(z, dec, Mp, tm):
    lat = z.shape[1]
    emb = dec["winit"].shape[1]
    C8 = dec["w_out"].shape[1]
    L = dec["A"].shape[0]
    n_blk = dec["w1"].shape[0]
    out_w = 2 * C8
    kern = functools.partial(_decoder_kernel, n_blocks=n_blk, steps=dec["steps"],
                             thetas=dec["thetas"], iter_num=dec["iter_num"],
                             chan=C8 // 8)
    return pl.pallas_call(
        kern,
        out_shape=jax.ShapeDtypeStruct((Mp, out_w), jnp.float32),
        grid=(Mp // tm,),
        in_specs=[
            pl.BlockSpec((tm, lat), lambda i: (i, 0)),
            pl.BlockSpec((lat, emb), lambda i: (0, 0)),
            pl.BlockSpec((L, lat, emb), lambda i: (0, 0, 0)),
            pl.BlockSpec((L, emb, emb), lambda i: (0, 0, 0)),
            pl.BlockSpec((n_blk, emb, emb), lambda i: (0, 0, 0)),
            pl.BlockSpec((n_blk, 1, emb), lambda i: (0, 0, 0)),
            pl.BlockSpec((n_blk, emb, emb), lambda i: (0, 0, 0)),
            pl.BlockSpec((n_blk, 1, emb), lambda i: (0, 0, 0)),
            pl.BlockSpec((emb, C8), lambda i: (0, 0)),
            pl.BlockSpec((1, C8), lambda i: (0, 0)),
        ],
        out_specs=pl.BlockSpec((tm, out_w), lambda i: (i, 0)),
        compiler_params=pltpu.CompilerParams(dimension_semantics=("parallel",)),
    )(z, dec["winit"], dec["back"], dec["A"], dec["w1"], dec["b1"],
      dec["w2"], dec["b2"], dec["w_out"], dec["b_out"])


# --------------------------------------------------------------------------
# Parameter init (deterministic, synthetic)
# --------------------------------------------------------------------------

def init_params(key, args, in_ch=3):
    assert args.embedding_dim == args.l_dim + args.h_dim
    keys = iter(jax.random.split(key, 256))
    scale = 0.02
    wd = MATMUL_WEIGHT_DTYPE
    l, h, emb, lat = args.l_dim, args.h_dim, args.embedding_dim, args.latent_dim
    C8 = 8 * in_ch

    def w(din, dout):
        return scale * jax.random.normal(next(keys), (din, dout), jnp.float32)

    def sep_pair():
        # low + high separate paths fused into one block-diagonal emb-wide weight
        return _block_diag(w(l, l), w(h, h)), jnp.zeros((1, emb), jnp.float32)

    def fusion_pair():
        return w(emb, emb), jnp.zeros((1, emb), jnp.float32)

    # TODO(synk): Encoder_Arch / Decoder_Arch / ISTA / Patcher internals are not
    # in the provided source; structure is reproduced (low/high separate paths,
    # fusion layers, ISTA sample/recon with soft-thresholding, Haar DWT) with
    # synthetic pointwise channel mixers.
    n_sep, n_fus = args.sep_num_layer, args.fusion_num_layer

    enc_w1, enc_b1, enc_w2, enc_b2 = [], [], [], []
    for _ in range(n_sep):
        a, ab = sep_pair(); b, bb = sep_pair()
        enc_w1.append(a); enc_b1.append(ab); enc_w2.append(b); enc_b2.append(bb)
    for _ in range(n_fus):
        a, ab = fusion_pair(); b, bb = fusion_pair()
        enc_w1.append(a); enc_b1.append(ab); enc_w2.append(b); enc_b2.append(bb)
    w_in = _block_diag(w(in_ch, l), w(7 * in_ch, h))        # (C8, emb)

    phi_sample = w(emb, lat)   # ISTA.sample analysis operator
    w_std = w(emb, lat)        # std_layer
    enc = {"w_in": w_in.astype(wd), "b_in": jnp.zeros((1, emb), jnp.float32),
           "w1": jnp.stack(enc_w1).astype(wd), "b1": jnp.stack(enc_b1),
           "w2": jnp.stack(enc_w2).astype(wd), "b2": jnp.stack(enc_b2),
           "zw": jnp.concatenate([phi_sample, w_std], axis=1).astype(wd),
           "zb": jnp.zeros((1, 2 * lat), jnp.float32)}

    L = args.ista_layer_num
    winit = w(lat, emb)
    phis = jnp.stack([w(emb, lat) for _ in range(L)])
    backs = jnp.stack([w(lat, emb) for _ in range(L)])
    A = jnp.einsum("lij,ljk->lik", phis, backs)              # phi_l @ back_l, f32

    dec_w1, dec_b1, dec_w2, dec_b2 = [], [], [], []
    for _ in range(n_fus):
        a, ab = fusion_pair(); b, bb = fusion_pair()
        dec_w1.append(a); dec_b1.append(ab); dec_w2.append(b); dec_b2.append(bb)
    for _ in range(n_sep):
        a, ab = sep_pair(); b, bb = sep_pair()
        dec_w1.append(a); dec_b1.append(ab); dec_w2.append(b); dec_b2.append(bb)
    w_out = _block_diag(w(l, in_ch), w(h, 7 * in_ch))        # (emb, C8)

    dec = {"winit": winit.astype(wd), "back": backs.astype(wd), "A": A.astype(wd),
           "steps": tuple(0.5 for _ in range(L)),
           "thetas": tuple(0.02 for _ in range(L)),
           "iter_num": int(args.ista_iter_num),
           "w1": jnp.stack(dec_w1).astype(wd), "b1": jnp.stack(dec_b1),
           "w2": jnp.stack(dec_w2).astype(wd), "b2": jnp.stack(dec_b2),
           "w_out": w_out.astype(wd), "b_out": jnp.zeros((1, C8), jnp.float32)}

    return {"enc": enc, "dec": dec, "latent_dim": lat}


# --------------------------------------------------------------------------
# Model forward
# --------------------------------------------------------------------------

def leanvae_forward(params, x, eps_key):
    """Mirrors LeanVAE.forward: returns (x, x_recon, x_dwt, x_dwt_rec, posterior)."""
    B, C, T, H, W = x.shape
    assert T % 2 == 0 and H % 2 == 0 and W % 2 == 0
    # TODO(synk): original Patcher replicates the first frame for causal odd-T handling.
    lat = params["latent_dim"]
    T2, H2, W2 = T // 2, H // 2, W // 2
    C8 = 8 * C
    M = B * T2 * H2 * W2
    Mp, tm = _pick_tile(M)

    # One XLA corner-gather transpose: token row = (b,t2,h2,w2), column =
    # (dt*4+dh*2+dw)*C + c.  All downstream work stays in this lane-dense
    # (tokens, channels) layout, padded once.
    ctok = (x.reshape(B, C, T2, 2, H2, 2, W2, 2)
             .transpose(0, 2, 4, 6, 3, 5, 7, 1)
             .reshape(M, C8))
    ctok = jnp.pad(ctok, ((0, Mp - M), (0, 0)))

    # TODO(synk): reparameterization noise drawn with jax.random outside the
    # kernel (in-kernel pltpu PRNG would change the random stream).
    eps = jax.random.normal(eps_key, (Mp, lat), jnp.float32)

    # ---- fused encoder (DWT + encoder + latent proj + sample), one launch ----
    enc_out = encoder_forward_pallas(ctok, eps, params["enc"], Mp, tm, lat)
    tok = enc_out[:M, :C8]
    mean = enc_out[:M, C8:C8 + lat]
    logvar = enc_out[:M, C8 + lat:C8 + 2 * lat]
    z = enc_out[:, C8 + 2 * lat:]            # keep padded rows for the decoder

    # ---- fused decoder (ISTA + decoder + out_proj + IDWT), one launch ----
    dec_out = decoder_forward_pallas(z, params["dec"], Mp, tm)
    dtok = dec_out[:M, :C8]
    ctok_rec = dec_out[:M, C8:]

    # Layout glue for returned NCTHW tensors (off the encoder/decoder hot path).
    x_dwt = tok.reshape(B, T2, H2, W2, C8).transpose(0, 4, 1, 2, 3)
    x_dwt_rec = dtok.reshape(B, T2, H2, W2, C8).transpose(0, 4, 1, 2, 3)
    x_recon = (ctok_rec.reshape(B, T2, H2, W2, 2, 2, 2, C)
               .transpose(0, 7, 1, 4, 2, 5, 3, 6)
               .reshape(B, C, T, H, W))

    # TODO(synk): posterior returned as a dict in (B,T2,H2,W2,lat) layout rather
    # than a DiagonalGaussianDistribution object.
    posterior = {"mean": mean.reshape(B, T2, H2, W2, lat),
                 "logvar": logvar.reshape(B, T2, H2, W2, lat)}
    return x, x_recon, x_dwt, x_dwt_rec, posterior


# --------------------------------------------------------------------------
# Demo
# --------------------------------------------------------------------------

if __name__ == "__main__":
    class Args:
        embedding_dim = 128
        latent_dim = 4
        ista_iter_num = 2
        ista_layer_num = 2
        l_dim = 32
        h_dim = 96
        sep_num_layer = 2
        fusion_num_layer = 2

    args = Args()
    key = jax.random.PRNGKey(0)
    k_param, k_x, k_eps = jax.random.split(key, 3)

    params = init_params(k_param, args, in_ch=3)

    B, C, T, H, W = 2, 3, 4, 32, 32
    x = jax.random.normal(k_x, (B, C, T, H, W), jnp.float32)

    fwd = jax.jit(lambda xx, kk: leanvae_forward(params, xx, kk))
    x_out, x_recon, x_dwt, x_dwt_rec, posterior = fwd(x, k_eps)
    jax.block_until_ready((x_out, x_recon, x_dwt, x_dwt_rec, posterior))

    assert x_out.shape == (B, C, T, H, W)
    assert x_recon.shape == (B, C, T, H, W)
    assert x_dwt.shape == (B, 8 * C, T // 2, H // 2, W // 2)
    assert x_dwt_rec.shape == x_dwt.shape
    assert posterior["mean"].shape == (B, T // 2, H // 2, W // 2, args.latent_dim)
    assert bool(jnp.all(jnp.isfinite(x_recon)))
    assert bool(jnp.all(jnp.isfinite(x_dwt)))
    assert bool(jnp.all(jnp.isfinite(x_dwt_rec)))

    # DWT correctness: the in-kernel Haar matches a pure-JAX reference, and the
    # orthonormal mix round-trips exactly (it is self-inverse).
    T2, H2, W2 = T // 2, H // 2, W // 2
    ct_ref = (x.reshape(B, C, T2, 2, H2, 2, W2, 2)
               .transpose(0, 2, 4, 6, 3, 5, 7, 1)
               .reshape(-1, 8 * C))
    tok_ref = _haar_mix(ct_ref, C)
    x_dwt_ref = tok_ref.reshape(B, T2, H2, W2, 8 * C).transpose(0, 4, 1, 2, 3)
    assert bool(jnp.allclose(x_dwt, x_dwt_ref, atol=1e-4))
    x_rt = (_haar_mix(tok_ref, C)
            .reshape(B, T2, H2, W2, 2, 2, 2, C)
            .transpose(0, 7, 1, 4, 2, 5, 3, 6)
            .reshape(B, C, T, H, W))
    assert bool(jnp.allclose(x_rt, x, atol=1e-4))

    print("KERNEL_OK")
</pallas_src>

<mosaic_0001>
module attributes {stable_mosaic.version = 11 : i64} {
  func.func @_encoder_kernel(%arg0: i32, %arg1: memref<128x24xf32, #tpu.memory_space<vmem>>, %arg2: memref<128x4xf32, #tpu.memory_space<vmem>>, %arg3: memref<24x128xbf16, #tpu.memory_space<vmem>>, %arg4: memref<1x128xf32, #tpu.memory_space<vmem>>, %arg5: memref<4x128x128xbf16, #tpu.memory_space<vmem>>, %arg6: memref<4x1x128xf32, #tpu.memory_space<vmem>>, %arg7: memref<4x128x128xbf16, #tpu.memory_space<vmem>>, %arg8: memref<4x1x128xf32, #tpu.memory_space<vmem>>, %arg9: memref<128x8xbf16, #tpu.memory_space<vmem>>, %arg10: memref<1x8xf32, #tpu.memory_space<vmem>>, %arg11: memref<128x36xf32, #tpu.memory_space<vmem>>) attributes {dimension_semantics = [#tpu.dimension_semantics<parallel>], iteration_bounds = array<i64: 8>, scalar_prefetch = 0 : i64, scratch_operands = 0 : i64, tpu.core_type = #tpu.core_type<tc>, window_params = [{transform_indices = @transform_0, window_bounds = array<i64: 128, 24>}, {transform_indices = @transform_1, window_bounds = array<i64: 128, 4>}, {pipeline_mode = #tpu.pipeline_mode<synchronous>, transform_indices = @transform_2, window_bounds = array<i64: 24, 128>}, {pipeline_mode = #tpu.pipeline_mode<synchronous>, transform_indices = @transform_3, window_bounds = array<i64: 1, 128>}, {pipeline_mode = #tpu.pipeline_mode<synchronous>, transform_indices = @transform_4, window_bounds = array<i64: 4, 128, 128>}, {pipeline_mode = #tpu.pipeline_mode<synchronous>, transform_indices = @transform_5, window_bounds = array<i64: 4, 1, 128>}, {pipeline_mode = #tpu.pipeline_mode<synchronous>, transform_indices = @transform_6, window_bounds = array<i64: 4, 128, 128>}, {pipeline_mode = #tpu.pipeline_mode<synchronous>, transform_indices = @transform_7, window_bounds = array<i64: 4, 1, 128>}, {pipeline_mode = #tpu.pipeline_mode<synchronous>, transform_indices = @transform_8, window_bounds = array<i64: 128, 8>}, {pipeline_mode = #tpu.pipeline_mode<synchronous>, transform_indices = @transform_9, window_bounds = array<i64: 1, 8>}, {transform_indices = @transform_10, window_bounds = array<i64: 128, 36>}]} {
    %c0 = arith.constant 0 : index
    %c0_0 = arith.constant 0 : index
    %0 = vector.load %arg1[%c0, %c0_0] : memref<128x24xf32, #tpu.memory_space<vmem>>, vector<128x24xf32>
    %1 = vector.extract_strided_slice %0 {offsets = [0, 0], sizes = [128, 3], strides = [1, 1]} : vector<128x24xf32> to vector<128x3xf32>
    %2 = vector.extract_strided_slice %0 {offsets = [0, 3], sizes = [128, 3], strides = [1, 1]} : vector<128x24xf32> to vector<128x3xf32>
    %3 = vector.extract_strided_slice %0 {offsets = [0, 6], sizes = [128, 3], strides = [1, 1]} : vector<128x24xf32> to vector<128x3xf32>
    %4 = vector.extract_strided_slice %0 {offsets = [0, 9], sizes = [128, 3], strides = [1, 1]} : vector<128x24xf32> to vector<128x3xf32>
    %5 = vector.extract_strided_slice %0 {offsets = [0, 12], sizes = [128, 3], strides = [1, 1]} : vector<128x24xf32> to vector<128x3xf32>
    %6 = vector.extract_strided_slice %0 {offsets = [0, 15], sizes = [128, 3], strides = [1, 1]} : vector<128x24xf32> to vector<128x3xf32>
    %7 = vector.extract_strided_slice %0 {offsets = [0, 18], sizes = [128, 3], strides = [1, 1]} : vector<128x24xf32> to vector<128x3xf32>
    %8 = vector.extract_strided_slice %0 {offsets = [0, 21], sizes = [128, 3], strides = [1, 1]} : vector<128x24xf32> to vector<128x3xf32>
    %9 = arith.addf %1, %2 : vector<128x3xf32>
    %10 = arith.subf %1, %2 : vector<128x3xf32>
    %11 = arith.addf %3, %4 : vector<128x3xf32>
    %12 = arith.subf %3, %4 : vector<128x3xf32>
    %13 = arith.addf %5, %6 : vector<128x3xf32>
    %14 = arith.subf %5, %6 : vector<128x3xf32>
    %15 = arith.addf %7, %8 : vector<128x3xf32>
    %16 = arith.subf %7, %8 : vector<128x3xf32>
    %17 = arith.addf %9, %11 : vector<128x3xf32>
    %18 = arith.subf %9, %11 : vector<128x3xf32>
    %19 = arith.addf %10, %12 : vector<128x3xf32>
    %20 = arith.subf %10, %12 : vector<128x3xf32>
    %21 = arith.addf %13, %15 : vector<128x3xf32>
    %22 = arith.subf %13, %15 : vector<128x3xf32>
    %23 = arith.addf %14, %16 : vector<128x3xf32>
    %24 = arith.subf %14, %16 : vector<128x3xf32>
    %25 = arith.addf %17, %21 : vector<128x3xf32>
    %26 = arith.subf %17, %21 : vector<128x3xf32>
    %27 = arith.addf %19, %23 : vector<128x3xf32>
    %28 = arith.subf %19, %23 : vector<128x3xf32>
    %29 = arith.addf %18, %22 : vector<128x3xf32>
    %30 = arith.subf %18, %22 : vector<128x3xf32>
    %31 = arith.addf %20, %24 : vector<128x3xf32>
    %32 = arith.subf %20, %24 : vector<128x3xf32>
    %33 = tpu.concatenate %25, %27, %29, %31, %26, %28, %30, %32 in 1 : vector<128x3xf32>, vector<128x3xf32>, vector<128x3xf32>, vector<128x3xf32>, vector<128x3xf32>, vector<128x3xf32>, vector<128x3xf32>, vector<128x3xf32> -> vector<128x24xf32>
    %cst = arith.constant 0.353553385 : f32
    %34 = vector.broadcast %cst : f32 to vector<128x24xf32>
    %35 = arith.mulf %33, %34 : vector<128x24xf32>
    %36 = arith.truncf %35 : vector<128x24xf32> to vector<128x24xbf16>
    %c0_1 = arith.constant 0 : index
    %c0_2 = arith.constant 0 : index
    %37 = vector.load %arg3[%c0_1, %c0_2] : memref<24x128xbf16, #tpu.memory_space<vmem>>, vector<24x128xbf16>
    %cst_3 = arith.constant dense<0.000000e+00> : vector<128x128xf32>
    %38 = tpu.matmul %36, %37, %cst_3 {dimension_numbers = #tpu.dot_dimension_numbers<[1], [0], [0], [1], [0, 0, 1, 1], [], []>} : vector<128x24xbf16>, vector<24x128xbf16>, vector<128x128xf32> -> vector<128x128xf32>
    %c0_4 = arith.constant 0 : index
    %c0_5 = arith.constant 0 : index
    %39 = vector.load %arg4[%c0_4, %c0_5] : memref<1x128xf32, #tpu.memory_space<vmem>>, vector<1x128xf32>
    %40 = vector.broadcast %39 : vector<1x128xf32> to vector<128x128xf32>
    %41 = arith.addf %38, %40 : vector<128x128xf32>
    %42 = arith.mulf %41, %41 : vector<128x128xf32>
    %43 = arith.mulf %41, %42 : vector<128x128xf32>
    %cst_6 = arith.constant 4.471500e-02 : f32
    %44 = vector.broadcast %cst_6 : f32 to vector<128x128xf32>
    %45 = arith.mulf %44, %43 : vector<128x128xf32>
    %46 = arith.addf %41, %45 : vector<128x128xf32>
    %cst_7 = arith.constant 0.797884583 : f32
    %47 = vector.broadcast %cst_7 : f32 to vector<128x128xf32>
    %48 = arith.mulf %47, %46 : vector<128x128xf32>
    %49 = math.tanh %48 : vector<128x128xf32>
    %cst_8 = arith.constant 1.000000e+00 : f32
    %50 = vector.broadcast %cst_8 : f32 to vector<128x128xf32>
    %51 = arith.addf %50, %49 : vector<128x128xf32>
    %cst_9 = arith.constant 5.000000e-01 : f32
    %52 = vector.broadcast %cst_9 : f32 to vector<128x128xf32>
    %53 = arith.mulf %52, %51 : vector<128x128xf32>
    %54 = arith.mulf %41, %53 : vector<128x128xf32>
    %55 = arith.truncf %54 : vector<128x128xf32> to vector<128x128xbf16>
    %c0_10 = arith.constant 0 : index
    %c0_11 = arith.constant 0 : index
    %c0_12 = arith.constant 0 : index
    %56 = vector.load %arg5[%c0_10, %c0_11, %c0_12] : memref<4x128x128xbf16, #tpu.memory_space<vmem>>, vector<1x128x128xbf16>
    %57 = vector.shape_cast %56 : vector<1x128x128xbf16> to vector<128x128xbf16>
    %cst_13 = arith.constant dense<0.000000e+00> : vector<128x128xf32>
    %58 = tpu.matmul %55, %57, %cst_13 {dimension_numbers = #tpu.dot_dimension_numbers<[1], [0], [0], [1], [0, 0, 1, 1], [], []>} : vector<128x128xbf16>, vector<128x128xbf16>, vector<128x128xf32> -> vector<128x128xf32>
    %c0_14 = arith.constant 0 : index
    %c0_15 = arith.constant 0 : index
    %c0_16 = arith.constant 0 : index
    %59 = vector.load %arg6[%c0_14, %c0_15, %c0_16] : memref<4x1x128xf32, #tpu.memory_space<vmem>>, vector<1x1x128xf32>
    %60 = vector.shape_cast %59 : vector<1x1x128xf32> to vector<1x128xf32>
    %61 = vector.broadcast %60 : vector<1x128xf32> to vector<128x128xf32>
    %62 = arith.addf %58, %61 : vector<128x128xf32>
    %63 = arith.mulf %62, %62 : vector<128x128xf32>
    %64 = arith.mulf %62, %63 : vector<128x128xf32>
    %cst_17 = arith.constant 4.471500e-02 : f32
    %65 = vector.broadcast %cst_17 : f32 to vector<128x128xf32>
    %66 = arith.mulf %65, %64 : vector<128x128xf32>
    %67 = arith.addf %62, %66 : vector<128x128xf32>
    %cst_18 = arith.constant 0.797884583 : f32
    %68 = vector.broadcast %cst_18 : f32 to vector<128x128xf32>
    %69 = arith.mulf %68, %67 : vector<128x128xf32>
    %70 = math.tanh %69 : vector<128x128xf32>
    %cst_19 = arith.constant 1.000000e+00 : f32
    %71 = vector.broadcast %cst_19 : f32 to vector<128x128xf32>
    %72 = arith.addf %71, %70 : vector<128x128xf32>
    %cst_20 = arith.constant 5.000000e-01 : f32
    %73 = vector.broadcast %cst_20 : f32 to vector<128x128xf32>
    %74 = arith.mulf %73, %72 : vector<128x128xf32>
    %75 = arith.mulf %62, %74 : vector<128x128xf32>
    %76 = arith.truncf %75 : vector<128x128xf32> to vector<128x128xbf16>
    %c0_21 = arith.constant 0 : index
    %c0_22 = arith.constant 0 : index
    %c0_23 = arith.constant 0 : index
    %77 = vector.load %arg7[%c0_21, %c0_22, %c0_23] : memref<4x128x128xbf16, #tpu.memory_space<vmem>>, vector<1x128x128xbf16>
    %78 = vector.shape_cast %77 : vector<1x128x128xbf16> to vector<128x128xbf16>
    %cst_24 = arith.constant dense<0.000000e+00> : vector<128x128xf32>
    %79 = tpu.matmul %76, %78, %cst_24 {dimension_numbers = #tpu.dot_dimension_numbers<[1], [0], [0], [1], [0, 0, 1, 1], [], []>} : vector<128x128xbf16>, vector<128x128xbf16>, vector<128x128xf32> -> vector<128x128xf32>
    %80 = arith.addf %54, %79 : vector<128x128xf32>
    %c0_25 = arith.constant 0 : index
    %c0_26 = arith.constant 0 : index
    %c0_27 = arith.constant 0 : index
    %81 = vector.load %arg8[%c0_25, %c0_26, %c0_27] : memref<4x1x128xf32, #tpu.memory_space<vmem>>, vector<1x1x128xf32>
    %82 = vector.shape_cast %81 : vector<1x1x128xf32> to vector<1x128xf32>
    %83 = vector.broadcast %82 : vector<1x128xf32> to vector<128x128xf32>
    %84 = arith.addf %80, %83 : vector<128x128xf32>
    %85 = arith.truncf %84 : vector<128x128xf32> to vector<128x128xbf16>
    %c1 = arith.constant 1 : index
    %c0_28 = arith.constant 0 : index
    %c0_29 = arith.constant 0 : index
    %86 = vector.load %arg5[%c1, %c0_28, %c0_29] : memref<4x128x128xbf16, #tpu.memory_space<vmem>>, vector<1x128x128xbf16>
    %87 = vector.shape_cast %86 : vector<1x128x128xbf16> to vector<128x128xbf16>
    %cst_30 = arith.constant dense<0.000000e+00> : vector<128x128xf32>
    %88 = tpu.matmul %85, %87, %cst_30 {dimension_numbers = #tpu.dot_dimension_numbers<[1], [0], [0], [1], [0, 0, 1, 1], [], []>} : vector<128x128xbf16>, vector<128x128xbf16>, vector<128x128xf32> -> vector<128x128xf32>
    %c1_31 = arith.constant 1 : index
    %c0_32 = arith.constant 0 : index
    %c0_33 = arith.constant 0 : index
    %89 = vector.load %arg6[%c1_31, %c0_32, %c0_33] : memref<4x1x128xf32, #tpu.memory_space<vmem>>, vector<1x1x128xf32>
    %90 = vector.shape_cast %89 : vector<1x1x128xf32> to vector<1x128xf32>
    %91 = vector.broadcast %90 : vector<1x128xf32> to vector<128x128xf32>
    %92 = arith.addf %88, %91 : vector<128x128xf32>
    %93 = arith.mulf %92, %92 : vector<128x128xf32>
    %94 = arith.mulf %92, %93 : vector<128x128xf32>
    %cst_34 = arith.constant 4.471500e-02 : f32
    %95 = vector.broadcast %cst_34 : f32 to vector<128x128xf32>
    %96 = arith.mulf %95, %94 : vector<128x128xf32>
    %97 = arith.addf %92, %96 : vector<128x128xf32>
    %cst_35 = arith.constant 0.797884583 : f32
    %98 = vector.broadcast %cst_35 : f32 to vector<128x128xf32>
    %99 = arith.mulf %98, %97 : vector<128x128xf32>
    %100 = math.tanh %99 : vector<128x128xf32>
    %cst_36 = arith.constant 1.000000e+00 : f32
    %101 = vector.broadcast %cst_36 : f32 to vector<128x128xf32>
    %102 = arith.addf %101, %100 : vector<128x128xf32>
    %cst_37 = arith.constant 5.000000e-01 : f32
    %103 = vector.broadcast %cst_37 : f32 to vector<128x128xf32>
    %104 = arith.mulf %103, %102 : vector<128x128xf32>
    %105 = arith.mulf %92, %104 : vector<128x128xf32>
    %106 = arith.truncf %105 : vector<128x128xf32> to vector<128x128xbf16>
    %c1_38 = arith.constant 1 : index
    %c0_39 = arith.constant 0 : index
    %c0_40 = arith.constant 0 : index
    %107 = vector.load %arg7[%c1_38, %c0_39, %c0_40] : memref<4x128x128xbf16, #tpu.memory_space<vmem>>, vector<1x128x128xbf16>
    %108 = vector.shape_cast %107 : vector<1x128x128xbf16> to vector<128x128xbf16>
    %cst_41 = arith.constant dense<0.000000e+00> : vector<128x128xf32>
    %109 = tpu.matmul %106, %108, %cst_41 {dimension_numbers = #tpu.dot_dimension_numbers<[1], [0], [0], [1], [0, 0, 1, 1], [], []>} : vector<128x128xbf16>, vector<128x128xbf16>, vector<128x128xf32> -> vector<128x128xf32>
    %110 = arith.addf %84, %109 : vector<128x128xf32>
    %c1_42 = arith.constant 1 : index
    %c0_43 = arith.constant 0 : index
    %c0_44 = arith.constant 0 : index
    %111 = vector.load %arg8[%c1_42, %c0_43, %c0_44] : memref<4x1x128xf32, #tpu.memory_space<vmem>>, vector<1x1x128xf32>
    %112 = vector.shape_cast %111 : vector<1x1x128xf32> to vector<1x128xf32>
    %113 = vector.broadcast %112 : vector<1x128xf32> to vector<128x128xf32>
    %114 = arith.addf %110, %113 : vector<128x128xf32>
    %115 = arith.truncf %114 : vector<128x128xf32> to vector<128x128xbf16>
    %c2 = arith.constant 2 : index
    %c0_45 = arith.constant 0 : index
    %c0_46 = arith.constant 0 : index
    %116 = vector.load %arg5[%c2, %c0_45, %c0_46] : memref<4x128x128xbf16, #tpu.memory_space<vmem>>, vector<1x128x128xbf16>
    %117 = vector.shape_cast %116 : vector<1x128x128xbf16> to vector<128x128xbf16>
    %cst_47 = arith.constant dense<0.000000e+00> : vector<128x128xf32>
    %118 = tpu.matmul %115, %117, %cst_47 {dimension_numbers = #tpu.dot_dimension_numbers<[1], [0], [0], [1], [0, 0, 1, 1], [], []>} : vector<128x128xbf16>, vector<128x128xbf16>, vector<128x128xf32> -> vector<128x128xf32>
    %c2_48 = arith.constant 2 : index
    %c0_49 = arith.constant 0 : index
    %c0_50 = arith.constant 0 : index
    %119 = vector.load %arg6[%c2_48, %c0_49, %c0_50] : memref<4x1x128xf32, #tpu.memory_space<vmem>>, vector<1x1x128xf32>
    %120 = vector.shape_cast %119 : vector<1x1x128xf32> to vector<1x128xf32>
    %121 = vector.broadcast %120 : vector<1x128xf32> to vector<128x128xf32>
    %122 = arith.addf %118, %121 : vector<128x128xf32>
    %123 = arith.mulf %122, %122 : vector<128x128xf32>
    %124 = arith.mulf %122, %123 : vector<128x128xf32>
    %cst_51 = arith.constant 4.471500e-02 : f32
    %125 = vector.broadcast %cst_51 : f32 to vector<128x128xf32>
    %126 = arith.mulf %125, %124 : vector<128x128xf32>
    %127 = arith.addf %122, %126 : vector<128x128xf32>
    %cst_52 = arith.constant 0.797884583 : f32
    %128 = vector.broadcast %cst_52 : f32 to vector<128x128xf32>
    %129 = arith.mulf %128, %127 : vector<128x128xf32>
    %130 = math.tanh %129 : vector<128x128xf32>
    %cst_53 = arith.constant 1.000000e+00 : f32
    %131 = vector.broadcast %cst_53 : f32 to vector<128x128xf32>
    %132 = arith.addf %131, %130 : vector<128x128xf32>
    %cst_54 = arith.constant 5.000000e-01 : f32
    %133 = vector.broadcast %cst_54 : f32 to vector<128x128xf32>
    %134 = arith.mulf %133, %132 : vector<128x128xf32>
    %135 = arith.mulf %122, %134 : vector<128x128xf32>
    %136 = arith.truncf %135 : vector<128x128xf32> to vector<128x128xbf16>
    %c2_55 = arith.constant 2 : index
    %c0_56 = arith.constant 0 : index
    %c0_57 = arith.constant 0 : index
    %137 = vector.load %arg7[%c2_55, %c0_56, %c0_57] : memref<4x128x128xbf16, #tpu.memory_space<vmem>>, vector<1x128x128xbf16>
    %138 = vector.shape_cast %137 : vector<1x128x128xbf16> to vector<128x128xbf16>
    %cst_58 = arith.constant dense<0.000000e+00> : vector<128x128xf32>
    %139 = tpu.matmul %136, %138, %cst_58 {dimension_numbers = #tpu.dot_dimension_numbers<[1], [0], [0], [1], [0, 0, 1, 1], [], []>} : vector<128x128xbf16>, vector<128x128xbf16>, vector<128x128xf32> -> vector<128x128xf32>
    %140 = arith.addf %114, %139 : vector<128x128xf32>
    %c2_59 = arith.constant 2 : index
    %c0_60 = arith.constant 0 : index
    %c0_61 = arith.constant 0 : index
    %141 = vector.load %arg8[%c2_59, %c0_60, %c0_61] : memref<4x1x128xf32, #tpu.memory_space<vmem>>, vector<1x1x128xf32>
    %142 = vector.shape_cast %141 : vector<1x1x128xf32> to vector<1x128xf32>
    %143 = vector.broadcast %142 : vector<1x128xf32> to vector<128x128xf32>
    %144 = arith.addf %140, %143 : vector<128x128xf32>
    %145 = arith.truncf %144 : vector<128x128xf32> to vector<128x128xbf16>
    %c3 = arith.constant 3 : index
    %c0_62 = arith.constant 0 : index
    %c0_63 = arith.constant 0 : index
    %146 = vector.load %arg5[%c3, %c0_62, %c0_63] : memref<4x128x128xbf16, #tpu.memory_space<vmem>>, vector<1x128x128xbf16>
    %147 = vector.shape_cast %146 : vector<1x128x128xbf16> to vector<128x128xbf16>
    %cst_64 = arith.constant dense<0.000000e+00> : vector<128x128xf32>
    %148 = tpu.matmul %145, %147, %cst_64 {dimension_numbers = #tpu.dot_dimension_numbers<[1], [0], [0], [1], [0, 0, 1, 1], [], []>} : vector<128x128xbf16>, vector<128x128xbf16>, vector<128x128xf32> -> vector<128x128xf32>
    %c3_65 = arith.constant 3 : index
    %c0_66 = arith.constant 0 : index
    %c0_67 = arith.constant 0 : index
    %149 = vector.load %arg6[%c3_65, %c0_66, %c0_67] : memref<4x1x128xf32, #tpu.memory_space<vmem>>, vector<1x1x128xf32>
    %150 = vector.shape_cast %149 : vector<1x1x128xf32> to vector<1x128xf32>
    %151 = vector.broadcast %150 : vector<1x128xf32> to vector<128x128xf32>
    %152 = arith.addf %148, %151 : vector<128x128xf32>
    %153 = arith.mulf %152, %152 : vector<128x128xf32>
    %154 = arith.mulf %152, %153 : vector<128x128xf32>
    %cst_68 = arith.constant 4.471500e-02 : f32
    %155 = vector.broadcast %cst_68 : f32 to vector<128x128xf32>
    %156 = arith.mulf %155, %154 : vector<128x128xf32>
    %157 = arith.addf %152, %156 : vector<128x128xf32>
    %cst_69 = arith.constant 0.797884583 : f32
    %158 = vector.broadcast %cst_69 : f32 to vector<128x128xf32>
    %159 = arith.mulf %158, %157 : vector<128x128xf32>
    %160 = math.tanh %159 : vector<128x128xf32>
    %cst_70 = arith.constant 1.000000e+00 : f32
    %161 = vector.broadcast %cst_70 : f32 to vector<128x128xf32>
    %162 = arith.addf %161, %160 : vector<128x128xf32>
    %cst_71 = arith.constant 5.000000e-01 : f32
    %163 = vector.broadcast %cst_71 : f32 to vector<128x128xf32>
    %164 = arith.mulf %163, %162 : vector<128x128xf32>
    %165 = arith.mulf %152, %164 : vector<128x128xf32>
    %166 = arith.truncf %165 : vector<128x128xf32> to vector<128x128xbf16>
    %c3_72 = arith.constant 3 : index
    %c0_73 = arith.constant 0 : index
    %c0_74 = arith.constant 0 : index
    %167 = vector.load %arg7[%c3_72, %c0_73, %c0_74] : memref<4x128x128xbf16, #tpu.memory_space<vmem>>, vector<1x128x128xbf16>
    %168 = vector.shape_cast %167 : vector<1x128x128xbf16> to vector<128x128xbf16>
    %cst_75 = arith.constant dense<0.000000e+00> : vector<128x128xf32>
    %169 = tpu.matmul %166, %168, %cst_75 {dimension_numbers = #tpu.dot_dimension_numbers<[1], [0], [0], [1], [0, 0, 1, 1], [], []>} : vector<128x128xbf16>, vector<128x128xbf16>, vector<128x128xf32> -> vector<128x128xf32>
    %170 = arith.addf %144, %169 : vector<128x128xf32>
    %c3_76 = arith.constant 3 : index
    %c0_77 = arith.constant 0 : index
    %c0_78 = arith.constant 0 : index
    %171 = vector.load %arg8[%c3_76, %c0_77, %c0_78] : memref<4x1x128xf32, #tpu.memory_space<vmem>>, vector<1x1x128xf32>
    %172 = vector.shape_cast %171 : vector<1x1x128xf32> to vector<1x128xf32>
    %173 = vector.broadcast %172 : vector<1x128xf32> to vector<128x128xf32>
    %174 = arith.addf %170, %173 : vector<128x128xf32>
    %175 = arith.truncf %174 : vector<128x128xf32> to vector<128x128xbf16>
    %c0_79 = arith.constant 0 : index
    %c0_80 = arith.constant 0 : index
    %176 = vector.load %arg9[%c0_79, %c0_80] : memref<128x8xbf16, #tpu.memory_space<vmem>>, vector<128x8xbf16>
    %cst_81 = arith.constant dense<0.000000e+00> : vector<128x8xf32>
    %177 = tpu.matmul %175, %176, %cst_81 {dimension_numbers = #tpu.dot_dimension_numbers<[1], [0], [0], [1], [0, 0, 1, 1], [], []>} : vector<128x128xbf16>, vector<128x8xbf16>, vector<128x8xf32> -> vector<128x8xf32>
    %c0_82 = arith.constant 0 : index
    %c0_83 = arith.constant 0 : index
    %178 = vector.load %arg10[%c0_82, %c0_83] : memref<1x8xf32, #tpu.memory_space<vmem>>, vector<1x8xf32>
    %179 = vector.broadcast %178 : vector<1x8xf32> to vector<128x8xf32>
    %180 = arith.addf %177, %179 : vector<128x8xf32>
    %181 = vector.extract_strided_slice %180 {offsets = [0, 0], sizes = [128, 4], strides = [1, 1]} : vector<128x8xf32> to vector<128x4xf32>
    %182 = vector.extract_strided_slice %180 {offsets = [0, 4], sizes = [128, 4], strides = [1, 1]} : vector<128x8xf32> to vector<128x4xf32>
    %cst_84 = arith.constant -3.000000e+01 : f32
    %cst_85 = arith.constant 2.000000e+01 : f32
    %183 = vector.broadcast %cst_84 : f32 to vector<128x4xf32>
    %184 = arith.maximumf %183, %182 : vector<128x4xf32>
    %185 = vector.broadcast %cst_85 : f32 to vector<128x4xf32>
    %186 = arith.minimumf %185, %184 : vector<128x4xf32>
    %cst_86 = arith.constant 5.000000e-01 : f32
    %187 = vector.broadcast %cst_86 : f32 to vector<128x4xf32>
    %188 = arith.mulf %187, %186 : vector<128x4xf32>
    %189 = math.exp %188 : vector<128x4xf32>
    %c0_87 = arith.constant 0 : index
    %c0_88 = arith.constant 0 : index
    %190 = vector.load %arg2[%c0_87, %c0_88] : memref<128x4xf32, #tpu.memory_space<vmem>>, vector<128x4xf32>
    %191 = arith.mulf %189, %190 : vector<128x4xf32>
    %192 = arith.addf %181, %191 : vector<128x4xf32>
    %193 = tpu.concatenate %35, %181, %186, %192 in 1 : vector<128x24xf32>, vector<128x4xf32>, vector<128x4xf32>, vector<128x4xf32> -> vector<128x36xf32>
    %c0_89 = arith.constant 0 : index
    %c0_90 = arith.constant 0 : index
    %194 = vector.load %arg11[%c0_89, %c0_90] : memref<128x36xf32, #tpu.memory_space<vmem>>, vector<128x36xf32>
    tpu.vector_store %arg11[%c0_89, %c0_90], %193 {strides = array<i32>} : memref<128x36xf32, #tpu.memory_space<vmem>>, vector<128x36xf32>,
    return
  }
  func.func @transform_0(%arg0: i32) -> (i32, i32) {
    %c0_i32 = arith.constant 0 : i32
    %c0_i32_0 = arith.constant 0 : i32
    return %arg0, %c0_i32 : i32, i32
  }
  func.func @transform_1(%arg0: i32) -> (i32, i32) {
    %c0_i32 = arith.constant 0 : i32
    %c0_i32_0 = arith.constant 0 : i32
    return %arg0, %c0_i32 : i32, i32
  }
  func.func @transform_2(%arg0: i32) -> (i32, i32) {
    %c0_i32 = arith.constant 0 : i32
    %c0_i32_0 = arith.constant 0 : i32
    %c0_i32_1 = arith.constant 0 : i32
    return %c0_i32, %c0_i32_0 : i32, i32
  }
  func.func @transform_3(%arg0: i32) -> (i32, i32) {
    %c0_i32 = arith.constant 0 : i32
    %c0_i32_0 = arith.constant 0 : i32
    %c0_i32_1 = arith.constant 0 : i32
    return %c0_i32, %c0_i32_0 : i32, i32
  }
  func.func @transform_4(%arg0: i32) -> (i32, i32, i32) {
    %c0_i32 = arith.constant 0 : i32
    %c0_i32_0 = arith.constant 0 : i32
    %c0_i32_1 = arith.constant 0 : i32
    %c0_i32_2 = arith.constant 0 : i32
    return %c0_i32, %c0_i32_0, %c0_i32_1 : i32, i32, i32
  }
  func.func @transform_5(%arg0: i32) -> (i32, i32, i32) {
    %c0_i32 = arith.constant 0 : i32
    %c0_i32_0 = arith.constant 0 : i32
    %c0_i32_1 = arith.constant 0 : i32
    %c0_i32_2 = arith.constant 0 : i32
    return %c0_i32, %c0_i32_0, %c0_i32_1 : i32, i32, i32
  }
  func.func @transform_6(%arg0: i32) -> (i32, i32, i32) {
    %c0_i32 = arith.constant 0 : i32
    %c0_i32_0 = arith.constant 0 : i32
    %c0_i32_1 = arith.constant 0 : i32
    %c0_i32_2 = arith.constant 0 : i32
    return %c0_i32, %c0_i32_0, %c0_i32_1 : i32, i32, i32
  }
  func.func @transform_7(%arg0: i32) -> (i32, i32, i32) {
    %c0_i32 = arith.constant 0 : i32
    %c0_i32_0 = arith.constant 0 : i32
    %c0_i32_1 = arith.constant 0 : i32
    %c0_i32_2 = arith.constant 0 : i32
    return %c0_i32, %c0_i32_0, %c0_i32_1 : i32, i32, i32
  }
  func.func @transform_8(%arg0: i32) -> (i32, i32) {
    %c0_i32 = arith.constant 0 : i32
    %c0_i32_0 = arith.constant 0 : i32
    %c0_i32_1 = arith.constant 0 : i32
    return %c0_i32, %c0_i32_0 : i32, i32
  }
  func.func @transform_9(%arg0: i32) -> (i32, i32) {
    %c0_i32 = arith.constant 0 : i32
    %c0_i32_0 = arith.constant 0 : i32
    %c0_i32_1 = arith.constant 0 : i32
    return %c0_i32, %c0_i32_0 : i32, i32
  }
  func.func @transform_10(%arg0: i32) -> (i32, i32) {
    %c0_i32 = arith.constant 0 : i32
    %c0_i32_0 = arith.constant 0 : i32
    return %arg0, %c0_i32 : i32, i32
  }
}

module attributes {stable_mosaic.version = 11 : i64} {
  func.func @_decoder_kernel(%arg0: i32, %arg1: memref<128x4xf32, #tpu.memory_space<vmem>>, %arg2: memref<4x128xbf16, #tpu.memory_space<vmem>>, %arg3: memref<2x4x128xbf16, #tpu.memory_space<vmem>>, %arg4: memref<2x128x128xbf16, #tpu.memory_space<vmem>>, %arg5: memref<4x128x128xbf16, #tpu.memory_space<vmem>>, %arg6: memref<4x1x128xf32, #tpu.memory_space<vmem>>, %arg7: memref<4x128x128xbf16, #tpu.memory_space<vmem>>, %arg8: memref<4x1x128xf32, #tpu.memory_space<vmem>>, %arg9: memref<128x24xbf16, #tpu.memory_space<vmem>>, %arg10: memref<1x24xf32, #tpu.memory_space<vmem>>, %arg11: memref<128x48xf32, #tpu.memory_space<vmem>>) attributes {dimension_semantics = [#tpu.dimension_semantics<parallel>], iteration_bounds = array<i64: 8>, scalar_prefetch = 0 : i64, scratch_operands = 0 : i64, tpu.core_type = #tpu.core_type<tc>, window_params = [{transform_indices = @transform_0, window_bounds = array<i64: 128, 4>}, {pipeline_mode = #tpu.pipeline_mode<synchronous>, transform_indices = @transform_1, window_bounds = array<i64: 4, 128>}, {pipeline_mode = #tpu.pipeline_mode<synchronous>, transform_indices = @transform_2, window_bounds = array<i64: 2, 4, 128>}, {pipeline_mode = #tpu.pipeline_mode<synchronous>, transform_indices = @transform_3, window_bounds = array<i64: 2, 128, 128>}, {pipeline_mode = #tpu.pipeline_mode<synchronous>, transform_indices = @transform_4, window_bounds = array<i64: 4, 128, 128>}, {pipeline_mode = #tpu.pipeline_mode<synchronous>, transform_indices = @transform_5, window_bounds = array<i64: 4, 1, 128>}, {pipeline_mode = #tpu.pipeline_mode<synchronous>, transform_indices = @transform_6, window_bounds = array<i64: 4, 128, 128>}, {pipeline_mode = #tpu.pipeline_mode<synchronous>, transform_indices = @transform_7, window_bounds = array<i64: 4, 1, 128>}, {pipeline_mode = #tpu.pipeline_mode<synchronous>, transform_indices = @transform_8, window_bounds = array<i64: 128, 24>}, {pipeline_mode = #tpu.pipeline_mode<synchronous>, transform_indices = @transform_9, window_bounds = array<i64: 1, 24>}, {transform_indices = @transform_10, window_bounds = array<i64: 128, 48>}]} {
    %c0 = arith.constant 0 : index
    %c0_0 = arith.constant 0 : index
    %0 = vector.load %arg1[%c0, %c0_0] : memref<128x4xf32, #tpu.memory_space<vmem>>, vector<128x4xf32>
    %1 = arith.truncf %0 : vector<128x4xf32> to vector<128x4xbf16>
    %c0_1 = arith.constant 0 : index
    %c0_2 = arith.constant 0 : index
    %2 = vector.load %arg2[%c0_1, %c0_2] : memref<4x128xbf16, #tpu.memory_space<vmem>>, vector<4x128xbf16>
    %cst = arith.constant dense<0.000000e+00> : vector<128x128xf32>
    %3 = tpu.matmul %1, %2, %cst {dimension_numbers = #tpu.dot_dimension_numbers<[1], [0], [0], [1], [0, 0, 1, 1], [], []>} : vector<128x4xbf16>, vector<4x128xbf16>, vector<128x128xf32> -> vector<128x128xf32>
    %c0_3 = arith.constant 0 : index
    %c0_4 = arith.constant 0 : index
    %c0_5 = arith.constant 0 : index
    %4 = vector.load %arg3[%c0_3, %c0_4, %c0_5] : memref<2x4x128xbf16, #tpu.memory_space<vmem>>, vector<1x4x128xbf16>
    %5 = vector.shape_cast %4 : vector<1x4x128xbf16> to vector<4x128xbf16>
    %cst_6 = arith.constant dense<0.000000e+00> : vector<128x128xf32>
    %6 = tpu.matmul %1, %5, %cst_6 {dimension_numbers = #tpu.dot_dimension_numbers<[1], [0], [0], [1], [0, 0, 1, 1], [], []>} : vector<128x4xbf16>, vector<4x128xbf16>, vector<128x128xf32> -> vector<128x128xf32>
    %cst_7 = arith.constant 5.000000e-01 : f32
    %7 = vector.broadcast %cst_7 : f32 to vector<128x128xf32>
    %8 = arith.mulf %7, %6 : vector<128x128xf32>
    %9 = arith.truncf %3 : vector<128x128xf32> to vector<128x128xbf16>
    %c0_8 = arith.constant 0 : index
    %c0_9 = arith.constant 0 : index
    %c0_10 = arith.constant 0 : index
    %10 = vector.load %arg4[%c0_8, %c0_9, %c0_10] : memref<2x128x128xbf16, #tpu.memory_space<vmem>>, vector<1x128x128xbf16>
    %11 = vector.shape_cast %10 : vector<1x128x128xbf16> to vector<128x128xbf16>
    %cst_11 = arith.constant dense<0.000000e+00> : vector<128x128xf32>
    %12 = tpu.matmul %9, %11, %cst_11 {dimension_numbers = #tpu.dot_dimension_numbers<[1], [0], [0], [1], [0, 0, 1, 1], [], []>} : vector<128x128xbf16>, vector<128x128xbf16>, vector<128x128xf32> -> vector<128x128xf32>
    %cst_12 = arith.constant 5.000000e-01 : f32
    %13 = vector.broadcast %cst_12 : f32 to vector<128x128xf32>
    %14 = arith.mulf %13, %12 : vector<128x128xf32>
    %15 = arith.subf %3, %14 : vector<128x128xf32>
    %16 = arith.addf %15, %8 : vector<128x128xf32>
    %cst_13 = arith.constant 2.000000e-02 : f32
    %17 = vector.broadcast %cst_13 : f32 to vector<128x128xf32>
    %18 = arith.subf %16, %17 : vector<128x128xf32>
    %cst_14 = arith.constant 0.000000e+00 : f32
    %19 = vector.broadcast %cst_14 : f32 to vector<128x128xf32>
    %20 = arith.maximumf %18, %19 : vector<128x128xf32>
    %cst_15 = arith.constant 0.000000e+00 : f32
    %21 = vector.broadcast %cst_15 : f32 to vector<128x128xf32>
    %22 = arith.subf %21, %16 : vector<128x128xf32>
    %cst_16 = arith.constant 2.000000e-02 : f32
    %23 = vector.broadcast %cst_16 : f32 to vector<128x128xf32>
    %24 = arith.subf %22, %23 : vector<128x128xf32>
    %cst_17 = arith.constant 0.000000e+00 : f32
    %25 = vector.broadcast %cst_17 : f32 to vector<128x128xf32>
    %26 = arith.maximumf %24, %25 : vector<128x128xf32>
    %27 = arith.subf %20, %26 : vector<128x128xf32>
    %28 = arith.truncf %27 : vector<128x128xf32> to vector<128x128xbf16>
    %c0_18 = arith.constant 0 : index
    %c0_19 = arith.constant 0 : index
    %c0_20 = arith.constant 0 : index
    %29 = vector.load %arg4[%c0_18, %c0_19, %c0_20] : memref<2x128x128xbf16, #tpu.memory_space<vmem>>, vector<1x128x128xbf16>
    %30 = vector.shape_cast %29 : vector<1x128x128xbf16> to vector<128x128xbf16>
    %cst_21 = arith.constant dense<0.000000e+00> : vector<128x128xf32>
    %31 = tpu.matmul %28, %30, %cst_21 {dimension_numbers = #tpu.dot_dimension_numbers<[1], [0], [0], [1], [0, 0, 1, 1], [], []>} : vector<128x128xbf16>, vector<128x128xbf16>, vector<128x128xf32> -> vector<128x128xf32>
    %cst_22 = arith.constant 5.000000e-01 : f32
    %32 = vector.broadcast %cst_22 : f32 to vector<128x128xf32>
    %33 = arith.mulf %32, %31 : vector<128x128xf32>
    %34 = arith.subf %27, %33 : vector<128x128xf32>
    %35 = arith.addf %34, %8 : vector<128x128xf32>
    %cst_23 = arith.constant 2.000000e-02 : f32
    %36 = vector.broadcast %cst_23 : f32 to vector<128x128xf32>
    %37 = arith.subf %35, %36 : vector<128x128xf32>
    %cst_24 = arith.constant 0.000000e+00 : f32
    %38 = vector.broadcast %cst_24 : f32 to vector<128x128xf32>
    %39 = arith.maximumf %37, %38 : vector<128x128xf32>
    %cst_25 = arith.constant 0.000000e+00 : f32
    %40 = vector.broadcast %cst_25 : f32 to vector<128x128xf32>
    %41 = arith.subf %40, %35 : vector<128x128xf32>
    %cst_26 = arith.constant 2.000000e-02 : f32
    %42 = vector.broadcast %cst_26 : f32 to vector<128x128xf32>
    %43 = arith.subf %41, %42 : vector<128x128xf32>
    %cst_27 = arith.constant 0.000000e+00 : f32
    %44 = vector.broadcast %cst_27 : f32 to vector<128x128xf32>
    %45 = arith.maximumf %43, %44 : vector<128x128xf32>
    %46 = arith.subf %39, %45 : vector<128x128xf32>
    %c1 = arith.constant 1 : index
    %c0_28 = arith.constant 0 : index
    %c0_29 = arith.constant 0 : index
    %47 = vector.load %arg3[%c1, %c0_28, %c0_29] : memref<2x4x128xbf16, #tpu.memory_space<vmem>>, vector<1x4x128xbf16>
    %48 = vector.shape_cast %47 : vector<1x4x128xbf16> to vector<4x128xbf16>
    %cst_30 = arith.constant dense<0.000000e+00> : vector<128x128xf32>
    %49 = tpu.matmul %1, %48, %cst_30 {dimension_numbers = #tpu.dot_dimension_numbers<[1], [0], [0], [1], [0, 0, 1, 1], [], []>} : vector<128x4xbf16>, vector<4x128xbf16>, vector<128x128xf32> -> vector<128x128xf32>
    %cst_31 = arith.constant 5.000000e-01 : f32
    %50 = vector.broadcast %cst_31 : f32 to vector<128x128xf32>
    %51 = arith.mulf %50, %49 : vector<128x128xf32>
    %52 = arith.truncf %46 : vector<128x128xf32> to vector<128x128xbf16>
    %c1_32 = arith.constant 1 : index
    %c0_33 = arith.constant 0 : index
    %c0_34 = arith.constant 0 : index
    %53 = vector.load %arg4[%c1_32, %c0_33, %c0_34] : memref<2x128x128xbf16, #tpu.memory_space<vmem>>, vector<1x128x128xbf16>
    %54 = vector.shape_cast %53 : vector<1x128x128xbf16> to vector<128x128xbf16>
    %cst_35 = arith.constant dense<0.000000e+00> : vector<128x128xf32>
    %55 = tpu.matmul %52, %54, %cst_35 {dimension_numbers = #tpu.dot_dimension_numbers<[1], [0], [0], [1], [0, 0, 1, 1], [], []>} : vector<128x128xbf16>, vector<128x128xbf16>, vector<128x128xf32> -> vector<128x128xf32>
    %cst_36 = arith.constant 5.000000e-01 : f32
    %56 = vector.broadcast %cst_36 : f32 to vector<128x128xf32>
    %57 = arith.mulf %56, %55 : vector<128x128xf32>
    %58 = arith.subf %46, %57 : vector<128x128xf32>
    %59 = arith.addf %58, %51 : vector<128x128xf32>
    %cst_37 = arith.constant 2.000000e-02 : f32
    %60 = vector.broadcast %cst_37 : f32 to vector<128x128xf32>
    %61 = arith.subf %59, %60 : vector<128x128xf32>
    %cst_38 = arith.constant 0.000000e+00 : f32
    %62 = vector.broadcast %cst_38 : f32 to vector<128x128xf32>
    %63 = arith.maximumf %61, %62 : vector<128x128xf32>
    %cst_39 = arith.constant 0.000000e+00 : f32
    %64 = vector.broadcast %cst_39 : f32 to vector<128x128xf32>
    %65 = arith.subf %64, %59 : vector<128x128xf32>
    %cst_40 = arith.constant 2.000000e-02 : f32
    %66 = vector.broadcast %cst_40 : f32 to vector<128x128xf32>
    %67 = arith.subf %65, %66 : vector<128x128xf32>
    %cst_41 = arith.constant 0.000000e+00 : f32
    %68 = vector.broadcast %cst_41 : f32 to vector<128x128xf32>
    %69 = arith.maximumf %67, %68 : vector<128x128xf32>
    %70 = arith.subf %63, %69 : vector<128x128xf32>
    %71 = arith.truncf %70 : vector<128x128xf32> to vector<128x128xbf16>
    %c1_42 = arith.constant 1 : index
    %c0_43 = arith.constant 0 : index
    %c0_44 = arith.constant 0 : index
    %72 = vector.load %arg4[%c1_42, %c0_43, %c0_44] : memref<2x128x128xbf16, #tpu.memory_space<vmem>>, vector<1x128x128xbf16>
    %73 = vector.shape_cast %72 : vector<1x128x128xbf16> to vector<128x128xbf16>
    %cst_45 = arith.constant dense<0.000000e+00> : vector<128x128xf32>
    %74 = tpu.matmul %71, %73, %cst_45 {dimension_numbers = #tpu.dot_dimension_numbers<[1], [0], [0], [1], [0, 0, 1, 1], [], []>} : vector<128x128xbf16>, vector<128x128xbf16>, vector<128x128xf32> -> vector<128x128xf32>
    %cst_46 = arith.constant 5.000000e-01 : f32
    %75 = vector.broadcast %cst_46 : f32 to vector<128x128xf32>
    %76 = arith.mulf %75, %74 : vector<128x128xf32>
    %77 = arith.subf %70, %76 : vector<128x128xf32>
    %78 = arith.addf %77, %51 : vector<128x128xf32>
    %cst_47 = arith.constant 2.000000e-02 : f32
    %79 = vector.broadcast %cst_47 : f32 to vector<128x128xf32>
    %80 = arith.subf %78, %79 : vector<128x128xf32>
    %cst_48 = arith.constant 0.000000e+00 : f32
    %81 = vector.broadcast %cst_48 : f32 to vector<128x128xf32>
    %82 = arith.maximumf %80, %81 : vector<128x128xf32>
    %cst_49 = arith.constant 0.000000e+00 : f32
    %83 = vector.broadcast %cst_49 : f32 to vector<128x128xf32>
    %84 = arith.subf %83, %78 : vector<128x128xf32>
    %cst_50 = arith.constant 2.000000e-02 : f32
    %85 = vector.broadcast %cst_50 : f32 to vector<128x128xf32>
    %86 = arith.subf %84, %85 : vector<128x128xf32>
    %cst_51 = arith.constant 0.000000e+00 : f32
    %87 = vector.broadcast %cst_51 : f32 to vector<128x128xf32>
    %88 = arith.maximumf %86, %87 : vector<128x128xf32>
    %89 = arith.subf %82, %88 : vector<128x128xf32>
    %90 = arith.truncf %89 : vector<128x128xf32> to vector<128x128xbf16>
    %c0_52 = arith.constant 0 : index
    %c0_53 = arith.constant 0 : index
    %c0_54 = arith.constant 0 : index
    %91 = vector.load %arg5[%c0_52, %c0_53, %c0_54] : memref<4x128x128xbf16, #tpu.memory_space<vmem>>, vector<1x128x128xbf16>
    %92 = vector.shape_cast %91 : vector<1x128x128xbf16> to vector<128x128xbf16>
    %cst_55 = arith.constant dense<0.000000e+00> : vector<128x128xf32>
    %93 = tpu.matmul %90, %92, %cst_55 {dimension_numbers = #tpu.dot_dimension_numbers<[1], [0], [0], [1], [0, 0, 1, 1], [], []>} : vector<128x128xbf16>, vector<128x128xbf16>, vector<128x128xf32> -> vector<128x128xf32>
    %c0_56 = arith.constant 0 : index
    %c0_57 = arith.constant 0 : index
    %c0_58 = arith.constant 0 : index
    %94 = vector.load %arg6[%c0_56, %c0_57, %c0_58] : memref<4x1x128xf32, #tpu.memory_space<vmem>>, vector<1x1x128xf32>
    %95 = vector.shape_cast %94 : vector<1x1x128xf32> to vector<1x128xf32>
    %96 = vector.broadcast %95 : vector<1x128xf32> to vector<128x128xf32>
    %97 = arith.addf %93, %96 : vector<128x128xf32>
    %98 = arith.mulf %97, %97 : vector<128x128xf32>
    %99 = arith.mulf %97, %98 : vector<128x128xf32>
    %cst_59 = arith.constant 4.471500e-02 : f32
    %100 = vector.broadcast %cst_59 : f32 to vector<128x128xf32>
    %101 = arith.mulf %100, %99 : vector<128x128xf32>
    %102 = arith.addf %97, %101 : vector<128x128xf32>
    %cst_60 = arith.constant 0.797884583 : f32
    %103 = vector.broadcast %cst_60 : f32 to vector<128x128xf32>
    %104 = arith.mulf %103, %102 : vector<128x128xf32>
    %105 = math.tanh %104 : vector<128x128xf32>
    %cst_61 = arith.constant 1.000000e+00 : f32
    %106 = vector.broadcast %cst_61 : f32 to vector<128x128xf32>
    %107 = arith.addf %106, %105 : vector<128x128xf32>
    %cst_62 = arith.constant 5.000000e-01 : f32
    %108 = vector.broadcast %cst_62 : f32 to vector<128x128xf32>
    %109 = arith.mulf %108, %107 : vector<128x128xf32>
    %110 = arith.mulf %97, %109 : vector<128x128xf32>
    %111 = arith.truncf %110 : vector<128x128xf32> to vector<128x128xbf16>
    %c0_63 = arith.constant 0 : index
    %c0_64 = arith.constant 0 : index
    %c0_65 = arith.constant 0 : index
    %112 = vector.load %arg7[%c0_63, %c0_64, %c0_65] : memref<4x128x128xbf16, #tpu.memory_space<vmem>>, vector<1x128x128xbf16>
    %113 = vector.shape_cast %112 : vector<1x128x128xbf16> to vector<128x128xbf16>
    %cst_66 = arith.constant dense<0.000000e+00> : vector<128x128xf32>
    %114 = tpu.matmul %111, %113, %cst_66 {dimension_numbers = #tpu.dot_dimension_numbers<[1], [0], [0], [1], [0, 0, 1, 1], [], []>} : vector<128x128xbf16>, vector<128x128xbf16>, vector<128x128xf32> -> vector<128x128xf32>
    %115 = arith.addf %89, %114 : vector<128x128xf32>
    %c0_67 = arith.constant 0 : index
    %c0_68 = arith.constant 0 : index
    %c0_69 = arith.constant 0 : index
    %116 = vector.load %arg8[%c0_67, %c0_68, %c0_69] : memref<4x1x128xf32, #tpu.memory_space<vmem>>, vector<1x1x128xf32>
    %117 = vector.shape_cast %116 : vector<1x1x128xf32> to vector<1x128xf32>
    %118 = vector.broadcast %117 : vector<1x128xf32> to vector<128x128xf32>
    %119 = arith.addf %115, %118 : vector<128x128xf32>
    %120 = arith.truncf %119 : vector<128x128xf32> to vector<128x128xbf16>
    %c1_70 = arith.constant 1 : index
    %c0_71 = arith.constant 0 : index
    %c0_72 = arith.constant 0 : index
    %121 = vector.load %arg5[%c1_70, %c0_71, %c0_72] : memref<4x128x128xbf16, #tpu.memory_space<vmem>>, vector<1x128x128xbf16>
    %122 = vector.shape_cast %121 : vector<1x128x128xbf16> to vector<128x128xbf16>
    %cst_73 = arith.constant dense<0.000000e+00> : vector<128x128xf32>
    %123 = tpu.matmul %120, %122, %cst_73 {dimension_numbers = #tpu.dot_dimension_numbers<[1], [0], [0], [1], [0, 0, 1, 1], [], []>} : vector<128x128xbf16>, vector<128x128xbf16>, vector<128x128xf32> -> vector<128x128xf32>
    %c1_74 = arith.constant 1 : index
    %c0_75 = arith.constant 0 : index
    %c0_76 = arith.constant 0 : index
    %124 = vector.load %arg6[%c1_74, %c0_75, %c0_76] : memref<4x1x128xf32, #tpu.memory_space<vmem>>, vector<1x1x128xf32>
    %125 = vector.shape_cast %124 : vector<1x1x128xf32> to vector<1x128xf32>
    %126 = vector.broadcast %125 : vector<1x128xf32> to vector<128x128xf32>
    %127 = arith.addf %123, %126 : vector<128x128xf32>
    %128 = arith.mulf %127, %127 : vector<128x128xf32>
    %129 = arith.mulf %127, %128 : vector<128x128xf32>
    %cst_77 = arith.constant 4.471500e-02 : f32
    %130 = vector.broadcast %cst_77 : f32 to vector<128x128xf32>
    %131 = arith.mulf %130, %129 : vector<128x128xf32>
    %132 = arith.addf %127, %131 : vector<128x128xf32>
    %cst_78 = arith.constant 0.797884583 : f32
    %133 = vector.broadcast %cst_78 : f32 to vector<128x128xf32>
    %134 = arith.mulf %133, %132 : vector<128x128xf32>
    %135 = math.tanh %134 : vector<128x128xf32>
    %cst_79 = arith.constant 1.000000e+00 : f32
    %136 = vector.broadcast %cst_79 : f32 to vector<128x128xf32>
    %137 = arith.addf %136, %135 : vector<128x128xf32>
    %cst_80 = arith.constant 5.000000e-01 : f32
    %138 = vector.broadcast %cst_80 : f32 to vector<128x128xf32>
    %139 = arith.mulf %138, %137 : vector<128x128xf32>
    %140 = arith.mulf %127, %139 : vector<128x128xf32>
    %141 = arith.truncf %140 : vector<128x128xf32> to vector<128x128xbf16>
    %c1_81 = arith.constant 1 : index
    %c0_82 = arith.constant 0 : index
    %c0_83 = arith.constant 0 : index
    %142 = vector.load %arg7[%c1_81, %c0_82, %c0_83] : memref<4x128x128xbf16, #tpu.memory_space<vmem>>, vector<1x128x128xbf16>
    %143 = vector.shape_cast %142 : vector<1x128x128xbf16> to vector<128x128xbf16>
    %cst_84 = arith.constant dense<0.000000e+00> : vector<128x128xf32>
    %144 = tpu.matmul %141, %143, %cst_84 {dimension_numbers = #tpu.dot_dimension_numbers<[1], [0], [0], [1], [0, 0, 1, 1], [], []>} : vector<128x128xbf16>, vector<128x128xbf16>, vector<128x128xf32> -> vector<128x128xf32>
    %145 = arith.addf %119, %144 : vector<128x128xf32>
    %c1_85 = arith.constant 1 : index
    %c0_86 = arith.constant 0 : index
    %c0_87 = arith.constant 0 : index
    %146 = vector.load %arg8[%c1_85, %c0_86, %c0_87] : memref<4x1x128xf32, #tpu.memory_space<vmem>>, vector<1x1x128xf32>
    %147 = vector.shape_cast %146 : vector<1x1x128xf32> to vector<1x128xf32>
    %148 = vector.broadcast %147 : vector<1x128xf32> to vector<128x128xf32>
    %149 = arith.addf %145, %148 : vector<128x128xf32>
    %150 = arith.truncf %149 : vector<128x128xf32> to vector<128x128xbf16>
    %c2 = arith.constant 2 : index
    %c0_88 = arith.constant 0 : index
    %c0_89 = arith.constant 0 : index
    %151 = vector.load %arg5[%c2, %c0_88, %c0_89] : memref<4x128x128xbf16, #tpu.memory_space<vmem>>, vector<1x128x128xbf16>
    %152 = vector.shape_cast %151 : vector<1x128x128xbf16> to vector<128x128xbf16>
    %cst_90 = arith.constant dense<0.000000e+00> : vector<128x128xf32>
    %153 = tpu.matmul %150, %152, %cst_90 {dimension_numbers = #tpu.dot_dimension_numbers<[1], [0], [0], [1], [0, 0, 1, 1], [], []>} : vector<128x128xbf16>, vector<128x128xbf16>, vector<128x128xf32> -> vector<128x128xf32>
    %c2_91 = arith.constant 2 : index
    %c0_92 = arith.constant 0 : index
    %c0_93 = arith.constant 0 : index
    %154 = vector.load %arg6[%c2_91, %c0_92, %c0_93] : memref<4x1x128xf32, #tpu.memory_space<vmem>>, vector<1x1x128xf32>
    %155 = vector.shape_cast %154 : vector<1x1x128xf32> to vector<1x128xf32>
    %156 = vector.broadcast %155 : vector<1x128xf32> to vector<128x128xf32>
    %157 = arith.addf %153, %156 : vector<128x128xf32>
    %158 = arith.mulf %157, %157 : vector<128x128xf32>
    %159 = arith.mulf %157, %158 : vector<128x128xf32>
    %cst_94 = arith.constant 4.471500e-02 : f32
    %160 = vector.broadcast %cst_94 : f32 to vector<128x128xf32>
    %161 = arith.mulf %160, %159 : vector<128x128xf32>
    %162 = arith.addf %157, %161 : vector<128x128xf32>
    %cst_95 = arith.constant 0.797884583 : f32
    %163 = vector.broadcast %cst_95 : f32 to vector<128x128xf32>
    %164 = arith.mulf %163, %162 : vector<128x128xf32>
    %165 = math.tanh %164 : vector<128x128xf32>
    %cst_96 = arith.constant 1.000000e+00 : f32
    %166 = vector.broadcast %cst_96 : f32 to vector<128x128xf32>
    %167 = arith.addf %166, %165 : vector<128x128xf32>
    %cst_97 = arith.constant 5.000000e-01 : f32
    %168 = vector.broadcast %cst_97 : f32 to vector<128x128xf32>
    %169 = arith.mulf %168, %167 : vector<128x128xf32>
    %170 = arith.mulf %157, %169 : vector<128x128xf32>
    %171 = arith.truncf %170 : vector<128x128xf32> to vector<128x128xbf16>
    %c2_98 = arith.constant 2 : index
    %c0_99 = arith.constant 0 : index
    %c0_100 = arith.constant 0 : index
    %172 = vector.load %arg7[%c2_98, %c0_99, %c0_100] : memref<4x128x128xbf16, #tpu.memory_space<vmem>>, vector<1x128x128xbf16>
    %173 = vector.shape_cast %172 : vector<1x128x128xbf16> to vector<128x128xbf16>
    %cst_101 = arith.constant dense<0.000000e+00> : vector<128x128xf32>
    %174 = tpu.matmul %171, %173, %cst_101 {dimension_numbers = #tpu.dot_dimension_numbers<[1], [0], [0], [1], [0, 0, 1, 1], [], []>} : vector<128x128xbf16>, vector<128x128xbf16>, vector<128x128xf32> -> vector<128x128xf32>
    %175 = arith.addf %149, %174 : vector<128x128xf32>
    %c2_102 = arith.constant 2 : index
    %c0_103 = arith.constant 0 : index
    %c0_104 = arith.constant 0 : index
    %176 = vector.load %arg8[%c2_102, %c0_103, %c0_104] : memref<4x1x128xf32, #tpu.memory_space<vmem>>, vector<1x1x128xf32>
    %177 = vector.shape_cast %176 : vector<1x1x128xf32> to vector<1x128xf32>
    %178 = vector.broadcast %177 : vector<1x128xf32> to vector<128x128xf32>
    %179 = arith.addf %175, %178 : vector<128x128xf32>
    %180 = arith.truncf %179 : vector<128x128xf32> to vector<128x128xbf16>
    %c3 = arith.constant 3 : index
    %c0_105 = arith.constant 0 : index
    %c0_106 = arith.constant 0 : index
    %181 = vector.load %arg5[%c3, %c0_105, %c0_106] : memref<4x128x128xbf16, #tpu.memory_space<vmem>>, vector<1x128x128xbf16>
    %182 = vector.shape_cast %181 : vector<1x128x128xbf16> to vector<128x128xbf16>
    %cst_107 = arith.constant dense<0.000000e+00> : vector<128x128xf32>
    %183 = tpu.matmul %180, %182, %cst_107 {dimension_numbers = #tpu.dot_dimension_numbers<[1], [0], [0], [1], [0, 0, 1, 1], [], []>} : vector<128x128xbf16>, vector<128x128xbf16>, vector<128x128xf32> -> vector<128x128xf32>
    %c3_108 = arith.constant 3 : index
    %c0_109 = arith.constant 0 : index
    %c0_110 = arith.constant 0 : index
    %184 = vector.load %arg6[%c3_108, %c0_109, %c0_110] : memref<4x1x128xf32, #tpu.memory_space<vmem>>, vector<1x1x128xf32>
    %185 = vector.shape_cast %184 : vector<1x1x128xf32> to vector<1x128xf32>
    %186 = vector.broadcast %185 : vector<1x128xf32> to vector<128x128xf32>
    %187 = arith.addf %183, %186 : vector<128x128xf32>
    %188 = arith.mulf %187, %187 : vector<128x128xf32>
    %189 = arith.mulf %187, %188 : vector<128x128xf32>
    %cst_111 = arith.constant 4.471500e-02 : f32
    %190 = vector.broadcast %cst_111 : f32 to vector<128x128xf32>
    %191 = arith.mulf %190, %189 : vector<128x128xf32>
    %192 = arith.addf %187, %191 : vector<128x128xf32>
    %cst_112 = arith.constant 0.797884583 : f32
    %193 = vector.broadcast %cst_112 : f32 to vector<128x128xf32>
    %194 = arith.mulf %193, %192 : vector<128x128xf32>
    %195 = math.tanh %194 : vector<128x128xf32>
    %cst_113 = arith.constant 1.000000e+00 : f32
    %196 = vector.broadcast %cst_113 : f32 to vector<128x128xf32>
    %197 = arith.addf %196, %195 : vector<128x128xf32>
    %cst_114 = arith.constant 5.000000e-01 : f32
    %198 = vector.broadcast %cst_114 : f32 to vector<128x128xf32>
    %199 = arith.mulf %198, %197 : vector<128x128xf32>
    %200 = arith.mulf %187, %199 : vector<128x128xf32>
    %201 = arith.truncf %200 : vector<128x128xf32> to vector<128x128xbf16>
    %c3_115 = arith.constant 3 : index
    %c0_116 = arith.constant 0 : index
    %c0_117 = arith.constant 0 : index
    %202 = vector.load %arg7[%c3_115, %c0_116, %c0_117] : memref<4x128x128xbf16, #tpu.memory_space<vmem>>, vector<1x128x128xbf16>
    %203 = vector.shape_cast %202 : vector<1x128x128xbf16> to vector<128x128xbf16>
    %cst_118 = arith.constant dense<0.000000e+00> : vector<128x128xf32>
    %204 = tpu.matmul %201, %203, %cst_118 {dimension_numbers = #tpu.dot_dimension_numbers<[1], [0], [0], [1], [0, 0, 1, 1], [], []>} : vector<128x128xbf16>, vector<128x128xbf16>, vector<128x128xf32> -> vector<128x128xf32>
    %205 = arith.addf %179, %204 : vector<128x128xf32>
    %c3_119 = arith.constant 3 : index
    %c0_120 = arith.constant 0 : index
    %c0_121 = arith.constant 0 : index
    %206 = vector.load %arg8[%c3_119, %c0_120, %c0_121] : memref<4x1x128xf32, #tpu.memory_space<vmem>>, vector<1x1x128xf32>
    %207 = vector.shape_cast %206 : vector<1x1x128xf32> to vector<1x128xf32>
    %208 = vector.broadcast %207 : vector<1x128xf32> to vector<128x128xf32>
    %209 = arith.addf %205, %208 : vector<128x128xf32>
    %210 = arith.truncf %209 : vector<128x128xf32> to vector<128x128xbf16>
    %c0_122 = arith.constant 0 : index
    %c0_123 = arith.constant 0 : index
    %211 = vector.load %arg9[%c0_122, %c0_123] : memref<128x24xbf16, #tpu.memory_space<vmem>>, vector<128x24xbf16>
    %cst_124 = arith.constant dense<0.000000e+00> : vector<128x24xf32>
    %212 = tpu.matmul %210, %211, %cst_124 {dimension_numbers = #tpu.dot_dimension_numbers<[1], [0], [0], [1], [0, 0, 1, 1], [], []>} : vector<128x128xbf16>, vector<128x24xbf16>, vector<128x24xf32> -> vector<128x24xf32>
    %c0_125 = arith.constant 0 : index
    %c0_126 = arith.constant 0 : index
    %213 = vector.load %arg10[%c0_125, %c0_126] : memref<1x24xf32, #tpu.memory_space<vmem>>, vector<1x24xf32>
    %214 = vector.broadcast %213 : vector<1x24xf32> to vector<128x24xf32>
    %215 = arith.addf %212, %214 : vector<128x24xf32>
    %216 = vector.extract_strided_slice %215 {offsets = [0, 0], sizes = [128, 3], strides = [1, 1]} : vector<128x24xf32> to vector<128x3xf32>
    %217 = vector.extract_strided_slice %215 {offsets = [0, 3], sizes = [128, 3], strides = [1, 1]} : vector<128x24xf32> to vector<128x3xf32>
    %218 = vector.extract_strided_slice %215 {offsets = [0, 6], sizes = [128, 3], strides = [1, 1]} : vector<128x24xf32> to vector<128x3xf32>
    %219 = vector.extract_strided_slice %215 {offsets = [0, 9], sizes = [128, 3], strides = [1, 1]} : vector<128x24xf32> to vector<128x3xf32>
    %220 = vector.extract_strided_slice %215 {offsets = [0, 12], sizes = [128, 3], strides = [1, 1]} : vector<128x24xf32> to vector<128x3xf32>
    %221 = vector.extract_strided_slice %215 {offsets = [0, 15], sizes = [128, 3], strides = [1, 1]} : vector<128x24xf32> to vector<128x3xf32>
    %222 = vector.extract_strided_slice %215 {offsets = [0, 18], sizes = [128, 3], strides = [1, 1]} : vector<128x24xf32> to vector<128x3xf32>
    %223 = vector.extract_strided_slice %215 {offsets = [0, 21], sizes = [128, 3], strides = [1, 1]} : vector<128x24xf32> to vector<128x3xf32>
    %224 = arith.addf %216, %217 : vector<128x3xf32>
    %225 = arith.subf %216, %217 : vector<128x3xf32>
    %226 = arith.addf %218, %219 : vector<128x3xf32>
    %227 = arith.subf %218, %219 : vector<128x3xf32>
    %228 = arith.addf %220, %221 : vector<128x3xf32>
    %229 = arith.subf %220, %221 : vector<128x3xf32>
    %230 = arith.addf %222, %223 : vector<128x3xf32>
    %231 = arith.subf %222, %223 : vector<128x3xf32>
    %232 = arith.addf %224, %226 : vector<128x3xf32>
    %233 = arith.subf %224, %226 : vector<128x3xf32>
    %234 = arith.addf %225, %227 : vector<128x3xf32>
    %235 = arith.subf %225, %227 : vector<128x3xf32>
    %236 = arith.addf %228, %230 : vector<128x3xf32>
    %237 = arith.subf %228, %230 : vector<128x3xf32>
    %238 = arith.addf %229, %231 : vector<128x3xf32>
    %239 = arith.subf %229, %231 : vector<128x3xf32>
    %240 = arith.addf %232, %236 : vector<128x3xf32>
    %241 = arith.subf %232, %236 : vector<128x3xf32>
    %242 = arith.addf %234, %238 : vector<128x3xf32>
    %243 = arith.subf %234, %238 : vector<128x3xf32>
    %244 = arith.addf %233, %237 : vector<128x3xf32>
    %245 = arith.subf %233, %237 : vector<128x3xf32>
    %246 = arith.addf %235, %239 : vector<128x3xf32>
    %247 = arith.subf %235, %239 : vector<128x3xf32>
    %248 = tpu.concatenate %240, %242, %244, %246, %241, %243, %245, %247 in 1 : vector<128x3xf32>, vector<128x3xf32>, vector<128x3xf32>, vector<128x3xf32>, vector<128x3xf32>, vector<128x3xf32>, vector<128x3xf32>, vector<128x3xf32> -> vector<128x24xf32>
    %cst_127 = arith.constant 0.353553385 : f32
    %249 = vector.broadcast %cst_127 : f32 to vector<128x24xf32>
    %250 = arith.mulf %248, %249 : vector<128x24xf32>
    %251 = tpu.concatenate %215, %250 in 1 : vector<128x24xf32>, vector<128x24xf32> -> vector<128x48xf32>
    %c0_128 = arith.constant 0 : index
    %c0_129 = arith.constant 0 : index
    %252 = vector.load %arg11[%c0_128, %c0_129] : memref<128x48xf32, #tpu.memory_space<vmem>>, vector<128x48xf32>
    tpu.vector_store %arg11[%c0_128, %c0_129], %251 {strides = array<i32>} : memref<128x48xf32, #tpu.memory_space<vmem>>, vector<128x48xf32>,
    return
  }
  func.func @transform_0(%arg0: i32) -> (i32, i32) {
    %c0_i32 = arith.constant 0 : i32
    %c0_i32_0 = arith.constant 0 : i32
    return %arg0, %c0_i32 : i32, i32
  }
  func.func @transform_1(%arg0: i32) -> (i32, i32) {
    %c0_i32 = arith.constant 0 : i32
    %c0_i32_0 = arith.constant 0 : i32
    %c0_i32_1 = arith.constant 0 : i32
    return %c0_i32, %c0_i32_0 : i32, i32
  }
  func.func @transform_2(%arg0: i32) -> (i32, i32, i32) {
    %c0_i32 = arith.constant 0 : i32
    %c0_i32_0 = arith.constant 0 : i32
    %c0_i32_1 = arith.constant 0 : i32
    %c0_i32_2 = arith.constant 0 : i32
    return %c0_i32, %c0_i32_0, %c0_i32_1 : i32, i32, i32
  }
  func.func @transform_3(%arg0: i32) -> (i32, i32, i32) {
    %c0_i32 = arith.constant 0 : i32
    %c0_i32_0 = arith.constant 0 : i32
    %c0_i32_1 = arith.constant 0 : i32
    %c0_i32_2 = arith.constant 0 : i32
    return %c0_i32, %c0_i32_0, %c0_i32_1 : i32, i32, i32
  }
  func.func @transform_4(%arg0: i32) -> (i32, i32, i32) {
    %c0_i32 = arith.constant 0 : i32
    %c0_i32_0 = arith.constant 0 : i32
    %c0_i32_1 = arith.constant 0 : i32
    %c0_i32_2 = arith.constant 0 : i32
    return %c0_i32, %c0_i32_0, %c0_i32_1 : i32, i32, i32
  }
  func.func @transform_5(%arg0: i32) -> (i32, i32, i32) {
    %c0_i32 = arith.constant 0 : i32
    %c0_i32_0 = arith.constant 0 : i32
    %c0_i32_1 = arith.constant 0 : i32
    %c0_i32_2 = arith.constant 0 : i32
    return %c0_i32, %c0_i32_0, %c0_i32_1 : i32, i32, i32
  }
  func.func @transform_6(%arg0: i32) -> (i32, i32, i32) {
    %c0_i32 = arith.constant 0 : i32
    %c0_i32_0 = arith.constant 0 : i32
    %c0_i32_1 = arith.constant 0 : i32
    %c0_i32_2 = arith.constant 0 : i32
    return %c0_i32, %c0_i32_0, %c0_i32_1 : i32, i32, i32
  }
  func.func @transform_7(%arg0: i32) -> (i32, i32, i32) {
    %c0_i32 = arith.constant 0 : i32
    %c0_i32_0 = arith.constant 0 : i32
    %c0_i32_1 = arith.constant 0 : i32
    %c0_i32_2 = arith.constant 0 : i32
    return %c0_i32, %c0_i32_0, %c0_i32_1 : i32, i32, i32
  }
  func.func @transform_8(%arg0: i32) -> (i32, i32) {
    %c0_i32 = arith.constant 0 : i32
    %c0_i32_0 = arith.constant 0 : i32
    %c0_i32_1 = arith.constant 0 : i32
    return %c0_i32, %c0_i32_0 : i32, i32
  }
  func.func @transform_9(%arg0: i32) -> (i32, i32) {
    %c0_i32 = arith.constant 0 : i32
    %c0_i32_0 = arith.constant 0 : i32
    %c0_i32_1 = arith.constant 0 : i32
    return %c0_i32, %c0_i32_0 : i32, i32
  }
  func.func @transform_10(%arg0: i32) -> (i32, i32) {
    %c0_i32 = arith.constant 0 : i32
    %c0_i32_0 = arith.constant 0 : i32
    return %arg0, %c0_i32 : i32, i32
  }
}

</mosaic_0001>

<bundles_post_ra>
// kernel: _lambda_.2
= control target key start
LH: loop header
LB: loop body
LE: loop exit
PB: predicated region body
PF: predicated region fallthrough
CT: control target
= control target key end

     0   :  { %s5888_s13 = smov 0   ;;  %s8255_s0 = inlined_call_operand.vmem [shape: f32[1024,24], index: 0, kind: input, shape index: {}]   ;;  %s8256_s1 = inlined_call_operand.vmem [shape: f32[1024,4], index: 1, kind: input, shape index: {}]   ;;  %s8257_s2 = inlined_call_operand.vmem [shape: bf16[24,128], index: 2, kind: input, shape index: {}]   ;;  %s8258_s3 = inlined_call_operand.vmem [shape: f32[1,128], index: 3, kind: input, shape index: {}]   ;;  %s8259_s4 = inlined_call_operand.vmem [shape: bf16[4,128,128], index: 4, kind: input, shape index: {}]   ;;  %s8260_s5 = inlined_call_operand.vmem [shape: f32[4,1,128], index: 5, kind: input, shape index: {}, may-alias: {5,7}]   ;;  %s8261_s6 = inlined_call_operand.vmem [shape: bf16[4,128,128], index: 6, kind: input, shape index: {}]   ;;  %s8262_s7 = inlined_call_operand.vmem [shape: f32[4,1,128], index: 7, kind: input, shape index: {}, may-alias: {5,7}]   ;;  %s8263_s8 = inlined_call_operand.vmem [shape: bf16[128,8], index: 8, kind: input, shape index: {}]   ;;  %s8264_s9 = inlined_call_operand.vmem [shape: f32[1,8], index: 9, kind: input, shape index: {}]   ;;  %s8265_s10 = inlined_call_operand.vmem [shape: f32[1024,36], index: 10, kind: output, shape index: {}]  }
   0x1 LB: > { %s4837_s14 = sadd.s32 4294967295, %s5817_s13   ;;  %p4841_p0 = scmp.ge.s32.totalorder %s5817_s13, 1  ;;  %s5817_s13 = sphi %s5888_s13, %s20_s13  }
   0x2   : > { %p324_p1 = scmp.lt.s32.totalorder %s5817_s13, 9 }
   0x4   : > { %p325_p2 = pnand %p4841_p0, %p324_p1 }
   0x6   : > { %328 = sbr.rel (%p325_p2) target bundleno = 3191 (0xc77), region = 60 }
   0xb   : > { %s4842_s15 = sshll.u32 %s4837_s14, 4  ;;  %s5819_s20 = smov 125   ;;  %vm1709_vm0 = vcmask 1043456   ;;  %vm1522_vm1 = vcmask 23552   ;;  %vm1539_vm2 = vcmask 48128   ;;  %vm1556_vm3 = vcmask 72704  }
   0xc   : > { %p368_p3 = scmp.lt.s32.totalorder %s4842_s15, 127  ;;  %s5820_s21 = smov 122   ;;  %vm1573_vm4 = vcmask 97280   ;;  %vm1590_vm5 = vcmask 121856   ;;  %vm1607_vm6 = vcmask 146432   ;;  %vm1624_vm7 = vcmask 171008  }
   0xd   : > { %s5821_s22 = smov 116   ;;  %s5822_s23 = smov 3   ;;  %vm1684_vm8 = vcmask 195584   ;;  %vm4718_vm9 = vcmask 228352   ;;  %vm4735_vm10 = vcmask 261120   ;;  %vm4752_vm11 = vcmask 293888  }
   0xe   : > { %s8450_s15 = smov (!%p368_p3, %s4842_s15), 127  ;;  %s5823_s24 = smov 6  }
   0xf   : > { %s5896_s16 = sshll.u32 %s8450_s15, 3  ;;  %s5824_s25 = smov 9  }
  0x10   : > { %s371_s19 = scalar_lea.vmem %s8255_s0, %s5896_s16  ;;  %s5825_s26 = smov 12  }
  0x11   : > { %v386_v0 = vld [vmem:[%s371_s19] sm:$0xff]  ;;  %v388_v1 = vld [vmem:[%s371_s19 + $0x10] sm:$0xff]  ;;  %v387_v2 = vld [vmem:[%s371_s19 + $0x8] sm:$0xff]  ;;  %s5826_s27 = smov 15   ;;  %s5827_s30 = smov 18  }
  0x12   : > { %418 = vrot.lane.b32.xlu0 %v386_v0, %s5819_s20  ;;  %422 = vrot.lane.b32.xlu1 %v388_v1, %s5819_s20  ;;  %v389_v3 = vld [vmem:[%s371_s19 + $0x18] sm:$0xff]  ;;  %v390_v4 = vld [vmem:[%s371_s19 + $0x20] sm:$0xff]  ;;  %s5828_s14 = smov 21   ;;  %s7760_s15 = scalar_lea.vmem %s8256_s1, %s5896_s16 }
  0x13   : > { %v391_v5 = vld [vmem:[%s371_s19 + $0x28] sm:$0xff]  ;;  %v392_v6 = vld [vmem:[%s371_s19 + $0x30] sm:$0xff]  ;;  %v393_v7 = vld [vmem:[%s371_s19 + $0x38] sm:$0xff]  ;;  %s5829_s17 = smov 4  }
  0x14   : > { %v394_v8 = vld [vmem:[%s371_s19 + $0x40] sm:$0xff]  ;;  %v5902_v9 = vld [vmem:[%s371_s19 + $0x48] sm:$0xff]  ;;  %v5904_v10 = vld [vmem:[%s371_s19 + $0x50] sm:$0xff] }
  0x15   : > { %v5906_v11 = vld [vmem:[%s371_s19 + $0x58] sm:$0xff]  ;;  %v5909_v12 = vld [vmem:[%s371_s19 + $0x60] sm:$0xff]  ;;  %v5911_v13 = vld [vmem:[%s371_s19 + $0x68] sm:$0xff] }
  0x16   : > { %420 = vrot.lane.b32.xlu0 %v387_v2, %s5819_s20  ;;  %424 = vrot.lane.b32.xlu1 %v389_v3, %s5819_s20  ;;  %v5915_v14 = vld [vmem:[%s371_s19 + $0x70] sm:$0xff]  ;;  %v5917_v15 = vld [vmem:[%s371_s19 + $0x78] sm:$0xff] }
  0x1a   : > { %426 = vrot.lane.b32.xlu0 %v390_v4, %s5819_s20  ;;  %428 = vrot.lane.b32.xlu1 %v391_v5, %s5819_s20 }
  0x1e   : > { %430 = vrot.lane.b32.xlu0 %v392_v6, %s5819_s20  ;;  %432 = vrot.lane.b32.xlu1 %v393_v7, %s5819_s20 }
  0x22   : > { %434 = vrot.lane.b32.xlu0 %v394_v8, %s5819_s20  ;;  %436 = vrot.lane.b32.xlu1 %v5902_v9, %s5819_s20 }
  0x26   : > { %438 = vrot.lane.b32.xlu0 %v5904_v10, %s5819_s20  ;;  %440 = vrot.lane.b32.xlu1 %v5906_v11, %s5819_s20 }
  0x2a   : > { %442 = vrot.lane.b32.xlu0 %v5909_v12, %s5819_s20  ;;  %444 = vrot.lane.b32.xlu1 %v5911_v13, %s5819_s20 }
  0x2e   : > { %446 = vrot.lane.b32.xlu0 %v5915_v14, %s5819_s20  ;;  %448 = vrot.lane.b32.xlu1 %v5917_v15, %s5819_s20 }
  0x84   : > { %v419_v16 = vpop.permute.xlu0 %418  ;;  %v423_v18 = vpop.permute.xlu1 %422 }
  0x85   : > { %v5923_v17 = vsub.f32 %v386_v0, %v419_v16  ;;  %v5927_v20 = vadd.f32 %v419_v16, %v386_v0  ;;  %v5935_v22 = vsub.f32 %v388_v1, %v423_v18  ;;  %v5945_v27 = vadd.f32 %v423_v18, %v388_v1 }
  0x87   : > { %610 = vrot.lane.b32.xlu0 %v5923_v17, %s5820_s21 }
  0x88   : > { %v421_v19 = vpop.permute.xlu0 %420  ;;  %v425_v23 = vpop.permute.xlu1 %424 }
  0x89   : > { %v5929_v21 = vsub.f32 %v387_v2, %v421_v19  ;;  %v5937_v24 = vadd.f32 %v421_v19, %v387_v2  ;;  %v5943_v25 = vsub.f32 %v389_v3, %v425_v23  ;;  %v5953_v30 = vadd.f32 %v425_v23, %v389_v3 }
  0x8b   : > { %514 = vrot.lane.b32.xlu0 %v5927_v20, %s5820_s21  ;;  %612 = vrot.lane.b32.xlu1 %v5929_v21, %s5820_s21 }
  0x8c   : > { %v427_v26 = vpop.permute.xlu0 %426  ;;  %v429_v29 = vpop.permute.xlu1 %428 }
  0x8d   : > { %v5951_v28 = vsub.f32 %v390_v4, %v427_v26  ;;  %v5955_v31 = vadd.f32 %v427_v26, %v390_v4  ;;  %v5961_v32 = vsub.f32 %v391_v5, %v429_v29  ;;  %v5963_v34 = vadd.f32 %v429_v29, %v391_v5 }
  0x8f   : > { %614 = vrot.lane.b32.xlu0 %v5935_v22, %s5820_s21  ;;  %516 = vrot.lane.b32.xlu1 %v5937_v24, %s5820_s21 }
  0x90   : > { %v431_v33 = vpop.permute.xlu0 %430  ;;  %v433_v36 = vpop.permute.xlu1 %432 }
  0x91   : > { %v5969_v35 = vsub.f32 %v392_v6, %v431_v33  ;;  %v5971_v37 = vadd.f32 %v431_v33, %v392_v6  ;;  %v5977_v38 = vsub.f32 %v393_v7, %v433_v36  ;;  %v5979_v40 = vadd.f32 %v433_v36, %v393_v7 }
  0x93   : > { %518 = vrot.lane.b32.xlu0 %v5945_v27, %s5820_s21  ;;  %616 = vrot.lane.b32.xlu1 %v5943_v25, %s5820_s21 }
  0x94   : > { %v435_v39 = vpop.permute.xlu0 %434  ;;  %v437_v42 = vpop.permute.xlu1 %436 }
  0x95   : > { %v5985_v41 = vsub.f32 %v394_v8, %v435_v39  ;;  %v5987_v43 = vadd.f32 %v435_v39, %v394_v8  ;;  %v5994_v44 = vsub.f32 %v5902_v9, %v437_v42  ;;  %v5997_v46 = vadd.f32 %v437_v42, %v5902_v9 }
  0x97   : > { %520 = vrot.lane.b32.xlu1 %v5953_v30, %s5820_s21  ;;  %618 = vrot.lane.b32.xlu0 %v5951_v28, %s5820_s21 }
  0x98   : > { %v439_v45 = vpop.permute.xlu0 %438  ;;  %v441_v48 = vpop.permute.xlu1 %440 }
  0x99   : > { %v6004_v47 = vsub.f32 %v5904_v10, %v439_v45  ;;  %v6007_v49 = vadd.f32 %v439_v45, %v5904_v10  ;;  %v6014_v50 = vsub.f32 %v5906_v11, %v441_v48  ;;  %v6017_v52 = vadd.f32 %v441_v48, %v5906_v11 }
  0x9b   : > { %620 = vrot.lane.b32.xlu1 %v5961_v32, %s5820_s21  ;;  %522 = vrot.lane.b32.xlu0 %v5955_v31, %s5820_s21 }
  0x9c   : > { %v443_v51 = vpop.permute.xlu0 %442  ;;  %v445_v54 = vpop.permute.xlu1 %444 }
  0x9d   : > { %v6024_v53 = vsub.f32 %v5909_v12, %v443_v51  ;;  %v6027_v55 = vadd.f32 %v443_v51, %v5909_v12  ;;  %v6034_v56 = vsub.f32 %v5911_v13, %v445_v54  ;;  %v6037_v58 = vadd.f32 %v445_v54, %v5911_v13 }
  0x9f   : > { %524 = vrot.lane.b32.xlu1 %v5963_v34, %s5820_s21  ;;  %622 = vrot.lane.b32.xlu0 %v5969_v35, %s5820_s21 }
  0xa0   : > { %v447_v57 = vpop.permute.xlu0 %446  ;;  %v449_v60 = vpop.permute.xlu1 %448 }
  0xa1   : > { %v6044_v59 = vsub.f32 %v5915_v14, %v447_v57  ;;  %v6047_v61 = vadd.f32 %v447_v57, %v5915_v14  ;;  %v6054_v62 = vsub.f32 %v5917_v15, %v449_v60  ;;  %v6057_v63 = vadd.f32 %v449_v60, %v5917_v15 }
  0xa3   : > { %624 = vrot.lane.b32.xlu1 %v5977_v38, %s5820_s21  ;;  %526 = vrot.lane.b32.xlu0 %v5971_v37, %s5820_s21 }
  0xa7   : > { %528 = vrot.lane.b32.xlu1 %v5979_v40, %s5820_s21  ;;  %626 = vrot.lane.b32.xlu0 %v5985_v41, %s5820_s21 }
  0xab   : > { %628 = vrot.lane.b32.xlu1 %v5994_v44, %s5820_s21  ;;  %530 = vrot.lane.b32.xlu0 %v5987_v43, %s5820_s21 }
  0xaf   : > { %532 = vrot.lane.b32.xlu1 %v5997_v46, %s5820_s21  ;;  %630 = vrot.lane.b32.xlu0 %v6004_v47, %s5820_s21 }
  0xb3   : > { %632 = vrot.lane.b32.xlu1 %v6014_v50, %s5820_s21  ;;  %534 = vrot.lane.b32.xlu0 %v6007_v49, %s5820_s21 }
  0xb7   : > { %536 = vrot.lane.b32.xlu1 %v6017_v52, %s5820_s21  ;;  %634 = vrot.lane.b32.xlu0 %v6024_v53, %s5820_s21 }
  0xbb   : > { %636 = vrot.lane.b32.xlu1 %v6034_v56, %s5820_s21  ;;  %538 = vrot.lane.b32.xlu0 %v6027_v55, %s5820_s21 }
  0xbf   : > { %540 = vrot.lane.b32.xlu1 %v6037_v58, %s5820_s21  ;;  %638 = vrot.lane.b32.xlu0 %v6044_v59, %s5820_s21 }
  0xc3   : > { %640 = vrot.lane.b32.xlu1 %v6054_v62, %s5820_s21  ;;  %542 = vrot.lane.b32.xlu0 %v6047_v61, %s5820_s21 }
  0xc7   : > { %544 = vrot.lane.b32.xlu1 %v6057_v63, %s5820_s21 }
  0xf9   : > { %v611_v0 = vpop.permute.xlu0 %610 }
  0xfa   : > { %v6066_v1 = vadd.f32 %v611_v0, %v5923_v17  ;;  %v6101_v15 = vsub.f32 %v5923_v17, %v611_v0 }
  0xfc   : > { %802 = vrot.lane.b32.xlu0 %v6066_v1, %s5821_s22 }
  0xfd   : > { %v613_v2 = vpop.permute.xlu1 %612  ;;  %v515_v3 = vpop.permute.xlu0 %514 }
  0xfe   : > { %v6071_v4 = vadd.f32 %v613_v2, %v5929_v21  ;;  %v6081_v9 = vsub.f32 %v5927_v20, %v515_v3  ;;  %v6111_v18 = vsub.f32 %v5929_v21, %v613_v2  ;;  %v6114_v19 = vadd.f32 %v515_v3, %v5927_v20 }
 0x100   : > { %804 = vrot.lane.b32.xlu1 %v6071_v4, %s5821_s22  ;;  %8340 = vst [vmem:[#allocation2_spill] sm:$0xff] %v6114_v19 }
 0x101   : > { %v517_v5 = vpop.permute.xlu1 %516  ;;  %v615_v6 = vpop.permute.xlu0 %614 }
 0x102   : > { %v6076_v7 = vadd.f32 %v615_v6, %v5935_v22  ;;  %v6091_v12 = vsub.f32 %v5937_v24, %v517_v5  ;;  %v6121_v17 = vadd.f32 %v517_v5, %v5937_v24  ;;  %v6124_v26 = vsub.f32 %v5935_v22, %v615_v6 }
 0x104   : > { %806 = vrot.lane.b32.xlu0 %v6076_v7, %s5821_s22 }
 0x105   : > { %v617_v8 = vpop.permute.xlu1 %616  ;;  %v519_v11 = vpop.permute.xlu0 %518 }
 0x106   : > { %v6084_v10 = vadd.f32 %v617_v8, %v5943_v25  ;;  %v6094_v13 = vsub.f32 %v5945_v27, %v519_v11  ;;  %v6131_v21 = vsub.f32 %v5943_v25, %v617_v8  ;;  %v6134_v33 = vadd.f32 %v519_v11, %v5945_v27 }
 0x108   : > { %808 = vrot.lane.b32.xlu1 %v6084_v10, %s5821_s22  ;;  %898 = vrot.lane.b32.xlu0 %v6081_v9, %s5821_s22 }
 0x109   : > { %v521_v14 = vpop.permute.xlu1 %520  ;;  %v619_v23 = vpop.permute.xlu0 %618 }
 0x10a   : > { %v6104_v16 = vsub.f32 %v5953_v30, %v521_v14  ;;  %v6141_v24 = vadd.f32 %v521_v14, %v5953_v30  ;;  %v6144_v36 = vadd.f32 %v619_v23, %v5951_v28  ;;  %v6181_v60 = vsub.f32 %v5951_v28, %v619_v23 }
 0x10c   : > { %900 = vrot.lane.b32.xlu1 %v6091_v12, %s5821_s22  ;;  %902 = vrot.lane.b32.xlu0 %v6094_v13, %s5821_s22 }
 0x10d   : > { %v621_v29 = vpop.permute.xlu1 %620  ;;  %v523_v20 = vpop.permute.xlu0 %522 }
 0x10e   : > { %v6151_v25 = vadd.f32 %v621_v29, %v5961_v32  ;;  %v6161_v30 = vsub.f32 %v5955_v31, %v523_v20  ;;  %v6191_v2 = vsub.f32 %v5961_v32, %v621_v29  ;;  %v6194_v3 = vadd.f32 %v523_v20, %v5955_v31 }
 0x110   : > { %904 = vrot.lane.b32.xlu1 %v6104_v16, %s5821_s22  ;;  %994 = vrot.lane.b32.xlu0 %v6101_v15, %s5821_s22  ;;  %8341 = vst [vmem:[#allocation3_spill] sm:$0xff] %v6194_v3 }
 0x111   : > { %v525_v22 = vpop.permute.xlu1 %524  ;;  %v623_v39 = vpop.permute.xlu0 %622 }
 0x112   : > { %v6154_v27 = vadd.f32 %v623_v39, %v5969_v35  ;;  %v6171_v51 = vsub.f32 %v5963_v34, %v525_v22  ;;  %v6201_v28 = vadd.f32 %v525_v22, %v5963_v34  ;;  %v6204_v6 = vsub.f32 %v5969_v35, %v623_v39 }
 0x114   : > { %996 = vrot.lane.b32.xlu1 %v6111_v18, %s5821_s22  ;;  %706 = vrot.lane.b32.xlu0 %v6114_v19, %s5821_s22  ;;  %8342 = vst [vmem:[#allocation4_spill] sm:$0xff] %v6201_v28 }
 0x115   : > { %v625_v42 = vpop.permute.xlu1 %624  ;;  %v527_v48 = vpop.permute.xlu0 %526 }
 0x116   : > { %v6164_v45 = vadd.f32 %v625_v42, %v5977_v38  ;;  %v6174_v54 = vsub.f32 %v5971_v37, %v527_v48  ;;  %v6211_v32 = vsub.f32 %v5977_v38, %v625_v42  ;;  %v6214_v11 = vadd.f32 %v527_v48, %v5971_v37 }
 0x118   : > { %708 = vrot.lane.b32.xlu1 %v6121_v17, %s5821_s22  ;;  %998 = vrot.lane.b32.xlu0 %v6124_v26, %s5821_s22  ;;  %8343 = vst [vmem:[#allocation5_spill] sm:$0xff] %v6214_v11 }
 0x119   : > { %v529_v57 = vpop.permute.xlu1 %528  ;;  %v627_v5 = vpop.permute.xlu0 %626 }
 0x11a   : > { %v6184_v0 = vsub.f32 %v5979_v40, %v529_v57  ;;  %v6221_v35 = vadd.f32 %v529_v57, %v5979_v40  ;;  %v6224_v14 = vadd.f32 %v627_v5, %v5985_v41  ;;  %v6261_v57 = vsub.f32 %v5985_v41, %v627_v5 }
 0x11c   : > { %1000 = vrot.lane.b32.xlu1 %v6131_v21, %s5821_s22  ;;  %710 = vrot.lane.b32.xlu0 %v6134_v33, %s5821_s22  ;;  %8344 = vst [vmem:[#allocation6_spill] sm:$0xff] %v6221_v35  ;;  %8349 = vst [vmem:[#allocation11_spill] sm:$0xff] %v6261_v57 }
 0x11d   : > { %v629_v8 = vpop.permute.xlu1 %628  ;;  %v531_v31 = vpop.permute.xlu0 %530 }
 0x11e   : > { %v6231_v37 = vadd.f32 %v629_v8, %v5994_v44  ;;  %v6241_v40 = vsub.f32 %v5987_v43, %v531_v31 }
 0x120   : > { %712 = vrot.lane.b32.xlu1 %v6141_v24, %s5821_s22  ;;  %810 = vrot.lane.b32.xlu0 %v6144_v36, %s5821_s22  ;;  %8346 = vst [vmem:[#allocation8_spill] sm:$0xff] %v6241_v40 }
 0x121   : > { %v533_v34 = vpop.permute.xlu1 %532  ;;  %v631_v23 = vpop.permute.xlu0 %630 }
 0x122   : > { %v6234_v38 = vadd.f32 %v631_v23, %v6004_v47  ;;  %v6251_v39 = vsub.f32 %v5997_v46, %v533_v34  ;;  %v6281_v41 = vadd.f32 %v533_v34, %v5997_v46  ;;  %v6284_v5 = vsub.f32 %v6004_v47, %v631_v23 }
 0x124   : > { %812 = vrot.lane.b32.xlu1 %v6151_v25, %s5821_s22  ;;  %814 = vrot.lane.b32.xlu0 %v6154_v27, %s5821_s22  ;;  %8345 = vst [vmem:[#allocation7_spill] sm:$0xff] %v6234_v38  ;;  %8348 = vst [vmem:[#allocation10_spill] sm:$0xff] %v6251_v39 }
 0x125   : > { %v633_v29 = vpop.permute.xlu1 %632  ;;  %v535_v22 = vpop.permute.xlu0 %534  ;;  %8351 = vst [vmem:[#allocation13_spill] sm:$0xff] %v6281_v41 }
 0x126   : > { %v6244_v20 = vadd.f32 %v633_v29, %v6014_v50  ;;  %v6254_v42 = vsub.f32 %v6007_v49, %v535_v22 }
 0x128   : > { %816 = vrot.lane.b32.xlu1 %v6164_v45, %s5821_s22  ;;  %906 = vrot.lane.b32.xlu0 %v6161_v30, %s5821_s22  ;;  %8347 = vst [vmem:[#allocation9_spill] sm:$0xff] %v6244_v20 }
 0x129   : > { %v537_v48 = vpop.permute.xlu1 %536 }
 0x12a   : > { %v6301_v47 = vadd.f32 %v537_v48, %v6017_v52 }
 0x12c   : > { %908 = vrot.lane.b32.xlu1 %v6171_v51, %s5821_s22  ;;  %910 = vrot.lane.b32.xlu0 %v6174_v54, %s5821_s22  ;;  %8353 = vst [vmem:[#allocation15_spill] sm:$0xff] %v6301_v47 }
 0x130   : > { %912 = vrot.lane.b32.xlu1 %v6184_v0, %s5821_s22  ;;  %1002 = vrot.lane.b32.xlu0 %v6181_v60, %s5821_s22 }
 0x134   : > { %1004 = vrot.lane.b32.xlu1 %v6191_v2, %s5821_s22  ;;  %714 = vrot.lane.b32.xlu0 %v6194_v3, %s5821_s22 }
 0x138   : > { %716 = vrot.lane.b32.xlu1 %v6201_v28, %s5821_s22  ;;  %1006 = vrot.lane.b32.xlu0 %v6204_v6, %s5821_s22 }
 0x13c   : > { %1008 = vrot.lane.b32.xlu1 %v6211_v32, %s5821_s22  ;;  %718 = vrot.lane.b32.xlu0 %v6214_v11, %s5821_s22 }
 0x140   : > { %720 = vrot.lane.b32.xlu1 %v6221_v35, %s5821_s22  ;;  %818 = vrot.lane.b32.xlu0 %v6224_v14, %s5821_s22 }
 0x144   : > { %820 = vrot.lane.b32.xlu1 %v6231_v37, %s5821_s22  ;;  %822 = vrot.lane.b32.xlu0 %v6234_v38, %s5821_s22  ;;  %v635_v38 = vpop.permute.xlu0 %634 }
 0x148   : > { %824 = vrot.lane.b32.xlu1 %v6244_v20, %s5821_s22  ;;  %914 = vrot.lane.b32.xlu0 %v6241_v40, %s5821_s22  ;;  %v6264_v20 = vsub.f32 %v6017_v52, %v537_v48  ;;  %v6271_v40 = vsub.f32 %v5994_v44, %v629_v8  ;;  %v6291_v44 = vsub.f32 %v6014_v50, %v633_v29 }
 0x149   : > { %v6294_v8 = vadd.f32 %v535_v22, %v6007_v49 }
 0x14b   : > { %8352 = vst [vmem:[#allocation14_spill] sm:$0xff] %v6294_v8 }
 0x14c   : > { %916 = vrot.lane.b32.xlu1 %v6251_v39, %s5821_s22  ;;  %918 = vrot.lane.b32.xlu0 %v6254_v42, %s5821_s22  ;;  %v6274_v39 = vadd.f32 %v531_v31, %v5987_v43  ;;  %v539_v43 = vpop.permute.xlu0 %538  ;;  %v6304_v31 = vadd.f32 %v635_v38, %v6024_v53 }
 0x14d   : > { %v6321_v52 = vsub.f32 %v6027_v55, %v539_v43 }
 0x14e   : > { %8350 = vst [vmem:[#allocation12_spill] sm:$0xff] %v6274_v39  ;;  %8354 = vst [vmem:[#allocation16_spill] sm:$0xff] %v6304_v31 }
 0x14f   : > { %8357 = vst [vmem:[#allocation19_spill] sm:$0xff] %v6321_v52 }
 0x150   : > { %920 = vrot.lane.b32.xlu1 %v6264_v20, %s5821_s22  ;;  %1010 = vrot.lane.b32.xlu0 %v6261_v57, %s5821_s22  ;;  %v637_v57 = vpop.permute.xlu1 %636  ;;  %v639_v34 = vpop.permute.xlu0 %638 }
 0x151   : > { %v6311_v49 = vadd.f32 %v637_v57, %v6034_v56  ;;  %v6314_v50 = vadd.f32 %v639_v34, %v6044_v59 }
 0x153   : > { %8355 = vst [vmem:[#allocation17_spill] sm:$0xff] %v6311_v49  ;;  %8356 = vst [vmem:[#allocation18_spill] sm:$0xff] %v6314_v50 }
 0x154   : > { %1012 = vrot.lane.b32.xlu1 %v6271_v40, %s5821_s22  ;;  %722 = vrot.lane.b32.xlu0 %v6274_v39, %s5821_s22  ;;  %v541_v46 = vpop.permute.xlu1 %540  ;;  %v543_v22 = vpop.permute.xlu0 %542 }
 0x155   : > { %v6331_v48 = vsub.f32 %v6037_v58, %v541_v46 }
 0x157   : > { %8359 = vst [vmem:[#allocation21_spill] sm:$0xff] %v6331_v48 }
 0x158   : > { %724 = vrot.lane.b32.xlu1 %v6281_v41, %s5821_s22  ;;  %1014 = vrot.lane.b32.xlu0 %v6284_v5, %s5821_s22  ;;  %v641_v23 = vpop.permute.xlu1 %640 }
 0x159   : > { %v6324_v29 = vadd.f32 %v641_v23, %v6054_v62 }
 0x15b   : > { %8358 = vst [vmem:[#allocation20_spill] sm:$0xff] %v6324_v29 }
 0x15c   : > { %1016 = vrot.lane.b32.xlu1 %v6291_v44, %s5821_s22  ;;  %726 = vrot.lane.b32.xlu0 %v6294_v8, %s5821_s22 }
 0x160   : > { %728 = vrot.lane.b32.xlu1 %v6301_v47, %s5821_s22  ;;  %826 = vrot.lane.b32.xlu0 %v6304_v31, %s5821_s22  ;;  %v6341_v31 = vsub.f32 %v6024_v53, %v635_v38  ;;  %v6363_v53 = vadd.f32 %v541_v46, %v6037_v58  ;;  %v6366_v38 = vsub.f32 %v6044_v59, %v639_v34 }
 0x162   : > { %8361 = vst [vmem:[#allocation23_spill] sm:$0xff] %v6341_v31  ;;  %8365 = vst [vmem:[#allocation27_spill] sm:$0xff] %v6363_v53 }
 0x163   : > { %8366 = vst [vmem:[#allocation28_spill] sm:$0xff] %v6366_v38 }
 0x164   : > { %828 = vrot.lane.b32.xlu1 %v6311_v49, %s5821_s22  ;;  %830 = vrot.lane.b32.xlu0 %v6314_v50, %s5821_s22  ;;  %v6334_v49 = vsub.f32 %v6047_v61, %v543_v22  ;;  %v545_v50 = vpop.permute.xlu1 %544 }
 0x166   : > { %8360 = vst [vmem:[#allocation22_spill] sm:$0xff] %v6334_v49 }
 0x168   : > { %832 = vrot.lane.b32.xlu1 %v6324_v29, %s5821_s22  ;;  %922 = vrot.lane.b32.xlu0 %v6321_v52, %s5821_s22  ;;  %v6344_v29 = vsub.f32 %v6057_v63, %v545_v50  ;;  %v6351_v52 = vsub.f32 %v6034_v56, %v637_v57  ;;  %v6380_v57 = vadd.f32 %v543_v22, %v6047_v61 }
 0x16a   : > { %8362 = vst [vmem:[#allocation24_spill] sm:$0xff] %v6344_v29  ;;  %8363 = vst [vmem:[#allocation25_spill] sm:$0xff] %v6351_v52 }
 0x16b   : > { %8368 = vst [vmem:[#allocation30_spill] sm:$0xff] %v6380_v57 }
 0x16c   : > { %924 = vrot.lane.b32.xlu1 %v6331_v48, %s5821_s22  ;;  %926 = vrot.lane.b32.xlu0 %v6334_v49, %s5821_s22  ;;  %v6354_v48 = vadd.f32 %v539_v43, %v6027_v55  ;;  %v6377_v55 = vsub.f32 %v6054_v62, %v641_v23  ;;  %v6391_v43 = vadd.f32 %v545_v50, %v6057_v63 }
 0x16e   : > { %8364 = vst [vmem:[#allocation26_spill] sm:$0xff] %v6354_v48  ;;  %v6356_v47 = vpop.permute.xlu0 %802  ;;  %8367 = vst [vmem:[#allocation29_spill] sm:$0xff] %v6377_v55 }
 0x16f   : > { %8369 = vst [vmem:[#allocation31_spill] sm:$0xff] %v6391_v43  ;;  %v850_v62 = vadd.f32 %v6356_v47, %v6066_v1 }
 0x170   : > { %928 = vrot.lane.b32.xlu1 %v6344_v29, %s5821_s22  ;;  %1018 = vrot.lane.b32.xlu0 %v6341_v31, %s5821_s22 }
 0x172   : > { %v6368_v31 = vpop.permute.xlu1 %804 }
 0x173   : > { %v851_v34 = vadd.f32 %v6368_v31, %v6071_v4 }
 0x174   : > { %1020 = vrot.lane.b32.xlu1 %v6351_v52, %s5821_s22  ;;  %730 = vrot.lane.b32.xlu0 %v6354_v48, %s5821_s22 }
 0x176   : > { %v6370_v56 = vpop.permute.xlu0 %806 }
 0x177   : > { %v852_v63 = vadd.f32 %v6370_v56, %v6076_v7 }
 0x178   : > { %732 = vrot.lane.b32.xlu1 %v6363_v53, %s5821_s22  ;;  %1022 = vrot.lane.b32.xlu0 %v6366_v38, %s5821_s22 }
 0x17a   : > { %v6382_v58 = vpop.permute.xlu1 %808  ;;  %v6384_v59 = vpop.permute.xlu0 %898 }
 0x17b   : > { %v853_v22 = vadd.f32 %v6382_v58, %v6084_v10 }
 0x17c   : > { %1024 = vrot.lane.b32.xlu1 %v6377_v55, %s5821_s22  ;;  %734 = vrot.lane.b32.xlu0 %v6380_v57, %s5821_s22 }
 0x17e   : > { %v6395_v46 = vpop.permute.xlu1 %900  ;;  %v6397_v61 = vpop.permute.xlu0 %902 }
 0x180   : > { %736 = vrot.lane.b32.xlu1 %v6391_v43, %s5821_s22  ;;  %1090 = vrot.lane.b32.xlu0 %v850_v62, %s5822_s23  ;;  %v946_v62 = vadd.f32 %v6384_v59, %v6081_v9  ;;  %s5830_s22 = smov 24  }
 0x182   : > { %v6406_v50 = vpop.permute.xlu1 %904  ;;  %v6408_v23 = vpop.permute.xlu0 %994 }
 0x184   : > { %1092 = vrot.lane.b32.xlu1 %v851_v34, %s5822_s23  ;;  %1094 = vrot.lane.b32.xlu0 %v852_v63, %s5822_s23  ;;  %v947_v34 = vadd.f32 %v6395_v46, %v6091_v12  ;;  %v948_v63 = vadd.f32 %v6397_v61, %v6094_v13 }
 0x186   : > { %v6416_v43 = vpop.permute.xlu1 %996  ;;  %v6418_v57 = vpop.permute.xlu0 %706 }
 0x187   : > { %8370 = vst [vmem:[#allocation32_spill] sm:$0xff] %v6418_v57 }
 0x188   : > { %1096 = vrot.lane.b32.xlu1 %v853_v22, %s5822_s23  ;;  %1154 = vrot.lane.b32.xlu0 %v946_v62, %s5823_s24  ;;  %v949_v22 = vadd.f32 %v6406_v50, %v6104_v16  ;;  %v1042_v62 = vadd.f32 %v6408_v23, %v6101_v15 }
 0x18a   : > { %v6426_v53 = vpop.permute.xlu1 %708  ;;  %v6428_v55 = vpop.permute.xlu0 %998 }
 0x18b   : > { %8371 = vst [vmem:[#allocation33_spill] sm:$0xff] %v6426_v53 }
 0x18c   : > { %1156 = vrot.lane.b32.xlu1 %v947_v34, %s5823_s24  ;;  %1158 = vrot.lane.b32.xlu0 %v948_v63, %s5823_s24  ;;  %v1043_v34 = vadd.f32 %v6416_v43, %v6111_v18  ;;  %v1044_v63 = vadd.f32 %v6428_v55, %v6124_v26 }
 0x18e   : > { %v6436_v48 = vpop.permute.xlu1 %1000  ;;  %v6438_v38 = vpop.permute.xlu0 %710 }
 0x18f   : > { %8372 = vst [vmem:[#allocation34_spill] sm:$0xff] %v6438_v38 }
 0x190   : > { %1160 = vrot.lane.b32.xlu1 %v949_v22, %s5823_s24  ;;  %1218 = vrot.lane.b32.xlu0 %v1042_v62, %s5824_s25  ;;  %v770_v22 = vsub.f32 %v6114_v19, %v6418_v57  ;;  %v1045_v62 = vadd.f32 %v6436_v48, %v6131_v21 }
 0x192   : > { %v6446_v52 = vpop.permute.xlu1 %712  ;;  %v6448_v29 = vpop.permute.xlu0 %810 }
 0x194   : > { %1220 = vrot.lane.b32.xlu1 %v1043_v34, %s5824_s25  ;;  %1222 = vrot.lane.b32.xlu0 %v1044_v63, %s5824_s25  ;;  %v771_v34 = vsub.f32 %v6121_v17, %v6426_v53  ;;  %v772_v63 = vsub.f32 %v6134_v33, %v6438_v38 }
 0x196   : > { %v6456_v49 = vpop.permute.xlu1 %812  ;;  %v6458_v8 = vpop.permute.xlu0 %814 }
 0x198   : > { %1224 = vrot.lane.b32.xlu1 %v1045_v62, %s5824_s25  ;;  %1282 = vrot.lane.b32.xlu0 %v770_v22, %s5825_s26  ;;  %v866_v62 = vsub.f32 %v6066_v1, %v6356_v47  ;;  %v773_v22 = vsub.f32 %v6141_v24, %v6446_v52  ;;  %v869_v47 = vsub.f32 %v6084_v10, %v6382_v58 }
 0x199   : > { %v963_v10 = vsub.f32 %v6091_v12, %v6395_v46  ;;  %v965_v12 = vsub.f32 %v6104_v16, %v6406_v50 }
 0x19a   : > { %v6466_v41 = vpop.permute.xlu1 %816  ;;  %v6468_v57 = vpop.permute.xlu0 %906 }
 0x19c   : > { %1284 = vrot.lane.b32.xlu1 %v771_v34, %s5825_s26  ;;  %1286 = vrot.lane.b32.xlu0 %v772_v63, %s5825_s26  ;;  %v867_v34 = vsub.f32 %v6071_v4, %v6368_v31  ;;  %v868_v63 = vsub.f32 %v6076_v7, %v6370_v56  ;;  %v5545_v7 = vld [vmem:[%s8257_s2 + $0x8] ss:$0 sps:$4 sm:$0xff]  }
 0x19d   : > { %5522 = vmatprep.subr.msk.bf16.mxu0 %vm1709_vm0, %v5545_v7  ;;  %v1711_v31 = vsel %vm1709_vm0, %v5545_v7, 0 }
 0x19e   : > { %v6476_v19 = vpop.permute.xlu1 %908  ;;  %v6478_v53 = vpop.permute.xlu0 %910  ;;  %5199 = vmatpush3.bf16.msra.mxu0 %v1711_v31 }
 0x1a0   : > { %1288 = vrot.lane.b32.xlu1 %v773_v22, %s5825_s26  ;;  %1346 = vrot.lane.b32.xlu0 %v866_v62, %s5826_s27  ;;  %v962_v62 = vsub.f32 %v6081_v9, %v6384_v59  ;;  %v964_v9 = vsub.f32 %v6094_v13, %v6397_v61  ;;  %v5546_v59 = vld [vmem:[%s8257_s2] sm:$0xff]   ;;  %v1058_v13 = vsub.f32 %v6101_v15, %v6408_v23 }
 0x1a1   : > { %5200 = vmatprep.subr.bf16.mxu0 %v5546_v59  ;;  %v1061_v15 = vsub.f32 %v6131_v21, %v6436_v48  ;;  %v854_v23 = vadd.f32 %v6448_v29, %v6144_v36  ;;  %v857_v48 = vadd.f32 %v6466_v41, %v6164_v45 }
 0x1a2   : > { %v6486_v38 = vpop.permute.xlu1 %912  ;;  %v6488_v1 = vpop.permute.xlu0 %1002  ;;  %5201 = vmatpush3.bf16.msra.mxu0 %v5546_v59 }
 0x1a4   : > { %1348 = vrot.lane.b32.xlu1 %v867_v34, %s5826_s27  ;;  %1350 = vrot.lane.b32.xlu0 %v868_v63, %s5826_s27  ;;  %v1059_v34 = vsub.f32 %v6111_v18, %v6416_v43  ;;  %v1060_v63 = vsub.f32 %v6124_v26, %v6428_v55  ;;  %v855_v26 = vadd.f32 %v6456_v49, %v6151_v25 }
 0x1a5   : > { %v856_v55 = vadd.f32 %v6458_v8, %v6154_v27 }
 0x1a6   : > { %v6496_v22 = vpop.permute.xlu1 %1004  ;;  %v6498_v4 = vpop.permute.xlu0 %714 }
 0x1a7   : > { %8373 = vst [vmem:[#allocation35_spill] sm:$0xff] %v6498_v4 }
 0x1a8   : > { %1352 = vrot.lane.b32.xlu1 %v869_v47, %s5826_s27  ;;  %1410 = vrot.lane.b32.xlu0 %v962_v62, %s5827_s30  ;;  %v950_v62 = vadd.f32 %v6468_v57, %v6161_v30 }
 0x1aa   : > { %v6509_v56 = vpop.permute.xlu1 %716  ;;  %v6511_v58 = vpop.permute.xlu0 %1006 }
 0x1ab   : > { %8374 = vst [vmem:[#allocation36_spill] sm:$0xff] %v6509_v56 }
 0x1ac   : > { %1412 = vrot.lane.b32.xlu1 %v963_v10, %s5827_s30  ;;  %1414 = vrot.lane.b32.xlu0 %v964_v9, %s5827_s30  ;;  %v951_v10 = vadd.f32 %v6476_v19, %v6171_v51  ;;  %v952_v9 = vadd.f32 %v6478_v53, %v6174_v54 }
 0x1ae   : > { %v6522_v46 = vpop.permute.xlu1 %1008  ;;  %v6524_v61 = vpop.permute.xlu0 %718 }
 0x1af   : > { %8375 = vst [vmem:[#allocation37_spill] sm:$0xff] %v6524_v61 }
 0x1b0   : > { %1416 = vrot.lane.b32.xlu1 %v965_v12, %s5827_s30  ;;  %1474 = vrot.lane.b32.xlu0 %v1058_v13, %s5828_s14  ;;  %v953_v13 = vadd.f32 %v6486_v38, %v6184_v0 }
 0x1b2   : > { %v6532_v16 = vpop.permute.xlu1 %720  ;;  %v6534_v50 = vpop.permute.xlu0 %818 }
 0x1b3   : > { %8376 = vst [vmem:[#allocation38_spill] sm:$0xff] %v6532_v16 }
 0x1b4   : > { %1476 = vrot.lane.b32.xlu1 %v1059_v34, %s5828_s14  ;;  %1478 = vrot.lane.b32.xlu0 %v1060_v63, %s5828_s14  ;;  %v1046_v34 = vadd.f32 %v6488_v1, %v6181_v60 }
 0x1b6   : > { %v6542_v47 = vpop.permute.xlu1 %820  ;;  %v6544_v18 = vpop.permute.xlu0 %822 }
 0x1b8   : > { %1480 = vrot.lane.b32.xlu1 %v1061_v15, %s5828_s14  ;;  %1098 = vrot.lane.b32.xlu0 %v854_v23, %s5822_s23  ;;  %v1047_v23 = vadd.f32 %v6496_v22, %v6191_v2 }
 0x1ba   : > { %v6552_v43 = vpop.permute.xlu1 %824  ;;  %v6554_v21 = vpop.permute.xlu0 %914 }
 0x1bc   : > { %1100 = vrot.lane.b32.xlu1 %v855_v26, %s5822_s23  ;;  %1102 = vrot.lane.b32.xlu0 %v856_v55, %s5822_s23  ;;  %v1048_v26 = vadd.f32 %v6511_v58, %v6204_v6 }
 0x1be   : > { %v6562_v7 = vpop.permute.xlu1 %916  ;;  %v6564_v31 = vpop.permute.xlu0 %918 }
 0x1c0   : > { %1104 = vrot.lane.b32.xlu1 %v857_v48, %s5822_s23  ;;  %1162 = vrot.lane.b32.xlu0 %v950_v62, %s5823_s24  ;;  %v774_v62 = vsub.f32 %v6194_v3, %v6498_v4  ;;  %v870_v3 = vsub.f32 %v6144_v36, %v6448_v29  ;;  %v873_v29 = vsub.f32 %v6164_v45, %v6466_v41 }
 0x1c1   : > { %v1062_v41 = vsub.f32 %v6181_v60, %v6488_v1  ;;  %v1065_v60 = vsub.f32 %v6211_v32, %v6522_v46 }
 0x1c2   : > { %v6572_v59 = vpop.permute.xlu1 %920  ;;  %v6574_v12 = vpop.permute.xlu0 %1010 }
 0x1c4   : > { %1164 = vrot.lane.b32.xlu1 %v951_v10, %s5823_s24  ;;  %1166 = vrot.lane.b32.xlu0 %v952_v9, %s5823_s24  ;;  %v1049_v10 = vadd.f32 %v6522_v46, %v6211_v32  ;;  %v8385_v46 = vld [vmem:[#allocation9_spill] sm:$0xff] }
 0x1c6   : > { %v6582_v63 = vpop.permute.xlu1 %1012  ;;  %v6584_v15 = vpop.permute.xlu0 %722 }
 0x1c7   : > { %8377 = vst [vmem:[#allocation39_spill] sm:$0xff] %v6584_v15 }
 0x1c8   : > { %1168 = vrot.lane.b32.xlu1 %v953_v13, %s5823_s24  ;;  %1226 = vrot.lane.b32.xlu0 %v1046_v34, %s5824_s25  ;;  %v775_v34 = vsub.f32 %v6201_v28, %v6509_v56 }
 0x1ca   : > { %v6592_v55 = vpop.permute.xlu1 %724  ;;  %v6594_v48 = vpop.permute.xlu0 %1014 }
 0x1cc   : > { %1228 = vrot.lane.b32.xlu1 %v1047_v23, %s5824_s25  ;;  %1230 = vrot.lane.b32.xlu0 %v1048_v26, %s5824_s25  ;;  %v776_v23 = vsub.f32 %v6214_v11, %v6524_v61  ;;  %v871_v61 = vsub.f32 %v6151_v25, %v6456_v49  ;;  %v778_v11 = vsub.f32 %v6274_v39, %v6584_v15 }
 0x1cd   : > { %v874_v39 = vsub.f32 %v6224_v14, %v6534_v50 }
 0x1ce   : > { %v6602_v9 = vpop.permute.xlu1 %1016  ;;  %v6604_v13 = vpop.permute.xlu0 %726 }
 0x1cf   : > { %8378 = vst [vmem:[#allocation40_spill] sm:$0xff] %v6604_v13 }
 0x1d0   : > { %1232 = vrot.lane.b32.xlu1 %v1049_v10, %s5824_s25  ;;  %1290 = vrot.lane.b32.xlu0 %v774_v62, %s5825_s26  ;;  %v777_v62 = vsub.f32 %v6221_v35, %v6532_v16  ;;  %v1051_v16 = vadd.f32 %v6582_v63, %v6271_v40 }
 0x1d2   : > { %v6612_v26 = vpop.permute.xlu1 %728  ;;  %v6614_v4 = vpop.permute.xlu0 %826 }
 0x1d4   : > { %1292 = vrot.lane.b32.xlu1 %v775_v34, %s5825_s26  ;;  %1294 = vrot.lane.b32.xlu0 %v776_v23, %s5825_s26  ;;  %v872_v34 = vsub.f32 %v6154_v27, %v6458_v8  ;;  %v967_v27 = vsub.f32 %v6171_v51, %v6476_v19  ;;  %v968_v8 = vsub.f32 %v6174_v54, %v6478_v53 }
 0x1d5   : > { %v1063_v51 = vsub.f32 %v6191_v2, %v6496_v22  ;;  %v1064_v54 = vsub.f32 %v6204_v6, %v6511_v58  ;;  %v859_v6 = vadd.f32 %v6542_v47, %v6231_v37  ;;  %v8383_v22 = vld [vmem:[#allocation7_spill] sm:$0xff] }
 0x1d6   : > { %v6622_v10 = vpop.permute.xlu1 %828  ;;  %v6624_v56 = vpop.permute.xlu0 %830  ;;  %v860_v58 = vadd.f32 %v6544_v18, %v8383_v22 }
 0x1d8   : > { %1296 = vrot.lane.b32.xlu1 %v777_v62, %s5825_s26  ;;  %1354 = vrot.lane.b32.xlu0 %v870_v3, %s5826_s27  ;;  %v966_v3 = vsub.f32 %v6161_v30, %v6468_v57  ;;  %v969_v30 = vsub.f32 %v6184_v0, %v6486_v38  ;;  %v858_v38 = vadd.f32 %v6534_v50, %v6224_v14 }
 0x1d9   : > { %v877_v14 = vsub.f32 %v8385_v46, %v6552_v43 }
 0x1da   : > { %v6632_v23 = vpop.permute.xlu1 %832  ;;  %v6634_v36 = vpop.permute.xlu0 %922 }
 0x1dc   : > { %1356 = vrot.lane.b32.xlu1 %v871_v61, %s5826_s27  ;;  %1358 = vrot.lane.b32.xlu0 %v872_v34, %s5826_s27  ;;  %v861_v34 = vadd.f32 %v6552_v43, %v8385_v46  ;;  %v8392_v43 = vld [vmem:[#allocation2_spill] sm:$0xff]  ;;  %v973_v46 = vsub.f32 %v6264_v20, %v6572_v59 }
 0x1de   : > { %v6642_v62 = vpop.permute.xlu1 %924  ;;  %v6644_v25 = vpop.permute.xlu0 %926 }
 0x1e0   : > { %1360 = vrot.lane.b32.xlu1 %v873_v29, %s5826_s27  ;;  %1418 = vrot.lane.b32.xlu0 %v966_v3, %s5827_s30  ;;  %v8386_v29 = vld [vmem:[#allocation8_spill] sm:$0xff] }
 0x1e1   : > { %v954_v3 = vadd.f32 %v6554_v21, %v8386_v29  ;;  %v970_v50 = vsub.f32 %v8386_v29, %v6554_v21  ;;  %v8393_v21 = vld [vmem:[#allocation32_spill] sm:$0xff] }
 0x1e2   : > { %v6652_v49 = vpop.permute.xlu1 %928  ;;  %v6654_v45 = vpop.permute.xlu0 %1018 }
 0x1e4   : > { %1420 = vrot.lane.b32.xlu1 %v967_v27, %s5827_s30  ;;  %1422 = vrot.lane.b32.xlu0 %v968_v8, %s5827_s30 }
 0x1e6   : > { %v6662_v57 = vpop.permute.xlu1 %1020  ;;  %v6664_v19 = vpop.permute.xlu0 %730 }
 0x1e7   : > { %8379 = vst [vmem:[#allocation41_spill] sm:$0xff] %v6664_v19 }
 0x1e8   : > { %1424 = vrot.lane.b32.xlu1 %v969_v30, %s5827_s30  ;;  %1482 = vrot.lane.b32.xlu0 %v1062_v41, %s5828_s14  ;;  %v8387_v30 = vld [vmem:[#allocation10_spill] sm:$0xff] }
 0x1e9   : > { %v955_v41 = vadd.f32 %v6562_v7, %v8387_v30 }
 0x1ea   : > { %v6672_v53 = vpop.permute.xlu1 %732  ;;  %v6674_v0 = vpop.permute.xlu0 %1022 }
 0x1eb   : > { %8380 = vst [vmem:[#allocation42_spill] sm:$0xff] %v6672_v53 }
 0x1ec   : > { %1484 = vrot.lane.b32.xlu1 %v1063_v51, %s5828_s14  ;;  %1486 = vrot.lane.b32.xlu0 %v1064_v54, %s5828_s14  ;;  %v956_v51 = vadd.f32 %v6564_v31, %v6254_v42 }
 0x1ee   : > { %v6682_v1 = vpop.permute.xlu1 %1024  ;;  %v6684_v2 = vpop.permute.xlu0 %734 }
 0x1ef   : > { %8381 = vst [vmem:[#allocation43_spill] sm:$0xff] %v6682_v1  ;;  %8382 = vst [vmem:[#allocation44_spill] sm:$0xff] %v6684_v2 }
 0x1f0   : > { %1488 = vrot.lane.b32.xlu1 %v1065_v60, %s5828_s14  ;;  %1106 = vrot.lane.b32.xlu0 %v858_v38, %s5822_s23  ;;  %v957_v38 = vadd.f32 %v6572_v59, %v6264_v20 }
 0x1f2   : > { %v6692_v61 = vpop.permute.xlu1 %736  ;;  %v6694_v32 = vpop.permute.xlu0 %1090 }
 0x1f3   : > { %8384 = vst [vmem:[#allocation7_spill] sm:$0xff] %v6692_v61  ;;  %v8389_v61 = vld [vmem:[#allocation13_spill] sm:$0xff] }
 0x1f4   : > { %1108 = vrot.lane.b32.xlu1 %v859_v6, %s5822_s23  ;;  %1110 = vrot.lane.b32.xlu0 %v860_v58, %s5822_s23  ;;  %v8388_v6 = vld [vmem:[#allocation11_spill] sm:$0xff]  ;;  %v779_v2 = vsub.f32 %v8389_v61, %v6592_v55 }
 0x1f5   : > { %v1050_v58 = vadd.f32 %v6574_v12, %v8388_v6 }
 0x1f6   : > { %v6702_v27 = vpop.permute.xlu1 %1092  ;;  %v6704_v8 = vpop.permute.xlu0 %1094 }
 0x1f8   : > { %1112 = vrot.lane.b32.xlu1 %v861_v34, %s5822_s23  ;;  %1170 = vrot.lane.b32.xlu0 %v954_v3, %s5823_s24 }
 0x1fa   : > { %v6712_v54 = vpop.permute.xlu1 %1096  ;;  %v6714_v60 = vpop.permute.xlu0 %1154 }
 0x1fc   : > { %1172 = vrot.lane.b32.xlu1 %v955_v41, %s5823_s24  ;;  %1174 = vrot.lane.b32.xlu0 %v956_v51, %s5823_s24  ;;  %v1052_v41 = vadd.f32 %v6594_v48, %v6284_v5 }
 0x1fe   : > { %v6722_v34 = vpop.permute.xlu1 %1156  ;;  %v6724_v3 = vpop.permute.xlu0 %1158 }
 0x200   : > { %1176 = vrot.lane.b32.xlu1 %v957_v38, %s5823_s24  ;;  %1234 = vrot.lane.b32.xlu0 %v1050_v58, %s5824_s25  ;;  %v1053_v38 = vadd.f32 %v6602_v9, %v6291_v44 }
 0x202   : > { %v6732_v51 = vpop.permute.xlu1 %1160  ;;  %v1219_v35 = vpop.permute.xlu0 %1218 }
 0x204   : > { %1236 = vrot.lane.b32.xlu1 %v1051_v16, %s5824_s25  ;;  %1238 = vrot.lane.b32.xlu0 %v1052_v41, %s5824_s25  ;;  %v8390_v16 = vld [vmem:[#allocation14_spill] sm:$0xff] }
 0x205   : > { %v780_v41 = vsub.f32 %v8390_v16, %v6604_v13  ;;  %v875_v13 = vsub.f32 %v6231_v37, %v6542_v47  ;;  %v971_v37 = vsub.f32 %v8387_v30, %v6562_v7  ;;  %v972_v47 = vsub.f32 %v6254_v42, %v6564_v31  ;;  %v8394_v31 = vld [vmem:[#allocation33_spill] sm:$0xff] }
 0x206   : > { %v6740_v58 = vpop.permute.xlu1 %1220  ;;  %v6742_v28 = vpop.permute.xlu0 %1222  ;;  %v1066_v7 = vsub.f32 %v8388_v6, %v6574_v12  ;;  %v755_v30 = vadd.f32 %v8394_v31, %v6121_v17 }
 0x208   : > { %1240 = vrot.lane.b32.xlu1 %v1053_v38, %s5824_s25  ;;  %1298 = vrot.lane.b32.xlu0 %v778_v11, %s5825_s26  ;;  %v8391_v38 = vld [vmem:[#allocation15_spill] sm:$0xff]  ;;  %v1524_v17 = vsel %vm1522_vm1, %v755_v30, %v6702_v27  ;;  %v1069_v27 = vsub.f32 %v6291_v44, %v6602_v9 }
 0x209   : > { %v781_v1 = vsub.f32 %v8391_v38, %v6612_v26 }
 0x20a   : > { %v6750_v53 = vpop.permute.xlu1 %1224  ;;  %v1283_v15 = vpop.permute.xlu0 %1282 }
 0x20c   : > { %1300 = vrot.lane.b32.xlu1 %v779_v2, %s5825_s26  ;;  %1302 = vrot.lane.b32.xlu0 %v780_v41, %s5825_s26  ;;  %v876_v2 = vsub.f32 %v8383_v22, %v6544_v18  ;;  %v754_v22 = vadd.f32 %v8393_v21, %v8392_v43 }
 0x20e   : > { %v1285_v11 = vpop.permute.xlu1 %1284  ;;  %v6758_v19 = vpop.permute.xlu0 %1286 }
 0x210   : > { %1304 = vrot.lane.b32.xlu1 %v781_v1, %s5825_s26  ;;  %1362 = vrot.lane.b32.xlu0 %v874_v39, %s5826_s27 }
 0x212   : > { %v6766_v41 = vpop.permute.xlu1 %1288  ;;  %v1347_v16 = vpop.permute.xlu0 %1346 }
 0x214   : > { %1364 = vrot.lane.b32.xlu1 %v875_v13, %s5826_s27  ;;  %1366 = vrot.lane.b32.xlu0 %v876_v2, %s5826_s27  ;;  %v1523_v2 = vsel %vm1522_vm1, %v754_v22, %v6694_v32 }
 0x215   : > { %v1540_v20 = vsel %vm1539_vm2, %v1523_v2, %v6714_v60 }
 0x216   : > { %v1349_v39 = vpop.permute.xlu1 %1348  ;;  %v1351_v1 = vpop.permute.xlu0 %1350  ;;  %v1557_v59 = vsel %vm1556_vm3, %v1540_v20, %v1219_v35  ;;  %v8402_v20 = vld [vmem:[#allocation19_spill] sm:$0xff] }
 0x217   : > { %v1574_v12 = vsel %vm1573_vm4, %v1557_v59, %v1283_v15 }
 0x218   : > { %1368 = vrot.lane.b32.xlu1 %v877_v14, %s5826_s27  ;;  %1426 = vrot.lane.b32.xlu0 %v970_v50, %s5827_s30  ;;  %v8395_v14 = vld [vmem:[#allocation34_spill] sm:$0xff] }
 0x219   : > { %v756_v50 = vadd.f32 %v8395_v14, %v6134_v33  ;;  %v1067_v33 = vsub.f32 %v6271_v40, %v6582_v63  ;;  %v1591_v40 = vsel %vm1590_vm5, %v1574_v12, %v1347_v16 }
 0x21a   : > { %v1353_v18 = vpop.permute.xlu1 %1352  ;;  %v1411_v13 = vpop.permute.xlu0 %1410 }
 0x21b   : > { %v1525_v35 = vsel %vm1522_vm1, %v756_v50, %v6704_v8  ;;  %v1608_v15 = vsel %vm1607_vm6, %v1591_v40, %v1411_v13  ;;  %v8401_v50 = vld [vmem:[#allocation20_spill] sm:$0xff] }
 0x21c   : > { %1428 = vrot.lane.b32.xlu1 %v971_v37, %s5827_s30  ;;  %1430 = vrot.lane.b32.xlu0 %v972_v47, %s5827_s30  ;;  %v757_v37 = vadd.f32 %v6446_v52, %v6141_v24  ;;  %v1068_v24 = vsub.f32 %v6284_v5, %v6594_v48  ;;  %v1541_v52 = vsel %vm1539_vm2, %v1524_v17, %v6722_v34  ;;  %v8396_v34 = vld [vmem:[#allocation16_spill] sm:$0xff] }
 0x21d   : > { %v1558_v6 = vsel %vm1556_vm3, %v1541_v52, %v6740_v58  ;;  %v1542_v5 = vsel %vm1539_vm2, %v1525_v35, %v6724_v3  ;;  %v862_v3 = vadd.f32 %v6614_v4, %v8396_v34  ;;  %v958_v17 = vadd.f32 %v6634_v36, %v8402_v20  ;;  %v8403_v52 = vld [vmem:[#allocation21_spill] sm:$0xff] }
 0x21e   : > { %v1413_v29 = vpop.permute.xlu1 %1412  ;;  %v1415_v42 = vpop.permute.xlu0 %1414  ;;  %v1575_v63 = vsel %vm1573_vm4, %v1558_v6, %v1285_v11  ;;  %v1526_v44 = vsel %vm1522_vm1, %v757_v37, %v6712_v54  ;;  %v1559_v48 = vsel %vm1556_vm3, %v1542_v5, %v6742_v28  ;;  %v865_v37 = vadd.f32 %v6632_v23, %v8401_v50  ;;  %v8405_v6 = vld [vmem:[#allocation24_spill] sm:$0xff]  ;;  %v8406_v5 = vld [vmem:[#allocation23_spill] sm:$0xff] }
 0x21f   : > { %v1592_v9 = vsel %vm1590_vm5, %v1575_v63, %v1349_v39  ;;  %v1543_v58 = vsel %vm1539_vm2, %v1526_v44, %v6732_v51  ;;  %v1576_v16 = vsel %vm1573_vm4, %v1559_v48, %v6758_v19  ;;  %v959_v12 = vadd.f32 %v6642_v62, %v8403_v52  ;;  %v8407_v48 = vld [vmem:[#allocation25_spill] sm:$0xff] }
 0x220   : > { %1432 = vrot.lane.b32.xlu1 %v973_v46, %s5827_s30  ;;  %1490 = vrot.lane.b32.xlu0 %v1066_v7, %s5828_s14  ;;  %v1609_v11 = vsel %vm1607_vm6, %v1592_v9, %v1413_v29  ;;  %v1560_v28 = vsel %vm1556_vm3, %v1543_v58, %v6750_v53  ;;  %v1593_v39 = vsel %vm1590_vm5, %v1576_v16, %v1351_v1  ;;  %v8397_v1 = vld [vmem:[#allocation17_spill] sm:$0xff]  ;;  %v8398_v7 = vld [vmem:[#allocation18_spill] sm:$0xff] }
 0x221   : > { %v1577_v43 = vsel %vm1573_vm4, %v1560_v28, %v6766_v41  ;;  %v1610_v21 = vsel %vm1607_vm6, %v1593_v39, %v1415_v42  ;;  %v863_v46 = vadd.f32 %v6622_v10, %v8397_v1  ;;  %v864_v41 = vadd.f32 %v6624_v56, %v8398_v7  ;;  %v8411_v28 = vld [vmem:[#allocation29_spill] sm:$0xff]  ;;  %v8412_v39 = vld [vmem:[#allocation43_spill] sm:$0xff] }
 0x222   : > { %v1417_v32 = vpop.permute.xlu1 %1416  ;;  %v1475_v60 = vpop.permute.xlu0 %1474  ;;  %v1594_v19 = vsel %vm1590_vm5, %v1577_v43, %v1353_v18  ;;  %v961_v40 = vadd.f32 %v6652_v49, %v8405_v6  ;;  %v1054_v63 = vadd.f32 %v6654_v45, %v8406_v5  ;;  %v1055_v9 = vadd.f32 %v6662_v57, %v8407_v48 }
 0x223   : > { %v1625_v8 = vsel %vm1624_vm7, %v1608_v15, %v1475_v60  ;;  %v1611_v29 = vsel %vm1607_vm6, %v1594_v19, %v1417_v32  ;;  %v8404_v32 = vld [vmem:[#allocation22_spill] sm:$0xff] }
 0x224   : > { %1492 = vrot.lane.b32.xlu1 %v1067_v33, %s5828_s14  ;;  %1494 = vrot.lane.b32.xlu0 %v1068_v24, %s5828_s14  ;;  %v6843_v51 = vmul.f32 0.35355338, %v1625_v8  ;;  %v960_v60 = vadd.f32 %v6644_v25, %v8404_v32  ;;  %v8408_v8 = vld [vmem:[#allocation28_spill] sm:$0xff]  ;;  %v8413_v19 = vld [vmem:[#allocation42_spill] sm:$0xff] }
 0x226   : > { %v1477_v47 = vpop.permute.xlu1 %1476  ;;  %v1479_v54 = vpop.permute.xlu0 %1478 }
 0x227   : > { %v1626_v13 = vsel %vm1624_vm7, %v1609_v11, %v1477_v47  ;;  %v1627_v53 = vsel %vm1624_vm7, %v1610_v21, %v1479_v54  ;;  %v8409_v11 = vld [vmem:[#allocation41_spill] sm:$0xff]  ;;  %v8410_v47 = vld [vmem:[#allocation26_spill] sm:$0xff] }
 0x228   : > { %v6845_v22 = vmul.f32 0.35355338, %v1626_v13  ;;  %1496 = vrot.lane.b32.xlu1 %v1069_v27, %s5828_s14  ;;  %1114 = vrot.lane.b32.xlu0 %v862_v3, %s5822_s23  ;;  %v6861_v18 = vmul.f32 0.35355338, %v1627_v53  ;;  %v1056_v3 = vadd.f32 %v6674_v0, %v8408_v8  ;;  %v782_v54 = vsub.f32 %v8410_v47, %v8409_v11  ;;  %v8414_v53 = vld [vmem:[#allocation27_spill] sm:$0xff] }
 0x229   : > { %v1057_v13 = vadd.f32 %v8412_v39, %v8411_v28 }
 0x22a   : > { %v1481_v42 = vpop.permute.xlu1 %1480  ;;  %v6856_v31 = vpop.permute.xlu0 %1098  ;;  %v1657_v30 = vpack.c.bf16 %v6845_v22, %v6843_v51  ;;  %8399 = vst [vmem:[#allocation9_spill] sm:$0xff] %v6861_v18 }
 0x22b   : > { %v1628_v2 = vsel %vm1624_vm7, %v1611_v29, %v1481_v42  ;;  %v8416_v29 = vld [vmem:[#allocation30_spill] sm:$0xff] }
 0x22c   : > { %v6863_v14 = vmul.f32 0.35355338, %v1628_v2  ;;  %1116 = vrot.lane.b32.xlu1 %v863_v46, %s5822_s23  ;;  %1118 = vrot.lane.b32.xlu0 %v864_v41, %s5822_s23  ;;  %v783_v46 = vsub.f32 %v8414_v53, %v8413_v19  ;;  %v8415_v41 = vld [vmem:[#allocation44_spill] sm:$0xff] }
 0x22d   : > { %5202 = vmatprep.mubr.msk.bf16.mxu0 %vm1684_vm8, %v1657_v30  ;;  %v784_v42 = vsub.f32 %v8416_v29, %v8415_v41 }
 0x22e   : > { %8400 = vst [vmem:[#allocation8_spill] sm:$0xff] %v6863_v14  ;;  %v1658_v59 = vpack.c.bf16 %v6863_v14, %v6861_v18  ;;  %v6874_v33 = vpop.permute.xlu1 %1100  ;;  %v6876_v24 = vpop.permute.xlu0 %1102 }
 0x230   : > { %1120 = vrot.lane.b32.xlu1 %v865_v37, %s5822_s23  ;;  %1178 = vrot.lane.b32.xlu0 %v958_v17, %s5823_s24  ;;  %v878_v37 = vsub.f32 %v8396_v34, %v6614_v4  ;;  %v8417_v17 = vld [vmem:[#allocation7_spill] sm:$0xff]  ;;  %v881_v4 = vsub.f32 %v8401_v50, %v6632_v23  ;;  %v974_v34 = vsub.f32 %v8402_v20, %v6634_v36  ;;  %s5831_s23 = smov 124  }
 0x231   : > { %5203 = vmatmul.mubr.msk.bf16.vlgmr.msra.gmra.mxu0 %vm1684_vm8, %v1658_v59  ;;  %v8418_v59 = vld [vmem:[#allocation31_spill] sm:$0xff]  ;;  %v977_v20 = vsub.f32 %v8405_v6, %v6652_v49 }
 0x232   : > { %v6885_v27 = vpop.permute.xlu1 %1104  ;;  %v1163_v35 = vpop.permute.xlu0 %1162  ;;  %v8419_v23 = vld [vmem:[#allocation3_spill] sm:$0xff] }
 0x233   : > { %v8420_v36 = vld [vmem:[#allocation35_spill] sm:$0xff] }
 0x234   : > { %1180 = vrot.lane.b32.xlu1 %v959_v12, %s5823_s24  ;;  %1182 = vrot.lane.b32.xlu0 %v960_v60, %s5823_s24  ;;  %v785_v12 = vsub.f32 %v8418_v59, %v8417_v17  ;;  %v758_v50 = vadd.f32 %v8420_v36, %v8419_v23  ;;  %v8425_v23 = vld [vmem:[#allocation6_spill] sm:$0xff] }
 0x235   : > { %v8426_v36 = vld [vmem:[#allocation38_spill] sm:$0xff] }
 0x236   : > { %v1165_v15 = vpop.permute.xlu1 %1164  ;;  %v6893_v44 = vpop.permute.xlu0 %1166 }
 0x238   : > { %1184 = vrot.lane.b32.xlu1 %v961_v40, %s5823_s24  ;;  %1242 = vrot.lane.b32.xlu0 %v1054_v63, %s5824_s25  ;;  %v879_v63 = vsub.f32 %v8397_v1, %v6622_v10  ;;  %v976_v10 = vsub.f32 %v8404_v32, %v6644_v25  ;;  %v1527_v32 = vsel %vm1522_vm1, %v758_v50, %v6856_v31  ;;  %s5832_s24 = smov 32  }
 0x239   : > { %v1072_v31 = vsub.f32 %v8408_v8, %v6674_v0  ;;  %v761_v50 = vadd.f32 %v8426_v36, %v8425_v23  ;;  %v5548_v36 = vld [vmem:[%s8259_s4 + $0x30] sm:$0xff]  }
 0x23a   : > { %v6901_v58 = vpop.permute.xlu1 %1168  ;;  %v1227_v16 = vpop.permute.xlu0 %1226 }
 0x23c   : > { %1244 = vrot.lane.b32.xlu1 %v1055_v9, %s5824_s25  ;;  %1246 = vrot.lane.b32.xlu0 %v1056_v3, %s5824_s25  ;;  %v880_v9 = vsub.f32 %v8398_v7, %v6624_v56  ;;  %v975_v56 = vsub.f32 %v8403_v52, %v6642_v62  ;;  %v8421_v52 = vld [vmem:[#allocation4_spill] sm:$0xff] }
 0x23e   : > { %v1229_v43 = vpop.permute.xlu1 %1228  ;;  %v6909_v21 = vpop.permute.xlu0 %1230 }
 0x240   : > { %1248 = vrot.lane.b32.xlu1 %v1057_v13, %s5824_s25  ;;  %1306 = vrot.lane.b32.xlu0 %v782_v54, %s5825_s26 }
 0x242   : > { %v6917_v30 = vpop.permute.xlu1 %1232  ;;  %v1291_v2 = vpop.permute.xlu0 %1290 }
 0x244   : > { %1308 = vrot.lane.b32.xlu1 %v783_v46, %s5825_s26  ;;  %1310 = vrot.lane.b32.xlu0 %v784_v42, %s5825_s26  ;;  %v1070_v42 = vsub.f32 %v8406_v5, %v6654_v45  ;;  %v1071_v5 = vsub.f32 %v8407_v48, %v6662_v57  ;;  %v1530_v48 = vsel %vm1522_vm1, %v761_v50, %v6885_v27 }
 0x246   : > { %v1293_v60 = vpop.permute.xlu1 %1292  ;;  %v1295_v40 = vpop.permute.xlu0 %1294 }
 0x248   : > { %1312 = vrot.lane.b32.xlu1 %v785_v12, %s5825_s26  ;;  %1370 = vrot.lane.b32.xlu0 %v878_v37, %s5826_s27  ;;  %v8422_v12 = vld [vmem:[#allocation36_spill] sm:$0xff] }
 0x249   : > { %v759_v25 = vadd.f32 %v8422_v12, %v8421_v52 }
 0x24a   : > { %v1297_v3 = vpop.permute.xlu1 %1296  ;;  %v1355_v54 = vpop.permute.xlu0 %1354 }
 0x24b   : > { %v1528_v45 = vsel %vm1522_vm1, %v759_v25, %v6874_v33 }
 0x24c   : > { %1372 = vrot.lane.b32.xlu1 %v879_v63, %s5826_s27  ;;  %1374 = vrot.lane.b32.xlu0 %v880_v9, %s5826_s27  ;;  %v1544_v63 = vsel %vm1539_vm2, %v1527_v32, %v1163_v35  ;;  %v8423_v9 = vld [vmem:[#allocation5_spill] sm:$0xff]  ;;  %v1545_v35 = vsel %vm1539_vm2, %v1528_v45, %v1165_v15 }
 0x24d   : > { %v1561_v6 = vsel %vm1556_vm3, %v1544_v63, %v1227_v16  ;;  %v1562_v16 = vsel %vm1556_vm3, %v1545_v35, %v1229_v43 }
 0x24e   : > { %v1357_v13 = vpop.permute.xlu1 %1356  ;;  %v1359_v46 = vpop.permute.xlu0 %1358  ;;  %v1579_v0 = vsel %vm1573_vm4, %v1562_v16, %v1293_v60  ;;  %v5549_v16 = vld [vmem:[%s8259_s4 + $0x28] sm:$0xff]  }
 0x24f   : > { %v1596_v8 = vsel %vm1590_vm5, %v1579_v0, %v1357_v13  ;;  %v5550_v0 = vld [vmem:[%s8259_s4 + $0x20] sm:$0xff]  }
 0x250   : > { %1376 = vrot.lane.b32.xlu1 %v881_v4, %s5826_s27  ;;  %1434 = vrot.lane.b32.xlu0 %v974_v34, %s5827_s30  ;;  %v8424_v4 = vld [vmem:[#allocation37_spill] sm:$0xff]  ;;  %v1578_v34 = vsel %vm1573_vm4, %v1561_v6, %v1291_v2  ;;  %v1547_v2 = vsel %vm1539_vm2, %v1530_v48, %v6901_v58  ;;  %s8195_s27 = scalar_lea.vmem %s8265_s10, %s5896_s16 }
 0x251   : > { %v760_v49 = vadd.f32 %v8424_v4, %v8423_v9  ;;  %v1564_v27 = vsel %vm1556_vm3, %v1547_v2, %v6917_v30  ;;  %v8427_v2 = vld [vmem:[#allocation12_spill] sm:$0xff] }
 0x252   : > { %v1361_v1 = vpop.permute.xlu1 %1360  ;;  %v1419_v7 = vpop.permute.xlu0 %1418  ;;  %v1581_v52 = vsel %vm1573_vm4, %v1564_v27, %v1297_v3 }
 0x253   : > { %v1529_v33 = vsel %vm1522_vm1, %v760_v49, %v6876_v24 }
 0x254   : > { %1436 = vrot.lane.b32.xlu1 %v975_v56, %s5827_s30  ;;  %1438 = vrot.lane.b32.xlu0 %v976_v10, %s5827_s30  ;;  %v1546_v57 = vsel %vm1539_vm2, %v1529_v33, %v6893_v44  ;;  %v1073_v44 = vsub.f32 %v8411_v28, %v8412_v39 }
 0x255   : > { %v1563_v24 = vsel %vm1556_vm3, %v1546_v57, %v6909_v21 }
 0x256   : > { %v1421_v37 = vpop.permute.xlu1 %1420  ;;  %v1423_v62 = vpop.permute.xlu0 %1422  ;;  %v1580_v60 = vsel %vm1573_vm4, %v1563_v24, %v1295_v40  ;;  %v1598_v40 = vsel %vm1590_vm5, %v1581_v52, %v1361_v1 }
 0x257   : > { %v1597_v21 = vsel %vm1590_vm5, %v1580_v60, %v1359_v46  ;;  %v8428_v60 = vld [vmem:[#allocation39_spill] sm:$0xff] }
 0x258   : > { %1440 = vrot.lane.b32.xlu1 %v977_v20, %s5827_s30  ;;  %1498 = vrot.lane.b32.xlu0 %v1070_v42, %s5828_s14  ;;  %v1595_v20 = vsel %vm1590_vm5, %v1578_v34, %v1355_v54  ;;  %v1613_v54 = vsel %vm1607_vm6, %v1596_v8, %v1421_v37  ;;  %v1614_v28 = vsel %vm1607_vm6, %v1597_v21, %v1423_v62  ;;  %v5552_v8 = vld [vmem:[%s8259_s4 + $0x10] sm:$0xff]  }
 0x259   : > { %v1612_v15 = vsel %vm1607_vm6, %v1595_v20, %v1419_v7  ;;  %v763_v21 = vadd.f32 %v6592_v55, %v8389_v61 }
 0x25a   : > { %v1425_v56 = vpop.permute.xlu1 %1424  ;;  %v1483_v10 = vpop.permute.xlu0 %1482 }
 0x25b   : > { %v1629_v43 = vsel %vm1624_vm7, %v1612_v15, %v1483_v10  ;;  %v1615_v30 = vsel %vm1607_vm6, %v1598_v40, %v1425_v56  ;;  %v5547_v56 = vld [vmem:[%s8259_s4 + $0x38] sm:$0xff]   ;;  %v8430_v40 = vld [vmem:[#allocation40_spill] sm:$0xff] }
 0x25c   : > { %1500 = vrot.lane.b32.xlu1 %v1071_v5, %s5828_s14  ;;  %1502 = vrot.lane.b32.xlu0 %v1072_v31, %s5828_s14  ;;  %v6999_v39 = vmul.f32 0.35355338, %v1629_v43  ;;  %v5551_v15 = vld [vmem:[%s8259_s4 + $0x18] sm:$0xff]  }
 0x25d   : > { %5218 = vmatprep.subr.bf16.mxu1 %v5547_v56 }
 0x25e   : > { %v1485_v7 = vpop.permute.xlu1 %1484  ;;  %v1487_v42 = vpop.permute.xlu0 %1486  ;;  %5219 = vmatpush3.bf16.msra.mxu1 %v5547_v56 }
 0x25f   : > { %v1630_v13 = vsel %vm1624_vm7, %v1613_v54, %v1485_v7  ;;  %v1631_v37 = vsel %vm1624_vm7, %v1614_v28, %v1487_v42  ;;  %5220 = vmatprep.subr.bf16.mxu1 %v5548_v36  ;;  %v762_v54 = vadd.f32 %v8428_v60, %v8427_v2  ;;  %v5553_v7 = vld [vmem:[%s8259_s4 + $0x8] sm:$0xff]   ;;  %v8429_v28 = vld [vmem:[#allocation14_spill] sm:$0xff] }
 0x260   : > { %v7001_v58 = vmul.f32 0.35355338, %v1630_v13  ;;  %1504 = vrot.lane.b32.xlu1 %v1073_v44, %s5828_s14  ;;  %v7010_v62 = vmul.f32 0.35355338, %v1631_v37  ;;  %v764_v37 = vadd.f32 %v8430_v40, %v8429_v28 }
 0x262   : > { %v1659_v46 = vpack.c.bf16 %v7001_v58, %v6999_v39  ;;  %v1489_v12 = vpop.permute.xlu1 %1488  ;;  %v1107_v25 = vpop.permute.xlu0 %1106  ;;  %5221 = vmatpush3.bf16.msra.mxu1 %v5548_v36 }
 0x263   : > { %v1632_v3 = vsel %vm1624_vm7, %v1615_v30, %v1489_v12  ;;  %5222 = vmatprep.subr.bf16.mxu1 %v5549_v16  ;;  %v1531_v13 = vsel %vm1522_vm1, %v762_v54, %v1107_v25  ;;  %v5554_v12 = vld [vmem:[%s8259_s4] sm:$0xff]  }
 0x264   : > { %v7012_v32 = vmul.f32 0.35355338, %v1632_v3  ;;  %5206 = vmatprep.mubr.msk.bf16.mxu0 %vm1684_vm8, %v1659_v46 }
 0x266   : > { %v1660_v1 = vpack.c.bf16 %v7012_v32, %v7010_v62  ;;  %v1109_v63 = vpop.permute.xlu1 %1108  ;;  %v1111_v9 = vpop.permute.xlu0 %1110  ;;  %5223 = vmatpush3.bf16.msra.mxu1 %v5549_v16 }
 0x267   : > { %5224 = vmatprep.subr.bf16.mxu1 %v5550_v0  ;;  %v1532_v30 = vsel %vm1522_vm1, %v763_v21, %v1109_v63 }
 0x268   : > { %5207 = vmatmul.mubr.msk.bf16.gmra.mxu0 %vm1684_vm8, %v1660_v1  ;;  %v765_v1 = vadd.f32 %v6612_v26, %v8391_v38 }
 0x26a   : > { %v1113_v4 = vpop.permute.xlu1 %1112  ;;  %v1171_v49 = vpop.permute.xlu0 %1170  ;;  %5225 = vmatpush3.bf16.msra.mxu1 %v5550_v0 }
 0x26b   : > { %5226 = vmatprep.subr.bf16.mxu1 %v5551_v15  ;;  %v1548_v52 = vsel %vm1539_vm2, %v1531_v13, %v1171_v49  ;;  %v1533_v49 = vsel %vm1522_vm1, %v764_v37, %v1111_v9 }
 0x26e   : > { %v1173_v45 = vpop.permute.xlu1 %1172  ;;  %v1175_v6 = vpop.permute.xlu0 %1174  ;;  %5227 = vmatpush3.bf16.msra.mxu1 %v5551_v15 }
 0x26f   : > { %5228 = vmatprep.subr.bf16.mxu1 %v5552_v8  ;;  %v1549_v3 = vsel %vm1539_vm2, %v1532_v30, %v1173_v45  ;;  %v1550_v56 = vsel %vm1539_vm2, %v1533_v49, %v1175_v6  ;;  %v1534_v45 = vsel %vm1522_vm1, %v765_v1, %v1113_v4 }
 0x272   : > { %v1177_v5 = vpop.permute.xlu1 %1176  ;;  %v1235_v31 = vpop.permute.xlu0 %1234  ;;  %5229 = vmatpush3.bf16.msra.mxu1 %v5552_v8 }
 0x273   : > { %v1565_v46 = vsel %vm1556_vm3, %v1548_v52, %v1235_v31  ;;  %5230 = vmatprep.subr.bf16.mxu1 %v5553_v7  ;;  %v1551_v38 = vsel %vm1539_vm2, %v1534_v45, %v1177_v5 }
 0x276   : > { %v1237_v35 = vpop.permute.xlu1 %1236  ;;  %v1239_v34 = vpop.permute.xlu0 %1238  ;;  %5231 = vmatpush3.bf16.msra.mxu1 %v5553_v7 }
 0x277   : > { %v1566_v63 = vsel %vm1556_vm3, %v1549_v3, %v1237_v35  ;;  %5232 = vmatprep.subr.bf16.mxu1 %v5554_v12 }
 0x27a   : > { %v1241_v10 = vpop.permute.xlu1 %1240  ;;  %v1299_v23 = vpop.permute.xlu0 %1298  ;;  %5233 = vmatpush3.bf16.msra.mxu1 %v5554_v12 }
 0x27b   : > { %v1582_v55 = vsel %vm1573_vm4, %v1565_v46, %v1299_v23  ;;  %v1567_v23 = vsel %vm1556_vm3, %v1550_v56, %v1239_v34 }
 0x27e   : > { %v1301_v50 = vpop.permute.xlu1 %1300  ;;  %v1303_v33 = vpop.permute.xlu0 %1302 }
 0x27f   : > { %v1583_v36 = vsel %vm1573_vm4, %v1566_v63, %v1301_v50  ;;  %v1584_v9 = vsel %vm1573_vm4, %v1567_v23, %v1303_v33  ;;  %v767_v23 = vadd.f32 %v8413_v19, %v8414_v53  ;;  %v769_v19 = vadd.f32 %v8417_v17, %v8418_v59 }
 0x282   : > { %v1305_v20 = vpop.permute.xlu1 %1304  ;;  %v1363_v57 = vpop.permute.xlu0 %1362 }
 0x283   : > { %v1599_v31 = vsel %vm1590_vm5, %v1582_v55, %v1363_v57  ;;  %v1568_v57 = vsel %vm1556_vm3, %v1551_v38, %v1241_v10  ;;  %v768_v38 = vadd.f32 %v8415_v41, %v8416_v29 }
 0x284   : > { %v1585_v34 = vsel %vm1573_vm4, %v1568_v57, %v1305_v20 }
 0x286   : > { %v1365_v48 = vpop.permute.xlu1 %1364  ;;  %v1367_v24 = vpop.permute.xlu0 %1366 }
 0x287   : > { %v1600_v0 = vsel %vm1590_vm5, %v1583_v36, %v1365_v48  ;;  %v1601_v15 = vsel %vm1590_vm5, %v1584_v9, %v1367_v24  ;;  %v766_v36 = vadd.f32 %v8409_v11, %v8410_v47 }
 0x28a   : > { %v1369_v43 = vpop.permute.xlu1 %1368  ;;  %v1427_v44 = vpop.permute.xlu0 %1426 }
 0x28b   : > { %v1616_v16 = vsel %vm1607_vm6, %v1599_v31, %v1427_v44  ;;  %v1602_v5 = vsel %vm1590_vm5, %v1585_v34, %v1369_v43 }
 0x28e   : > { %v1429_v42 = vpop.permute.xlu1 %1428  ;;  %v1431_v27 = vpop.permute.xlu0 %1430 }
 0x28f   : > { %v1617_v6 = vsel %vm1607_vm6, %v1600_v0, %v1429_v42  ;;  %v1618_v48 = vsel %vm1607_vm6, %v1601_v15, %v1431_v27 }
 0x292   : > { %v1433_v61 = vpop.permute.xlu1 %1432  ;;  %v1491_v25 = vpop.permute.xlu0 %1490 }
 0x293   : > { %v1633_v26 = vsel %vm1624_vm7, %v1616_v16, %v1491_v25  ;;  %v1619_v2 = vsel %vm1607_vm6, %v1602_v5, %v1433_v61 }
 0x294   : > { %v7074_v8 = vmul.f32 0.35355338, %v1633_v26 }
 0x296   : > { %v1493_v35 = vpop.permute.xlu1 %1492  ;;  %v1495_v50 = vpop.permute.xlu0 %1494 }
 0x297   : > { %v1634_v4 = vsel %vm1624_vm7, %v1617_v6, %v1493_v35  ;;  %v1635_v33 = vsel %vm1624_vm7, %v1618_v48, %v1495_v50 }
 0x298   : > { %v7076_v44 = vmul.f32 0.35355338, %v1634_v4  ;;  %v7084_v54 = vmul.f32 0.35355338, %v1635_v33 }
 0x29a   : > { %v1661_v10 = vpack.c.bf16 %v7076_v44, %v7074_v8  ;;  %v1497_v24 = vpop.permute.xlu1 %1496  ;;  %v1115_v60 = vpop.permute.xlu0 %1114 }
 0x29b   : > { %v1636_v20 = vsel %vm1624_vm7, %v1619_v2, %v1497_v24  ;;  %v1535_v0 = vsel %vm1522_vm1, %v766_v36, %v1115_v60 }
 0x29c   : > { %v7086_v7 = vmul.f32 0.35355338, %v1636_v20  ;;  %5210 = vmatprep.mubr.msk.bf16.mxu0 %vm1684_vm8, %v1661_v10 }
 0x29e   : > { %v1662_v43 = vpack.c.bf16 %v7086_v7, %v7084_v54  ;;  %v1117_v42 = vpop.permute.xlu1 %1116  ;;  %v1119_v27 = vpop.permute.xlu0 %1118 }
 0x29f   : > { %v1536_v9 = vsel %vm1522_vm1, %v767_v23, %v1117_v42  ;;  %v1537_v53 = vsel %vm1522_vm1, %v768_v38, %v1119_v27 }
 0x2a0   : > { %5211 = vmatmul.mubr.msk.bf16.gmra.mxu0 %vm1684_vm8, %v1662_v43 }
 0x2a2   : > { %v1121_v21 = vpop.permute.xlu1 %1120  ;;  %v1179_v13 = vpop.permute.xlu0 %1178 }
 0x2a3   : > { %v1552_v26 = vsel %vm1539_vm2, %v1535_v0, %v1179_v13  ;;  %v1538_v34 = vsel %vm1522_vm1, %v769_v19, %v1121_v21 }
 0x2a6   : > { %v1181_v52 = vpop.permute.xlu1 %1180  ;;  %v1183_v28 = vpop.permute.xlu0 %1182 }
 0x2a7   : > { %v1553_v35 = vsel %vm1539_vm2, %v1536_v9, %v1181_v52  ;;  %v1554_v41 = vsel %vm1539_vm2, %v1537_v53, %v1183_v28 }
 0x2aa   : > { %v1185_v40 = vpop.permute.xlu1 %1184  ;;  %v1243_v37 = vpop.permute.xlu0 %1242 }
 0x2ab   : > { %v1569_v6 = vsel %vm1556_vm3, %v1552_v26, %v1243_v37  ;;  %v1555_v59 = vsel %vm1539_vm2, %v1538_v34, %v1185_v40 }
 0x2ae   : > { %v1245_v30 = vpop.permute.xlu1 %1244  ;;  %v1247_v46 = vpop.permute.xlu0 %1246 }
 0x2af   : > { %v1570_v57 = vsel %vm1556_vm3, %v1553_v35, %v1245_v30  ;;  %v1571_v48 = vsel %vm1556_vm3, %v1554_v41, %v1247_v46 }
 0x2b2   : > { %v1249_v12 = vpop.permute.xlu1 %1248  ;;  %v1307_v3 = vpop.permute.xlu0 %1306 }
 0x2b3   : > { %v1586_v11 = vsel %vm1573_vm4, %v1569_v6, %v1307_v3  ;;  %v1572_v60 = vsel %vm1556_vm3, %v1555_v59, %v1249_v12 }
 0x2b6   : > { %v1309_v55 = vpop.permute.xlu1 %1308  ;;  %v1311_v61 = vpop.permute.xlu0 %1310 }
 0x2b7   : > { %v1587_v29 = vsel %vm1573_vm4, %v1570_v57, %v1309_v55  ;;  %v1588_v33 = vsel %vm1573_vm4, %v1571_v48, %v1311_v61  ;;  %v7145_v61 = vld [vmem:[%s8258_s3] ss:$0 sm:$0xff] }
 0x2ba   : > { %v1313_v25 = vpop.permute.xlu1 %1312  ;;  %v1371_v1 = vpop.permute.xlu0 %1370 }
 0x2bb   : > { %v1603_v15 = vsel %vm1590_vm5, %v1586_v11, %v1371_v1  ;;  %v1589_v42 = vsel %vm1573_vm4, %v1572_v60, %v1313_v25 }
 0x2be   : > { %v1373_v49 = vpop.permute.xlu1 %1372  ;;  %v1375_v63 = vpop.permute.xlu0 %1374 }
 0x2bf   : > { %v1604_v5 = vsel %vm1590_vm5, %v1587_v29, %v1373_v49  ;;  %v1605_v20 = vsel %vm1590_vm5, %v1588_v33, %v1375_v63 }
 0x2c2   : > { %v1377_v31 = vpop.permute.xlu1 %1376  ;;  %v1435_v56 = vpop.permute.xlu0 %1434 }
 0x2c3   : > { %v1620_v4 = vsel %vm1607_vm6, %v1603_v15, %v1435_v56  ;;  %v1606_v52 = vsel %vm1590_vm5, %v1589_v42, %v1377_v31 }
 0x2c6   : > { %v1437_v16 = vpop.permute.xlu1 %1436  ;;  %v1439_v45 = vpop.permute.xlu0 %1438 }
 0x2c7   : > { %v1621_v2 = vsel %vm1607_vm6, %v1604_v5, %v1437_v16  ;;  %v1622_v27 = vsel %vm1607_vm6, %v1605_v20, %v1439_v45 }
 0x2ca   : > { %v1441_v47 = vpop.permute.xlu1 %1440  ;;  %v1499_v50 = vpop.permute.xlu0 %1498 }
 0x2cb   : > { %v1637_v17 = vsel %vm1624_vm7, %v1620_v4, %v1499_v50  ;;  %v1623_v40 = vsel %vm1607_vm6, %v1606_v52, %v1441_v47 }
 0x2cc   : > { %v7124_v21 = vmul.f32 0.35355338, %v1637_v17 }
 0x2ce   : > { %v1501_v10 = vpop.permute.xlu1 %1500  ;;  %v1503_v24 = vpop.permute.xlu0 %1502  ;;  %8431 = vst [vmem:[#allocation10_spill] sm:$0xff] %v7124_v21 }
 0x2cf   : > { %v1638_v43 = vsel %vm1624_vm7, %v1621_v2, %v1501_v10  ;;  %v1639_v28 = vsel %vm1624_vm7, %v1622_v27, %v1503_v24 }
 0x2d0   : > { %v7126_v13 = vmul.f32 0.35355338, %v1638_v43  ;;  %v7134_v12 = vmul.f32 0.35355338, %v1639_v28 }
 0x2d2   : > { %8432 = vst [vmem:[#allocation11_spill] sm:$0xff] %v7126_v13  ;;  %v1663_v37 = vpack.c.bf16 %v7126_v13, %v7124_v21  ;;  %v1505_v30 = vpop.permute.xlu1 %1504  ;;  %8433 = vst [vmem:[#allocation13_spill] sm:$0xff] %v7134_v12 }
 0x2d3   : > { %v1640_v46 = vsel %vm1624_vm7, %v1623_v40, %v1505_v30 }
 0x2d4   : > { %v7136_v3 = vmul.f32 0.35355338, %v1640_v46  ;;  %5214 = vmatprep.mubr.msk.bf16.mxu0 %vm1684_vm8, %v1663_v37 }
 0x2d6   : > { %8434 = vst [vmem:[#allocation15_spill] sm:$0xff] %v7136_v3  ;;  %v1664_v55 = vpack.c.bf16 %v7136_v3, %v7134_v12 }
 0x2d8   : > { %5215 = vmatmul.mubr.msk.bf16.gmra.mxu0 %vm1684_vm8, %v1664_v55 }
 0x2f1   : > { %v5204_v25 = vpop.f32.mrf.mxu0 }
 0x2f2   : > { %v1756_v1 = vadd.f32 %v5204_v25, %v7145_v61 }
 0x2f3   : > { %v1747_v49 = vpop.f32.mrf.mxu0 }
 0x2f4   : > { %v1812_v63 = vmul.f32 %v1756_v1, %v1756_v1  ;;  %v1748_v31 = vadd.f32 %v7145_v61, %v1747_v49 }
 0x2f5   : > { %v5205_v56 = vpop.f32.mrf.mxu0 }
 0x2f6   : > { %v1828_v36 = vmul.f32 %v1812_v63, %v1756_v1  ;;  %v1810_v16 = vmul.f32 %v1748_v31, %v1748_v31  ;;  %v1759_v45 = vadd.f32 %v5205_v56, %v7145_v61 }
 0x2f7   : > { %v1750_v23 = vpop.f32.mrf.mxu0 }
 0x2f8   : > { %v1844_v0 = vmul.f32 0.044715, %v1828_v36  ;;  %v1826_v26 = vmul.f32 %v1810_v16, %v1748_v31  ;;  %v1813_v38 = vmul.f32 %v1759_v45, %v1759_v45  ;;  %v1751_v9 = vadd.f32 %v7145_v61, %v1750_v23 }
 0x2fa   : > { %v1860_v6 = vadd.f32 %v1844_v0, %v1756_v1  ;;  %v1842_v35 = vmul.f32 0.044715, %v1826_v26  ;;  %v1829_v11 = vmul.f32 %v1813_v38, %v1759_v45  ;;  %v1811_v47 = vmul.f32 %v1751_v9, %v1751_v9 }
 0x2fc   : > { %v1876_v50 = vmul.f32 0.7978846, %v1860_v6  ;;  %v1858_v19 = vadd.f32 %v1842_v35, %v1748_v31  ;;  %v1845_v53 = vmul.f32 0.044715, %v1829_v11  ;;  %v1827_v57 = vmul.f32 %v1811_v47, %v1751_v9 }
 0x2fe   : > { %v1861_v15 = vadd.f32 %v1845_v53, %v1759_v45  ;;  %v1843_v41 = vmul.f32 0.044715, %v1827_v57  ;;  %v1874_v29 = vmul.f32 0.7978846, %v1858_v19  ;;  %5619 = vtanh.f32 %v1876_v50 }
 0x300   : > { %v1877_v4 = vmul.f32 0.7978846, %v1861_v15  ;;  %v1859_v34 = vadd.f32 %v1843_v41, %v1751_v9  ;;  %5621 = vtanh.f32 %v1874_v29 }
 0x302   : > { %5623 = vtanh.f32 %v1877_v4  ;;  %v1875_v48 = vmul.f32 0.7978846, %v1859_v34 }
 0x304   : > { %5625 = vtanh.f32 %v1875_v48 }
 0x30b   : > { %v5620_v5 = vpop.eup %5619 }
 0x30c   : > { %v1908_v2 = vadd.f32 1.0, %v5620_v5 }
 0x30d   : > { %v5622_v17 = vpop.eup %5621 }
 0x30e   : > { %v1906_v59 = vadd.f32 1.0, %v5622_v17  ;;  %v1924_v42 = vmul.f32 0.5, %v1908_v2 }
 0x30f   : > { %v5624_v33 = vpop.eup %5623 }
 0x310   : > { %v1909_v10 = vadd.f32 1.0, %v5624_v33  ;;  %v1922_v20 = vmul.f32 0.5, %v1906_v59  ;;  %v7157_v37 = vmul.f32 %v1924_v42, %v1756_v1 }
 0x311   : > { %v5626_v24 = vpop.eup %5625 }
 0x312   : > { %v1907_v60 = vadd.f32 1.0, %v5626_v24  ;;  %v1925_v43 = vmul.f32 0.5, %v1909_v10  ;;  %v7153_v28 = vmul.f32 %v1922_v20, %v1748_v31 }
 0x314   : > { %v1923_v27 = vmul.f32 0.5, %v1907_v60  ;;  %v7151_v52 = vmul.f32 %v1925_v43, %v1759_v45 }
 0x316   : > { %v7155_v40 = vmul.f32 %v1923_v27, %v1751_v9  ;;  %v1955_v46 = vpack.c.bf16 %v7151_v52, %v7157_v37 }
 0x318   : > { %v1954_v30 = vpack.c.bf16 %v7155_v40, %v7153_v28 }
 0x31a   : > { %5234 = vmatprep.mubr.bf16.mxu1 %v1954_v30 }
 0x31b   : > { %5235 = vmatmul.mubr.bf16.vlgmr.msra.gmra.mxu1 %v1955_v46 }
 0x328   : > { %v5208_v55 = vpop.f32.mrf.mxu0 }
 0x329   : > { %v1772_v25 = vadd.f32 %v5208_v55, %v7145_v61 }
 0x32a   : > { %v1763_v49 = vpop.f32.mrf.mxu0 }
 0x32b   : > { %v1816_v63 = vmul.f32 %v1772_v25, %v1772_v25  ;;  %v1764_v31 = vadd.f32 %v7145_v61, %v1763_v49 }
 0x32c   : > { %v5209_v56 = vpop.f32.mrf.mxu0 }
 0x32d   : > { %v1832_v36 = vmul.f32 %v1816_v63, %v1772_v25  ;;  %v1814_v16 = vmul.f32 %v1764_v31, %v1764_v31  ;;  %v1775_v1 = vadd.f32 %v5209_v56, %v7145_v61 }
 0x32e   : > { %v1766_v45 = vpop.f32.mrf.mxu0 }
 0x32f   : > { %v1848_v23 = vmul.f32 0.044715, %v1832_v36  ;;  %v1830_v0 = vmul.f32 %v1814_v16, %v1764_v31  ;;  %v1817_v26 = vmul.f32 %v1775_v1, %v1775_v1  ;;  %v1767_v38 = vadd.f32 %v7145_v61, %v1766_v45 }
 0x331   : > { %v1864_v9 = vadd.f32 %v1848_v23, %v1772_v25  ;;  %v1846_v6 = vmul.f32 0.044715, %v1830_v0  ;;  %v1833_v35 = vmul.f32 %v1817_v26, %v1775_v1  ;;  %v1815_v11 = vmul.f32 %v1767_v38, %v1767_v38 }
 0x333   : > { %v1880_v47 = vmul.f32 0.7978846, %v1864_v9  ;;  %v1862_v50 = vadd.f32 %v1846_v6, %v1764_v31  ;;  %v1849_v19 = vmul.f32 0.044715, %v1833_v35  ;;  %v1831_v53 = vmul.f32 %v1815_v11, %v1767_v38 }
 0x335   : > { %v1878_v57 = vmul.f32 0.7978846, %v1862_v50  ;;  %v1865_v15 = vadd.f32 %v1849_v19, %v1775_v1  ;;  %v1847_v41 = vmul.f32 0.044715, %v1831_v53  ;;  %5627 = vtanh.f32 %v1880_v47  ;;  %v5556_v47 = vld [vmem:[%s8261_s6 + $0x30] sm:$0xff]  }
 0x337   : > { %5629 = vtanh.f32 %v1878_v57  ;;  %v1881_v29 = vmul.f32 0.7978846, %v1865_v15  ;;  %v1863_v4 = vadd.f32 %v1847_v41, %v1767_v38 }
 0x339   : > { %5631 = vtanh.f32 %v1881_v29  ;;  %v1879_v34 = vmul.f32 0.7978846, %v1863_v4 }
 0x33b   : > { %5633 = vtanh.f32 %v1879_v34  ;;  %v5557_v34 = vld [vmem:[%s8261_s6 + $0x28] sm:$0xff]  }
 0x342   : > { %v5628_v48 = vpop.eup %5627 }
 0x343   : > { %v1912_v33 = vadd.f32 1.0, %v5628_v48 }
 0x344   : > { %v5630_v5 = vpop.eup %5629 }
 0x345   : > { %v1910_v17 = vadd.f32 1.0, %v5630_v5  ;;  %v1928_v43 = vmul.f32 0.5, %v1912_v33 }
 0x346   : > { %v5632_v59 = vpop.eup %5631 }
 0x347   : > { %v1913_v2 = vadd.f32 1.0, %v5632_v59  ;;  %v1926_v60 = vmul.f32 0.5, %v1910_v17  ;;  %v7173_v55 = vmul.f32 %v1928_v43, %v1772_v25  ;;  %v5555_v25 = vld [vmem:[%s8261_s6 + $0x38] sm:$0xff]   ;;  %v5561_v43 = vld [vmem:[%s8261_s6 + $0x8] sm:$0xff]  }
 0x348   : > { %v5634_v10 = vpop.eup %5633  ;;  %5250 = vmatprep.subr.bf16.mxu0 %v5555_v25 }
 0x349   : > { %v1911_v24 = vadd.f32 1.0, %v5634_v10  ;;  %v1929_v20 = vmul.f32 0.5, %v1913_v2  ;;  %v7169_v30 = vmul.f32 %v1926_v60, %v1764_v31  ;;  %5251 = vmatpush3.bf16.msra.mxu0 %v5555_v25  ;;  %v5558_v2 = vld [vmem:[%s8261_s6 + $0x20] sm:$0xff]   ;;  %v5560_v60 = vld [vmem:[%s8261_s6 + $0x10] sm:$0xff]  }
 0x34a   : > { %5252 = vmatprep.subr.bf16.mxu0 %v5556_v47 }
 0x34b   : > { %v1927_v42 = vmul.f32 0.5, %v1911_v24  ;;  %v7167_v27 = vmul.f32 %v1929_v20, %v1775_v1  ;;  %v5559_v24 = vld [vmem:[%s8261_s6 + $0x18] sm:$0xff]  }
 0x34d   : > { %v7171_v46 = vmul.f32 %v1927_v42, %v1767_v38  ;;  %v1957_v63 = vpack.c.bf16 %v7167_v27, %v7173_v55  ;;  %5253 = vmatpush3.bf16.msra.mxu0 %v5556_v47 }
 0x34e   : > { %5254 = vmatprep.subr.bf16.mxu0 %v5557_v34 }
 0x34f   : > { %v1956_v49 = vpack.c.bf16 %v7171_v46, %v7169_v30 }
 0x351   : > { %5238 = vmatprep.mubr.bf16.mxu1 %v1956_v49  ;;  %5255 = vmatpush3.bf16.msra.mxu0 %v5557_v34 }
 0x352   : > { %5239 = vmatmul.mubr.bf16.gmra.mxu1 %v1957_v63  ;;  %5256 = vmatprep.subr.bf16.mxu0 %v5558_v2 }
 0x355   : > { %5257 = vmatpush3.bf16.msra.mxu0 %v5558_v2 }
 0x356   : > { %5258 = vmatprep.subr.bf16.mxu0 %v5559_v24 }
 0x359   : > { %5259 = vmatpush3.bf16.msra.mxu0 %v5559_v24 }
 0x35a   : > { %5260 = vmatprep.subr.bf16.mxu0 %v5560_v60 }
 0x35d   : > { %5261 = vmatpush3.bf16.msra.mxu0 %v5560_v60 }
 0x35e   : > { %5262 = vmatprep.subr.bf16.mxu0 %v5561_v43 }
 0x360   : > { %v5212_v56 = vpop.f32.mrf.mxu0 }
 0x361   : > { %v7180_v36 = vadd.f32 %v5212_v56, %v7145_v61  ;;  %5263 = vmatpush3.bf16.msra.mxu0 %v5561_v43 }
 0x362   : > { %v1779_v16 = vpop.f32.mrf.mxu0 }
 0x363   : > { %v1820_v31 = vmul.f32 %v7180_v36, %v7180_v36  ;;  %v7185_v1 = vadd.f32 %v7145_v61, %v1779_v16 }
 0x364   : > { %v5213_v45 = vpop.f32.mrf.mxu0 }
 0x365   : > { %v1836_v23 = vmul.f32 %v1820_v31, %v7180_v36  ;;  %v1818_v0 = vmul.f32 %v7185_v1, %v7185_v1  ;;  %v1791_v26 = vadd.f32 %v5213_v45, %v7145_v61  ;;  %v5562_v31 = vld [vmem:[%s8261_s6] sm:$0xff]  }
 0x366   : > { %v1782_v38 = vpop.f32.mrf.mxu0  ;;  %5264 = vmatprep.subr.bf16.mxu0 %v5562_v31 }
 0x367   : > { %v1852_v9 = vmul.f32 0.044715, %v1836_v23  ;;  %v1834_v6 = vmul.f32 %v1818_v0, %v7185_v1  ;;  %v1821_v35 = vmul.f32 %v1791_v26, %v1791_v26  ;;  %v1783_v11 = vadd.f32 %v7145_v61, %v1782_v38  ;;  %5265 = vmatpush3.bf16.msra.mxu0 %v5562_v31 }
 0x369   : > { %v1868_v50 = vadd.f32 %v1852_v9, %v7180_v36  ;;  %v1850_v19 = vmul.f32 0.044715, %v1834_v6  ;;  %v1837_v53 = vmul.f32 %v1821_v35, %v1791_v26  ;;  %v1819_v57 = vmul.f32 %v1783_v11, %v1783_v11 }
 0x36b   : > { %v1884_v15 = vmul.f32 0.7978846, %v1868_v50  ;;  %v1866_v41 = vadd.f32 %v1850_v19, %v7185_v1  ;;  %v1853_v29 = vmul.f32 0.044715, %v1837_v53  ;;  %v1835_v4 = vmul.f32 %v1819_v57, %v1783_v11 }
 0x36d   : > { %v1882_v48 = vmul.f32 0.7978846, %v1866_v41  ;;  %v1869_v5 = vadd.f32 %v1853_v29, %v1791_v26  ;;  %v1851_v17 = vmul.f32 0.044715, %v1835_v4  ;;  %5635 = vtanh.f32 %v1884_v15 }
 0x36f   : > { %5637 = vtanh.f32 %v1882_v48  ;;  %v1885_v59 = vmul.f32 0.7978846, %v1869_v5  ;;  %v1867_v33 = vadd.f32 %v1851_v17, %v1783_v11 }
 0x371   : > { %5639 = vtanh.f32 %v1885_v59  ;;  %v1883_v10 = vmul.f32 0.7978846, %v1867_v33 }
 0x373   : > { %5641 = vtanh.f32 %v1883_v10 }
 0x37a   : > { %v5636_v20 = vpop.eup %5635 }
 0x37b   : > { %v1916_v56 = vadd.f32 1.0, %v5636_v20 }
 0x37c   : > { %v5638_v42 = vpop.eup %5637 }
 0x37d   : > { %v1914_v49 = vadd.f32 1.0, %v5638_v42  ;;  %v1932_v38 = vmul.f32 0.5, %v1916_v56 }
 0x37e   : > { %v5640_v63 = vpop.eup %5639 }
 0x37f   : > { %v1917_v16 = vadd.f32 1.0, %v5640_v63  ;;  %v1930_v23 = vmul.f32 0.5, %v1914_v49  ;;  %v7227_v50 = vmul.f32 %v1932_v38, %v7180_v36 }
 0x380   : > { %v5642_v25 = vpop.eup %5641 }
 0x381   : > { %v1915_v45 = vadd.f32 1.0, %v5642_v25  ;;  %v1933_v0 = vmul.f32 0.5, %v1917_v16  ;;  %v7222_v35 = vmul.f32 %v1930_v23, %v7185_v1 }
 0x383   : > { %v1931_v9 = vmul.f32 0.5, %v1915_v45  ;;  %v7219_v6 = vmul.f32 %v1933_v0, %v1791_v26 }
 0x385   : > { %v7224_v47 = vmul.f32 %v1931_v9, %v1783_v11  ;;  %v1959_v53 = vpack.c.bf16 %v7219_v6, %v7227_v50 }
 0x387   : > { %v1958_v19 = vpack.c.bf16 %v7224_v47, %v7222_v35 }
 0x389   : > { %5242 = vmatprep.mubr.bf16.mxu1 %v1958_v19 }
 0x38a   : > { %5243 = vmatmul.mubr.bf16.gmra.mxu1 %v1959_v53 }
 0x398   : > { %v5216_v57 = vpop.f32.mrf.mxu0 }
 0x399   : > { %v1804_v26 = vadd.f32 %v5216_v57, %v7145_v61 }
 0x39a   : > { %v1795_v15 = vpop.f32.mrf.mxu0 }
 0x39b   : > { %v1824_v41 = vmul.f32 %v1804_v26, %v1804_v26  ;;  %v1796_v1 = vadd.f32 %v7145_v61, %v1795_v15 }
 0x39c   : > { %v5217_v11 = vpop.f32.mrf.mxu0 }
 0x39d   : > { %v1840_v29 = vmul.f32 %v1824_v41, %v1804_v26  ;;  %v1822_v4 = vmul.f32 %v1796_v1, %v1796_v1  ;;  %v1807_v36 = vadd.f32 %v5217_v11, %v7145_v61 }
 0x39e   : > { %v1798_v34 = vpop.f32.mrf.mxu0 }
 0x39f   : > { %v1856_v48 = vmul.f32 0.044715, %v1840_v29  ;;  %v1838_v5 = vmul.f32 %v1822_v4, %v1796_v1  ;;  %v1825_v17 = vmul.f32 %v1807_v36, %v1807_v36  ;;  %v1799_v59 = vadd.f32 %v7145_v61, %v1798_v34 }
 0x3a1   : > { %v1872_v33 = vadd.f32 %v1856_v48, %v1804_v26  ;;  %v1854_v2 = vmul.f32 0.044715, %v1838_v5  ;;  %v1841_v10 = vmul.f32 %v1825_v17, %v1807_v36  ;;  %v1823_v24 = vmul.f32 %v1799_v59, %v1799_v59 }
 0x3a3   : > { %v1888_v60 = vmul.f32 0.7978846, %v1872_v33  ;;  %v1870_v20 = vadd.f32 %v1854_v2, %v1796_v1  ;;  %v1857_v43 = vmul.f32 0.044715, %v1841_v10  ;;  %v1839_v42 = vmul.f32 %v1823_v24, %v1799_v59  ;;  %v7252_v33 = vld [vmem:[%s8260_s5] ss:$0 sm:$0xff] }
 0x3a5   : > { %v1886_v49 = vmul.f32 0.7978846, %v1870_v20  ;;  %v1873_v63 = vadd.f32 %v1857_v43, %v1807_v36  ;;  %v1855_v56 = vmul.f32 0.044715, %v1839_v42  ;;  %5643 = vtanh.f32 %v1888_v60 }
 0x3a7   : > { %5645 = vtanh.f32 %v1886_v49  ;;  %v1889_v16 = vmul.f32 0.7978846, %v1873_v63  ;;  %v1871_v31 = vadd.f32 %v1855_v56, %v1799_v59 }
 0x3a9   : > { %5647 = vtanh.f32 %v1889_v16  ;;  %v1887_v25 = vmul.f32 0.7978846, %v1871_v31 }
 0x3ab   : > { %5649 = vtanh.f32 %v1887_v25 }
 0x3b2   : > { %v5644_v45 = vpop.eup %5643 }
 0x3b3   : > { %v1920_v38 = vadd.f32 1.0, %v5644_v45 }
 0x3b4   : > { %v5646_v61 = vpop.eup %5645 }
 0x3b5   : > { %v1918_v23 = vadd.f32 1.0, %v5646_v61  ;;  %v1936_v41 = vmul.f32 0.5, %v1920_v38 }
 0x3b6   : > { %v5648_v0 = vpop.eup %5647 }
 0x3b7   : > { %v1921_v9 = vadd.f32 1.0, %v5648_v0  ;;  %v1934_v57 = vmul.f32 0.5, %v1918_v23  ;;  %v7243_v48 = vmul.f32 %v1936_v41, %v1804_v26 }
 0x3b8   : > { %v5650_v19 = vpop.eup %5649 }
 0x3b9   : > { %v1919_v53 = vadd.f32 1.0, %v5650_v19  ;;  %v1937_v15 = vmul.f32 0.5, %v1921_v9  ;;  %v7239_v4 = vmul.f32 %v1934_v57, %v1796_v1 }
 0x3bb   : > { %v1935_v11 = vmul.f32 0.5, %v1919_v53  ;;  %v7237_v29 = vmul.f32 %v1937_v15, %v1807_v36 }
 0x3bd   : > { %v7241_v34 = vmul.f32 %v1935_v11, %v1799_v59  ;;  %v1961_v17 = vpack.c.bf16 %v7237_v29, %v7243_v48 }
 0x3bf   : > { %v1960_v5 = vpack.c.bf16 %v7241_v34, %v7239_v4 }
 0x3c1   : > { %5246 = vmatprep.mubr.bf16.mxu1 %v1960_v5 }
 0x3c2   : > { %5247 = vmatmul.mubr.bf16.gmra.mxu1 %v1961_v17 }
 0x3db   : > { %v5236_v36 = vpop.f32.mrf.mxu1 }
 0x3dc   : > { %v2076_v1 = vadd.f32 %v5236_v36, %v7252_v33 }
 0x3dd   : > { %v2067_v59 = vpop.f32.mrf.mxu1 }
 0x3de   : > { %v2132_v2 = vmul.f32 %v2076_v1, %v2076_v1  ;;  %v2068_v26 = vadd.f32 %v7252_v33, %v2067_v59 }
 0x3df   : > { %v5237_v10 = vpop.f32.mrf.mxu1 }
 0x3e0   : > { %v2148_v24 = vmul.f32 %v2132_v2, %v2076_v1  ;;  %v2130_v60 = vmul.f32 %v2068_v26, %v2068_v26  ;;  %v2079_v20 = vadd.f32 %v5237_v10, %v7252_v33 }
 0x3e1   : > { %v2070_v43 = vpop.f32.mrf.mxu1 }
 0x3e2   : > { %v2164_v42 = vmul.f32 0.044715, %v2148_v24  ;;  %v2146_v49 = vmul.f32 %v2130_v60, %v2068_v26  ;;  %v2133_v63 = vmul.f32 %v2079_v20, %v2079_v20  ;;  %v2071_v56 = vadd.f32 %v7252_v33, %v2070_v43 }
 0x3e4   : > { %v2180_v16 = vadd.f32 %v2164_v42, %v2076_v1  ;;  %v2162_v31 = vmul.f32 0.044715, %v2146_v49  ;;  %v2149_v25 = vmul.f32 %v2133_v63, %v2079_v20  ;;  %v2131_v45 = vmul.f32 %v2071_v56, %v2071_v56 }
 0x3e6   : > { %v2196_v61 = vmul.f32 0.7978846, %v2180_v16  ;;  %v2178_v23 = vadd.f32 %v2162_v31, %v2068_v26  ;;  %v2165_v0 = vmul.f32 0.044715, %v2149_v25  ;;  %v2147_v38 = vmul.f32 %v2131_v45, %v2071_v56 }
 0x3e8   : > { %v2194_v9 = vmul.f32 0.7978846, %v2178_v23  ;;  %v2181_v19 = vadd.f32 %v2165_v0, %v2079_v20  ;;  %v2163_v53 = vmul.f32 0.044715, %v2147_v38  ;;  %5651 = vtanh.f32 %v2196_v61 }
 0x3ea   : > { %5653 = vtanh.f32 %v2194_v9  ;;  %v2197_v57 = vmul.f32 0.7978846, %v2181_v19  ;;  %v2179_v15 = vadd.f32 %v2163_v53, %v2071_v56 }
 0x3ec   : > { %5655 = vtanh.f32 %v2197_v57  ;;  %v2195_v41 = vmul.f32 0.7978846, %v2179_v15 }
 0x3ee   : > { %5657 = vtanh.f32 %v2195_v41 }
 0x3f5   : > { %v5652_v11 = vpop.eup %5651 }
 0x3f6   : > { %v2228_v59 = vadd.f32 1.0, %v5652_v11 }
 0x3f7   : > { %v5654_v5 = vpop.eup %5653 }
 0x3f8   : > { %v2226_v17 = vadd.f32 1.0, %v5654_v5  ;;  %v2244_v42 = vmul.f32 0.5, %v2228_v59 }
 0x3f9   : > { %v5656_v36 = vpop.eup %5655 }
 0x3fa   : > { %v2229_v2 = vadd.f32 1.0, %v5656_v36  ;;  %v2242_v43 = vmul.f32 0.5, %v2226_v17  ;;  %v2260_v25 = vmul.f32 %v2244_v42, %v2076_v1 }
 0x3fb   : > { %v5658_v10 = vpop.eup %5657 }
 0x3fc   : > { %v2245_v24 = vmul.f32 0.5, %v2229_v2  ;;  %v2227_v60 = vadd.f32 1.0, %v5658_v10  ;;  %v2258_v16 = vmul.f32 %v2242_v43, %v2068_v26 }
 0x3fe   : > { %v2243_v49 = vmul.f32 0.5, %v2227_v60  ;;  %v2261_v63 = vmul.f32 %v2245_v24, %v2079_v20 }
 0x400   : > { %v2259_v31 = vmul.f32 %v2243_v49, %v2071_v56  ;;  %v2275_v61 = vpack.c.bf16 %v2261_v63, %v2260_v25  ;;  %v5563_v25 = vld [vmem:[%s8259_s4 + $0x78] sm:$0xff]  }
 0x401   : > { %5282 = vmatprep.subr.bf16.mxu1 %v5563_v25 }
 0x402   : > { %v2274_v45 = vpack.c.bf16 %v2259_v31, %v2258_v16  ;;  %5283 = vmatpush3.bf16.msra.mxu1 %v5563_v25 }
 0x404   : > { %5266 = vmatprep.mubr.bf16.mxu0 %v2274_v45  ;;  %v5564_v45 = vld [vmem:[%s8259_s4 + $0x70] sm:$0xff]  }
 0x405   : > { %5267 = vmatmul.mubr.bf16.vlgmr.msra.gmra.mxu0 %v2275_v61  ;;  %5284 = vmatprep.subr.bf16.mxu1 %v5564_v45 }
 0x406   : > { %5285 = vmatpush3.bf16.msra.mxu1 %v5564_v45 }
 0x412   : > { %v5240_v23 = vpop.f32.mrf.mxu1 }
 0x413   : > { %v2092_v0 = vadd.f32 %v5240_v23, %v7252_v33 }
 0x414   : > { %v2083_v38 = vpop.f32.mrf.mxu1 }
 0x415   : > { %v2136_v9 = vmul.f32 %v2092_v0, %v2092_v0  ;;  %v2084_v19 = vadd.f32 %v7252_v33, %v2083_v38 }
 0x416   : > { %v5241_v53 = vpop.f32.mrf.mxu1 }
 0x417   : > { %v2152_v57 = vmul.f32 %v2136_v9, %v2092_v0  ;;  %v2134_v15 = vmul.f32 %v2084_v19, %v2084_v19  ;;  %v2095_v41 = vadd.f32 %v5241_v53, %v7252_v33 }
 0x418   : > { %v2086_v20 = vpop.f32.mrf.mxu1 }
 0x419   : > { %v2168_v26 = vmul.f32 0.044715, %v2152_v57  ;;  %v2150_v56 = vmul.f32 %v2134_v15, %v2084_v19  ;;  %v2137_v1 = vmul.f32 %v2095_v41, %v2095_v41  ;;  %v2087_v11 = vadd.f32 %v7252_v33, %v2086_v20  ;;  %v5565_v57 = vld [vmem:[%s8259_s4 + $0x68] sm:$0xff]  }
 0x41a   : > { %5286 = vmatprep.subr.bf16.mxu1 %v5565_v57 }
 0x41b   : > { %v2184_v5 = vadd.f32 %v2168_v26, %v2092_v0  ;;  %v2166_v17 = vmul.f32 0.044715, %v2150_v56  ;;  %v2153_v36 = vmul.f32 %v2137_v1, %v2095_v41  ;;  %v2135_v59 = vmul.f32 %v2087_v11, %v2087_v11  ;;  %5287 = vmatpush3.bf16.msra.mxu1 %v5565_v57 }
 0x41d   : > { %v2200_v2 = vmul.f32 0.7978846, %v2184_v5  ;;  %v2182_v10 = vadd.f32 %v2166_v17, %v2084_v19  ;;  %v2169_v24 = vmul.f32 0.044715, %v2153_v36  ;;  %v2151_v60 = vmul.f32 %v2135_v59, %v2087_v11  ;;  %v5566_v17 = vld [vmem:[%s8259_s4 + $0x60] sm:$0xff]  }
 0x41e   : > { %5288 = vmatprep.subr.bf16.mxu1 %v5566_v17 }
 0x41f   : > { %v2198_v43 = vmul.f32 0.7978846, %v2182_v10  ;;  %v2185_v42 = vadd.f32 %v2169_v24, %v2095_v41  ;;  %v2167_v49 = vmul.f32 0.044715, %v2151_v60  ;;  %5659 = vtanh.f32 %v2200_v2  ;;  %v5567_v60 = vld [vmem:[%s8259_s4 + $0x58] sm:$0xff]   ;;  %5289 = vmatpush3.bf16.msra.mxu1 %v5566_v17 }
 0x420   : > { %5290 = vmatprep.subr.bf16.mxu1 %v5567_v60 }
 0x421   : > { %5661 = vtanh.f32 %v2198_v43  ;;  %v2201_v63 = vmul.f32 0.7978846, %v2185_v42  ;;  %v2183_v16 = vadd.f32 %v2167_v49, %v2087_v11 }
 0x423   : > { %5663 = vtanh.f32 %v2201_v63  ;;  %v2199_v31 = vmul.f32 0.7978846, %v2183_v16  ;;  %5291 = vmatpush3.bf16.msra.mxu1 %v5567_v60 }
 0x425   : > { %5665 = vtanh.f32 %v2199_v31  ;;  %v5570_v31 = vld [vmem:[%s8259_s4 + $0x40] sm:$0xff]  }
 0x42c   : > { %v5660_v61 = vpop.eup %5659 }
 0x42d   : > { %v2232_v53 = vadd.f32 1.0, %v5660_v61 }
 0x42e   : > { %v5662_v23 = vpop.eup %5661 }
 0x42f   : > { %v2230_v38 = vadd.f32 1.0, %v5662_v23  ;;  %v2248_v5 = vmul.f32 0.5, %v2232_v53 }
 0x430   : > { %v5664_v9 = vpop.eup %5663 }
 0x431   : > { %v2233_v15 = vadd.f32 1.0, %v5664_v9  ;;  %v2246_v56 = vmul.f32 0.5, %v2230_v38  ;;  %v2264_v24 = vmul.f32 %v2248_v5, %v2092_v0  ;;  %v5569_v0 = vld [vmem:[%s8259_s4 + $0x48] sm:$0xff]  }
 0x432   : > { %v5666_v20 = vpop.eup %5665 }
 0x433   : > { %v2231_v26 = vadd.f32 1.0, %v5666_v20  ;;  %v2249_v1 = vmul.f32 0.5, %v2233_v15  ;;  %v2262_v2 = vmul.f32 %v2246_v56, %v2084_v19 }
 0x435   : > { %v2247_v36 = vmul.f32 0.5, %v2231_v26  ;;  %v2265_v59 = vmul.f32 %v2249_v1, %v2095_v41  ;;  %v5568_v41 = vld [vmem:[%s8259_s4 + $0x50] sm:$0xff]  }
 0x436   : > { %5292 = vmatprep.subr.bf16.mxu1 %v5568_v41 }
 0x437   : > { %v2263_v10 = vmul.f32 %v2247_v36, %v2087_v11  ;;  %v2277_v42 = vpack.c.bf16 %v2265_v59, %v2264_v24  ;;  %5293 = vmatpush3.bf16.msra.mxu1 %v5568_v41 }
 0x438   : > { %5294 = vmatprep.subr.bf16.mxu1 %v5569_v0 }
 0x439   : > { %v2276_v43 = vpack.c.bf16 %v2263_v10, %v2262_v2 }
 0x43b   : > { %5270 = vmatprep.mubr.bf16.mxu0 %v2276_v43  ;;  %5295 = vmatpush3.bf16.msra.mxu1 %v5569_v0 }
 0x43c   : > { %5271 = vmatmul.mubr.bf16.gmra.mxu0 %v2277_v42  ;;  %5296 = vmatprep.subr.bf16.mxu1 %v5570_v31 }
 0x43f   : > { %5297 = vmatpush3.bf16.msra.mxu1 %v5570_v31 }
 0x44a   : > { %v5244_v19 = vpop.f32.mrf.mxu1 }
 0x44b   : > { %v2108_v11 = vadd.f32 %v5244_v19, %v7252_v33 }
 0x44c   : > { %v2099_v49 = vpop.f32.mrf.mxu1 }
 0x44d   : > { %v2140_v63 = vmul.f32 %v2108_v11, %v2108_v11  ;;  %v2100_v16 = vadd.f32 %v7252_v33, %v2099_v49 }
 0x44e   : > { %v5245_v25 = vpop.f32.mrf.mxu1 }
 0x44f   : > { %v2156_v45 = vmul.f32 %v2140_v63, %v2108_v11  ;;  %v2138_v61 = vmul.f32 %v2100_v16, %v2100_v16  ;;  %v2111_v23 = vadd.f32 %v5245_v25, %v7252_v33 }
 0x450   : > { %v2102_v38 = vpop.f32.mrf.mxu1 }
 0x451   : > { %v2172_v9 = vmul.f32 0.044715, %v2156_v45  ;;  %v2154_v53 = vmul.f32 %v2138_v61, %v2100_v16  ;;  %v2141_v57 = vmul.f32 %v2111_v23, %v2111_v23  ;;  %v2103_v15 = vadd.f32 %v7252_v33, %v2102_v38 }
 0x453   : > { %v2188_v20 = vadd.f32 %v2172_v9, %v2108_v11  ;;  %v2170_v26 = vmul.f32 0.044715, %v2154_v53  ;;  %v2157_v56 = vmul.f32 %v2141_v57, %v2111_v23  ;;  %v2139_v1 = vmul.f32 %v2103_v15, %v2103_v15 }
 0x455   : > { %v2204_v5 = vmul.f32 0.7978846, %v2188_v20  ;;  %v2186_v17 = vadd.f32 %v2170_v26, %v2100_v16  ;;  %v2173_v36 = vmul.f32 0.044715, %v2157_v56  ;;  %v2155_v59 = vmul.f32 %v2139_v1, %v2103_v15 }
 0x457   : > { %v2202_v2 = vmul.f32 0.7978846, %v2186_v17  ;;  %v2189_v10 = vadd.f32 %v2173_v36, %v2111_v23  ;;  %v2171_v24 = vmul.f32 0.044715, %v2155_v59  ;;  %5667 = vtanh.f32 %v2204_v5 }
 0x459   : > { %5669 = vtanh.f32 %v2202_v2  ;;  %v2205_v60 = vmul.f32 0.7978846, %v2189_v10  ;;  %v2187_v43 = vadd.f32 %v2171_v24, %v2103_v15 }
 0x45b   : > { %5671 = vtanh.f32 %v2205_v60  ;;  %v2203_v42 = vmul.f32 0.7978846, %v2187_v43 }
 0x45d   : > { %5673 = vtanh.f32 %v2203_v42 }
 0x464   : > { %v5668_v41 = vpop.eup %5667 }
 0x465   : > { %v2236_v63 = vadd.f32 1.0, %v5668_v41 }
 0x466   : > { %v5670_v0 = vpop.eup %5669 }
 0x467   : > { %v2234_v19 = vadd.f32 1.0, %v5670_v0  ;;  %v2252_v9 = vmul.f32 0.5, %v2236_v63 }
 0x468   : > { %v5672_v49 = vpop.eup %5671 }
 0x469   : > { %v2237_v31 = vadd.f32 1.0, %v5672_v49  ;;  %v2250_v61 = vmul.f32 0.5, %v2234_v19  ;;  %v2268_v56 = vmul.f32 %v2252_v9, %v2108_v11 }
 0x46a   : > { %v5674_v25 = vpop.eup %5673 }
 0x46b   : > { %v2235_v45 = vadd.f32 1.0, %v5674_v25  ;;  %v2253_v38 = vmul.f32 0.5, %v2237_v31  ;;  %v2266_v20 = vmul.f32 %v2250_v61, %v2100_v16 }
 0x46d   : > { %v2251_v53 = vmul.f32 0.5, %v2235_v45  ;;  %v2269_v57 = vmul.f32 %v2253_v38, %v2111_v23 }
 0x46f   : > { %v2267_v26 = vmul.f32 %v2251_v53, %v2103_v15  ;;  %v2279_v5 = vpack.c.bf16 %v2269_v57, %v2268_v56 }
 0x471   : > { %v2278_v1 = vpack.c.bf16 %v2267_v26, %v2266_v20 }
 0x473   : > { %5274 = vmatprep.mubr.bf16.mxu0 %v2278_v1 }
 0x474   : > { %5275 = vmatmul.mubr.bf16.gmra.mxu0 %v2279_v5 }
 0x482   : > { %v5248_v17 = vpop.f32.mrf.mxu1 }
 0x483   : > { %v2124_v36 = vadd.f32 %v5248_v17, %v7252_v33 }
 0x484   : > { %v2115_v59 = vpop.f32.mrf.mxu1 }
 0x485   : > { %v2144_v2 = vmul.f32 %v2124_v36, %v2124_v36  ;;  %v2116_v10 = vadd.f32 %v7252_v33, %v2115_v59 }
 0x486   : > { %v5249_v24 = vpop.f32.mrf.mxu1 }
 0x487   : > { %v2160_v60 = vmul.f32 %v2144_v2, %v2124_v36  ;;  %v2142_v43 = vmul.f32 %v2116_v10, %v2116_v10  ;;  %v2127_v42 = vadd.f32 %v5249_v24, %v7252_v33 }
 0x488   : > { %v2118_v23 = vpop.f32.mrf.mxu1 }
 0x489   : > { %v2176_v16 = vmul.f32 0.044715, %v2160_v60  ;;  %v2158_v15 = vmul.f32 %v2142_v43, %v2116_v10  ;;  %v2145_v11 = vmul.f32 %v2127_v42, %v2127_v42  ;;  %v2119_v41 = vadd.f32 %v7252_v33, %v2118_v23 }
 0x48b   : > { %v2192_v0 = vadd.f32 %v2176_v16, %v2124_v36  ;;  %v2174_v19 = vmul.f32 0.044715, %v2158_v15  ;;  %v2161_v49 = vmul.f32 %v2145_v11, %v2127_v42  ;;  %v2143_v63 = vmul.f32 %v2119_v41, %v2119_v41 }
 0x48d   : > { %v2208_v31 = vmul.f32 0.7978846, %v2192_v0  ;;  %v2190_v25 = vadd.f32 %v2174_v19, %v2116_v10  ;;  %v2177_v45 = vmul.f32 0.044715, %v2161_v49  ;;  %v2159_v61 = vmul.f32 %v2143_v63, %v2119_v41 }
 0x48f   : > { %v2206_v38 = vmul.f32 0.7978846, %v2190_v25  ;;  %v2193_v9 = vadd.f32 %v2177_v45, %v2127_v42  ;;  %v2175_v53 = vmul.f32 0.044715, %v2159_v61  ;;  %5675 = vtanh.f32 %v2208_v31 }
 0x491   : > { %5677 = vtanh.f32 %v2206_v38  ;;  %v2209_v57 = vmul.f32 0.7978846, %v2193_v9  ;;  %v2191_v20 = vadd.f32 %v2175_v53, %v2119_v41 }
 0x493   : > { %5679 = vtanh.f32 %v2209_v57  ;;  %v2207_v26 = vmul.f32 0.7978846, %v2191_v20 }
 0x495   : > { %5681 = vtanh.f32 %v2207_v26 }
 0x49c   : > { %v5676_v56 = vpop.eup %5675 }
 0x49d   : > { %v2240_v17 = vadd.f32 1.0, %v5676_v56 }
 0x49e   : > { %v5678_v33 = vpop.eup %5677 }
 0x49f   : > { %v2238_v1 = vadd.f32 1.0, %v5678_v33  ;;  %v2256_v23 = vmul.f32 0.5, %v2240_v17 }
 0x4a0   : > { %v5680_v5 = vpop.eup %5679 }
 0x4a1   : > { %v2241_v59 = vadd.f32 1.0, %v5680_v5  ;;  %v2254_v60 = vmul.f32 0.5, %v2238_v1  ;;  %v2272_v19 = vmul.f32 %v2256_v23, %v2124_v36  ;;  %v5574_v23 = vld [vmem:[%s8261_s6 + $0x60] sm:$0xff]  }
 0x4a2   : > { %v5682_v2 = vpop.eup %5681 }
 0x4a3   : > { %v2239_v24 = vadd.f32 1.0, %v5682_v2  ;;  %v2257_v43 = vmul.f32 0.5, %v2241_v59  ;;  %v2270_v11 = vmul.f32 %v2254_v60, %v2116_v10  ;;  %v7300_v10 = vld [vmem:[%s8262_s7] ss:$0 sm:$0xff] }
 0x4a5   : > { %v2255_v16 = vmul.f32 0.5, %v2239_v24  ;;  %v2273_v15 = vmul.f32 %v2257_v43, %v2127_v42  ;;  %v5573_v43 = vld [vmem:[%s8261_s6 + $0x68] sm:$0xff]  }
 0x4a7   : > { %v2271_v0 = vmul.f32 %v2255_v16, %v2119_v41  ;;  %v2281_v63 = vpack.c.bf16 %v2273_v15, %v2272_v19  ;;  %v5575_v16 = vld [vmem:[%s8261_s6 + $0x58] sm:$0xff]   ;;  %v5576_v15 = vld [vmem:[%s8261_s6 + $0x50] sm:$0xff]  }
 0x4a9   : > { %v2280_v49 = vpack.c.bf16 %v2271_v0, %v2270_v11  ;;  %v5577_v11 = vld [vmem:[%s8261_s6 + $0x48] sm:$0xff]  }
 0x4ab   : > { %5278 = vmatprep.mubr.bf16.mxu0 %v2280_v49  ;;  %v5578_v49 = vld [vmem:[%s8261_s6 + $0x40] sm:$0xff]  }
 0x4ac   : > { %5279 = vmatmul.mubr.bf16.gmra.mxu0 %v2281_v63 }
 0x4c5   : > { %v5268_v31 = vpop.f32.mrf.mxu0 }
 0x4c6   : > { %v2445_v9 = vadd.f32 %v5268_v31, %v7157_v37 }
 0x4c7   : > { %v2380_v25 = vpop.f32.mrf.mxu0 }
 0x4c8   : > { %v2443_v61 = vadd.f32 %v2380_v25, %v7153_v28 }
 0x4c9   : > { %v5269_v45 = vpop.f32.mrf.mxu0 }
 0x4ca   : > { %v2446_v38 = vadd.f32 %v5269_v45, %v7151_v52  ;;  %v7307_v41 = vadd.f32 %v7300_v10, %v2443_v61  ;;  %v7313_v52 = vadd.f32 %v7300_v10, %v2445_v9 }
 0x4cb   : > { %v2383_v53 = vpop.f32.mrf.mxu0 }
 0x4cc   : > { %v2444_v36 = vadd.f32 %v2383_v53, %v7155_v40  ;;  %v7304_v42 = vadd.f32 %v7300_v10, %v2446_v38 }
 0x4ce   : > { %v7310_v28 = vadd.f32 %v7300_v10, %v2444_v36  ;;  %v2483_v57 = vpack.c.bf16 %v7304_v42, %v7313_v52 }
 0x4d0   : > { %v2482_v37 = vpack.c.bf16 %v7310_v28, %v7307_v41 }
 0x4d2   : > { %5298 = vmatprep.mubr.bf16.mxu1 %v2482_v37 }
 0x4d3   : > { %5299 = vmatmul.mubr.bf16.vlgmr.msra.gmra.mxu1 %v2483_v57 }
 0x4fc   : > { %v5272_v40 = vpop.f32.mrf.mxu0 }
 0x4fd   : > { %v2449_v1 = vadd.f32 %v5272_v40, %v7173_v55  ;;  %v5572_v55 = vld [vmem:[%s8261_s6 + $0x70] sm:$0xff]  }
 0x4fe   : > { %v2396_v20 = vpop.f32.mrf.mxu0 }
 0x4ff   : > { %v2447_v56 = vadd.f32 %v2396_v20, %v7169_v30  ;;  %v7333_v60 = vadd.f32 %v7300_v10, %v2449_v1 }
 0x500   : > { %v5273_v26 = vpop.f32.mrf.mxu0 }
 0x501   : > { %v2450_v33 = vadd.f32 %v5273_v26, %v7167_v27  ;;  %v7327_v2 = vadd.f32 %v7300_v10, %v2447_v56 }
 0x502   : > { %v2399_v5 = vpop.f32.mrf.mxu0 }
 0x503   : > { %v2448_v17 = vadd.f32 %v2399_v5, %v7171_v46  ;;  %v7324_v59 = vadd.f32 %v7300_v10, %v2450_v33  ;;  %v5571_v46 = vld [vmem:[%s8261_s6 + $0x78] sm:$0xff]  }
 0x504   : > { %5314 = vmatprep.subr.bf16.mxu0 %v5571_v46 }
 0x505   : > { %v7330_v24 = vadd.f32 %v7300_v10, %v2448_v17  ;;  %v2485_v30 = vpack.c.bf16 %v7324_v59, %v7333_v60  ;;  %5315 = vmatpush3.bf16.msra.mxu0 %v5571_v46 }
 0x506   : > { %5316 = vmatprep.subr.bf16.mxu0 %v5572_v55 }
 0x507   : > { %v2484_v27 = vpack.c.bf16 %v7330_v24, %v7327_v2 }
 0x509   : > { %5302 = vmatprep.mubr.bf16.mxu1 %v2484_v27  ;;  %5317 = vmatpush3.bf16.msra.mxu0 %v5572_v55 }
 0x50a   : > { %5303 = vmatmul.mubr.bf16.gmra.mxu1 %v2485_v30  ;;  %5318 = vmatprep.subr.bf16.mxu0 %v5573_v43 }
 0x50d   : > { %5319 = vmatpush3.bf16.msra.mxu0 %v5573_v43 }
 0x50e   : > { %5320 = vmatprep.subr.bf16.mxu0 %v5574_v23 }
 0x511   : > { %5321 = vmatpush3.bf16.msra.mxu0 %v5574_v23 }
 0x512   : > { %5322 = vmatprep.subr.bf16.mxu0 %v5575_v16 }
 0x515   : > { %5323 = vmatpush3.bf16.msra.mxu0 %v5575_v16 }
 0x516   : > { %5324 = vmatprep.subr.bf16.mxu0 %v5576_v15 }
 0x519   : > { %5325 = vmatpush3.bf16.msra.mxu0 %v5576_v15 }
 0x51a   : > { %5326 = vmatprep.subr.bf16.mxu0 %v5577_v11 }
 0x51d   : > { %5327 = vmatpush3.bf16.msra.mxu0 %v5577_v11 }
 0x51e   : > { %5328 = vmatprep.subr.bf16.mxu0 %v5578_v49 }
 0x521   : > { %5329 = vmatpush3.bf16.msra.mxu0 %v5578_v49 }
 0x534   : > { %v5276_v0 = vpop.f32.mrf.mxu0 }
 0x535   : > { %v2453_v45 = vadd.f32 %v5276_v0, %v7227_v50 }
 0x536   : > { %v2412_v19 = vpop.f32.mrf.mxu0 }
 0x537   : > { %v2451_v31 = vadd.f32 %v2412_v19, %v7222_v35  ;;  %v7377_v35 = vadd.f32 %v7300_v10, %v2453_v45 }
 0x538   : > { %v5277_v63 = vpop.f32.mrf.mxu0 }
 0x539   : > { %v2454_v25 = vadd.f32 %v5277_v63, %v7219_v6  ;;  %v7371_v53 = vadd.f32 %v7300_v10, %v2451_v31 }
 0x53a   : > { %v2415_v61 = vpop.f32.mrf.mxu0 }
 0x53b   : > { %v2452_v38 = vadd.f32 %v2415_v61, %v7224_v47  ;;  %v7368_v9 = vadd.f32 %v7300_v10, %v2454_v25 }
 0x53d   : > { %v7374_v36 = vadd.f32 %v7300_v10, %v2452_v38  ;;  %v2487_v50 = vpack.c.bf16 %v7368_v9, %v7377_v35 }
 0x53f   : > { %v2486_v6 = vpack.c.bf16 %v7374_v36, %v7371_v53 }
 0x541   : > { %5306 = vmatprep.mubr.bf16.mxu1 %v2486_v6 }
 0x542   : > { %5307 = vmatmul.mubr.bf16.gmra.mxu1 %v2487_v50 }
 0x56c   : > { %v5280_v47 = vpop.f32.mrf.mxu0 }
 0x56d   : > { %v2457_v26 = vadd.f32 %v5280_v47, %v7243_v48 }
 0x56e   : > { %v2428_v37 = vpop.f32.mrf.mxu0 }
 0x56f   : > { %v2455_v40 = vadd.f32 %v2428_v37, %v7239_v4  ;;  %v7397_v27 = vadd.f32 %v7300_v10, %v2457_v26 }
 0x570   : > { %v5281_v57 = vpop.f32.mrf.mxu0 }
 0x571   : > { %v2458_v20 = vadd.f32 %v5281_v57, %v7237_v29  ;;  %v7391_v5 = vadd.f32 %v7300_v10, %v2455_v40 }
 0x572   : > { %v2431_v56 = vpop.f32.mrf.mxu0 }
 0x573   : > { %v2456_v33 = vadd.f32 %v2431_v56, %v7241_v34  ;;  %v7388_v1 = vadd.f32 %v7300_v10, %v2458_v20  ;;  %v7406_v34 = vld [vmem:[%s8260_s5 + $0x1] ss:$0 sm:$0xff] }
 0x575   : > { %v7394_v17 = vadd.f32 %v7300_v10, %v2456_v33  ;;  %v2489_v4 = vpack.c.bf16 %v7388_v1, %v7397_v27 }
 0x577   : > { %v2488_v29 = vpack.c.bf16 %v7394_v17, %v7391_v5 }
 0x579   : > { %5310 = vmatprep.mubr.bf16.mxu1 %v2488_v29 }
 0x57a   : > { %5311 = vmatmul.mubr.bf16.gmra.mxu1 %v2489_v4 }
 0x593   : > { %v5300_v48 = vpop.f32.mrf.mxu1 }
 0x594   : > { %v2606_v30 = vadd.f32 %v5300_v48, %v7406_v34 }
 0x595   : > { %v2597_v46 = vpop.f32.mrf.mxu1 }
 0x596   : > { %v2662_v55 = vmul.f32 %v2606_v30, %v2606_v30  ;;  %v2598_v10 = vadd.f32 %v7406_v34, %v2597_v46 }
 0x597   : > { %v5301_v43 = vpop.f32.mrf.mxu1 }
 0x598   : > { %v2678_v23 = vmul.f32 %v2662_v55, %v2606_v30  ;;  %v2660_v16 = vmul.f32 %v2598_v10, %v2598_v10  ;;  %v2609_v15 = vadd.f32 %v5301_v43, %v7406_v34 }
 0x599   : > { %v2600_v11 = vpop.f32.mrf.mxu1 }
 0x59a   : > { %v2694_v0 = vmul.f32 0.044715, %v2678_v23  ;;  %v2676_v19 = vmul.f32 %v2660_v16, %v2598_v10  ;;  %v2663_v49 = vmul.f32 %v2609_v15, %v2609_v15  ;;  %v2601_v63 = vadd.f32 %v7406_v34, %v2600_v11 }
 0x59c   : > { %v2710_v31 = vadd.f32 %v2694_v0, %v2606_v30  ;;  %v2692_v25 = vmul.f32 0.044715, %v2676_v19  ;;  %v2679_v45 = vmul.f32 %v2663_v49, %v2609_v15  ;;  %v2661_v61 = vmul.f32 %v2601_v63, %v2601_v63 }
 0x59e   : > { %v2726_v38 = vmul.f32 0.7978846, %v2710_v31  ;;  %v2708_v6 = vadd.f32 %v2692_v25, %v2598_v10  ;;  %v2695_v50 = vmul.f32 0.044715, %v2679_v45  ;;  %v2677_v47 = vmul.f32 %v2661_v61, %v2601_v63 }
 0x5a0   : > { %v2724_v37 = vmul.f32 0.7978846, %v2708_v6  ;;  %v2711_v57 = vadd.f32 %v2695_v50, %v2609_v15  ;;  %v2693_v40 = vmul.f32 0.044715, %v2677_v47  ;;  %5683 = vtanh.f32 %v2726_v38 }
 0x5a2   : > { %5685 = vtanh.f32 %v2724_v37  ;;  %v2727_v20 = vmul.f32 0.7978846, %v2711_v57  ;;  %v2709_v26 = vadd.f32 %v2693_v40, %v2601_v63 }
 0x5a4   : > { %5687 = vtanh.f32 %v2727_v20  ;;  %v2725_v56 = vmul.f32 0.7978846, %v2709_v26 }
 0x5a6   : > { %5689 = vtanh.f32 %v2725_v56 }
 0x5ad   : > { %v5684_v33 = vpop.eup %5683 }
 0x5ae   : > { %v2758_v46 = vadd.f32 1.0, %v5684_v33 }
 0x5af   : > { %v5686_v29 = vpop.eup %5685 }
 0x5b0   : > { %v2756_v4 = vadd.f32 1.0, %v5686_v29  ;;  %v2774_v0 = vmul.f32 0.5, %v2758_v46 }
 0x5b1   : > { %v5688_v48 = vpop.eup %5687 }
 0x5b2   : > { %v2759_v55 = vadd.f32 1.0, %v5688_v48  ;;  %v2772_v11 = vmul.f32 0.5, %v2756_v4  ;;  %v2790_v45 = vmul.f32 %v2774_v0, %v2606_v30 }
 0x5b3   : > { %v5690_v43 = vpop.eup %5689 }
 0x5b4   : > { %v2775_v23 = vmul.f32 0.5, %v2759_v55  ;;  %v2757_v16 = vadd.f32 1.0, %v5690_v43  ;;  %v2788_v31 = vmul.f32 %v2772_v11, %v2598_v10 }
 0x5b6   : > { %v2773_v19 = vmul.f32 0.5, %v2757_v16  ;;  %v2791_v49 = vmul.f32 %v2775_v23, %v2609_v15 }
 0x5b8   : > { %v2789_v25 = vmul.f32 %v2773_v19, %v2601_v63  ;;  %v2805_v38 = vpack.c.bf16 %v2791_v49, %v2790_v45  ;;  %v5579_v45 = vld [vmem:[%s8259_s4 + $0xb8] sm:$0xff]  }
 0x5b9   : > { %5346 = vmatprep.subr.bf16.mxu1 %v5579_v45 }
 0x5ba   : > { %v2804_v61 = vpack.c.bf16 %v2789_v25, %v2788_v31  ;;  %5347 = vmatpush3.bf16.msra.mxu1 %v5579_v45 }
 0x5bc   : > { %5330 = vmatprep.mubr.bf16.mxu0 %v2804_v61  ;;  %v5580_v61 = vld [vmem:[%s8259_s4 + $0xb0] sm:$0xff]  }
 0x5bd   : > { %5331 = vmatmul.mubr.bf16.vlgmr.msra.gmra.mxu0 %v2805_v38  ;;  %5348 = vmatprep.subr.bf16.mxu1 %v5580_v61 }
 0x5be   : > { %5349 = vmatpush3.bf16.msra.mxu1 %v5580_v61 }
 0x5ca   : > { %v5304_v6 = vpop.f32.mrf.mxu1 }
 0x5cb   : > { %v2622_v50 = vadd.f32 %v5304_v6, %v7406_v34 }
 0x5cc   : > { %v2613_v47 = vpop.f32.mrf.mxu1 }
 0x5cd   : > { %v2666_v37 = vmul.f32 %v2622_v50, %v2622_v50  ;;  %v2614_v57 = vadd.f32 %v7406_v34, %v2613_v47 }
 0x5ce   : > { %v5305_v40 = vpop.f32.mrf.mxu1 }
 0x5cf   : > { %v2682_v20 = vmul.f32 %v2666_v37, %v2622_v50  ;;  %v2664_v26 = vmul.f32 %v2614_v57, %v2614_v57  ;;  %v2625_v56 = vadd.f32 %v5305_v40, %v7406_v34 }
 0x5d0   : > { %v2616_v15 = vpop.f32.mrf.mxu1 }
 0x5d1   : > { %v2698_v10 = vmul.f32 0.044715, %v2682_v20  ;;  %v2680_v63 = vmul.f32 %v2664_v26, %v2614_v57  ;;  %v2667_v30 = vmul.f32 %v2625_v56, %v2625_v56  ;;  %v2617_v33 = vadd.f32 %v7406_v34, %v2616_v15  ;;  %v5581_v20 = vld [vmem:[%s8259_s4 + $0xa8] sm:$0xff]  }
 0x5d2   : > { %5350 = vmatprep.subr.bf16.mxu1 %v5581_v20 }
 0x5d3   : > { %v2714_v29 = vadd.f32 %v2698_v10, %v2622_v50  ;;  %v2696_v4 = vmul.f32 0.044715, %v2680_v63  ;;  %v2683_v48 = vmul.f32 %v2667_v30, %v2625_v56  ;;  %v2665_v46 = vmul.f32 %v2617_v33, %v2617_v33  ;;  %5351 = vmatpush3.bf16.msra.mxu1 %v5581_v20 }
 0x5d5   : > { %v2730_v55 = vmul.f32 0.7978846, %v2714_v29  ;;  %v2712_v43 = vadd.f32 %v2696_v4, %v2614_v57  ;;  %v2699_v23 = vmul.f32 0.044715, %v2683_v48  ;;  %v2681_v16 = vmul.f32 %v2665_v46, %v2617_v33  ;;  %v5582_v4 = vld [vmem:[%s8259_s4 + $0xa0] sm:$0xff]  }
 0x5d6   : > { %5352 = vmatprep.subr.bf16.mxu1 %v5582_v4 }
 0x5d7   : > { %v2728_v11 = vmul.f32 0.7978846, %v2712_v43  ;;  %v2715_v0 = vadd.f32 %v2699_v23, %v2625_v56  ;;  %v2697_v19 = vmul.f32 0.044715, %v2681_v16  ;;  %5691 = vtanh.f32 %v2730_v55  ;;  %v5583_v16 = vld [vmem:[%s8259_s4 + $0x98] sm:$0xff]   ;;  %5353 = vmatpush3.bf16.msra.mxu1 %v5582_v4 }
 0x5d8   : > { %5354 = vmatprep.subr.bf16.mxu1 %v5583_v16 }
 0x5d9   : > { %5693 = vtanh.f32 %v2728_v11  ;;  %v2731_v49 = vmul.f32 0.7978846, %v2715_v0  ;;  %v2713_v31 = vadd.f32 %v2697_v19, %v2617_v33 }
 0x5db   : > { %5695 = vtanh.f32 %v2731_v49  ;;  %v2729_v25 = vmul.f32 0.7978846, %v2713_v31  ;;  %5355 = vmatpush3.bf16.msra.mxu1 %v5583_v16 }
 0x5dd   : > { %5697 = vtanh.f32 %v2729_v25  ;;  %v5586_v25 = vld [vmem:[%s8259_s4 + $0x80] sm:$0xff]  }
 0x5e4   : > { %v5692_v38 = vpop.eup %5691 }
 0x5e5   : > { %v2762_v40 = vadd.f32 1.0, %v5692_v38 }
 0x5e6   : > { %v5694_v6 = vpop.eup %5693 }
 0x5e7   : > { %v2760_v47 = vadd.f32 1.0, %v5694_v6  ;;  %v2778_v29 = vmul.f32 0.5, %v2762_v40 }
 0x5e8   : > { %v5696_v37 = vpop.eup %5695 }
 0x5e9   : > { %v2763_v26 = vadd.f32 1.0, %v5696_v37  ;;  %v2776_v63 = vmul.f32 0.5, %v2760_v47  ;;  %v2794_v23 = vmul.f32 %v2778_v29, %v2622_v50  ;;  %v5585_v50 = vld [vmem:[%s8259_s4 + $0x88] sm:$0xff]  }
 0x5ea   : > { %v5698_v15 = vpop.eup %5697 }
 0x5eb   : > { %v2761_v10 = vadd.f32 1.0, %v5698_v15  ;;  %v2779_v30 = vmul.f32 0.5, %v2763_v26  ;;  %v2792_v55 = vmul.f32 %v2776_v63, %v2614_v57 }
 0x5ed   : > { %v2777_v48 = vmul.f32 0.5, %v2761_v10  ;;  %v2795_v46 = vmul.f32 %v2779_v30, %v2625_v56  ;;  %v5584_v56 = vld [vmem:[%s8259_s4 + $0x90] sm:$0xff]  }
 0x5ee   : > { %5356 = vmatprep.subr.bf16.mxu1 %v5584_v56 }
 0x5ef   : > { %v2793_v43 = vmul.f32 %v2777_v48, %v2617_v33  ;;  %v2807_v0 = vpack.c.bf16 %v2795_v46, %v2794_v23  ;;  %5357 = vmatpush3.bf16.msra.mxu1 %v5584_v56 }
 0x5f0   : > { %5358 = vmatprep.subr.bf16.mxu1 %v5585_v50 }
 0x5f1   : > { %v2806_v11 = vpack.c.bf16 %v2793_v43, %v2792_v55 }
 0x5f3   : > { %5334 = vmatprep.mubr.bf16.mxu0 %v2806_v11  ;;  %5359 = vmatpush3.bf16.msra.mxu1 %v5585_v50 }
 0x5f4   : > { %5335 = vmatmul.mubr.bf16.gmra.mxu0 %v2807_v0  ;;  %5360 = vmatprep.subr.bf16.mxu1 %v5586_v25 }
 0x5f7   : > { %5361 = vmatpush3.bf16.msra.mxu1 %v5586_v25 }
 0x602   : > { %v5308_v57 = vpop.f32.mrf.mxu1 }
 0x603   : > { %v2638_v33 = vadd.f32 %v5308_v57, %v7406_v34 }
 0x604   : > { %v2629_v19 = vpop.f32.mrf.mxu1 }
 0x605   : > { %v2670_v49 = vmul.f32 %v2638_v33, %v2638_v33  ;;  %v2630_v31 = vadd.f32 %v7406_v34, %v2629_v19 }
 0x606   : > { %v5309_v45 = vpop.f32.mrf.mxu1 }
 0x607   : > { %v2686_v61 = vmul.f32 %v2670_v49, %v2638_v33  ;;  %v2668_v38 = vmul.f32 %v2630_v31, %v2630_v31  ;;  %v2641_v6 = vadd.f32 %v5309_v45, %v7406_v34 }
 0x608   : > { %v2632_v47 = vpop.f32.mrf.mxu1 }
 0x609   : > { %v2702_v37 = vmul.f32 0.044715, %v2686_v61  ;;  %v2684_v40 = vmul.f32 %v2668_v38, %v2630_v31  ;;  %v2671_v20 = vmul.f32 %v2641_v6, %v2641_v6  ;;  %v2633_v26 = vadd.f32 %v7406_v34, %v2632_v47 }
 0x60b   : > { %v2718_v15 = vadd.f32 %v2702_v37, %v2638_v33  ;;  %v2700_v10 = vmul.f32 0.044715, %v2684_v40  ;;  %v2687_v63 = vmul.f32 %v2671_v20, %v2641_v6  ;;  %v2669_v30 = vmul.f32 %v2633_v26, %v2633_v26 }
 0x60d   : > { %v2734_v29 = vmul.f32 0.7978846, %v2718_v15  ;;  %v2716_v4 = vadd.f32 %v2700_v10, %v2630_v31  ;;  %v2703_v48 = vmul.f32 0.044715, %v2687_v63  ;;  %v2685_v46 = vmul.f32 %v2669_v30, %v2633_v26 }
 0x60f   : > { %v2732_v55 = vmul.f32 0.7978846, %v2716_v4  ;;  %v2719_v43 = vadd.f32 %v2703_v48, %v2641_v6  ;;  %v2701_v23 = vmul.f32 0.044715, %v2685_v46  ;;  %5699 = vtanh.f32 %v2734_v29 }
 0x611   : > { %5701 = vtanh.f32 %v2732_v55  ;;  %v2735_v16 = vmul.f32 0.7978846, %v2719_v43  ;;  %v2717_v11 = vadd.f32 %v2701_v23, %v2633_v26 }
 0x613   : > { %5703 = vtanh.f32 %v2735_v16  ;;  %v2733_v0 = vmul.f32 0.7978846, %v2717_v11 }
 0x615   : > { %5705 = vtanh.f32 %v2733_v0 }
 0x61c   : > { %v5700_v56 = vpop.eup %5699 }
 0x61d   : > { %v2766_v49 = vadd.f32 1.0, %v5700_v56 }
 0x61e   : > { %v5702_v50 = vpop.eup %5701 }
 0x61f   : > { %v2764_v57 = vadd.f32 1.0, %v5702_v50  ;;  %v2782_v37 = vmul.f32 0.5, %v2766_v49 }
 0x620   : > { %v5704_v19 = vpop.eup %5703 }
 0x621   : > { %v2767_v25 = vadd.f32 1.0, %v5704_v19  ;;  %v2780_v38 = vmul.f32 0.5, %v2764_v57  ;;  %v2798_v63 = vmul.f32 %v2782_v37, %v2638_v33 }
 0x622   : > { %v5706_v45 = vpop.eup %5705 }
 0x623   : > { %v2765_v61 = vadd.f32 1.0, %v5706_v45  ;;  %v2783_v47 = vmul.f32 0.5, %v2767_v25  ;;  %v2796_v15 = vmul.f32 %v2780_v38, %v2630_v31 }
 0x625   : > { %v2781_v40 = vmul.f32 0.5, %v2765_v61  ;;  %v2799_v20 = vmul.f32 %v2783_v47, %v2641_v6 }
 0x627   : > { %v2797_v10 = vmul.f32 %v2781_v40, %v2633_v26  ;;  %v2809_v29 = vpack.c.bf16 %v2799_v20, %v2798_v63 }
 0x629   : > { %v2808_v30 = vpack.c.bf16 %v2797_v10, %v2796_v15 }
 0x62b   : > { %5338 = vmatprep.mubr.bf16.mxu0 %v2808_v30 }
 0x62c   : > { %5339 = vmatmul.mubr.bf16.gmra.mxu0 %v2809_v29 }
 0x63a   : > { %v5312_v4 = vpop.f32.mrf.mxu1 }
 0x63b   : > { %v2654_v48 = vadd.f32 %v5312_v4, %v7406_v34 }
 0x63c   : > { %v2645_v46 = vpop.f32.mrf.mxu1 }
 0x63d   : > { %v2674_v55 = vmul.f32 %v2654_v48, %v2654_v48  ;;  %v2646_v43 = vadd.f32 %v7406_v34, %v2645_v46 }
 0x63e   : > { %v5313_v23 = vpop.f32.mrf.mxu1 }
 0x63f   : > { %v2690_v16 = vmul.f32 %v2674_v55, %v2654_v48  ;;  %v2672_v11 = vmul.f32 %v2646_v43, %v2646_v43  ;;  %v2657_v0 = vadd.f32 %v5313_v23, %v7406_v34 }
 0x640   : > { %v2648_v6 = vpop.f32.mrf.mxu1 }
 0x641   : > { %v2706_v31 = vmul.f32 0.044715, %v2690_v16  ;;  %v2688_v26 = vmul.f32 %v2672_v11, %v2646_v43  ;;  %v2675_v33 = vmul.f32 %v2657_v0, %v2657_v0  ;;  %v2649_v56 = vadd.f32 %v7406_v34, %v2648_v6 }
 0x643   : > { %v2722_v50 = vadd.f32 %v2706_v31, %v2654_v48  ;;  %v2704_v57 = vmul.f32 0.044715, %v2688_v26  ;;  %v2691_v19 = vmul.f32 %v2675_v33, %v2657_v0  ;;  %v2673_v49 = vmul.f32 %v2649_v56, %v2649_v56 }
 0x645   : > { %v2738_v25 = vmul.f32 0.7978846, %v2722_v50  ;;  %v2720_v45 = vadd.f32 %v2704_v57, %v2646_v43  ;;  %v2707_v61 = vmul.f32 0.044715, %v2691_v19  ;;  %v2689_v38 = vmul.f32 %v2673_v49, %v2649_v56 }
 0x647   : > { %v2736_v47 = vmul.f32 0.7978846, %v2720_v45  ;;  %v2723_v37 = vadd.f32 %v2707_v61, %v2657_v0  ;;  %v2705_v40 = vmul.f32 0.044715, %v2689_v38  ;;  %5707 = vtanh.f32 %v2738_v25 }
 0x649   : > { %5709 = vtanh.f32 %v2736_v47  ;;  %v2739_v20 = vmul.f32 0.7978846, %v2723_v37  ;;  %v2721_v15 = vadd.f32 %v2705_v40, %v2649_v56 }
 0x64b   : > { %5711 = vtanh.f32 %v2739_v20  ;;  %v2737_v10 = vmul.f32 0.7978846, %v2721_v15 }
 0x64d   : > { %5713 = vtanh.f32 %v2737_v10 }
 0x654   : > { %v5708_v63 = vpop.eup %5707 }
 0x655   : > { %v2770_v4 = vadd.f32 1.0, %v5708_v63 }
 0x656   : > { %v5710_v34 = vpop.eup %5709 }
 0x657   : > { %v2768_v30 = vadd.f32 1.0, %v5710_v34  ;;  %v2786_v6 = vmul.f32 0.5, %v2770_v4 }
 0x658   : > { %v5712_v29 = vpop.eup %5711 }
 0x659   : > { %v2771_v46 = vadd.f32 1.0, %v5712_v29  ;;  %v2784_v16 = vmul.f32 0.5, %v2768_v30  ;;  %v2802_v57 = vmul.f32 %v2786_v6, %v2654_v48  ;;  %v5590_v6 = vld [vmem:[%s8261_s6 + $0xa0] sm:$0xff]  }
 0x65a   : > { %v5714_v55 = vpop.eup %5713 }
 0x65b   : > { %v2769_v23 = vadd.f32 1.0, %v5714_v55  ;;  %v2787_v11 = vmul.f32 0.5, %v2771_v46  ;;  %v2800_v33 = vmul.f32 %v2784_v16, %v2646_v43  ;;  %v7454_v43 = vld [vmem:[%s8262_s7 + $0x1] ss:$0 sm:$0xff] }
 0x65d   : > { %v2785_v31 = vmul.f32 0.5, %v2769_v23  ;;  %v2803_v26 = vmul.f32 %v2787_v11, %v2657_v0  ;;  %v5589_v11 = vld [vmem:[%s8261_s6 + $0xa8] sm:$0xff]  }
 0x65f   : > { %v2801_v50 = vmul.f32 %v2785_v31, %v2649_v56  ;;  %v2811_v49 = vpack.c.bf16 %v2803_v26, %v2802_v57  ;;  %v5591_v31 = vld [vmem:[%s8261_s6 + $0x98] sm:$0xff]   ;;  %v5592_v26 = vld [vmem:[%s8261_s6 + $0x90] sm:$0xff]  }
 0x661   : > { %v2810_v19 = vpack.c.bf16 %v2801_v50, %v2800_v33  ;;  %v5593_v33 = vld [vmem:[%s8261_s6 + $0x88] sm:$0xff]  }
 0x663   : > { %5342 = vmatprep.mubr.bf16.mxu0 %v2810_v19  ;;  %v5594_v19 = vld [vmem:[%s8261_s6 + $0x80] sm:$0xff]  }
 0x664   : > { %5343 = vmatmul.mubr.bf16.gmra.mxu0 %v2811_v49 }
 0x67d   : > { %v5332_v25 = vpop.f32.mrf.mxu0 }
 0x67e   : > { %v2976_v37 = vadd.f32 %v5332_v25, %v7313_v52 }
 0x67f   : > { %v2911_v45 = vpop.f32.mrf.mxu0 }
 0x680   : > { %v2974_v38 = vadd.f32 %v2911_v45, %v7307_v41 }
 0x681   : > { %v5333_v61 = vpop.f32.mrf.mxu0 }
 0x682   : > { %v2977_v47 = vadd.f32 %v5333_v61, %v7304_v42  ;;  %v7461_v56 = vadd.f32 %v7454_v43, %v2974_v38  ;;  %v7467_v42 = vadd.f32 %v7454_v43, %v2976_v37 }
 0x683   : > { %v2914_v40 = vpop.f32.mrf.mxu0 }
 0x684   : > { %v2975_v48 = vadd.f32 %v2914_v40, %v7310_v28  ;;  %v7458_v0 = vadd.f32 %v7454_v43, %v2977_v47 }
 0x686   : > { %v7464_v41 = vadd.f32 %v7454_v43, %v2975_v48  ;;  %v3015_v20 = vpack.c.bf16 %v7458_v0, %v7467_v42 }
 0x688   : > { %v3014_v52 = vpack.c.bf16 %v7464_v41, %v7461_v56 }
 0x68a   : > { %5362 = vmatprep.mubr.bf16.mxu1 %v3014_v52 }
 0x68b   : > { %5363 = vmatmul.mubr.bf16.vlgmr.msra.gmra.mxu1 %v3015_v20 }
 0x6b4   : > { %v5336_v28 = vpop.f32.mrf.mxu0 }
 0x6b5   : > { %v2980_v30 = vadd.f32 %v5336_v28, %v7333_v60  ;;  %v5588_v60 = vld [vmem:[%s8261_s6 + $0xb0] sm:$0xff]  }
 0x6b6   : > { %v2927_v15 = vpop.f32.mrf.mxu0 }
 0x6b7   : > { %v2978_v63 = vadd.f32 %v2927_v15, %v7327_v2  ;;  %v7487_v16 = vadd.f32 %v7454_v43, %v2980_v30 }
 0x6b8   : > { %v5337_v10 = vpop.f32.mrf.mxu0 }
 0x6b9   : > { %v2981_v34 = vadd.f32 %v5337_v10, %v7324_v59  ;;  %v7481_v55 = vadd.f32 %v7454_v43, %v2978_v63 }
 0x6ba   : > { %v2930_v29 = vpop.f32.mrf.mxu0 }
 0x6bb   : > { %v2979_v4 = vadd.f32 %v2930_v29, %v7330_v24  ;;  %v7478_v46 = vadd.f32 %v7454_v43, %v2981_v34  ;;  %v5587_v24 = vld [vmem:[%s8261_s6 + $0xb8] sm:$0xff]  }
 0x6bc   : > { %5378 = vmatprep.subr.bf16.mxu0 %v5587_v24 }
 0x6bd   : > { %v7484_v23 = vadd.f32 %v7454_v43, %v2979_v4  ;;  %v3017_v2 = vpack.c.bf16 %v7478_v46, %v7487_v16  ;;  %5379 = vmatpush3.bf16.msra.mxu0 %v5587_v24 }
 0x6be   : > { %5380 = vmatprep.subr.bf16.mxu0 %v5588_v60 }
 0x6bf   : > { %v3016_v59 = vpack.c.bf16 %v7484_v23, %v7481_v55 }
 0x6c1   : > { %5366 = vmatprep.mubr.bf16.mxu1 %v3016_v59  ;;  %5381 = vmatpush3.bf16.msra.mxu0 %v5588_v60 }
 0x6c2   : > { %5367 = vmatmul.mubr.bf16.gmra.mxu1 %v3017_v2  ;;  %5382 = vmatprep.subr.bf16.mxu0 %v5589_v11 }
 0x6c5   : > { %5383 = vmatpush3.bf16.msra.mxu0 %v5589_v11 }
 0x6c6   : > { %5384 = vmatprep.subr.bf16.mxu0 %v5590_v6 }
 0x6c9   : > { %5385 = vmatpush3.bf16.msra.mxu0 %v5590_v6 }
 0x6ca   : > { %5386 = vmatprep.subr.bf16.mxu0 %v5591_v31 }
 0x6cd   : > { %5387 = vmatpush3.bf16.msra.mxu0 %v5591_v31 }
 0x6ce   : > { %5388 = vmatprep.subr.bf16.mxu0 %v5592_v26 }
 0x6d1   : > { %5389 = vmatpush3.bf16.msra.mxu0 %v5592_v26 }
 0x6d2   : > { %5390 = vmatprep.subr.bf16.mxu0 %v5593_v33 }
 0x6d5   : > { %5391 = vmatpush3.bf16.msra.mxu0 %v5593_v33 }
 0x6d6   : > { %5392 = vmatprep.subr.bf16.mxu0 %v5594_v19 }
 0x6d9   : > { %5393 = vmatpush3.bf16.msra.mxu0 %v5594_v19 }
 0x6ec   : > { %v5340_v50 = vpop.f32.mrf.mxu0 }
 0x6ed   : > { %v2984_v61 = vadd.f32 %v5340_v50, %v7377_v35 }
 0x6ee   : > { %v2943_v57 = vpop.f32.mrf.mxu0 }
 0x6ef   : > { %v2982_v25 = vadd.f32 %v2943_v57, %v7371_v53  ;;  %v7531_v53 = vadd.f32 %v7454_v43, %v2984_v61 }
 0x6f0   : > { %v5341_v49 = vpop.f32.mrf.mxu0 }
 0x6f1   : > { %v2985_v45 = vadd.f32 %v5341_v49, %v7368_v9  ;;  %v7525_v40 = vadd.f32 %v7454_v43, %v2982_v25 }
 0x6f2   : > { %v2946_v38 = vpop.f32.mrf.mxu0 }
 0x6f3   : > { %v2983_v47 = vadd.f32 %v2946_v38, %v7374_v36  ;;  %v7522_v37 = vadd.f32 %v7454_v43, %v2985_v45 }
 0x6f5   : > { %v7528_v48 = vadd.f32 %v7454_v43, %v2983_v47  ;;  %v3019_v35 = vpack.c.bf16 %v7522_v37, %v7531_v53 }
 0x6f7   : > { %v3018_v9 = vpack.c.bf16 %v7528_v48, %v7525_v40 }
 0x6f9   : > { %5370 = vmatprep.mubr.bf16.mxu1 %v3018_v9 }
 0x6fa   : > { %5371 = vmatmul.mubr.bf16.gmra.mxu1 %v3019_v35 }
 0x724   : > { %v5344_v36 = vpop.f32.mrf.mxu0 }
 0x725   : > { %v2988_v10 = vadd.f32 %v5344_v36, %v7397_v27 }
 0x726   : > { %v2959_v52 = vpop.f32.mrf.mxu0 }
 0x727   : > { %v2986_v28 = vadd.f32 %v2959_v52, %v7391_v5  ;;  %v7551_v59 = vadd.f32 %v7454_v43, %v2988_v10 }
 0x728   : > { %v5345_v20 = vpop.f32.mrf.mxu0 }
 0x729   : > { %v2989_v15 = vadd.f32 %v5345_v20, %v7388_v1  ;;  %v7545_v29 = vadd.f32 %v7454_v43, %v2986_v28 }
 0x72a   : > { %v2962_v63 = vpop.f32.mrf.mxu0 }
 0x72b   : > { %v2987_v34 = vadd.f32 %v2962_v63, %v7394_v17  ;;  %v7542_v30 = vadd.f32 %v7454_v43, %v2989_v15  ;;  %v7560_v17 = vld [vmem:[%s8260_s5 + $0x2] ss:$0 sm:$0xff] }
 0x72d   : > { %v7548_v4 = vadd.f32 %v7454_v43, %v2987_v34  ;;  %v3021_v5 = vpack.c.bf16 %v7542_v30, %v7551_v59 }
 0x72f   : > { %v3020_v1 = vpack.c.bf16 %v7548_v4, %v7545_v29 }
 0x731   : > { %5374 = vmatprep.mubr.bf16.mxu1 %v3020_v1 }
 0x732   : > { %5375 = vmatmul.mubr.bf16.gmra.mxu1 %v3021_v5 }
 0x74b   : > { %v5364_v27 = vpop.f32.mrf.mxu1 }
 0x74c   : > { %v3138_v2 = vadd.f32 %v5364_v27, %v7560_v17 }
 0x74d   : > { %v3129_v24 = vpop.f32.mrf.mxu1 }
 0x74e   : > { %v3194_v60 = vmul.f32 %v3138_v2, %v3138_v2  ;;  %v3130_v43 = vadd.f32 %v7560_v17, %v3129_v24 }
 0x74f   : > { %v5365_v11 = vpop.f32.mrf.mxu1 }
 0x750   : > { %v3210_v6 = vmul.f32 %v3194_v60, %v3138_v2  ;;  %v3192_v31 = vmul.f32 %v3130_v43, %v3130_v43  ;;  %v3141_v26 = vadd.f32 %v5365_v11, %v7560_v17 }
 0x751   : > { %v3132_v33 = vpop.f32.mrf.mxu1 }
 0x752   : > { %v3226_v50 = vmul.f32 0.044715, %v3210_v6  ;;  %v3208_v57 = vmul.f32 %v3192_v31, %v3130_v43  ;;  %v3195_v19 = vmul.f32 %v3141_v26, %v3141_v26  ;;  %v3133_v49 = vadd.f32 %v7560_v17, %v3132_v33 }
 0x754   : > { %v3242_v25 = vadd.f32 %v3226_v50, %v3138_v2  ;;  %v3224_v45 = vmul.f32 0.044715, %v3208_v57  ;;  %v3211_v61 = vmul.f32 %v3195_v19, %v3141_v26  ;;  %v3193_v38 = vmul.f32 %v3133_v49, %v3133_v49 }
 0x756   : > { %v3258_v47 = vmul.f32 0.7978846, %v3242_v25  ;;  %v3240_v9 = vadd.f32 %v3224_v45, %v3130_v43  ;;  %v3227_v35 = vmul.f32 0.044715, %v3211_v61  ;;  %v3209_v36 = vmul.f32 %v3193_v38, %v3133_v49 }
 0x758   : > { %v3256_v52 = vmul.f32 0.7978846, %v3240_v9  ;;  %v3243_v20 = vadd.f32 %v3227_v35, %v3141_v26  ;;  %v3225_v28 = vmul.f32 0.044715, %v3209_v36  ;;  %5715 = vtanh.f32 %v3258_v47 }
 0x75a   : > { %5717 = vtanh.f32 %v3256_v52  ;;  %v3259_v15 = vmul.f32 0.7978846, %v3243_v20  ;;  %v3241_v10 = vadd.f32 %v3225_v28, %v3133_v49 }
 0x75c   : > { %5719 = vtanh.f32 %v3259_v15  ;;  %v3257_v63 = vmul.f32 0.7978846, %v3241_v10 }
 0x75e   : > { %5721 = vtanh.f32 %v3257_v63 }
 0x765   : > { %v5716_v34 = vpop.eup %5715 }
 0x766   : > { %v3290_v24 = vadd.f32 1.0, %v5716_v34 }
 0x767   : > { %v5718_v1 = vpop.eup %5717 }
 0x768   : > { %v3288_v5 = vadd.f32 1.0, %v5718_v1  ;;  %v3306_v50 = vmul.f32 0.5, %v3290_v24 }
 0x769   : > { %v5720_v27 = vpop.eup %5719 }
 0x76a   : > { %v3291_v60 = vadd.f32 1.0, %v5720_v27  ;;  %v3304_v33 = vmul.f32 0.5, %v3288_v5  ;;  %v3322_v61 = vmul.f32 %v3306_v50, %v3138_v2 }
 0x76b   : > { %v5722_v11 = vpop.eup %5721 }
 0x76c   : > { %v3307_v6 = vmul.f32 0.5, %v3291_v60  ;;  %v3289_v31 = vadd.f32 1.0, %v5722_v11  ;;  %v3320_v25 = vmul.f32 %v3304_v33, %v3130_v43 }
 0x76e   : > { %v3305_v57 = vmul.f32 0.5, %v3289_v31  ;;  %v3323_v19 = vmul.f32 %v3307_v6, %v3141_v26 }
 0x770   : > { %v3321_v45 = vmul.f32 %v3305_v57, %v3133_v49  ;;  %v3337_v47 = vpack.c.bf16 %v3323_v19, %v3322_v61  ;;  %v5595_v61 = vld [vmem:[%s8259_s4 + $0xf8] sm:$0xff]  }
 0x771   : > { %5410 = vmatprep.subr.bf16.mxu1 %v5595_v61 }
 0x772   : > { %v3336_v38 = vpack.c.bf16 %v3321_v45, %v3320_v25  ;;  %5411 = vmatpush3.bf16.msra.mxu1 %v5595_v61 }
 0x774   : > { %5394 = vmatprep.mubr.bf16.mxu0 %v3336_v38  ;;  %v5596_v38 = vld [vmem:[%s8259_s4 + $0xf0] sm:$0xff]  }
 0x775   : > { %5395 = vmatmul.mubr.bf16.vlgmr.msra.gmra.mxu0 %v3337_v47  ;;  %5412 = vmatprep.subr.bf16.mxu1 %v5596_v38 }
 0x776   : > { %5413 = vmatpush3.bf16.msra.mxu1 %v5596_v38 }
 0x782   : > { %v5368_v9 = vpop.f32.mrf.mxu1 }
 0x783   : > { %v3154_v35 = vadd.f32 %v5368_v9, %v7560_v17 }
 0x784   : > { %v3145_v36 = vpop.f32.mrf.mxu1 }
 0x785   : > { %v3198_v52 = vmul.f32 %v3154_v35, %v3154_v35  ;;  %v3146_v20 = vadd.f32 %v7560_v17, %v3145_v36 }
 0x786   : > { %v5369_v28 = vpop.f32.mrf.mxu1 }
 0x787   : > { %v3214_v15 = vmul.f32 %v3198_v52, %v3154_v35  ;;  %v3196_v10 = vmul.f32 %v3146_v20, %v3146_v20  ;;  %v3157_v63 = vadd.f32 %v5369_v28, %v7560_v17 }
 0x788   : > { %v3148_v26 = vpop.f32.mrf.mxu1 }
 0x789   : > { %v3230_v43 = vmul.f32 0.044715, %v3214_v15  ;;  %v3212_v49 = vmul.f32 %v3196_v10, %v3146_v20  ;;  %v3199_v2 = vmul.f32 %v3157_v63, %v3157_v63  ;;  %v3149_v34 = vadd.f32 %v7560_v17, %v3148_v26  ;;  %v5597_v15 = vld [vmem:[%s8259_s4 + $0xe8] sm:$0xff]  }
 0x78a   : > { %5414 = vmatprep.subr.bf16.mxu1 %v5597_v15 }
 0x78b   : > { %v3246_v1 = vadd.f32 %v3230_v43, %v3154_v35  ;;  %v3228_v5 = vmul.f32 0.044715, %v3212_v49  ;;  %v3215_v27 = vmul.f32 %v3199_v2, %v3157_v63  ;;  %v3197_v24 = vmul.f32 %v3149_v34, %v3149_v34  ;;  %5415 = vmatpush3.bf16.msra.mxu1 %v5597_v15 }
 0x78d   : > { %v3262_v60 = vmul.f32 0.7978846, %v3246_v1  ;;  %v3244_v11 = vadd.f32 %v3228_v5, %v3146_v20  ;;  %v3231_v6 = vmul.f32 0.044715, %v3215_v27  ;;  %v3213_v31 = vmul.f32 %v3197_v24, %v3149_v34  ;;  %v5598_v5 = vld [vmem:[%s8259_s4 + $0xe0] sm:$0xff]  }
 0x78e   : > { %5416 = vmatprep.subr.bf16.mxu1 %v5598_v5 }
 0x78f   : > { %v3260_v33 = vmul.f32 0.7978846, %v3244_v11  ;;  %v3247_v50 = vadd.f32 %v3231_v6, %v3157_v63  ;;  %v3229_v57 = vmul.f32 0.044715, %v3213_v31  ;;  %5723 = vtanh.f32 %v3262_v60  ;;  %v5599_v31 = vld [vmem:[%s8259_s4 + $0xd8] sm:$0xff]   ;;  %5417 = vmatpush3.bf16.msra.mxu1 %v5598_v5 }
 0x790   : > { %5418 = vmatprep.subr.bf16.mxu1 %v5599_v31 }
 0x791   : > { %5725 = vtanh.f32 %v3260_v33  ;;  %v3263_v19 = vmul.f32 0.7978846, %v3247_v50  ;;  %v3245_v25 = vadd.f32 %v3229_v57, %v3149_v34 }
 0x793   : > { %5727 = vtanh.f32 %v3263_v19  ;;  %v3261_v45 = vmul.f32 0.7978846, %v3245_v25  ;;  %5419 = vmatpush3.bf16.msra.mxu1 %v5599_v31 }
 0x795   : > { %5729 = vtanh.f32 %v3261_v45  ;;  %v5602_v45 = vld [vmem:[%s8259_s4 + $0xc0] sm:$0xff]  }
 0x79c   : > { %v5724_v47 = vpop.eup %5723 }
 0x79d   : > { %v3294_v28 = vadd.f32 1.0, %v5724_v47 }
 0x79e   : > { %v5726_v9 = vpop.eup %5725 }
 0x79f   : > { %v3292_v36 = vadd.f32 1.0, %v5726_v9  ;;  %v3310_v1 = vmul.f32 0.5, %v3294_v28 }
 0x7a0   : > { %v5728_v52 = vpop.eup %5727 }
 0x7a1   : > { %v3295_v10 = vadd.f32 1.0, %v5728_v52  ;;  %v3308_v49 = vmul.f32 0.5, %v3292_v36  ;;  %v3326_v6 = vmul.f32 %v3310_v1, %v3154_v35  ;;  %v5601_v35 = vld [vmem:[%s8259_s4 + $0xc8] sm:$0xff]  }
 0x7a2   : > { %v5730_v26 = vpop.eup %5729 }
 0x7a3   : > { %v3293_v43 = vadd.f32 1.0, %v5730_v26  ;;  %v3311_v2 = vmul.f32 0.5, %v3295_v10  ;;  %v3324_v60 = vmul.f32 %v3308_v49, %v3146_v20 }
 0x7a5   : > { %v3309_v27 = vmul.f32 0.5, %v3293_v43  ;;  %v3327_v24 = vmul.f32 %v3311_v2, %v3157_v63  ;;  %v5600_v63 = vld [vmem:[%s8259_s4 + $0xd0] sm:$0xff]  }
 0x7a6   : > { %5420 = vmatprep.subr.bf16.mxu1 %v5600_v63 }
 0x7a7   : > { %v3325_v11 = vmul.f32 %v3309_v27, %v3149_v34  ;;  %v3339_v50 = vpack.c.bf16 %v3327_v24, %v3326_v6  ;;  %5421 = vmatpush3.bf16.msra.mxu1 %v5600_v63 }
 0x7a8   : > { %5422 = vmatprep.subr.bf16.mxu1 %v5601_v35 }
 0x7a9   : > { %v3338_v33 = vpack.c.bf16 %v3325_v11, %v3324_v60 }
 0x7ab   : > { %5398 = vmatprep.mubr.bf16.mxu0 %v3338_v33  ;;  %5423 = vmatpush3.bf16.msra.mxu1 %v5601_v35 }
 0x7ac   : > { %5399 = vmatmul.mubr.bf16.gmra.mxu0 %v3339_v50  ;;  %5424 = vmatprep.subr.bf16.mxu1 %v5602_v45 }
 0x7af   : > { %5425 = vmatpush3.bf16.msra.mxu1 %v5602_v45 }
 0x7ba   : > { %v5372_v20 = vpop.f32.mrf.mxu1 }
 0x7bb   : > { %v3170_v34 = vadd.f32 %v5372_v20, %v7560_v17 }
 0x7bc   : > { %v3161_v57 = vpop.f32.mrf.mxu1 }
 0x7bd   : > { %v3202_v19 = vmul.f32 %v3170_v34, %v3170_v34  ;;  %v3162_v25 = vadd.f32 %v7560_v17, %v3161_v57 }
 0x7be   : > { %v5373_v61 = vpop.f32.mrf.mxu1 }
 0x7bf   : > { %v3218_v38 = vmul.f32 %v3202_v19, %v3170_v34  ;;  %v3200_v47 = vmul.f32 %v3162_v25, %v3162_v25  ;;  %v3173_v9 = vadd.f32 %v5373_v61, %v7560_v17 }
 0x7c0   : > { %v3164_v36 = vpop.f32.mrf.mxu1 }
 0x7c1   : > { %v3234_v52 = vmul.f32 0.044715, %v3218_v38  ;;  %v3216_v28 = vmul.f32 %v3200_v47, %v3162_v25  ;;  %v3203_v15 = vmul.f32 %v3173_v9, %v3173_v9  ;;  %v3165_v10 = vadd.f32 %v7560_v17, %v3164_v36 }
 0x7c3   : > { %v3250_v26 = vadd.f32 %v3234_v52, %v3170_v34  ;;  %v3232_v43 = vmul.f32 0.044715, %v3216_v28  ;;  %v3219_v49 = vmul.f32 %v3203_v15, %v3173_v9  ;;  %v3201_v2 = vmul.f32 %v3165_v10, %v3165_v10 }
 0x7c5   : > { %v3266_v1 = vmul.f32 0.7978846, %v3250_v26  ;;  %v3248_v5 = vadd.f32 %v3232_v43, %v3162_v25  ;;  %v3235_v27 = vmul.f32 0.044715, %v3219_v49  ;;  %v3217_v24 = vmul.f32 %v3201_v2, %v3165_v10 }
 0x7c7   : > { %v3264_v60 = vmul.f32 0.7978846, %v3248_v5  ;;  %v3251_v11 = vadd.f32 %v3235_v27, %v3173_v9  ;;  %v3233_v6 = vmul.f32 0.044715, %v3217_v24  ;;  %5731 = vtanh.f32 %v3266_v1 }
 0x7c9   : > { %5733 = vtanh.f32 %v3264_v60  ;;  %v3267_v31 = vmul.f32 0.7978846, %v3251_v11  ;;  %v3249_v33 = vadd.f32 %v3233_v6, %v3165_v10 }
 0x7cb   : > { %5735 = vtanh.f32 %v3267_v31  ;;  %v3265_v50 = vmul.f32 0.7978846, %v3249_v33 }
 0x7cd   : > { %5737 = vtanh.f32 %v3265_v50 }
 0x7d4   : > { %v5732_v63 = vpop.eup %5731 }
 0x7d5   : > { %v3298_v19 = vadd.f32 1.0, %v5732_v63 }
 0x7d6   : > { %v5734_v35 = vpop.eup %5733 }
 0x7d7   : > { %v3296_v20 = vadd.f32 1.0, %v5734_v35  ;;  %v3314_v52 = vmul.f32 0.5, %v3298_v19 }
 0x7d8   : > { %v5736_v57 = vpop.eup %5735 }
 0x7d9   : > { %v3299_v45 = vadd.f32 1.0, %v5736_v57  ;;  %v3312_v47 = vmul.f32 0.5, %v3296_v20  ;;  %v3330_v49 = vmul.f32 %v3314_v52, %v3170_v34 }
 0x7da   : > { %v5738_v61 = vpop.eup %5737 }
 0x7db   : > { %v3297_v38 = vadd.f32 1.0, %v5738_v61  ;;  %v3315_v36 = vmul.f32 0.5, %v3299_v45  ;;  %v3328_v26 = vmul.f32 %v3312_v47, %v3162_v25 }
 0x7dd   : > { %v3313_v28 = vmul.f32 0.5, %v3297_v38  ;;  %v3331_v15 = vmul.f32 %v3315_v36, %v3173_v9 }
 0x7df   : > { %v3329_v43 = vmul.f32 %v3313_v28, %v3165_v10  ;;  %v3341_v1 = vpack.c.bf16 %v3331_v15, %v3330_v49 }
 0x7e1   : > { %v3340_v2 = vpack.c.bf16 %v3329_v43, %v3328_v26 }
 0x7e3   : > { %5402 = vmatprep.mubr.bf16.mxu0 %v3340_v2 }
 0x7e4   : > { %5403 = vmatmul.mubr.bf16.gmra.mxu0 %v3341_v1 }
 0x7f2   : > { %v5376_v5 = vpop.f32.mrf.mxu1 }
 0x7f3   : > { %v3186_v27 = vadd.f32 %v5376_v5, %v7560_v17 }
 0x7f4   : > { %v3177_v24 = vpop.f32.mrf.mxu1 }
 0x7f5   : > { %v3206_v60 = vmul.f32 %v3186_v27, %v3186_v27  ;;  %v3178_v11 = vadd.f32 %v7560_v17, %v3177_v24 }
 0x7f6   : > { %v5377_v6 = vpop.f32.mrf.mxu1 }
 0x7f7   : > { %v3222_v31 = vmul.f32 %v3206_v60, %v3186_v27  ;;  %v3204_v33 = vmul.f32 %v3178_v11, %v3178_v11  ;;  %v3189_v50 = vadd.f32 %v5377_v6, %v7560_v17 }
 0x7f8   : > { %v3180_v9 = vpop.f32.mrf.mxu1 }
 0x7f9   : > { %v3238_v25 = vmul.f32 0.044715, %v3222_v31  ;;  %v3220_v10 = vmul.f32 %v3204_v33, %v3178_v11  ;;  %v3207_v34 = vmul.f32 %v3189_v50, %v3189_v50  ;;  %v3181_v63 = vadd.f32 %v7560_v17, %v3180_v9 }
 0x7fb   : > { %v3254_v35 = vadd.f32 %v3238_v25, %v3186_v27  ;;  %v3236_v20 = vmul.f32 0.044715, %v3220_v10  ;;  %v3223_v57 = vmul.f32 %v3207_v34, %v3189_v50  ;;  %v3205_v19 = vmul.f32 %v3181_v63, %v3181_v63 }
 0x7fd   : > { %v3270_v45 = vmul.f32 0.7978846, %v3254_v35  ;;  %v3252_v61 = vadd.f32 %v3236_v20, %v3178_v11  ;;  %v3239_v38 = vmul.f32 0.044715, %v3223_v57  ;;  %v3221_v47 = vmul.f32 %v3205_v19, %v3181_v63 }
 0x7ff   : > { %v3268_v36 = vmul.f32 0.7978846, %v3252_v61  ;;  %v3255_v52 = vadd.f32 %v3239_v38, %v3189_v50  ;;  %v3237_v28 = vmul.f32 0.044715, %v3221_v47  ;;  %5739 = vtanh.f32 %v3270_v45 }
 0x801   : > { %5741 = vtanh.f32 %v3268_v36  ;;  %v3271_v15 = vmul.f32 0.7978846, %v3255_v52  ;;  %v3253_v26 = vadd.f32 %v3237_v28, %v3181_v63 }
 0x803   : > { %5743 = vtanh.f32 %v3271_v15  ;;  %v3269_v43 = vmul.f32 0.7978846, %v3253_v26 }
 0x805   : > { %5745 = vtanh.f32 %v3269_v43 }
 0x80c   : > { %v5740_v49 = vpop.eup %5739 }
 0x80d   : > { %v3302_v5 = vadd.f32 1.0, %v5740_v49 }
 0x80e   : > { %v5742_v17 = vpop.eup %5741 }
 0x80f   : > { %v3300_v2 = vadd.f32 1.0, %v5742_v17  ;;  %v3318_v9 = vmul.f32 0.5, %v3302_v5 }
 0x810   : > { %v5744_v1 = vpop.eup %5743 }
 0x811   : > { %v3303_v24 = vadd.f32 1.0, %v5744_v1  ;;  %v3316_v31 = vmul.f32 0.5, %v3300_v2  ;;  %v3334_v20 = vmul.f32 %v3318_v9, %v3186_v27  ;;  %v5606_v9 = vld [vmem:[%s8261_s6 + $0xe0] sm:$0xff]  }
 0x812   : > { %v5746_v60 = vpop.eup %5745 }
 0x813   : > { %v3301_v6 = vadd.f32 1.0, %v5746_v60  ;;  %v3319_v33 = vmul.f32 0.5, %v3303_v24  ;;  %v3332_v34 = vmul.f32 %v3316_v31, %v3178_v11  ;;  %v7608_v11 = vld [vmem:[%s8262_s7 + $0x2] ss:$0 sm:$0xff] }
 0x815   : > { %v3317_v25 = vmul.f32 0.5, %v3301_v6  ;;  %v3335_v10 = vmul.f32 %v3319_v33, %v3189_v50  ;;  %v5605_v33 = vld [vmem:[%s8261_s6 + $0xe8] sm:$0xff]  }
 0x817   : > { %v3333_v35 = vmul.f32 %v3317_v25, %v3181_v63  ;;  %v3343_v19 = vpack.c.bf16 %v3335_v10, %v3334_v20  ;;  %v5607_v25 = vld [vmem:[%s8261_s6 + $0xd8] sm:$0xff]   ;;  %v5608_v10 = vld [vmem:[%s8261_s6 + $0xd0] sm:$0xff]  }
 0x819   : > { %v3342_v57 = vpack.c.bf16 %v3333_v35, %v3332_v34  ;;  %v5609_v34 = vld [vmem:[%s8261_s6 + $0xc8] sm:$0xff]  }
 0x81b   : > { %5406 = vmatprep.mubr.bf16.mxu0 %v3342_v57  ;;  %v5610_v57 = vld [vmem:[%s8261_s6 + $0xc0] sm:$0xff]  }
 0x81c   : > { %5407 = vmatmul.mubr.bf16.gmra.mxu0 %v3343_v19 }
 0x835   : > { %v5396_v45 = vpop.f32.mrf.mxu0 }
 0x836   : > { %v3508_v52 = vadd.f32 %v5396_v45, %v7467_v42 }
 0x837   : > { %v3443_v61 = vpop.f32.mrf.mxu0 }
 0x838   : > { %v3506_v47 = vadd.f32 %v3443_v61, %v7461_v56 }
 0x839   : > { %v5397_v38 = vpop.f32.mrf.mxu0 }
 0x83a   : > { %v3509_v36 = vadd.f32 %v5397_v38, %v7458_v0  ;;  %v7615_v63 = vadd.f32 %v7608_v11, %v3506_v47  ;;  %v7621_v0 = vadd.f32 %v7608_v11, %v3508_v52 }
 0x83b   : > { %v3446_v28 = vpop.f32.mrf.mxu0 }
 0x83c   : > { %v3507_v27 = vadd.f32 %v3446_v28, %v7464_v41  ;;  %v7612_v50 = vadd.f32 %v7608_v11, %v3509_v36 }
 0x83e   : > { %v7618_v56 = vadd.f32 %v7608_v11, %v3507_v27  ;;  %v3547_v15 = vpack.c.bf16 %v7612_v50, %v7621_v0 }
 0x840   : > { %v3546_v42 = vpack.c.bf16 %v7618_v56, %v7615_v63 }
 0x842   : > { %5426 = vmatprep.mubr.bf16.mxu1 %v3546_v42 }
 0x843   : > { %5427 = vmatmul.mubr.bf16.vlgmr.msra.gmra.mxu1 %v3547_v15 }
 0x86c   : > { %v5400_v41 = vpop.f32.mrf.mxu0 }
 0x86d   : > { %v3512_v2 = vadd.f32 %v5400_v41, %v7487_v16  ;;  %v5604_v16 = vld [vmem:[%s8261_s6 + $0xf0] sm:$0xff]  }
 0x86e   : > { %v3459_v26 = vpop.f32.mrf.mxu0 }
 0x86f   : > { %v3510_v49 = vadd.f32 %v3459_v26, %v7481_v55  ;;  %v7641_v31 = vadd.f32 %v7608_v11, %v3512_v2 }
 0x870   : > { %v5401_v43 = vpop.f32.mrf.mxu0 }
 0x871   : > { %v3513_v17 = vadd.f32 %v5401_v43, %v7478_v46  ;;  %v7635_v60 = vadd.f32 %v7608_v11, %v3510_v49 }
 0x872   : > { %v3462_v1 = vpop.f32.mrf.mxu0 }
 0x873   : > { %v3511_v5 = vadd.f32 %v3462_v1, %v7484_v23  ;;  %v7632_v24 = vadd.f32 %v7608_v11, %v3513_v17  ;;  %v5603_v23 = vld [vmem:[%s8261_s6 + $0xf8] sm:$0xff]  }
 0x874   : > { %5442 = vmatprep.subr.bf16.mxu0 %v5603_v23 }
 0x875   : > { %v7638_v6 = vadd.f32 %v7608_v11, %v3511_v5  ;;  %v3549_v55 = vpack.c.bf16 %v7632_v24, %v7641_v31  ;;  %5443 = vmatpush3.bf16.msra.mxu0 %v5603_v23 }
 0x876   : > { %5444 = vmatprep.subr.bf16.mxu0 %v5604_v16 }
 0x877   : > { %v3548_v46 = vpack.c.bf16 %v7638_v6, %v7635_v60 }
 0x879   : > { %5430 = vmatprep.mubr.bf16.mxu1 %v3548_v46  ;;  %5445 = vmatpush3.bf16.msra.mxu0 %v5604_v16 }
 0x87a   : > { %5431 = vmatmul.mubr.bf16.gmra.mxu1 %v3549_v55  ;;  %5446 = vmatprep.subr.bf16.mxu0 %v5605_v33 }
 0x87d   : > { %5447 = vmatpush3.bf16.msra.mxu0 %v5605_v33 }
 0x87e   : > { %5448 = vmatprep.subr.bf16.mxu0 %v5606_v9 }
 0x881   : > { %5449 = vmatpush3.bf16.msra.mxu0 %v5606_v9 }
 0x882   : > { %5450 = vmatprep.subr.bf16.mxu0 %v5607_v25 }
 0x885   : > { %5451 = vmatpush3.bf16.msra.mxu0 %v5607_v25 }
 0x886   : > { %5452 = vmatprep.subr.bf16.mxu0 %v5608_v10 }
 0x889   : > { %5453 = vmatpush3.bf16.msra.mxu0 %v5608_v10 }
 0x88a   : > { %5454 = vmatprep.subr.bf16.mxu0 %v5609_v34 }
 0x88d   : > { %5455 = vmatpush3.bf16.msra.mxu0 %v5609_v34 }
 0x88e   : > { %5456 = vmatprep.subr.bf16.mxu0 %v5610_v57 }
 0x891   : > { %5457 = vmatpush3.bf16.msra.mxu0 %v5610_v57 }
 0x8a4   : > { %v5404_v35 = vpop.f32.mrf.mxu0 }
 0x8a5   : > { %v3516_v38 = vadd.f32 %v5404_v35, %v7531_v53 }
 0x8a6   : > { %v3475_v20 = vpop.f32.mrf.mxu0 }
 0x8a7   : > { %v3514_v45 = vadd.f32 %v3475_v20, %v7525_v40  ;;  %v7685_v40 = vadd.f32 %v7608_v11, %v3516_v38 }
 0x8a8   : > { %v5405_v19 = vpop.f32.mrf.mxu0 }
 0x8a9   : > { %v3517_v61 = vadd.f32 %v5405_v19, %v7522_v37  ;;  %v7679_v28 = vadd.f32 %v7608_v11, %v3514_v45 }
 0x8aa   : > { %v3478_v47 = vpop.f32.mrf.mxu0 }
 0x8ab   : > { %v3515_v36 = vadd.f32 %v3478_v47, %v7528_v48  ;;  %v7676_v52 = vadd.f32 %v7608_v11, %v3517_v61 }
 0x8ad   : > { %v7682_v27 = vadd.f32 %v7608_v11, %v3515_v36  ;;  %v3551_v53 = vpack.c.bf16 %v7676_v52, %v7685_v40 }
 0x8af   : > { %v3550_v37 = vpack.c.bf16 %v7682_v27, %v7679_v28 }
 0x8b1   : > { %5434 = vmatprep.mubr.bf16.mxu1 %v3550_v37 }
 0x8b2   : > { %5435 = vmatmul.mubr.bf16.gmra.mxu1 %v3551_v53 }
 0x8dc   : > { %v5408_v48 = vpop.f32.mrf.mxu0 }
 0x8dd   : > { %v3520_v43 = vadd.f32 %v5408_v48, %v7551_v59 }
 0x8de   : > { %v3491_v42 = vpop.f32.mrf.mxu0 }
 0x8df   : > { %v3518_v41 = vadd.f32 %v3491_v42, %v7545_v29  ;;  %v7705_v46 = vadd.f32 %v7608_v11, %v3520_v43 }
 0x8e0   : > { %v5409_v15 = vpop.f32.mrf.mxu0 }
 0x8e1   : > { %v3521_v26 = vadd.f32 %v5409_v15, %v7542_v30  ;;  %v7699_v1 = vadd.f32 %v7608_v11, %v3518_v41 }
 0x8e2   : > { %v3494_v49 = vpop.f32.mrf.mxu0 }
 0x8e3   : > { %v3519_v17 = vadd.f32 %v3494_v49, %v7548_v4  ;;  %v7696_v2 = vadd.f32 %v7608_v11, %v3521_v26  ;;  %v7714_v4 = vld [vmem:[%s8260_s5 + $0x3] ss:$0 sm:$0xff] }
 0x8e5   : > { %v7702_v5 = vadd.f32 %v7608_v11, %v3519_v17  ;;  %v3553_v29 = vpack.c.bf16 %v7696_v2, %v7705_v46 }
 0x8e7   : > { %v3552_v30 = vpack.c.bf16 %v7702_v5, %v7699_v1 }
 0x8e9   : > { %5438 = vmatprep.mubr.bf16.mxu1 %v3552_v30 }
 0x8ea   : > { %5439 = vmatmul.mubr.bf16.gmra.mxu1 %v3553_v29 }
 0x903   : > { %v5428_v59 = vpop.f32.mrf.mxu1 }
 0x904   : > { %v3670_v55 = vadd.f32 %v5428_v59, %v7714_v4 }
 0x905   : > { %v3661_v23 = vpop.f32.mrf.mxu1 }
 0x906   : > { %v3726_v16 = vmul.f32 %v3670_v55, %v3670_v55  ;;  %v3662_v11 = vadd.f32 %v7714_v4, %v3661_v23 }
 0x907   : > { %v5429_v33 = vpop.f32.mrf.mxu1 }
 0x908   : > { %v3742_v9 = vmul.f32 %v3726_v16, %v3670_v55  ;;  %v3724_v25 = vmul.f32 %v3662_v11, %v3662_v11  ;;  %v3673_v10 = vadd.f32 %v5429_v33, %v7714_v4 }
 0x909   : > { %v3664_v34 = vpop.f32.mrf.mxu1 }
 0x90a   : > { %v3758_v35 = vmul.f32 0.044715, %v3742_v9  ;;  %v3740_v20 = vmul.f32 %v3724_v25, %v3662_v11  ;;  %v3727_v57 = vmul.f32 %v3673_v10, %v3673_v10  ;;  %v3665_v19 = vadd.f32 %v7714_v4, %v3664_v34 }
 0x90c   : > { %v3774_v45 = vadd.f32 %v3758_v35, %v3670_v55  ;;  %v3756_v61 = vmul.f32 0.044715, %v3740_v20  ;;  %v3743_v38 = vmul.f32 %v3727_v57, %v3673_v10  ;;  %v3725_v47 = vmul.f32 %v3665_v19, %v3665_v19 }
 0x90e   : > { %v3790_v36 = vmul.f32 0.7978846, %v3774_v45  ;;  %v3772_v37 = vadd.f32 %v3756_v61, %v3662_v11  ;;  %v3759_v53 = vmul.f32 0.044715, %v3743_v38  ;;  %v3741_v48 = vmul.f32 %v3725_v47, %v3665_v19 }
 0x910   : > { %v3788_v42 = vmul.f32 0.7978846, %v3772_v37  ;;  %v3775_v15 = vadd.f32 %v3759_v53, %v3673_v10  ;;  %v3757_v41 = vmul.f32 0.044715, %v3741_v48  ;;  %5747 = vtanh.f32 %v3790_v36 }
 0x912   : > { %5749 = vtanh.f32 %v3788_v42  ;;  %v3791_v26 = vmul.f32 0.7978846, %v3775_v15  ;;  %v3773_v43 = vadd.f32 %v3757_v41, %v3665_v19 }
 0x914   : > { %5751 = vtanh.f32 %v3791_v26  ;;  %v3789_v49 = vmul.f32 0.7978846, %v3773_v43 }
 0x916   : > { %5753 = vtanh.f32 %v3789_v49 }
 0x91d   : > { %v5748_v17 = vpop.eup %5747 }
 0x91e   : > { %v3822_v23 = vadd.f32 1.0, %v5748_v17 }
 0x91f   : > { %v5750_v30 = vpop.eup %5749 }
 0x920   : > { %v3820_v29 = vadd.f32 1.0, %v5750_v30  ;;  %v3838_v35 = vmul.f32 0.5, %v3822_v23 }
 0x921   : > { %v5752_v59 = vpop.eup %5751 }
 0x922   : > { %v3823_v16 = vadd.f32 1.0, %v5752_v59  ;;  %v3836_v34 = vmul.f32 0.5, %v3820_v29  ;;  %v3854_v38 = vmul.f32 %v3838_v35, %v3670_v55 }
 0x923   : > { %v5754_v33 = vpop.eup %5753 }
 0x924   : > { %v3839_v9 = vmul.f32 0.5, %v3823_v16  ;;  %v3821_v25 = vadd.f32 1.0, %v5754_v33  ;;  %v3852_v45 = vmul.f32 %v3836_v34, %v3662_v11 }
 0x926   : > { %v3837_v20 = vmul.f32 0.5, %v3821_v25  ;;  %v3855_v57 = vmul.f32 %v3839_v9, %v3673_v10 }
 0x928   : > { %v3853_v61 = vmul.f32 %v3837_v20, %v3665_v19  ;;  %v3869_v36 = vpack.c.bf16 %v3855_v57, %v3854_v38  ;;  %v5611_v38 = vld [vmem:[%s8263_s8 + $0x38] sm:$0xff]  }
 0x929   : > { %5474 = vmatprep.subr.bf16.mxu0 %v5611_v38  ;;  %5506 = vmatprep.subr.bf16.mxu1 %v5611_v38 }
 0x92a   : > { %v3868_v47 = vpack.c.bf16 %v3853_v61, %v3852_v45  ;;  %5514 = vmatpush3.bf16.msra.mxu1 %v5611_v38 }
 0x92c   : > { %5458 = vmatprep.mubr.bf16.mxu0 %v3868_v47  ;;  %v5612_v47 = vld [vmem:[%s8263_s8 + $0x30] sm:$0xff]  }
 0x92d   : > { %5459 = vmatmul.mubr.bf16.vlgmr.msra.gmra.mxu0 %v3869_v36  ;;  %5507 = vmatprep.subr.bf16.mxu1 %v5612_v47 }
 0x92e   : > { %5475 = vmatpush3.bf16.msra.mxu0 %v5611_v38  ;;  %5515 = vmatpush3.bf16.msra.mxu1 %v5612_v47 }
 0x92f   : > { %5476 = vmatprep.subr.bf16.mxu0 %v5612_v47 }
 0x932   : > { %5477 = vmatpush3.bf16.msra.mxu0 %v5612_v47 }
 0x93a   : > { %v5432_v37 = vpop.f32.mrf.mxu1 }
 0x93b   : > { %v3686_v53 = vadd.f32 %v5432_v37, %v7714_v4 }
 0x93c   : > { %v3677_v48 = vpop.f32.mrf.mxu1 }
 0x93d   : > { %v3730_v42 = vmul.f32 %v3686_v53, %v3686_v53  ;;  %v3678_v15 = vadd.f32 %v7714_v4, %v3677_v48 }
 0x93e   : > { %v5433_v41 = vpop.f32.mrf.mxu1 }
 0x93f   : > { %v3746_v26 = vmul.f32 %v3730_v42, %v3686_v53  ;;  %v3728_v43 = vmul.f32 %v3678_v15, %v3678_v15  ;;  %v3689_v49 = vadd.f32 %v5433_v41, %v7714_v4 }
 0x940   : > { %v3680_v10 = vpop.f32.mrf.mxu1 }
 0x941   : > { %v3762_v11 = vmul.f32 0.044715, %v3746_v26  ;;  %v3744_v19 = vmul.f32 %v3728_v43, %v3678_v15  ;;  %v3731_v55 = vmul.f32 %v3689_v49, %v3689_v49  ;;  %v3681_v17 = vadd.f32 %v7714_v4, %v3680_v10  ;;  %v5613_v26 = vld [vmem:[%s8263_s8 + $0x28] sm:$0xff]  }
 0x942   : > { %5478 = vmatprep.subr.bf16.mxu0 %v5613_v26  ;;  %5508 = vmatprep.subr.bf16.mxu1 %v5613_v26 }
 0x943   : > { %v3778_v30 = vadd.f32 %v3762_v11, %v3686_v53  ;;  %v3760_v29 = vmul.f32 0.044715, %v3744_v19  ;;  %v3747_v59 = vmul.f32 %v3731_v55, %v3689_v49  ;;  %v3729_v23 = vmul.f32 %v3681_v17, %v3681_v17  ;;  %5479 = vmatpush3.bf16.msra.mxu0 %v5613_v26  ;;  %5516 = vmatpush3.bf16.msra.mxu1 %v5613_v26 }
 0x945   : > { %v3794_v16 = vmul.f32 0.7978846, %v3778_v30  ;;  %v3776_v33 = vadd.f32 %v3760_v29, %v3678_v15  ;;  %v3763_v9 = vmul.f32 0.044715, %v3747_v59  ;;  %v3745_v25 = vmul.f32 %v3729_v23, %v3681_v17  ;;  %v5614_v29 = vld [vmem:[%s8263_s8 + $0x20] sm:$0xff]  }
 0x946   : > { %5480 = vmatprep.subr.bf16.mxu0 %v5614_v29  ;;  %5509 = vmatprep.subr.bf16.mxu1 %v5614_v29 }
 0x947   : > { %v3792_v34 = vmul.f32 0.7978846, %v3776_v33  ;;  %v3779_v35 = vadd.f32 %v3763_v9, %v3689_v49  ;;  %v3761_v20 = vmul.f32 0.044715, %v3745_v25  ;;  %5755 = vtanh.f32 %v3794_v16  ;;  %v5615_v25 = vld [vmem:[%s8263_s8 + $0x18] sm:$0xff]   ;;  %5481 = vmatpush3.bf16.msra.mxu0 %v5614_v29  ;;  %5517 = vmatpush3.bf16.msra.mxu1 %v5614_v29 }
 0x948   : > { %5482 = vmatprep.subr.bf16.mxu0 %v5615_v25  ;;  %5510 = vmatprep.subr.bf16.mxu1 %v5615_v25 }
 0x949   : > { %5757 = vtanh.f32 %v3792_v34  ;;  %v3795_v57 = vmul.f32 0.7978846, %v3779_v35  ;;  %v3777_v45 = vadd.f32 %v3761_v20, %v3681_v17 }
 0x94b   : > { %5759 = vtanh.f32 %v3795_v57  ;;  %v3793_v61 = vmul.f32 0.7978846, %v3777_v45  ;;  %5483 = vmatpush3.bf16.msra.mxu0 %v5615_v25  ;;  %5518 = vmatpush3.bf16.msra.mxu1 %v5615_v25 }
 0x94d   : > { %5761 = vtanh.f32 %v3793_v61  ;;  %v5618_v61 = vld [vmem:[%s8263_s8] sm:$0xff]  }
 0x954   : > { %v5756_v36 = vpop.eup %5755 }
 0x955   : > { %v3826_v41 = vadd.f32 1.0, %v5756_v36 }
 0x956   : > { %v5758_v37 = vpop.eup %5757 }
 0x957   : > { %v3824_v48 = vadd.f32 1.0, %v5758_v37  ;;  %v3842_v30 = vmul.f32 0.5, %v3826_v41 }
 0x958   : > { %v5760_v42 = vpop.eup %5759 }
 0x959   : > { %v3827_v43 = vadd.f32 1.0, %v5760_v42  ;;  %v3840_v19 = vmul.f32 0.5, %v3824_v48  ;;  %v3858_v9 = vmul.f32 %v3842_v30, %v3686_v53  ;;  %v5616_v53 = vld [vmem:[%s8263_s8 + $0x10] sm:$0xff]  }
 0x95a   : > { %v5762_v10 = vpop.eup %5761  ;;  %5484 = vmatprep.subr.bf16.mxu0 %v5616_v53  ;;  %5511 = vmatprep.subr.bf16.mxu1 %v5616_v53 }
 0x95b   : > { %v3825_v11 = vadd.f32 1.0, %v5762_v10  ;;  %v3843_v55 = vmul.f32 0.5, %v3827_v43  ;;  %v3856_v16 = vmul.f32 %v3840_v19, %v3678_v15  ;;  %5485 = vmatpush3.bf16.msra.mxu0 %v5616_v53  ;;  %5519 = vmatpush3.bf16.msra.mxu1 %v5616_v53  ;;  %v5617_v15 = vld [vmem:[%s8263_s8 + $0x8] sm:$0xff]  }
 0x95c   : > { %5486 = vmatprep.subr.bf16.mxu0 %v5617_v15  ;;  %5512 = vmatprep.subr.bf16.mxu1 %v5617_v15 }
 0x95d   : > { %v3841_v59 = vmul.f32 0.5, %v3825_v11  ;;  %v3859_v23 = vmul.f32 %v3843_v55, %v3689_v49 }
 0x95f   : > { %v3857_v33 = vmul.f32 %v3841_v59, %v3681_v17  ;;  %v3871_v35 = vpack.c.bf16 %v3859_v23, %v3858_v9  ;;  %5487 = vmatpush3.bf16.msra.mxu0 %v5617_v15  ;;  %5520 = vmatpush3.bf16.msra.mxu1 %v5617_v15 }
 0x960   : > { %5488 = vmatprep.subr.bf16.mxu0 %v5618_v61  ;;  %5513 = vmatprep.subr.bf16.mxu1 %v5618_v61 }
 0x961   : > { %v3870_v34 = vpack.c.bf16 %v3857_v33, %v3856_v16 }
 0x963   : > { %5462 = vmatprep.mubr.bf16.mxu0 %v3870_v34  ;;  %5489 = vmatpush3.bf16.msra.mxu0 %v5618_v61 }
 0x964   : > { %5463 = vmatmul.mubr.bf16.gmra.mxu0 %v3871_v35  ;;  %5521 = vmatpush3.bf16.msra.mxu1 %v5618_v61 }
 0x972   : > { %v5436_v49 = vpop.f32.mrf.mxu1 }
 0x973   : > { %v3702_v17 = vadd.f32 %v5436_v49, %v7714_v4 }
 0x974   : > { %v3693_v20 = vpop.f32.mrf.mxu1 }
 0x975   : > { %v3734_v57 = vmul.f32 %v3702_v17, %v3702_v17  ;;  %v3694_v45 = vadd.f32 %v7714_v4, %v3693_v20 }
 0x976   : > { %v5437_v38 = vpop.f32.mrf.mxu1 }
 0x977   : > { %v3750_v47 = vmul.f32 %v3734_v57, %v3702_v17  ;;  %v3732_v36 = vmul.f32 %v3694_v45, %v3694_v45  ;;  %v3705_v37 = vadd.f32 %v5437_v38, %v7714_v4 }
 0x978   : > { %v3696_v48 = vpop.f32.mrf.mxu1 }
 0x979   : > { %v3766_v42 = vmul.f32 0.044715, %v3750_v47  ;;  %v3748_v41 = vmul.f32 %v3732_v36, %v3694_v45  ;;  %v3735_v26 = vmul.f32 %v3705_v37, %v3705_v37  ;;  %v3697_v43 = vadd.f32 %v7714_v4, %v3696_v48 }
 0x97b   : > { %v3782_v10 = vadd.f32 %v3766_v42, %v3702_v17  ;;  %v3764_v11 = vmul.f32 0.044715, %v3748_v41  ;;  %v3751_v19 = vmul.f32 %v3735_v26, %v3705_v37  ;;  %v3733_v55 = vmul.f32 %v3697_v43, %v3697_v43 }
 0x97d   : > { %v3798_v30 = vmul.f32 0.7978846, %v3782_v10  ;;  %v3780_v29 = vadd.f32 %v3764_v11, %v3694_v45  ;;  %v3767_v59 = vmul.f32 0.044715, %v3751_v19  ;;  %v3749_v23 = vmul.f32 %v3733_v55, %v3697_v43 }
 0x97f   : > { %v3796_v16 = vmul.f32 0.7978846, %v3780_v29  ;;  %v3783_v33 = vadd.f32 %v3767_v59, %v3705_v37  ;;  %v3765_v9 = vmul.f32 0.044715, %v3749_v23  ;;  %5763 = vtanh.f32 %v3798_v30 }
 0x981   : > { %5765 = vtanh.f32 %v3796_v16  ;;  %v3799_v25 = vmul.f32 0.7978846, %v3783_v33  ;;  %v3781_v34 = vadd.f32 %v3765_v9, %v3697_v43 }
 0x983   : > { %5767 = vtanh.f32 %v3799_v25  ;;  %v3797_v35 = vmul.f32 0.7978846, %v3781_v34 }
 0x985   : > { %5769 = vtanh.f32 %v3797_v35 }
 0x98c   : > { %v5764_v53 = vpop.eup %5763 }
 0x98d   : > { %v3830_v57 = vadd.f32 1.0, %v5764_v53 }
 0x98e   : > { %v5766_v15 = vpop.eup %5765 }
 0x98f   : > { %v3828_v49 = vadd.f32 1.0, %v5766_v15  ;;  %v3846_v42 = vmul.f32 0.5, %v3830_v57 }
 0x990   : > { %v5768_v20 = vpop.eup %5767 }
 0x991   : > { %v3831_v61 = vadd.f32 1.0, %v5768_v20  ;;  %v3844_v36 = vmul.f32 0.5, %v3828_v49  ;;  %v3862_v19 = vmul.f32 %v3846_v42, %v3702_v17 }
 0x992   : > { %v5770_v38 = vpop.eup %5769 }
 0x993   : > { %v3829_v47 = vadd.f32 1.0, %v5770_v38  ;;  %v3847_v48 = vmul.f32 0.5, %v3831_v61  ;;  %v3860_v10 = vmul.f32 %v3844_v36, %v3694_v45  ;;  %v4334_v61 = vld [vmem:[%s7760_s15] sm:$0xff] }
 0x994   : > { %4366 = vrot.lane.b32.xlu0 %v4334_v61, %s5829_s17 }
 0x995   : > { %v3845_v41 = vmul.f32 0.5, %v3829_v47  ;;  %v3863_v26 = vmul.f32 %v3847_v48, %v3705_v37 }
 0x997   : > { %v3861_v11 = vmul.f32 %v3845_v41, %v3697_v43  ;;  %v3873_v30 = vpack.c.bf16 %v3863_v26, %v3862_v19 }
 0x999   : > { %v3872_v55 = vpack.c.bf16 %v3861_v11, %v3860_v10 }
 0x99b   : > { %5466 = vmatprep.mubr.bf16.mxu0 %v3872_v55 }
 0x99c   : > { %5467 = vmatmul.mubr.bf16.gmra.mxu0 %v3873_v30 }
 0x9aa   : > { %v5440_v29 = vpop.f32.mrf.mxu1 }
 0x9ab   : > { %v3718_v59 = vadd.f32 %v5440_v29, %v7714_v4 }
 0x9ac   : > { %v3709_v23 = vpop.f32.mrf.mxu1 }
 0x9ad   : > { %v3738_v16 = vmul.f32 %v3718_v59, %v3718_v59  ;;  %v3710_v33 = vadd.f32 %v7714_v4, %v3709_v23 }
 0x9ae   : > { %v5441_v9 = vpop.f32.mrf.mxu1 }
 0x9af   : > { %v3754_v25 = vmul.f32 %v3738_v16, %v3718_v59  ;;  %v3736_v34 = vmul.f32 %v3710_v33, %v3710_v33  ;;  %v3721_v37 = vadd.f32 %v5441_v9, %v7714_v4 }
 0x9b0   : > { %v3712_v45 = vpop.f32.mrf.mxu1 }
 0x9b1   : > { %v3770_v43 = vmul.f32 0.044715, %v3754_v25  ;;  %v3752_v17 = vmul.f32 %v3736_v34, %v3710_v33  ;;  %v3739_v35 = vmul.f32 %v3721_v37, %v3721_v37  ;;  %v3713_v53 = vadd.f32 %v7714_v4, %v3712_v45 }
 0x9b3   : > { %v3786_v15 = vadd.f32 %v3770_v43, %v3718_v59  ;;  %v3768_v49 = vmul.f32 0.044715, %v3752_v17  ;;  %v3755_v20 = vmul.f32 %v3739_v35, %v3721_v37  ;;  %v3737_v57 = vmul.f32 %v3713_v53, %v3713_v53 }
 0x9b5   : > { %v3802_v38 = vmul.f32 0.7978846, %v3786_v15  ;;  %v3784_v47 = vadd.f32 %v3768_v49, %v3710_v33  ;;  %v3771_v36 = vmul.f32 0.044715, %v3755_v20  ;;  %v3753_v48 = vmul.f32 %v3737_v57, %v3713_v53 }
 0x9b7   : > { %v3800_v42 = vmul.f32 0.7978846, %v3784_v47  ;;  %v3787_v4 = vadd.f32 %v3771_v36, %v3721_v37  ;;  %v3769_v41 = vmul.f32 0.044715, %v3753_v48  ;;  %5771 = vtanh.f32 %v3802_v38  ;;  %v4335_v38 = vld [vmem:[%s7760_s15 + $0x8] sm:$0xff]  ;;  %v4336_v47 = vld [vmem:[%s7760_s15 + $0x10] sm:$0xff] }
 0x9b8   : > { %4368 = vrot.lane.b32.xlu1 %v4335_v38, %s5829_s17  ;;  %4370 = vrot.lane.b32.xlu0 %v4336_v47, %s5829_s17  ;;  %v4337_v36 = vld [vmem:[%s7760_s15 + $0x18] sm:$0xff]  ;;  %v4338_v48 = vld [vmem:[%s7760_s15 + $0x20] sm:$0xff] }
 0x9b9   : > { %5773 = vtanh.f32 %v3800_v42  ;;  %v3803_v26 = vmul.f32 0.7978846, %v3787_v4  ;;  %v3785_v10 = vadd.f32 %v3769_v41, %v3713_v53  ;;  %v4348_v47 = vld [vmem:[%s7760_s15 + $0x70] sm:$0xff] }
 0x9bb   : > { %5775 = vtanh.f32 %v3803_v26  ;;  %v3801_v11 = vmul.f32 0.7978846, %v3785_v10  ;;  %v7778_v26 = vld [vmem:[%s8262_s7 + $0x3] ss:$0 sm:$0xff] }
 0x9bc   : > { %4372 = vrot.lane.b32.xlu1 %v4337_v36, %s5829_s17  ;;  %4374 = vrot.lane.b32.xlu0 %v4338_v48, %s5829_s17 }
 0x9bd   : > { %5777 = vtanh.f32 %v3801_v11 }
 0x9c4   : > { %v5772_v19 = vpop.eup %5771 }
 0x9c5   : > { %v3834_v23 = vadd.f32 1.0, %v5772_v19 }
 0x9c6   : > { %v5774_v55 = vpop.eup %5773 }
 0x9c7   : > { %v3832_v30 = vadd.f32 1.0, %v5774_v55  ;;  %v3850_v43 = vmul.f32 0.5, %v3834_v23  ;;  %v4342_v23 = vld [vmem:[%s7760_s15 + $0x40] sm:$0xff] }
 0x9c8   : > { %v5776_v29 = vpop.eup %5775 }
 0x9c9   : > { %v3835_v16 = vadd.f32 1.0, %v5776_v29  ;;  %v3848_v34 = vmul.f32 0.5, %v3832_v30  ;;  %v3866_v20 = vmul.f32 %v3850_v43, %v3718_v59  ;;  %v4339_v30 = vld [vmem:[%s7760_s15 + $0x28] sm:$0xff]  ;;  %v4340_v29 = vld [vmem:[%s7760_s15 + $0x30] sm:$0xff] }
 0x9ca   : > { %v5778_v9 = vpop.eup %5777  ;;  %4376 = vrot.lane.b32.xlu1 %v4339_v30, %s5829_s17  ;;  %4378 = vrot.lane.b32.xlu0 %v4340_v29, %s5829_s17 }
 0x9cb   : > { %v3833_v25 = vadd.f32 1.0, %v5778_v9  ;;  %v3851_v45 = vmul.f32 0.5, %v3835_v16  ;;  %v3864_v15 = vmul.f32 %v3848_v34, %v3710_v33  ;;  %v4343_v16 = vld [vmem:[%s7760_s15 + $0x48] sm:$0xff]  ;;  %v4345_v34 = vld [vmem:[%s7760_s15 + $0x58] sm:$0xff] }
 0x9cd   : > { %v3849_v17 = vmul.f32 0.5, %v3833_v25  ;;  %v3867_v35 = vmul.f32 %v3851_v45, %v3721_v37  ;;  %v4344_v25 = vld [vmem:[%s7760_s15 + $0x50] sm:$0xff] }
 0x9ce   : > { %4382 = vrot.lane.b32.xlu0 %v4342_v23, %s5829_s17 }
 0x9cf   : > { %v3865_v49 = vmul.f32 %v3849_v17, %v3713_v53  ;;  %v3875_v61 = vpack.c.bf16 %v3867_v35, %v3866_v20  ;;  %v4346_v17 = vld [vmem:[%s7760_s15 + $0x60] sm:$0xff]  ;;  %v4347_v35 = vld [vmem:[%s7760_s15 + $0x68] sm:$0xff] }
 0x9d1   : > { %v3874_v57 = vpack.c.bf16 %v3865_v49, %v3864_v15 }
 0x9d2   : > { %4386 = vrot.lane.b32.xlu0 %v4344_v25, %s5829_s17 }
 0x9d3   : > { %5470 = vmatprep.mubr.bf16.mxu0 %v3874_v57 }
 0x9d4   : > { %5471 = vmatmul.mubr.bf16.gmra.mxu0 %v3875_v61 }
 0x9d6   : > { %4390 = vrot.lane.b32.xlu0 %v4346_v17, %s5829_s17 }
 0x9da   : > { %4394 = vrot.lane.b32.xlu0 %v4348_v47, %s5829_s17 }
 0x9ed   : > { %v5460_v37 = vpop.f32.mrf.mxu0 }
 0x9ee   : > { %v4040_v4 = vadd.f32 %v5460_v37, %v7621_v0 }
 0x9ef   : > { %v3975_v33 = vpop.f32.mrf.mxu0 }
 0x9f0   : > { %v4038_v53 = vadd.f32 %v3975_v33, %v7615_v63 }
 0x9f1   : > { %v5461_v59 = vpop.f32.mrf.mxu0 }
 0x9f2   : > { %v4041_v42 = vadd.f32 %v5461_v59, %v7612_v50  ;;  %v4062_v19 = vadd.f32 %v7778_v26, %v4038_v53  ;;  %v4064_v50 = vadd.f32 %v7778_v26, %v4040_v4 }
 0x9f3   : > { %v3978_v41 = vpop.f32.mrf.mxu0 }
 0x9f4   : > { %v4039_v10 = vadd.f32 %v3978_v41, %v7618_v56  ;;  %v4065_v11 = vadd.f32 %v7778_v26, %v4041_v42  ;;  %v4341_v56 = vld [vmem:[%s7760_s15 + $0x38] sm:$0xff] }
 0x9f5   : > { %4380 = vrot.lane.b32.xlu1 %v4341_v56, %s5829_s17 }
 0x9f6   : > { %v4063_v63 = vadd.f32 %v7778_v26, %v4039_v10  ;;  %v4079_v55 = vpack.c.bf16 %v4065_v11, %v4064_v50 }
 0x9f8   : > { %v4078_v0 = vpack.c.bf16 %v4063_v63, %v4062_v19 }
 0x9f9   : > { %4384 = vrot.lane.b32.xlu1 %v4343_v16, %s5829_s17 }
 0x9fa   : > { %5490 = vmatprep.mubr.bf16.mxu0 %v4078_v0 }
 0x9fb   : > { %5491 = vmatmul.mubr.bf16.vlgmr.msra.gmra.mxu0 %v4079_v55 }
 0x9fd   : > { %4388 = vrot.lane.b32.xlu1 %v4345_v34, %s5829_s17 }
 0xa01   : > { %4392 = vrot.lane.b32.xlu1 %v4347_v35, %s5829_s17 }
 0xa24   : > { %v5464_v9 = vpop.f32.mrf.mxu0 }
 0xa25   : > { %v4044_v20 = vadd.f32 %v5464_v9, %v7641_v31 }
 0xa26   : > { %v3991_v45 = vpop.f32.mrf.mxu0 }
 0xa27   : > { %v4042_v15 = vadd.f32 %v3991_v45, %v7635_v60  ;;  %v4068_v60 = vadd.f32 %v7778_v26, %v4044_v20 }
 0xa28   : > { %v5465_v43 = vpop.f32.mrf.mxu0 }
 0xa29   : > { %v4045_v49 = vadd.f32 %v5465_v43, %v7632_v24  ;;  %v4066_v36 = vadd.f32 %v7778_v26, %v4042_v15 }
 0xa2a   : > { %v3994_v57 = vpop.f32.mrf.mxu0 }
 0xa2b   : > { %v4043_v61 = vadd.f32 %v3994_v57, %v7638_v6  ;;  %v4069_v38 = vadd.f32 %v7778_v26, %v4045_v49  ;;  %v4349_v6 = vld [vmem:[%s7760_s15 + $0x78] sm:$0xff] }
 0xa2c   : > { %4396 = vrot.lane.b32.xlu1 %v4349_v6, %s5829_s17 }
 0xa2d   : > { %v4067_v48 = vadd.f32 %v7778_v26, %v4043_v61  ;;  %v4081_v31 = vpack.c.bf16 %v4069_v38, %v4068_v60 }
 0xa2f   : > { %v4080_v24 = vpack.c.bf16 %v4067_v48, %v4066_v36 }
 0xa31   : > { %5494 = vmatprep.mubr.bf16.mxu1 %v4080_v24 }
 0xa32   : > { %5495 = vmatmul.mubr.bf16.vlgmr.msra.gmra.mxu1 %v4081_v31 }
 0xa5c   : > { %v5468_v37 = vpop.f32.mrf.mxu0 }
 0xa5d   : > { %v4048_v4 = vadd.f32 %v5468_v37, %v7685_v40 }
 0xa5e   : > { %v4007_v33 = vpop.f32.mrf.mxu0 }
 0xa5f   : > { %v4046_v53 = vadd.f32 %v4007_v33, %v7679_v28  ;;  %v4072_v50 = vadd.f32 %v7778_v26, %v4048_v4  ;;  %v7886_v33 = vpop.permute.xlu0 %4366 }
 0xa60   : > { %v5469_v59 = vpop.f32.mrf.mxu0 }
 0xa61   : > { %v4049_v42 = vadd.f32 %v5469_v59, %v7676_v52  ;;  %v4070_v19 = vadd.f32 %v7778_v26, %v4046_v53  ;;  %v7888_v59 = vpop.permute.xlu1 %4368 }
 0xa62   : > { %v4010_v41 = vpop.f32.mrf.mxu0 }
 0xa63   : > { %v4047_v10 = vadd.f32 %v4010_v41, %v7682_v27  ;;  %v4073_v11 = vadd.f32 %v7778_v26, %v4049_v42  ;;  %v4371_v53 = vpop.permute.xlu0 %4370 }
 0xa65   : > { %v4071_v63 = vadd.f32 %v7778_v26, %v4047_v10  ;;  %v4083_v55 = vpack.c.bf16 %v4073_v11, %v4072_v50  ;;  %v4373_v42 = vpop.permute.xlu1 %4372 }
 0xa67   : > { %v4082_v0 = vpack.c.bf16 %v4071_v63, %v4070_v19  ;;  %v7890_v4 = vpop.permute.xlu0 %4374 }
 0xa69   : > { %5498 = vmatprep.mubr.bf16.mxu1 %v4082_v0  ;;  %v7892_v41 = vpop.permute.xlu1 %4376 }
 0xa6a   : > { %5499 = vmatmul.mubr.bf16.gmra.mxu1 %v4083_v55 }
 0xa6b   : > { %v7895_v11 = vpop.permute.xlu0 %4378 }
 0xa6d   : > { %v7900_v50 = vpop.permute.xlu1 %4380 }
 0xa6f   : > { %v7902_v0 = vpop.permute.xlu0 %4382 }
 0xa94   : > { %v5472_v28 = vpop.f32.mrf.mxu0 }
 0xa95   : > { %v4052_v27 = vadd.f32 %v5472_v28, %v7705_v46 }
 0xa96   : > { %v4023_v30 = vpop.f32.mrf.mxu0 }
 0xa97   : > { %v4050_v40 = vadd.f32 %v4023_v30, %v7699_v1  ;;  %v4076_v34 = vadd.f32 %v7778_v26, %v4052_v27  ;;  %v7907_v30 = vpop.permute.xlu1 %4384 }
 0xa98   : > { %v5473_v52 = vpop.f32.mrf.mxu0 }
 0xa99   : > { %v4053_v29 = vadd.f32 %v5473_v52, %v7696_v2  ;;  %v4074_v9 = vadd.f32 %v7778_v26, %v4050_v40  ;;  %v7834_v2 = vld [vmem:[%s8264_s9] ss:$0 sm:$0xff]  ;;  %v7909_v52 = vpop.permute.xlu0 %4386 }
 0xa9a   : > { %v4026_v56 = vpop.f32.mrf.mxu0 }
 0xa9b   : > { %v4051_v23 = vadd.f32 %v4026_v56, %v7702_v5  ;;  %v4077_v16 = vadd.f32 %v7778_v26, %v4053_v29  ;;  %v7912_v27 = vpop.permute.xlu1 %4388 }
 0xa9d   : > { %v4075_v25 = vadd.f32 %v7778_v26, %v4051_v23  ;;  %v4085_v43 = vpack.c.bf16 %v4077_v16, %v4076_v34  ;;  %v7914_v23 = vpop.permute.xlu0 %4390 }
 0xa9f   : > { %v4084_v45 = vpack.c.bf16 %v4075_v25, %v4074_v9  ;;  %v7916_v16 = vpop.permute.xlu1 %4392 }
 0xaa1   : > { %5502 = vmatprep.mubr.bf16.mxu1 %v4084_v45  ;;  %v7918_v25 = vpop.permute.xlu0 %4394 }
 0xaa2   : > { %5503 = vmatmul.mubr.bf16.gmra.mxu1 %v4085_v43 }
 0xabb   : > { %v5492_v1 = vpop.f32.mrf.mxu0 }
 0xabc   : > { %v7837_v5 = vadd.f32 %v5492_v1, %v7834_v2  ;;  %v7925_v1 = vpop.permute.xlu1 %4396 }
 0xabd   : > { %v4191_v46 = vpop.f32.mrf.mxu0 }
 0xabe   : > { %v7840_v17 = vadd.f32 %v7834_v2, %v4191_v46  ;;  %4530 = vrot.lane.b32.xlu0 %v7837_v5, %s5830_s22  ;;  %v4256_v10 = vmax.f32 %v7837_v5, -30.0 }
 0xabf   : > { %v5493_v26 = vpop.f32.mrf.mxu0 }
 0xac0   : > { %v4254_v35 = vmax.f32 %v7840_v17, -30.0  ;;  %v7846_v15 = vadd.f32 %v5493_v26, %v7834_v2  ;;  %v7897_v19 = vmin.f32 %v4256_v10, 20.0 }
 0xac1   : > { %v4194_v49 = vpop.f32.mrf.mxu0 }
 0xac2   : > { %v7849_v20 = vadd.f32 %v7834_v2, %v4194_v49  ;;  %4532 = vrot.lane.b32.xlu1 %v7846_v15, %s5830_s22  ;;  %4526 = vrot.lane.b32.xlu0 %v7840_v17, %s5830_s22  ;;  %v7855_v57 = vmin.f32 %v4254_v35, 20.0  ;;  %v4257_v63 = vmax.f32 %v7846_v15, -30.0  ;;  %v4288_v55 = vmul.f32 0.5, %v7897_v19 }
 0xac4   : > { %v4255_v61 = vmax.f32 %v7849_v20, -30.0  ;;  %v7905_v28 = vmin.f32 %v4257_v63, 20.0  ;;  %v4306_v40 = vmul.f32 1.442695, %v4288_v55 }
 0xac6   : > { %4528 = vrot.lane.b32.xlu1 %v7849_v20, %s5830_s22  ;;  %4590 = vrot.lane.b32.xlu0 %v7855_v57, %s5830_s22  ;;  %v7862_v38 = vmin.f32 %v4255_v61, 20.0  ;;  %v4289_v29 = vmul.f32 0.5, %v7905_v28  ;;  %5779 = vpow2.f32 %v4306_v40 }
 0xac8   : > { %v4308_v56 = vmul.f32 1.442695, %v4289_v29 }
 0xaca   : > { %4592 = vrot.lane.b32.xlu1 %v7862_v38, %s5830_s22  ;;  %5781 = vpow2.f32 %v4308_v56 }
 0xad3   : > { %v5780_v35 = vpop.eup %5779 }
 0xaf2   : > { %v5496_v47 = vpop.f32.mrf.mxu1 }
 0xaf3   : > { %v7867_v36 = vadd.f32 %v5496_v47, %v7834_v2  ;;  %v4416_v47 = vmul.f32 %v5780_v35, %v4371_v53 }
 0xaf4   : > { %v4207_v48 = vpop.f32.mrf.mxu1 }
 0xaf5   : > { %4538 = vrot.lane.b32.xlu0 %v7867_v36, %s5830_s22  ;;  %v7872_v24 = vadd.f32 %v7834_v2, %v4207_v48 }
 0xaf6   : > { %v5497_v60 = vpop.f32.mrf.mxu1 }
 0xaf7   : > { %v7875_v31 = vadd.f32 %v5497_v60, %v7834_v2  ;;  %v5782_v60 = vpop.eup %5781 }
 0xaf8   : > { %v4210_v6 = vpop.f32.mrf.mxu1  ;;  %v4417_v63 = vmul.f32 %v5782_v60, %v4373_v42  ;;  %v4260_v42 = vmax.f32 %v7867_v36, -30.0 }
 0xaf9   : > { %4540 = vrot.lane.b32.xlu1 %v7875_v31, %s5830_s22  ;;  %4534 = vrot.lane.b32.xlu0 %v7872_v24, %s5830_s22  ;;  %v7882_v37 = vadd.f32 %v7834_v2, %v4210_v6  ;;  %v4261_v60 = vmax.f32 %v7875_v31, -30.0 }
 0xafd   : > { %4536 = vrot.lane.b32.xlu1 %v7882_v37, %s5830_s22 }
 0xb2a   : > { %v5500_v9 = vpop.f32.mrf.mxu1 }
 0xb2b   : > { %v7921_v34 = vadd.f32 %v5500_v9, %v7834_v2 }
 0xb2c   : > { %v4223_v45 = vpop.f32.mrf.mxu1 }
 0xb2d   : > { %4546 = vrot.lane.b32.xlu0 %v7921_v34, %s5830_s22  ;;  %v7928_v46 = vadd.f32 %v7834_v2, %v4223_v45 }
 0xb2e   : > { %v5501_v43 = vpop.f32.mrf.mxu1 }
 0xb2f   : > { %v7931_v26 = vadd.f32 %v5501_v43, %v7834_v2  ;;  %v4286_v43 = vmul.f32 0.5, %v7855_v57  ;;  %v7969_v57 = vmin.f32 %v4261_v60, 20.0 }
 0xb30   : > { %v7933_v49 = vpop.permute.xlu0 %4530  ;;  %v4226_v61 = vpop.f32.mrf.mxu1 }
 0xb31   : > { %8435 = vst [vmem:[#allocation2_spill] sm:$0xff] %v7933_v49  ;;  %4548 = vrot.lane.b32.xlu1 %v7931_v26, %s5830_s22  ;;  %4542 = vrot.lane.b32.xlu0 %v7928_v46, %s5830_s22  ;;  %v7940_v48 = vadd.f32 %v7834_v2, %v4226_v61  ;;  %v4302_v35 = vmul.f32 1.442695, %v4286_v43  ;;  %v4258_v61 = vmax.f32 %v7872_v24, -30.0 }
 0xb33   : > { %5783 = vpow2.f32 %v4302_v35 }
 0xb34   : > { %v7942_v6 = vpop.permute.xlu1 %4532  ;;  %v4527_v10 = vpop.permute.xlu0 %4526 }
 0xb35   : > { %8436 = vst [vmem:[#allocation32_spill] sm:$0xff] %v7942_v6  ;;  %4544 = vrot.lane.b32.xlu1 %v7940_v48, %s5830_s22  ;;  %4450 = vrot.lane.b32.xlu0 %v4416_v47, %s5831_s23  ;;  %v4702_v55 = vsel %vm1684_vm8, %v6843_v51, %v4527_v10  ;;  %v4287_v51 = vmul.f32 0.5, %v7862_v38  ;;  %v7962_v47 = vmin.f32 %v4260_v42, 20.0  ;;  %v4262_v38 = vmax.f32 %v7928_v46, -30.0 }
 0xb36   : > { %v4293_v42 = vmul.f32 0.5, %v7969_v57 }
 0xb37   : > { %v4304_v10 = vmul.f32 1.442695, %v4287_v51  ;;  %v7980_v51 = vmin.f32 %v4262_v38, 20.0 }
 0xb38   : > { %v4529_v40 = vpop.permute.xlu1 %4528  ;;  %v4591_v53 = vpop.permute.xlu0 %4590 }
 0xb39   : > { %v7950_v29 = vsel %vm4718_vm9, %v4702_v55, %v4591_v53  ;;  %4452 = vrot.lane.b32.xlu1 %v4417_v63, %s5831_s23  ;;  %v4703_v56 = vsel %vm1684_vm8, %v6845_v22, %v4529_v40  ;;  %v7965_v22 = vmin.f32 %v4258_v61, 20.0  ;;  %v4259_v63 = vmax.f32 %v7882_v37, -30.0 }
 0xb3a   : > { %8437 = vst [vmem:[#allocation33_spill] sm:$0xff] %v7950_v29  ;;  %v4292_v55 = vmul.f32 0.5, %v7962_v47  ;;  %v4264_v40 = vmax.f32 %v7921_v34, -30.0  ;;  %5785 = vpow2.f32 %v4304_v10  ;;  %v4263_v10 = vmax.f32 %v7940_v48, -30.0 }
 0xb3b   : > { %v4290_v53 = vmul.f32 0.5, %v7965_v22  ;;  %v4316_v29 = vmul.f32 1.442695, %v4293_v42  ;;  %v4294_v14 = vmul.f32 0.5, %v7980_v51 }
 0xb3c   : > { %v4593_v9 = vpop.permute.xlu1 %4592  ;;  %v4314_v43 = vmul.f32 1.442695, %v4292_v55  ;;  %v7978_v35 = vmin.f32 %v4264_v40, 20.0  ;;  %v7989_v6 = vmin.f32 %v4263_v10, 20.0 }
 0xb3d   : > { %v7956_v45 = vsel %vm4718_vm9, %v4703_v56, %v4593_v9  ;;  %v7974_v56 = vmin.f32 %v4259_v63, 20.0  ;;  %v4265_v9 = vmax.f32 %v7931_v26, -30.0  ;;  %v4310_v61 = vmul.f32 1.442695, %v4290_v53 }
 0xb3e   : > { %8438 = vst [vmem:[#allocation34_spill] sm:$0xff] %v7956_v45  ;;  %5787 = vpow2.f32 %v4314_v43  ;;  %v4296_v63 = vmul.f32 0.5, %v7978_v35  ;;  %v4318_v49 = vmul.f32 1.442695, %v4294_v14 }
 0xb3f   : > { %v4291_v60 = vmul.f32 0.5, %v7974_v56  ;;  %v7983_v45 = vmin.f32 %v4265_v9, 20.0  ;;  %5789 = vpow2.f32 %v4310_v61 }
 0xb40   : > { %v5784_v53 = vpop.eup %5783  ;;  %5791 = vpow2.f32 %v4316_v29  ;;  %v4322_v18 = vmul.f32 1.442695, %v4296_v63  ;;  %v4295_v29 = vmul.f32 0.5, %v7989_v6 }
 0xb41   : > { %v4312_v55 = vmul.f32 1.442695, %v4291_v60  ;;  %v4297_v40 = vmul.f32 0.5, %v7983_v45  ;;  %v4414_v61 = vmul.f32 %v5784_v53, %v7886_v33 }
 0xb43   : > { %5793 = vpow2.f32 %v4312_v55  ;;  %v4324_v60 = vmul.f32 1.442695, %v4297_v40  ;;  %v4320_v40 = vmul.f32 1.442695, %v4295_v29 }
 0xb44   : > { %5795 = vpow2.f32 %v4322_v18 }
 0xb45   : > { %5797 = vpow2.f32 %v4318_v49 }
 0xb46   : > { %5799 = vpow2.f32 %v4324_v60 }
 0xb47   : > { %v5786_v63 = vpop.eup %5785  ;;  %5801 = vpow2.f32 %v4320_v40 }
 0xb48   : > { %v4415_v18 = vmul.f32 %v5786_v63, %v7888_v59 }
 0xb62   : > { %v5504_v38 = vpop.f32.mrf.mxu1 }
 0xb63   : > { %v7992_v9 = vadd.f32 %v5504_v38, %v7834_v2 }
 0xb64   : > { %v4239_v43 = vpop.f32.mrf.mxu1 }
 0xb65   : > { %v4268_v42 = vmax.f32 %v7992_v9, -30.0  ;;  %v7996_v3 = vadd.f32 %v7834_v2, %v4239_v43  ;;  %4554 = vrot.lane.b32.xlu0 %v7992_v9, %s5830_s22 }
 0xb66   : > { %v5505_v10 = vpop.f32.mrf.mxu1 }
 0xb67   : > { %v8002_v38 = vmin.f32 %v4268_v42, 20.0  ;;  %v4266_v14 = vmax.f32 %v7996_v3, -30.0  ;;  %v8006_v13 = vadd.f32 %v5505_v10, %v7834_v2 }
 0xb68   : > { %v4242_v43 = vpop.f32.mrf.mxu1 }
 0xb69   : > { %v4300_v12 = vmul.f32 0.5, %v8002_v38  ;;  %v8009_v21 = vmin.f32 %v4266_v14, 20.0  ;;  %v4269_v33 = vmax.f32 %v8006_v13, -30.0  ;;  %v8013_v55 = vadd.f32 %v7834_v2, %v4242_v43  ;;  %4556 = vrot.lane.b32.xlu1 %v8006_v13, %s5830_s22  ;;  %4446 = vrot.lane.b32.xlu0 %v4414_v61, %s5831_s23  ;;  %v5788_v14 = vpop.eup %5787 }
 0xb6a   : > { %v5790_v61 = vpop.eup %5789 }
 0xb6b   : > { %v4330_v49 = vmul.f32 1.442695, %v4300_v12  ;;  %v4298_v53 = vmul.f32 0.5, %v8009_v21  ;;  %v8020_v42 = vmin.f32 %v4269_v33, 20.0  ;;  %v4267_v10 = vmax.f32 %v8013_v55, -30.0  ;;  %v5792_v63 = vpop.eup %5791 }
 0xb6c   : > { %v4420_v12 = vmul.f32 %v5788_v14, %v7895_v11  ;;  %v5794_v33 = vpop.eup %5793  ;;  %v4421_v40 = vmul.f32 %v5792_v63, %v7900_v50 }
 0xb6d   : > { %v4301_v2 = vmul.f32 0.5, %v8020_v42  ;;  %v8024_v43 = vmin.f32 %v4267_v10, 20.0  ;;  %4448 = vrot.lane.b32.xlu1 %v4415_v18, %s5831_s23  ;;  %4550 = vrot.lane.b32.xlu0 %v7996_v3, %s5830_s22  ;;  %v4326_v59 = vmul.f32 1.442695, %v4298_v53  ;;  %5803 = vpow2.f32 %v4330_v49  ;;  %v5796_v10 = vpop.eup %5795 }
 0xb6e   : > { %v4418_v18 = vmul.f32 %v5790_v61, %v7890_v4  ;;  %v5798_v11 = vpop.eup %5797  ;;  %v4419_v14 = vmul.f32 %v5794_v33, %v7892_v41 }
 0xb6f   : > { %v4332_v60 = vmul.f32 1.442695, %v4301_v2  ;;  %v4299_v29 = vmul.f32 0.5, %v8024_v43  ;;  %5805 = vpow2.f32 %v4326_v59  ;;  %v5800_v49 = vpop.eup %5799  ;;  %v4424_v2 = vmul.f32 %v5796_v10, %v7909_v52 }
 0xb70   : > { %v5802_v4 = vpop.eup %5801  ;;  %v4425_v50 = vmul.f32 %v5800_v49, %v7912_v27  ;;  %v4422_v59 = vmul.f32 %v5798_v11, %v7902_v0 }
 0xb71   : > { %4552 = vrot.lane.b32.xlu1 %v8013_v55, %s5830_s22  ;;  %4458 = vrot.lane.b32.xlu0 %v4420_v12, %s5831_s23  ;;  %5807 = vpow2.f32 %v4332_v60  ;;  %v4328_v53 = vmul.f32 1.442695, %v4299_v29  ;;  %v4423_v41 = vmul.f32 %v5802_v4, %v7907_v30  ;;  %v8066_v30 = vpop.permute.xlu0 %4538 }
 0xb73   : > { %5809 = vpow2.f32 %v4328_v53 }
 0xb75   : > { %4460 = vrot.lane.b32.xlu1 %v4421_v40, %s5831_s23  ;;  %4454 = vrot.lane.b32.xlu0 %v4418_v18, %s5831_s23 }
 0xb79   : > { %4456 = vrot.lane.b32.xlu1 %v4419_v14, %s5831_s23  ;;  %4466 = vrot.lane.b32.xlu0 %v4424_v2, %s5831_s23 }
 0xb7a   : > { %v5804_v61 = vpop.eup %5803 }
 0xb7b   : > { %v4428_v60 = vmul.f32 %v5804_v61, %v7918_v25 }
 0xb7c   : > { %v5806_v12 = vpop.eup %5805 }
 0xb7d   : > { %4468 = vrot.lane.b32.xlu1 %v4425_v50, %s5831_s23  ;;  %4462 = vrot.lane.b32.xlu0 %v4422_v59, %s5831_s23  ;;  %v4426_v27 = vmul.f32 %v5806_v12, %v7914_v23 }
 0xb7e   : > { %v5808_v52 = vpop.eup %5807 }
 0xb7f   : > { %v4429_v29 = vmul.f32 %v5808_v52, %v7925_v1 }
 0xb80   : > { %v5810_v0 = vpop.eup %5809 }
 0xb81   : > { %4464 = vrot.lane.b32.xlu1 %v4423_v41, %s5831_s23  ;;  %4474 = vrot.lane.b32.xlu0 %v4428_v60, %s5831_s23  ;;  %v4427_v63 = vmul.f32 %v5810_v0, %v7916_v16 }
 0xb85   : > { %4476 = vrot.lane.b32.xlu1 %v4429_v29, %s5831_s23  ;;  %4470 = vrot.lane.b32.xlu0 %v4426_v27, %s5831_s23 }
 0xb89   : > { %4472 = vrot.lane.b32.xlu1 %v4427_v63, %s5831_s23  ;;  %4594 = vrot.lane.b32.xlu0 %v7897_v19, %s5830_s22  ;;  %v8072_v19 = vpop.permute.xlu1 %4540 }
 0xb8d   : > { %4596 = vrot.lane.b32.xlu1 %v7905_v28, %s5830_s22  ;;  %4598 = vrot.lane.b32.xlu0 %v7965_v22, %s5830_s22  ;;  %v8078_v28 = vpop.permute.xlu0 %4534  ;;  %v8084_v23 = vpop.permute.xlu1 %4536 }
 0xb91   : > { %4600 = vrot.lane.b32.xlu1 %v7974_v56, %s5830_s22  ;;  %4602 = vrot.lane.b32.xlu0 %v7962_v47, %s5830_s22 }
 0xb95   : > { %4604 = vrot.lane.b32.xlu1 %v7969_v57, %s5830_s22  ;;  %4606 = vrot.lane.b32.xlu0 %v7980_v51, %s5830_s22 }
 0xb99   : > { %4608 = vrot.lane.b32.xlu1 %v7989_v6, %s5830_s22  ;;  %4610 = vrot.lane.b32.xlu0 %v7978_v35, %s5830_s22 }
 0xb9d   : > { %4612 = vrot.lane.b32.xlu1 %v7983_v45, %s5830_s22  ;;  %4614 = vrot.lane.b32.xlu0 %v8009_v21, %s5830_s22 }
 0xb9f   : > { %v8086_v16 = vpop.permute.xlu0 %4546 }
 0xba1   : > { %4616 = vrot.lane.b32.xlu1 %v8024_v43, %s5830_s22  ;;  %4618 = vrot.lane.b32.xlu0 %v8002_v38, %s5830_s22 }
 0xba3   : > { %v8092_v25 = vpop.permute.xlu1 %4548  ;;  %v8094_v1 = vpop.permute.xlu0 %4542 }
 0xba4   : > { %v4710_v63 = vsel %vm1684_vm8, %v7074_v8, %v8094_v1  ;;  %v4713_v1 = vsel %vm1684_vm8, %v7086_v7, %v8092_v25 }
 0xba5   : > { %4620 = vrot.lane.b32.xlu1 %v8020_v42, %s5830_s22 }
 0xba7   : > { %v8098_v6 = vpop.permute.xlu1 %4544  ;;  %v4451_v21 = vpop.permute.xlu0 %4450 }
 0xba8   : > { %v4496_v45 = vadd.f32 %v4451_v21, %v7837_v5  ;;  %v4711_v21 = vsel %vm1684_vm8, %v7076_v44, %v8098_v6  ;;  %v8440_v6 = vld [vmem:[#allocation13_spill] sm:$0xff] }
 0xbaa   : > { %4658 = vrot.lane.b32.xlu0 %v4496_v45, %s5832_s24 }
 0xbab   : > { %v4453_v47 = vpop.permute.xlu1 %4452 }
 0xbac   : > { %v4497_v22 = vadd.f32 %v4453_v47, %v7846_v15  ;;  %v8439_v47 = vld [vmem:[#allocation10_spill] sm:$0xff] }
 0xbae   : > { %4660 = vrot.lane.b32.xlu1 %v4497_v22, %s5832_s24 }
 0xbd7   : > { %v8104_v57 = vpop.permute.xlu0 %4554 }
 0xbdb   : > { %v8106_v56 = vpop.permute.xlu1 %4556  ;;  %v4447_v35 = vpop.permute.xlu0 %4446 }
 0xbdc   : > { %v4494_v51 = vadd.f32 %v4447_v35, %v7840_v17 }
 0xbde   : > { %4654 = vrot.lane.b32.xlu0 %v4494_v51, %s5832_s24  ;;  %v4716_v51 = vsel %vm1684_vm8, %v8440_v6, %v8104_v57  ;;  %v8444_v57 = vld [vmem:[#allocation9_spill] sm:$0xff] }
 0xbdf   : > { %v4449_v38 = vpop.permute.xlu1 %4448  ;;  %v8110_v42 = vpop.permute.xlu0 %4550 }
 0xbe0   : > { %v4495_v5 = vadd.f32 %v4449_v38, %v7849_v20  ;;  %v4714_v22 = vsel %vm1684_vm8, %v8439_v47, %v8110_v42  ;;  %v8441_v38 = vld [vmem:[#allocation11_spill] sm:$0xff] }
 0xbe2   : > { %4656 = vrot.lane.b32.xlu1 %v4495_v5, %s5832_s24 }
 0xbe3   : > { %v8114_v43 = vpop.permute.xlu1 %4552  ;;  %v4459_v15 = vpop.permute.xlu0 %4458 }
 0xbe4   : > { %v4500_v33 = vadd.f32 %v4459_v15, %v7867_v36  ;;  %v4715_v5 = vsel %vm1684_vm8, %v8441_v38, %v8114_v43 }
 0xbe6   : > { %4666 = vrot.lane.b32.xlu0 %v4500_v33, %s5832_s24  ;;  %v8442_v33 = vld [vmem:[#allocation15_spill] sm:$0xff] }
 0xbe7   : > { %v4461_v18 = vpop.permute.xlu1 %4460  ;;  %v4455_v40 = vpop.permute.xlu0 %4454 }
 0xbe8   : > { %v4501_v17 = vadd.f32 %v4461_v18, %v7875_v31  ;;  %v4498_v53 = vadd.f32 %v4455_v40, %v7872_v24  ;;  %v4717_v18 = vsel %vm1684_vm8, %v8442_v33, %v8106_v56 }
 0xbea   : > { %4668 = vrot.lane.b32.xlu1 %v4501_v17, %s5832_s24  ;;  %4662 = vrot.lane.b32.xlu0 %v4498_v53, %s5832_s24  ;;  %v8443_v53 = vld [vmem:[#allocation2_spill] sm:$0xff] }
 0xbeb   : > { %v4457_v20 = vpop.permute.xlu1 %4456  ;;  %v4467_v10 = vpop.permute.xlu0 %4466 }
 0xbec   : > { %v4499_v11 = vadd.f32 %v4457_v20, %v7882_v37  ;;  %v4504_v49 = vadd.f32 %v4467_v10, %v7921_v34  ;;  %v4704_v20 = vsel %vm1684_vm8, %v8444_v57, %v8443_v53 }
 0xbee   : > { %4664 = vrot.lane.b32.xlu1 %v4499_v11, %s5832_s24  ;;  %4674 = vrot.lane.b32.xlu0 %v4504_v49, %s5832_s24  ;;  %v8445_v11 = vld [vmem:[#allocation32_spill] sm:$0xff] }
 0xbef   : > { %v4469_v36 = vpop.permute.xlu1 %4468  ;;  %v4463_v14 = vpop.permute.xlu0 %4462  ;;  %v8446_v49 = vld [vmem:[#allocation8_spill] sm:$0xff] }
 0xbf0   : > { %v4505_v31 = vadd.f32 %v4469_v36, %v7931_v26  ;;  %v4502_v24 = vadd.f32 %v4463_v14, %v7928_v46  ;;  %v4705_v36 = vsel %vm1684_vm8, %v8446_v49, %v8445_v11 }
 0xbf2   : > { %4676 = vrot.lane.b32.xlu1 %v4505_v31, %s5832_s24  ;;  %4670 = vrot.lane.b32.xlu0 %v4502_v24, %s5832_s24 }
 0xbf3   : > { %v4465_v2 = vpop.permute.xlu1 %4464  ;;  %v4475_v4 = vpop.permute.xlu0 %4474 }
 0xbf4   : > { %v4503_v37 = vadd.f32 %v4465_v2, %v7940_v48  ;;  %v4508_v46 = vadd.f32 %v4475_v4, %v7992_v9  ;;  %v4706_v48 = vsel %vm1684_vm8, %v6999_v39, %v8078_v28  ;;  %v4708_v9 = vsel %vm1684_vm8, %v7010_v62, %v8066_v30  ;;  %v8447_v4 = vld [vmem:[#allocation33_spill] sm:$0xff] }
 0xbf6   : > { %4672 = vrot.lane.b32.xlu1 %v4503_v37, %s5832_s24 }
 0xbf7   : > { %v4477_v34 = vpop.permute.xlu1 %4476  ;;  %v4471_v50 = vpop.permute.xlu0 %4470 }
 0xbf8   : > { %v4506_v59 = vadd.f32 %v4471_v50, %v7996_v3  ;;  %v4509_v3 = vadd.f32 %v4477_v34, %v8006_v13  ;;  %v4709_v13 = vsel %vm1684_vm8, %v7012_v32, %v8072_v19  ;;  %v8448_v50 = vld [vmem:[#allocation34_spill] sm:$0xff] }
 0xbfa   : > { %4678 = vrot.lane.b32.xlu0 %v4506_v59, %s5832_s24 }
 0xbfb   : > { %v4473_v61 = vpop.permute.xlu1 %4472  ;;  %v4595_v26 = vpop.permute.xlu0 %4594 }
 0xbfc   : > { %v4507_v12 = vadd.f32 %v4473_v61, %v8013_v55  ;;  %v4707_v55 = vsel %vm1684_vm8, %v7001_v58, %v8084_v23  ;;  %v4712_v23 = vsel %vm1684_vm8, %v7084_v54, %v8086_v16  ;;  %v4721_v56 = vsel %vm4718_vm9, %v4704_v20, %v4595_v26 }
 0xbfe   : > { %4680 = vrot.lane.b32.xlu1 %v4507_v12, %s5832_s24  ;;  %4682 = vrot.lane.b32.xlu0 %v4508_v46, %s5832_s24 }
 0xbff   : > { %v4597_v41 = vpop.permute.xlu1 %4596  ;;  %v4599_v60 = vpop.permute.xlu0 %4598 }
 0xc00   : > { %v4723_v52 = vsel %vm4718_vm9, %v4706_v48, %v4599_v60  ;;  %v4722_v14 = vsel %vm4718_vm9, %v4705_v36, %v4597_v41 }
 0xc02   : > { %4684 = vrot.lane.b32.xlu1 %v4509_v3, %s5832_s24 }
 0xc03   : > { %v4601_v29 = vpop.permute.xlu1 %4600  ;;  %v4603_v27 = vpop.permute.xlu0 %4602 }
 0xc04   : > { %v4724_v39 = vsel %vm4718_vm9, %v4707_v55, %v4601_v29  ;;  %v4725_v0 = vsel %vm4718_vm9, %v4708_v9, %v4603_v27 }
 0xc07   : > { %v4605_v28 = vpop.permute.xlu1 %4604  ;;  %v4607_v62 = vpop.permute.xlu0 %4606 }
 0xc08   : > { %v4726_v30 = vsel %vm4718_vm9, %v4709_v13, %v4605_v28  ;;  %v4727_v58 = vsel %vm4718_vm9, %v4710_v63, %v4607_v62 }
 0xc0b   : > { %v4609_v45 = vpop.permute.xlu1 %4608  ;;  %v4611_v32 = vpop.permute.xlu0 %4610 }
 0xc0c   : > { %v4728_v19 = vsel %vm4718_vm9, %v4711_v21, %v4609_v45  ;;  %v4729_v8 = vsel %vm4718_vm9, %v4712_v23, %v4611_v32 }
 0xc0f   : > { %v4613_v54 = vpop.permute.xlu1 %4612  ;;  %v4615_v16 = vpop.permute.xlu0 %4614 }
 0xc10   : > { %v4730_v35 = vsel %vm4718_vm9, %v4713_v1, %v4613_v54  ;;  %v4731_v44 = vsel %vm4718_vm9, %v4714_v22, %v4615_v16 }
 0xc13   : > { %v4617_v7 = vpop.permute.xlu1 %4616  ;;  %v4619_v25 = vpop.permute.xlu0 %4618 }
 0xc14   : > { %v4732_v15 = vsel %vm4718_vm9, %v4715_v5, %v4617_v7  ;;  %v4733_v42 = vsel %vm4718_vm9, %v4716_v51, %v4619_v25 }
 0xc17   : > { %v4621_v40 = vpop.permute.xlu1 %4620 }
 0xc18   : > { %v4734_v17 = vsel %vm4718_vm9, %v4717_v18, %v4621_v40 }
 0xc1c   : > { %v4659_v43 = vpop.permute.xlu0 %4658 }
 0xc1d   : > { %v4738_v10 = vsel %vm4735_vm10, %v4721_v56, %v4659_v43 }
 0xc1e   : > { %4755 = vst.msk [vmem:[%s8195_s27 + $0x10] sm:$0xff] %vm4752_vm11, %v4738_v10 }
 0xc20   : > { %v4661_v31 = vpop.permute.xlu1 %4660 }
 0xc21   : > { %v4739_v24 = vsel %vm4735_vm10, %v4722_v14, %v4661_v31 }
 0xc22   : > { %4756 = vst.msk [vmem:[%s8195_s27 + $0x18] sm:$0xff] %vm4752_vm11, %v4739_v24 }
 0xc50   : > { %v4655_v2 = vpop.permute.xlu0 %4654 }
 0xc51   : > { %v4736_v37 = vsel %vm4735_vm10, %v8447_v4, %v4655_v2 }
 0xc52   : > { %4753 = vst.msk [vmem:[%s8195_s27] sm:$0xff] %vm4752_vm11, %v4736_v37 }
 0xc54   : > { %v4657_v34 = vpop.permute.xlu1 %4656 }
 0xc55   : > { %v4737_v59 = vsel %vm4735_vm10, %v8448_v50, %v4657_v34 }
 0xc56   : > { %4754 = vst.msk [vmem:[%s8195_s27 + $0x8] sm:$0xff] %vm4752_vm11, %v4737_v59 }
 0xc58   : > { %v4667_v61 = vpop.permute.xlu0 %4666 }
 0xc59   : > { %v4742_v26 = vsel %vm4735_vm10, %v4725_v0, %v4667_v61 }
 0xc5a   : > { %4759 = vst.msk [vmem:[%s8195_s27 + $0x30] sm:$0xff] %vm4752_vm11, %v4742_v26 }
 0xc5c   : > { %v4669_v46 = vpop.permute.xlu1 %4668  ;;  %v4663_v12 = vpop.permute.xlu0 %4662 }
 0xc5d   : > { %v4743_v48 = vsel %vm4735_vm10, %v4726_v30, %v4669_v46  ;;  %v4740_v41 = vsel %vm4735_vm10, %v4723_v52, %v4663_v12 }
 0xc5e   : > { %4760 = vst.msk [vmem:[%s8195_s27 + $0x38] sm:$0xff] %vm4752_vm11, %v4743_v48  ;;  %4757 = vst.msk [vmem:[%s8195_s27 + $0x20] sm:$0xff] %vm4752_vm11, %v4740_v41 }
 0xc60   : > { %v4665_v60 = vpop.permute.xlu1 %4664  ;;  %v4675_v3 = vpop.permute.xlu0 %4674 }
 0xc61   : > { %v4741_v9 = vsel %vm4735_vm10, %v4724_v39, %v4665_v60  ;;  %v4746_v55 = vsel %vm4735_vm10, %v4729_v8, %v4675_v3 }
 0xc62   : > { %4758 = vst.msk [vmem:[%s8195_s27 + $0x28] sm:$0xff] %vm4752_vm11, %v4741_v9  ;;  %4763 = vst.msk [vmem:[%s8195_s27 + $0x50] sm:$0xff] %vm4752_vm11, %v4746_v55 }
 0xc64   : > { %v4677_v29 = vpop.permute.xlu1 %4676  ;;  %v4671_v27 = vpop.permute.xlu0 %4670 }
 0xc65   : > { %v4747_v52 = vsel %vm4735_vm10, %v4730_v35, %v4677_v29  ;;  %v4744_v0 = vsel %vm4735_vm10, %v4727_v58, %v4671_v27 }
 0xc66   : > { %4764 = vst.msk [vmem:[%s8195_s27 + $0x58] sm:$0xff] %vm4752_vm11, %v4747_v52  ;;  %4761 = vst.msk [vmem:[%s8195_s27 + $0x40] sm:$0xff] %vm4752_vm11, %v4744_v0 }
 0xc68   : > { %v4673_v39 = vpop.permute.xlu1 %4672 }
 0xc69   : > { %v4745_v13 = vsel %vm4735_vm10, %v4728_v19, %v4673_v39 }
 0xc6a   : > { %4762 = vst.msk [vmem:[%s8195_s27 + $0x48] sm:$0xff] %vm4752_vm11, %v4745_v13 }
 0xc6c   : > { %v4679_v63 = vpop.permute.xlu0 %4678 }
 0xc6d   : > { %v4748_v28 = vsel %vm4735_vm10, %v4731_v44, %v4679_v63 }
 0xc6e   : > { %4765 = vst.msk [vmem:[%s8195_s27 + $0x60] sm:$0xff] %vm4752_vm11, %v4748_v28 }
 0xc70   : > { %v4681_v62 = vpop.permute.xlu1 %4680  ;;  %v4683_v30 = vpop.permute.xlu0 %4682 }
 0xc71   : > { %v4749_v23 = vsel %vm4735_vm10, %v4732_v15, %v4681_v62  ;;  %v4750_v58 = vsel %vm4735_vm10, %v4733_v42, %v4683_v30 }
 0xc72   : > { %4766 = vst.msk [vmem:[%s8195_s27 + $0x68] sm:$0xff] %vm4752_vm11, %v4749_v23  ;;  %4767 = vst.msk [vmem:[%s8195_s27 + $0x70] sm:$0xff] %vm4752_vm11, %v4750_v58 }
 0xc74   : > { %v4685_v21 = vpop.permute.xlu1 %4684 }
 0xc75   : > { %v4751_v45 = vsel %vm4735_vm10, %v4734_v17, %v4685_v21 }
 0xc76   : > { %4768 = vst.msk [vmem:[%s8195_s27 + $0x78] sm:$0xff] %vm4752_vm11, %v4751_v45 }
 0xc77 PF: > { %s20_s13 = sadd.s32 1, %s5817_s13  }
 0xc78   : > { %p17_p4 = scmp.ge.s32.totalorder %s20_s13, 10  }
 0xc7a   :  { %19 = sbr.rel (!%p17_p4) target bundleno = 1 (0x1), region = 105 }

// kernel: _lambda_.3
= control target key start
LH: loop header
LB: loop body
LE: loop exit
PB: predicated region body
PF: predicated region fallthrough
CT: control target
= control target key end

     0   :  { %s6980_s13 = smov 0   ;;  %s9880_s0 = inlined_call_operand.vmem [shape: f32[1024,4], index: 0, kind: input, shape index: {}]   ;;  %s9881_s1 = inlined_call_operand.vmem [shape: bf16[4,128], index: 1, kind: input, shape index: {}]   ;;  %s9882_s2 = inlined_call_operand.vmem [shape: bf16[2,4,128], index: 2, kind: input, shape index: {}]   ;;  %s9883_s3 = inlined_call_operand.vmem [shape: bf16[2,128,128], index: 3, kind: input, shape index: {}]   ;;  %s9884_s4 = inlined_call_operand.vmem [shape: bf16[4,128,128], index: 4, kind: input, shape index: {}]   ;;  %s9885_s5 = inlined_call_operand.vmem [shape: f32[4,1,128], index: 5, kind: input, shape index: {}, may-alias: {5,7}]   ;;  %s9886_s6 = inlined_call_operand.vmem [shape: bf16[4,128,128], index: 6, kind: input, shape index: {}]   ;;  %s9887_s7 = inlined_call_operand.vmem [shape: f32[4,1,128], index: 7, kind: input, shape index: {}, may-alias: {5,7}]   ;;  %s9888_s8 = inlined_call_operand.vmem [shape: bf16[128,24], index: 8, kind: input, shape index: {}]   ;;  %s9889_s9 = inlined_call_operand.vmem [shape: f32[1,24], index: 9, kind: input, shape index: {}]   ;;  %s9890_s10 = inlined_call_operand.vmem [shape: f32[1024,48], index: 10, kind: output, shape index: {}]  }
   0x1 LB: > { %s5584_s14 = sadd.s32 4294967295, %s6912_s13   ;;  %p5588_p0 = scmp.ge.s32.totalorder %s6912_s13, 1  ;;  %s6912_s13 = sphi %s6980_s13, %s20_s13  }
   0x2   : > { %p313_p1 = scmp.lt.s32.totalorder %s6912_s13, 9 }
   0x4   : > { %p314_p2 = pnand %p5588_p0, %p313_p1 }
   0x6   : > { %317 = sbr.rel (%p314_p2) target bundleno = 3867 (0xf1b), region = 60 }
   0xb   : > { %v388_v0 = vld [vmem:[%s9881_s1] sm:$0x3]  ;;  %vm414_vm0 = vcmask 1041408   ;;  %s5589_s17 = sshll.u32 %s5584_s14, 4  ;;  %v6994_v1 = vld [vmem:[%s9883_s3 + $0x38] sm:$0xff]   ;;  %vm389_vm1 = vcmask 31744  }
   0xc   : > { %6668 = vmatprep.subr.msk.bf16.mxu0 %vm414_vm0, %v388_v0  ;;  %v416_v2 = vsel %vm414_vm0, %v388_v0, 0  ;;  %p352_p3 = scmp.lt.s32.totalorder %s5589_s17, 127  ;;  %v6691_v12 = vld [vmem:[%s9883_s3 + $0x30] sm:$0xff]   ;;  %v6692_v16 = vld [vmem:[%s9883_s3 + $0x28] sm:$0xff]   ;;  %v6693_v19 = vld [vmem:[%s9883_s3 + $0x20] sm:$0xff]   ;;  %s6914_s14 = smov 125  }
   0xd   : > { %6199 = vmatpush3.bf16.msra.mxu0 %v416_v2  ;;  %v6694_v25 = vld [vmem:[%s9883_s3 + $0x18] sm:$0xff]   ;;  %v6695_v27 = vld [vmem:[%s9883_s3 + $0x10] sm:$0xff]   ;;  %v6696_v32 = vld [vmem:[%s9883_s3 + $0x8] sm:$0xff]   ;;  %s6915_s15 = smov 122   ;;  %s6916_s16 = smov 116   ;;  %vm5295_vm2 = vcmask 23552  }
   0xe   : > { %s10110_s17 = smov (!%p352_p3, %s5589_s17), 127  ;;  %6234 = vmatprep.subr.bf16.mxu0 %v6994_v1  ;;  %v515_v33 = vld [vmem:[%s9882_s2] sm:$0x3]  ;;  %v7155_v60 = vld [vmem:[%s9883_s3 + $0x78] sm:$0xff]   ;;  %v5681_v61 = vld [vmem:[%s9882_s2 + $0x2] sm:$0x3] }
   0xf   : > { %s5590_s20 = sshll.u32 %s10110_s17, 3  ;;  %6669 = vmatprep.subr.msk.bf16.mxu1 %vm414_vm0, %v515_v33  ;;  %v517_v34 = vsel %vm414_vm0, %v515_v33, 0  ;;  %v6697_v35 = vld [vmem:[%s9883_s3] sm:$0xff]   ;;  %v1197_v62 = vsel %vm414_vm0, %v5681_v61, 0  ;;  %v7167_v63 = vld [vmem:[%s9883_s3 + $0x70] sm:$0xff]   ;;  %v7178_v0 = vld [vmem:[%s9883_s3 + $0x68] sm:$0xff]  }
  0x10   : > { %s7007_s23 = scalar_lea.vmem %s9880_s0, %s5590_s20  ;;  %6217 = vmatpush3.bf16.msra.mxu1 %v517_v34  ;;  %s6917_s18 = smov 3   ;;  %vm5312_vm3 = vcmask 48128   ;;  %vm5329_vm4 = vcmask 72704   ;;  %vm5346_vm5 = vcmask 97280   ;;  %vm5363_vm6 = vcmask 121856  }
  0x11   : > { %v364_v3 = vld [vmem:[%s7007_s23] sm:$0xff]  ;;  %v365_v4 = vld [vmem:[%s7007_s23 + $0x8] sm:$0xff]  ;;  %v366_v5 = vld [vmem:[%s7007_s23 + $0x10] sm:$0xff]  ;;  %6266 = vmatprep.subr.bf16.mxu1 %v6994_v1  ;;  %s6918_s19 = smov 6   ;;  %s6919_s21 = smov 9   ;;  %vm5380_vm7 = vcmask 146432  }
  0x12   : > { %v7012_v6 = vpack.c.bf16 %v365_v4, %v364_v3  ;;  %v367_v7 = vld [vmem:[%s7007_s23 + $0x18] sm:$0xff]  ;;  %v368_v8 = vld [vmem:[%s7007_s23 + $0x20] sm:$0xff]  ;;  %v369_v9 = vld [vmem:[%s7007_s23 + $0x28] sm:$0xff]  ;;  %s6920_s22 = smov 12   ;;  %s6922_s24 = smov 18   ;;  %vm5397_vm8 = vcmask 171008  }
  0x13   : > { %v7017_v10 = vpack.c.bf16 %v367_v7, %v366_v5  ;;  %v7019_v11 = vpack.c.bf16 %v369_v9, %v368_v8  ;;  %v370_v13 = vld [vmem:[%s7007_s23 + $0x30] sm:$0xff]  ;;  %v371_v14 = vld [vmem:[%s7007_s23 + $0x38] sm:$0xff]  ;;  %v372_v15 = vld [vmem:[%s7007_s23 + $0x40] sm:$0xff]  ;;  %s6923_s25 = smov 21   ;;  %s6924_s26 = smov 24   ;;  %vm5494_vm9 = vcmask 195584  }
  0x14   : > { %6200 = vmatprep.mubr.msk.bf16.mxu0 %vm389_vm1, %v7012_v6  ;;  %6218 = vmatprep.mubr.msk.bf16.mxu1 %vm389_vm1, %v7012_v6  ;;  %v373_v17 = vld [vmem:[%s7007_s23 + $0x48] sm:$0xff]  ;;  %v7040_v18 = vpack.c.bf16 %v371_v14, %v370_v13  ;;  %v374_v21 = vld [vmem:[%s7007_s23 + $0x50] sm:$0xff]  ;;  %v375_v22 = vld [vmem:[%s7007_s23 + $0x58] sm:$0xff]  ;;  %s9806_s29 = scalar_lea.vmem %s9890_s10, %s5590_s20  ;;  %vm5511_vm10 = vcmask 392192  }
  0x15   : > { %6201 = vmatmul.mubr.msk.bf16.vlgmr.msra.gmra.mxu0 %vm389_vm1, %v7017_v10  ;;  %v7045_v20 = vpack.c.bf16 %v373_v17, %v372_v15  ;;  %v376_v23 = vld [vmem:[%s7007_s23 + $0x60] sm:$0xff]  ;;  %v377_v24 = vld [vmem:[%s7007_s23 + $0x68] sm:$0xff]  ;;  %v7058_v26 = vpack.c.bf16 %v375_v22, %v374_v21  ;;  %v378_v29 = vld [vmem:[%s7007_s23 + $0x70] sm:$0xff]  ;;  %6219 = vmatmul.mubr.msk.bf16.vlgmr.msra.gmra.mxu1 %vm389_vm1, %v7017_v10 }
  0x16   : > { %6204 = vmatprep.mubr.msk.bf16.mxu0 %vm389_vm1, %v7019_v11  ;;  %6235 = vmatpush3.bf16.msra.mxu0 %v6994_v1  ;;  %v7063_v28 = vpack.c.bf16 %v377_v24, %v376_v23  ;;  %v379_v30 = vld [vmem:[%s7007_s23 + $0x78] sm:$0xff]  ;;  %s6921_s23 = smov 15  }
  0x17   : > { %6236 = vmatprep.subr.bf16.mxu0 %v6691_v12  ;;  %v7071_v31 = vpack.c.bf16 %v379_v30, %v378_v29  ;;  %6222 = vmatprep.mubr.msk.bf16.mxu1 %vm389_vm1, %v7019_v11 }
  0x18   : > { %6267 = vmatpush3.bf16.msra.mxu1 %v6994_v1 }
  0x19   : > { %6268 = vmatprep.subr.bf16.mxu1 %v6691_v12 }
  0x1a   : > { %6237 = vmatpush3.bf16.msra.mxu0 %v6691_v12 }
  0x1b   : > { %6238 = vmatprep.subr.bf16.mxu0 %v6692_v16 }
  0x1c   : > { %6269 = vmatpush3.bf16.msra.mxu1 %v6691_v12 }
  0x1d   : > { %6205 = vmatmul.mubr.msk.bf16.gmra.mxu0 %vm389_vm1, %v7040_v18  ;;  %6270 = vmatprep.subr.bf16.mxu1 %v6692_v16 }
  0x1e   : > { %6208 = vmatprep.mubr.msk.bf16.mxu0 %vm389_vm1, %v7045_v20  ;;  %6239 = vmatpush3.bf16.msra.mxu0 %v6692_v16 }
  0x1f   : > { %6240 = vmatprep.subr.bf16.mxu0 %v6693_v19  ;;  %6223 = vmatmul.mubr.msk.bf16.gmra.mxu1 %vm389_vm1, %v7040_v18 }
  0x20   : > { %6226 = vmatprep.mubr.msk.bf16.mxu1 %vm389_vm1, %v7045_v20  ;;  %6271 = vmatpush3.bf16.msra.mxu1 %v6692_v16 }
  0x21   : > { %6272 = vmatprep.subr.bf16.mxu1 %v6693_v19 }
  0x22   : > { %6241 = vmatpush3.bf16.msra.mxu0 %v6693_v19 }
  0x23   : > { %6242 = vmatprep.subr.bf16.mxu0 %v6694_v25 }
  0x24   : > { %6273 = vmatpush3.bf16.msra.mxu1 %v6693_v19 }
  0x25   : > { %6209 = vmatmul.mubr.msk.bf16.gmra.mxu0 %vm389_vm1, %v7058_v26  ;;  %6274 = vmatprep.subr.bf16.mxu1 %v6694_v25 }
  0x26   : > { %6212 = vmatprep.mubr.msk.bf16.mxu0 %vm389_vm1, %v7063_v28  ;;  %6243 = vmatpush3.bf16.msra.mxu0 %v6694_v25 }
  0x27   : > { %6244 = vmatprep.subr.bf16.mxu0 %v6695_v27  ;;  %6227 = vmatmul.mubr.msk.bf16.gmra.mxu1 %vm389_vm1, %v7058_v26 }
  0x28   : > { %6230 = vmatprep.mubr.msk.bf16.mxu1 %vm389_vm1, %v7063_v28  ;;  %6275 = vmatpush3.bf16.msra.mxu1 %v6694_v25 }
  0x29   : > { %6276 = vmatprep.subr.bf16.mxu1 %v6695_v27 }
  0x2a   : > { %6245 = vmatpush3.bf16.msra.mxu0 %v6695_v27 }
  0x2b   : > { %6246 = vmatprep.subr.bf16.mxu0 %v6696_v32 }
  0x2c   : > { %6277 = vmatpush3.bf16.msra.mxu1 %v6695_v27 }
  0x2d   : > { %6213 = vmatmul.mubr.msk.bf16.gmra.mxu0 %vm389_vm1, %v7071_v31  ;;  %6278 = vmatprep.subr.bf16.mxu1 %v6696_v32 }
  0x2e   : > { %6247 = vmatpush3.bf16.msra.mxu0 %v6696_v32 }
  0x2f   : > { %6248 = vmatprep.subr.bf16.mxu0 %v6697_v35  ;;  %6231 = vmatmul.mubr.msk.bf16.gmra.mxu1 %vm389_vm1, %v7071_v31 }
  0x30   : > { %6279 = vmatpush3.bf16.msra.mxu1 %v6696_v32 }
  0x31   : > { %6280 = vmatprep.subr.bf16.mxu1 %v6697_v35 }
  0x32   : > { %6249 = vmatpush3.bf16.msra.mxu0 %v6697_v35 }
  0x33   : > { %6670 = vmatprep.subr.msk.bf16.mxu0 %vm414_vm0, %v5681_v61 }
  0x34   : > { %6281 = vmatpush3.bf16.msra.mxu1 %v6697_v35 }
  0x35   : > { %6316 = vmatprep.subr.bf16.mxu1 %v7155_v60 }
  0xd5   : > { %v7102_v36 = vpop.f32.mrf.mxu0  ;;  %v6220_v1 = vpop.f32.mrf.mxu1 }
  0xd6   : > { %v7193_v14 = vmul.f32 0.5, %v6220_v1 }
  0xd7   : > { %v7104_v37 = vpop.f32.mrf.mxu0  ;;  %v553_v2 = vpop.f32.mrf.mxu1 }
  0xd8   : > { %v7196_v21 = vmul.f32 0.5, %v553_v2 }
  0xd9   : > { %v7106_v38 = vpop.f32.mrf.mxu0  ;;  %v6221_v3 = vpop.f32.mrf.mxu1 }
  0xda   : > { %v633_v41 = vpack.c.bf16 %v7106_v38, %v7102_v36  ;;  %v7202_v29 = vmul.f32 0.5, %v6221_v3 }
  0xdb   : > { %v7108_v39 = vpop.f32.mrf.mxu0  ;;  %v556_v4 = vpop.f32.mrf.mxu1 }
  0xdc   : > { %v632_v40 = vpack.c.bf16 %v7108_v39, %v7104_v37  ;;  %v7204_v33 = vmul.f32 0.5, %v556_v4 }
  0xdd   : > { %v7114_v42 = vpop.f32.mrf.mxu0 }
  0xde   : > { %6250 = vmatprep.mubr.bf16.mxu0 %v632_v40 }
  0xdf   : > { %v7116_v43 = vpop.f32.mrf.mxu0  ;;  %6251 = vmatmul.mubr.bf16.vlgmr.msra.gmra.mxu0 %v633_v41  ;;  %v6224_v5 = vpop.f32.mrf.mxu1 }
  0xe0   : > { %6299 = vmatpush3.bf16.msra.mxu0 %v1197_v62  ;;  %v7206_v34 = vmul.f32 0.5, %v6224_v5 }
  0xe1   : > { %v7118_v44 = vpop.f32.mrf.mxu0  ;;  %6348 = vmatprep.subr.bf16.mxu0 %v7155_v60 }
  0xe2   : > { %v635_v45 = vpack.c.bf16 %v7118_v44, %v7114_v42 }
  0xe3   : > { %v7122_v46 = vpop.f32.mrf.mxu0 }
  0xe4   : > { %v634_v47 = vpack.c.bf16 %v7122_v46, %v7116_v43 }
  0xe5   : > { %v7126_v48 = vpop.f32.mrf.mxu0 }
  0xe6   : > { %6254 = vmatprep.mubr.bf16.mxu0 %v634_v47 }
  0xe7   : > { %v7128_v49 = vpop.f32.mrf.mxu0  ;;  %6255 = vmatmul.mubr.bf16.gmra.mxu0 %v635_v45 }
  0xe9   : > { %v7130_v50 = vpop.f32.mrf.mxu0 }
  0xea   : > { %v637_v51 = vpack.c.bf16 %v7130_v50, %v7126_v48 }
  0xeb   : > { %v7134_v52 = vpop.f32.mrf.mxu0 }
  0xec   : > { %v636_v53 = vpack.c.bf16 %v7134_v52, %v7128_v49 }
  0xed   : > { %v7138_v54 = vpop.f32.mrf.mxu0 }
  0xee   : > { %6258 = vmatprep.mubr.bf16.mxu0 %v636_v53 }
  0xef   : > { %v7140_v55 = vpop.f32.mrf.mxu0  ;;  %6259 = vmatmul.mubr.bf16.gmra.mxu0 %v637_v51 }
  0xf1   : > { %v7142_v56 = vpop.f32.mrf.mxu0 }
  0xf2   : > { %v639_v57 = vpack.c.bf16 %v7142_v56, %v7138_v54 }
  0xf3   : > { %v7146_v58 = vpop.f32.mrf.mxu0 }
  0xf4   : > { %v638_v59 = vpack.c.bf16 %v7146_v58, %v7140_v55 }
  0xf6   : > { %6262 = vmatprep.mubr.bf16.mxu0 %v638_v59 }
  0xf7   : > { %6263 = vmatmul.mubr.bf16.gmra.mxu0 %v639_v57 }
  0xf8   : > { %6300 = vmatprep.mubr.msk.bf16.mxu0 %vm389_vm1, %v7012_v6  ;;  %v569_v6 = vpop.f32.mrf.mxu1 }
  0xf9   : > { %v7208_v35 = vmul.f32 0.5, %v569_v6 }
  0xfa   : > { %v6225_v7 = vpop.f32.mrf.mxu1 }
  0xfc   : > { %v572_v8 = vpop.f32.mrf.mxu1 }
  0xfe   : > { %v6228_v9 = vpop.f32.mrf.mxu1 }
  0xff   : > { %6301 = vmatmul.mubr.msk.bf16.vlgmr.msra.gmra.mxu0 %vm389_vm1, %v7017_v10  ;;  %v7216_v57 = vmul.f32 0.5, %v6228_v9 }
 0x100   : > { %6304 = vmatprep.mubr.msk.bf16.mxu0 %vm389_vm1, %v7019_v11  ;;  %6349 = vmatpush3.bf16.msra.mxu0 %v7155_v60  ;;  %v585_v10 = vpop.f32.mrf.mxu1 }
 0x101   : > { %6350 = vmatprep.subr.bf16.mxu0 %v7167_v63  ;;  %v7220_v2 = vmul.f32 0.5, %v585_v10 }
 0x102   : > { %v6229_v11 = vpop.f32.mrf.mxu1 }
 0x103   : > { %v7223_v6 = vmul.f32 0.5, %v6229_v11 }
 0x104   : > { %6351 = vmatpush3.bf16.msra.mxu0 %v7167_v63  ;;  %v588_v13 = vpop.f32.mrf.mxu1 }
 0x105   : > { %6352 = vmatprep.subr.bf16.mxu0 %v7178_v0 }
 0x107   : > { %6305 = vmatmul.mubr.msk.bf16.gmra.mxu0 %vm389_vm1, %v7040_v18 }
 0x108   : > { %6308 = vmatprep.mubr.msk.bf16.mxu0 %vm389_vm1, %v7045_v20  ;;  %6353 = vmatpush3.bf16.msra.mxu0 %v7178_v0  ;;  %v6232_v20 = vpop.f32.mrf.mxu1 }
 0x10a   : > { %v601_v32 = vpop.f32.mrf.mxu1 }
 0x10c   : > { %v6233_v3 = vpop.f32.mrf.mxu1 }
 0x10e   : > { %v604_v11 = vpop.f32.mrf.mxu1 }
 0x10f   : > { %6309 = vmatmul.mubr.msk.bf16.gmra.mxu0 %vm389_vm1, %v7058_v26 }
 0x110   : > { %6312 = vmatprep.mubr.msk.bf16.mxu0 %vm389_vm1, %v7063_v28 }
 0x117   : > { %6313 = vmatmul.mubr.msk.bf16.gmra.mxu0 %vm389_vm1, %v7071_v31 }
 0x19f   : > { %v6252_v12 = vpop.f32.mrf.mxu0 }
 0x1a0   : > { %v803_v15 = vmul.f32 0.5, %v6252_v12 }
 0x1a1   : > { %v738_v16 = vpop.f32.mrf.mxu0 }
 0x1a2   : > { %v819_v17 = vsub.f32 %v7102_v36, %v803_v15  ;;  %v801_v18 = vmul.f32 0.5, %v738_v16  ;;  %v7210_v36 = vmul.f32 0.5, %v6225_v7  ;;  %v7225_v15 = vmul.f32 0.5, %v588_v13 }
 0x1a3   : > { %v6253_v19 = vpop.f32.mrf.mxu0 }
 0x1a4   : > { %v835_v22 = vadd.f32 %v819_v17, %v7193_v14  ;;  %v817_v23 = vsub.f32 %v7104_v37, %v801_v18  ;;  %v804_v24 = vmul.f32 0.5, %v6253_v19 }
 0x1a5   : > { %v741_v25 = vpop.f32.mrf.mxu0 }
 0x1a6   : > { %v883_v26 = vsub.f32 0.0, %v835_v22  ;;  %v833_v27 = vadd.f32 %v817_v23, %v7196_v21  ;;  %v820_v28 = vsub.f32 %v7106_v38, %v804_v24  ;;  %v802_v30 = vmul.f32 0.5, %v741_v25 }
 0x1a7   : > { %v6256_v31 = vpop.f32.mrf.mxu0  ;;  %v7214_v38 = vmul.f32 0.5, %v572_v8  ;;  %v5619_v4 = vadd.f32 -0.02, %v835_v22 }
 0x1a8   : > { %v836_v37 = vadd.f32 %v820_v28, %v7202_v29  ;;  %v818_v40 = vsub.f32 %v7108_v39, %v802_v30  ;;  %v807_v41 = vmul.f32 0.5, %v6256_v31  ;;  %v5635_v47 = vadd.f32 -0.02, %v883_v26 }
 0x1a9   : > { %v754_v45 = vpop.f32.mrf.mxu0  ;;  %v881_v51 = vsub.f32 0.0, %v833_v27  ;;  %v5617_v7 = vadd.f32 -0.02, %v833_v27  ;;  %v867_v24 = vmax.f32 %v5619_v4, 0.0  ;;  %v7232_v27 = vmul.f32 0.5, %v601_v32 }
 0x1aa   : > { %v805_v53 = vmul.f32 0.5, %v754_v45  ;;  %v884_v59 = vsub.f32 0.0, %v836_v37  ;;  %v834_v61 = vadd.f32 %v818_v40, %v7204_v33  ;;  %v823_v62 = vsub.f32 %v7114_v42, %v807_v41 }
 0x1ab   : > { %v6257_v1 = vpop.f32.mrf.mxu0  ;;  %v915_v16 = vmax.f32 %v5635_v47, 0.0  ;;  %v5633_v17 = vadd.f32 -0.02, %v881_v51  ;;  %v5620_v10 = vadd.f32 -0.02, %v836_v37  ;;  %v7236_v31 = vmul.f32 0.5, %v6233_v3 }
 0x1ac   : > { %v821_v39 = vsub.f32 %v7116_v43, %v805_v53  ;;  %v808_v5 = vmul.f32 0.5, %v6257_v1  ;;  %v5636_v8 = vadd.f32 -0.02, %v884_v59  ;;  %v882_v12 = vsub.f32 0.0, %v834_v61 }
 0x1ad   : > { %v757_v9 = vpop.f32.mrf.mxu0  ;;  %v839_v22 = vadd.f32 %v823_v62, %v7206_v34  ;;  %v7229_v43 = vmul.f32 0.5, %v6232_v20  ;;  %v5618_v25 = vadd.f32 -0.02, %v834_v61  ;;  %v7238_v37 = vsub.f32 %v867_v24, %v915_v16 }
 0x1ae   : > { %v824_v42 = vsub.f32 %v7118_v44, %v808_v5  ;;  %v806_v18 = vmul.f32 0.5, %v757_v9  ;;  %v5634_v19 = vadd.f32 -0.02, %v882_v12  ;;  %v837_v26 = vadd.f32 %v821_v39, %v7208_v35 }
 0x1af   : > { %v6260_v23 = vpop.f32.mrf.mxu0  ;;  %v916_v13 = vmax.f32 %v5636_v8, 0.0  ;;  %v865_v40 = vmax.f32 %v5617_v7, 0.0  ;;  %v913_v20 = vmax.f32 %v5633_v17, 0.0  ;;  %v7240_v41 = vmul.f32 0.5, %v604_v11 }
 0x1b0   : > { %v840_v28 = vadd.f32 %v824_v42, %v7210_v36  ;;  %v822_v44 = vsub.f32 %v7122_v46, %v806_v18  ;;  %v868_v45 = vmax.f32 %v5620_v10, 0.0  ;;  %v914_v47 = vmax.f32 %v5634_v19, 0.0 }
 0x1b1   : > { %v770_v30 = vpop.f32.mrf.mxu0  ;;  %v887_v51 = vsub.f32 0.0, %v839_v22  ;;  %v866_v59 = vmax.f32 %v5618_v25, 0.0  ;;  %v885_v61 = vsub.f32 0.0, %v837_v26  ;;  %v811_v62 = vmul.f32 0.5, %v6260_v23 }
 0x1b2   : > { %v838_v32 = vadd.f32 %v822_v44, %v7214_v38  ;;  %v809_v1 = vmul.f32 0.5, %v770_v30  ;;  %v7243_v46 = vsub.f32 %v868_v45, %v916_v13  ;;  %v7245_v3 = vadd.f32 -0.02, %v839_v22 }
 0x1b3   : > { %v6261_v53 = vpop.f32.mrf.mxu0  ;;  %v888_v4 = vsub.f32 0.0, %v840_v28  ;;  %v827_v7 = vsub.f32 %v7126_v48, %v811_v62  ;;  %v7249_v16 = vadd.f32 -0.02, %v887_v51  ;;  %v5621_v17 = vadd.f32 -0.02, %v837_v26 }
 0x1b4   : > { %v886_v39 = vsub.f32 0.0, %v838_v32  ;;  %v825_v8 = vsub.f32 %v7128_v49, %v809_v1  ;;  %v812_v12 = vmul.f32 0.5, %v6261_v53  ;;  %v7251_v42 = vsub.f32 %v865_v40, %v913_v20 }
 0x1b5   : > { %v773_v5 = vpop.f32.mrf.mxu0  ;;  %v7253_v18 = vsub.f32 %v866_v59, %v914_v47  ;;  %v5637_v19 = vadd.f32 -0.02, %v885_v61  ;;  %v5624_v48 = vadd.f32 -0.02, %v840_v28  ;;  %v843_v49 = vadd.f32 %v827_v7, %v7216_v57 }
 0x1b6   : > { %v810_v9 = vmul.f32 0.5, %v773_v5  ;;  %v841_v22 = vadd.f32 %v825_v8, %v7220_v2  ;;  %v828_v23 = vsub.f32 %v7130_v50, %v812_v12  ;;  %v5638_v24 = vadd.f32 -0.02, %v886_v39 }
 0x1b7   : > { %v6264_v10 = vpop.f32.mrf.mxu0  ;;  %v945_v25 = vpack.c.bf16 %v7253_v18, %v7251_v42  ;;  %v946_v13 = vpack.c.bf16 %v7243_v46, %v7238_v37  ;;  %v871_v44 = vmax.f32 %v7245_v3, 0.0  ;;  %v5640_v30 = vadd.f32 -0.02, %v888_v4 }
 0x1b8   : > { %v826_v11 = vsub.f32 %v7134_v52, %v810_v9  ;;  %v889_v40 = vsub.f32 0.0, %v841_v22  ;;  %v5622_v20 = vadd.f32 -0.02, %v838_v32  ;;  %v844_v50 = vadd.f32 %v828_v23, %v7223_v6 }
 0x1b9   : > { %v786_v26 = vpop.f32.mrf.mxu0  ;;  %6282 = vmatprep.mubr.bf16.mxu1 %v945_v25  ;;  %v919_v47 = vmax.f32 %v7249_v16, 0.0  ;;  %v869_v51 = vmax.f32 %v5621_v17, 0.0  ;;  %v917_v53 = vmax.f32 %v5637_v19, 0.0  ;;  %v815_v59 = vmul.f32 0.5, %v6264_v10 }
 0x1ba   : > { %v842_v52 = vadd.f32 %v826_v11, %v7225_v15  ;;  %v813_v28 = vmul.f32 0.5, %v786_v26  ;;  %6283 = vmatmul.mubr.bf16.vlgmr.msra.gmra.mxu1 %v946_v13  ;;  %v872_v61 = vmax.f32 %v5624_v48, 0.0  ;;  %v918_v62 = vmax.f32 %v5638_v24, 0.0 }
 0x1bb   : > { %v6265_v45 = vpop.f32.mrf.mxu0  ;;  %v891_v1 = vsub.f32 0.0, %v843_v49  ;;  %6317 = vmatpush3.bf16.msra.mxu1 %v7155_v60  ;;  %v5625_v32 = vadd.f32 -0.02, %v841_v22  ;;  %v5641_v4 = vadd.f32 -0.02, %v889_v40  ;;  %v892_v39 = vsub.f32 0.0, %v844_v50 }
 0x1bc   : > { %v890_v3 = vsub.f32 0.0, %v842_v52  ;;  %v829_v5 = vsub.f32 %v7140_v55, %v813_v28  ;;  %6318 = vmatprep.subr.bf16.mxu1 %v7167_v63  ;;  %v920_v8 = vmax.f32 %v5640_v30, 0.0  ;;  %v870_v12 = vmax.f32 %v5622_v20, 0.0 }
 0x1bd   : > { %v789_v7 = vpop.f32.mrf.mxu0  ;;  %v5626_v9 = vadd.f32 -0.02, %v842_v52  ;;  %v831_v17 = vsub.f32 %v7138_v54, %v815_v59  ;;  %v816_v19 = vmul.f32 0.5, %v6265_v45  ;;  %v7272_v23 = vsub.f32 %v869_v51, %v917_v53 }
 0x1be   : > { %v5642_v16 = vadd.f32 -0.02, %v890_v3  ;;  %v845_v10 = vadd.f32 %v829_v5, %v7232_v27  ;;  %v5643_v60 = vadd.f32 -0.02, %v891_v1  ;;  %v814_v11 = vmul.f32 0.5, %v789_v7 }
 0x1bf   : > { %v7274_v48 = vsub.f32 %v870_v12, %v918_v62  ;;  %6319 = vmatpush3.bf16.msra.mxu1 %v7167_v63  ;;  %v873_v55 = vmax.f32 %v5625_v32, 0.0  ;;  %v921_v24 = vmax.f32 %v5641_v4, 0.0  ;;  %v5644_v25 = vadd.f32 -0.02, %v892_v39 }
 0x1c0   : > { %v922_v22 = vmax.f32 %v5642_v16, 0.0  ;;  %v893_v26 = vsub.f32 0.0, %v845_v10  ;;  %6320 = vmatprep.subr.bf16.mxu1 %v7178_v0  ;;  %v874_v13 = vmax.f32 %v5626_v9, 0.0  ;;  %v832_v54 = vsub.f32 %v7142_v56, %v816_v19 }
 0x1c1   : > { %v830_v30 = vsub.f32 %v7146_v58, %v814_v11  ;;  %v947_v40 = vpack.c.bf16 %v7274_v48, %v7272_v23  ;;  %v5628_v20 = vadd.f32 -0.02, %v844_v50  ;;  %v847_v52 = vadd.f32 %v831_v17, %v7229_v43 }
 0x1c2   : > { %v7283_v28 = vsub.f32 %v871_v44, %v919_v47  ;;  %v7285_v63 = vsub.f32 %v872_v61, %v920_v8  ;;  %v5645_v45 = vadd.f32 -0.02, %v893_v26  ;;  %v848_v51 = vadd.f32 %v832_v54, %v7236_v31 }
 0x1c3   : > { %6286 = vmatprep.mubr.bf16.mxu1 %v947_v40  ;;  %v846_v53 = vadd.f32 %v830_v30, %v7240_v41  ;;  %v7289_v59 = vsub.f32 %v874_v13, %v922_v22  ;;  %v5627_v56 = vadd.f32 -0.02, %v843_v49  ;;  %v924_v58 = vmax.f32 %v5644_v25, 0.0  ;;  %6321 = vmatpush3.bf16.msra.mxu1 %v7178_v0 }
 0x1c4   : > { %v948_v62 = vpack.c.bf16 %v7285_v63, %v7283_v28  ;;  %v7293_v50 = vsub.f32 %v873_v55, %v921_v24  ;;  %v5629_v44 = vadd.f32 -0.02, %v845_v10  ;;  %v896_v47 = vsub.f32 0.0, %v848_v51 }
 0x1c5   : > { %v5630_v61 = vadd.f32 -0.02, %v846_v53  ;;  %v894_v1 = vsub.f32 0.0, %v846_v53  ;;  %v923_v3 = vmax.f32 %v5643_v60, 0.0  ;;  %v876_v32 = vmax.f32 %v5628_v20, 0.0  ;;  %v6704_v53 = vld [vmem:[%s9883_s3 + $0x48] sm:$0xff]  }
 0x1c6   : > { %v895_v4 = vsub.f32 0.0, %v847_v52  ;;  %6287 = vmatmul.mubr.bf16.gmra.mxu1 %v948_v62  ;;  %v949_v39 = vpack.c.bf16 %v7289_v59, %v7293_v50  ;;  %v925_v49 = vmax.f32 %v5645_v45, 0.0  ;;  %v875_v7 = vmax.f32 %v5627_v56, 0.0  ;;  %v6702_v45 = vld [vmem:[%s9883_s3 + $0x58] sm:$0xff]   ;;  %v6705_v56 = vld [vmem:[%s9883_s3 + $0x40] sm:$0xff]  }
 0x1c7   : > { %v5646_v5 = vadd.f32 -0.02, %v894_v1  ;;  %v5648_v8 = vadd.f32 -0.02, %v896_v47  ;;  %v7298_v12 = vsub.f32 %v876_v32, %v924_v58  ;;  %v877_v9 = vmax.f32 %v5629_v44, 0.0 }
 0x1c8   : > { %6290 = vmatprep.mubr.bf16.mxu1 %v949_v39  ;;  %v878_v0 = vmax.f32 %v5630_v61, 0.0  ;;  %v5647_v17 = vadd.f32 -0.02, %v895_v4  ;;  %v5632_v10 = vadd.f32 -0.02, %v848_v51  ;;  %v7300_v19 = vsub.f32 %v875_v7, %v923_v3  ;;  %v6703_v51 = vld [vmem:[%s9883_s3 + $0x50] sm:$0xff]  }
 0x1c9   : > { %v926_v16 = vmax.f32 %v5646_v5, 0.0  ;;  %v7302_v60 = vsub.f32 %v877_v9, %v925_v49  ;;  %v5631_v11 = vadd.f32 -0.02, %v847_v52  ;;  %v928_v55 = vmax.f32 %v5648_v8, 0.0  ;;  %v6701_v52 = vld [vmem:[%s9883_s3 + $0x60] sm:$0xff]  }
 0x1ca   : > { %v950_v24 = vpack.c.bf16 %v7298_v12, %v7300_v19  ;;  %v927_v26 = vmax.f32 %v5647_v17, 0.0  ;;  %v880_v13 = vmax.f32 %v5632_v10, 0.0  ;;  %6322 = vmatprep.subr.bf16.mxu1 %v6701_v52  ;;  %6354 = vmatprep.subr.bf16.mxu0 %v6701_v52 }
 0x1cb   : > { %v7304_v22 = vsub.f32 %v878_v0, %v926_v16  ;;  %v879_v54 = vmax.f32 %v5631_v11, 0.0  ;;  %6323 = vmatpush3.bf16.msra.mxu1 %v6701_v52  ;;  %6355 = vmatpush3.bf16.msra.mxu0 %v6701_v52 }
 0x1cc   : > { %v7310_v30 = vsub.f32 %v880_v13, %v928_v55  ;;  %6324 = vmatprep.subr.bf16.mxu1 %v6702_v45  ;;  %6356 = vmatprep.subr.bf16.mxu0 %v6702_v45 }
 0x1cd   : > { %v951_v25 = vpack.c.bf16 %v7304_v22, %v7302_v60  ;;  %v7312_v40 = vsub.f32 %v879_v54, %v927_v26 }
 0x1ce   : > { %6291 = vmatmul.mubr.bf16.gmra.mxu1 %v950_v24 }
 0x1cf   : > { %6294 = vmatprep.mubr.bf16.mxu1 %v951_v25  ;;  %v952_v20 = vpack.c.bf16 %v7310_v30, %v7312_v40  ;;  %6325 = vmatpush3.bf16.msra.mxu1 %v6702_v45 }
 0x1d0   : > { %6357 = vmatpush3.bf16.msra.mxu0 %v6702_v45  ;;  %6326 = vmatprep.subr.bf16.mxu1 %v6703_v51 }
 0x1d1   : > { %6358 = vmatprep.subr.bf16.mxu0 %v6703_v51 }
 0x1d3   : > { %6327 = vmatpush3.bf16.msra.mxu1 %v6703_v51 }
 0x1d4   : > { %6359 = vmatpush3.bf16.msra.mxu0 %v6703_v51  ;;  %6328 = vmatprep.subr.bf16.mxu1 %v6704_v53 }
 0x1d5   : > { %6360 = vmatprep.subr.bf16.mxu0 %v6704_v53 }
 0x1d6   : > { %6295 = vmatmul.mubr.bf16.gmra.mxu1 %v952_v20 }
 0x1d7   : > { %6329 = vmatpush3.bf16.msra.mxu1 %v6704_v53 }
 0x1d8   : > { %6361 = vmatpush3.bf16.msra.mxu0 %v6704_v53  ;;  %6330 = vmatprep.subr.bf16.mxu1 %v6705_v56 }
 0x1d9   : > { %6362 = vmatprep.subr.bf16.mxu0 %v6705_v56 }
 0x1db   : > { %6331 = vmatpush3.bf16.msra.mxu1 %v6705_v56 }
 0x1dc   : > { %6363 = vmatpush3.bf16.msra.mxu0 %v6705_v56 }
 0x27a   : > { %v6284_v58 = vpop.f32.mrf.mxu1 }
 0x27b   : > { %v1052_v62 = vmul.f32 0.5, %v6284_v58 }
 0x27c   : > { %v987_v44 = vpop.f32.mrf.mxu1 }
 0x27d   : > { %v1068_v47 = vsub.f32 %v7238_v37, %v1052_v62  ;;  %v1050_v61 = vmul.f32 0.5, %v987_v44 }
 0x27e   : > { %v6285_v1 = vpop.f32.mrf.mxu1 }
 0x27f   : > { %v1084_v3 = vadd.f32 %v1068_v47, %v7193_v14  ;;  %v1066_v32 = vsub.f32 %v7251_v42, %v1050_v61  ;;  %v1053_v4 = vmul.f32 0.5, %v6285_v1 }
 0x280   : > { %v990_v39 = vpop.f32.mrf.mxu1 }
 0x281   : > { %v1082_v49 = vadd.f32 %v1066_v32, %v7196_v21  ;;  %v1069_v5 = vsub.f32 %v7243_v46, %v1053_v4  ;;  %v1132_v7 = vsub.f32 0.0, %v1084_v3  ;;  %v1051_v8 = vmul.f32 0.5, %v990_v39 }
 0x282   : > { %v5651_v37 = vadd.f32 -0.02, %v1084_v3 }
 0x283   : > { %v1130_v9 = vsub.f32 0.0, %v1082_v49  ;;  %v1085_v0 = vadd.f32 %v1069_v5, %v7202_v29  ;;  %v1067_v16 = vsub.f32 %v7253_v18, %v1051_v8  ;;  %v5667_v17 = vadd.f32 -0.02, %v1132_v7 }
 0x284   : > { %v5649_v55 = vadd.f32 -0.02, %v1082_v49  ;;  %v1116_v62 = vmax.f32 %v5651_v37, 0.0 }
 0x285   : > { %v5665_v10 = vadd.f32 -0.02, %v1130_v9  ;;  %v1133_v11 = vsub.f32 0.0, %v1085_v0  ;;  %v1083_v14 = vadd.f32 %v1067_v16, %v7204_v33  ;;  %v5652_v24 = vadd.f32 -0.02, %v1085_v0 }
 0x286   : > { %v6288_v42 = vpop.f32.mrf.mxu1  ;;  %v1164_v29 = vmax.f32 %v5667_v17, 0.0  ;;  %v1114_v44 = vmax.f32 %v5649_v55, 0.0 }
 0x287   : > { %v1056_v25 = vmul.f32 0.5, %v6288_v42  ;;  %v5668_v21 = vadd.f32 -0.02, %v1133_v11  ;;  %v5650_v26 = vadd.f32 -0.02, %v1083_v14  ;;  %v1131_v46 = vsub.f32 0.0, %v1083_v14 }
 0x288   : > { %v1003_v13 = vpop.f32.mrf.mxu1  ;;  %v1162_v52 = vmax.f32 %v5665_v10, 0.0  ;;  %v1117_v53 = vmax.f32 %v5652_v24, 0.0 }
 0x289   : > { %v1072_v54 = vsub.f32 %v7283_v28, %v1056_v25  ;;  %v1054_v20 = vmul.f32 0.5, %v1003_v13  ;;  %v1165_v18 = vmax.f32 %v5668_v21, 0.0  ;;  %v5666_v45 = vadd.f32 -0.02, %v1131_v46 }
 0x28a   : > { %v6289_v51 = vpop.f32.mrf.mxu1  ;;  %v1115_v47 = vmax.f32 %v5650_v26, 0.0  ;;  %v7346_v5 = vsub.f32 %v1114_v44, %v1162_v52 }
 0x28b   : > { %v1088_v56 = vadd.f32 %v1072_v54, %v7206_v34  ;;  %v1070_v33 = vsub.f32 %v7272_v23, %v1054_v20  ;;  %v1057_v58 = vmul.f32 0.5, %v6289_v51  ;;  %v1163_v61 = vmax.f32 %v5666_v45, 0.0 }
 0x28c   : > { %v1006_v1 = vpop.f32.mrf.mxu1  ;;  %v7342_v3 = vsub.f32 %v1117_v53, %v1165_v18  ;;  %v7350_v23 = vsub.f32 %v1116_v62, %v1164_v29 }
 0x28d   : > { %v1136_v28 = vsub.f32 0.0, %v1088_v56  ;;  %v1086_v32 = vadd.f32 %v1070_v33, %v7208_v35  ;;  %v1073_v4 = vsub.f32 %v7285_v63, %v1057_v58  ;;  %v1055_v39 = vmul.f32 0.5, %v1006_v1 }
 0x28e   : > { %v6292_v49 = vpop.f32.mrf.mxu1  ;;  %v7348_v34 = vsub.f32 %v1115_v47, %v1163_v61  ;;  %v1313_v63 = vpack.c.bf16 %v7342_v3, %v7350_v23  ;;  %v5655_v55 = vadd.f32 -0.02, %v1088_v56 }
 0x28f   : > { %v5671_v7 = vadd.f32 -0.02, %v1136_v28  ;;  %v1134_v8 = vsub.f32 0.0, %v1086_v32  ;;  %v1089_v9 = vadd.f32 %v1073_v4, %v7210_v36  ;;  %v1071_v0 = vsub.f32 %v7274_v48, %v1055_v39 }
 0x290   : > { %v1060_v16 = vmul.f32 0.5, %v6292_v49  ;;  %v1019_v37 = vpop.f32.mrf.mxu1  ;;  %v1312_v35 = vpack.c.bf16 %v7348_v34, %v7346_v5  ;;  %v5653_v36 = vadd.f32 -0.02, %v1086_v32  ;;  %v1120_v45 = vmax.f32 %v5655_v55, 0.0 }
 0x291   : > { %v1058_v17 = vmul.f32 0.5, %v1019_v37  ;;  %v1137_v10 = vsub.f32 0.0, %v1089_v9  ;;  %v1087_v11 = vadd.f32 %v1071_v0, %v7214_v38  ;;  %v1168_v25 = vmax.f32 %v5671_v7, 0.0 }
 0x292   : > { %v1076_v14 = vsub.f32 %v7300_v19, %v1060_v16  ;;  %v6293_v42 = vpop.f32.mrf.mxu1  ;;  %6332 = vmatprep.mubr.bf16.mxu1 %v1312_v35  ;;  %v5669_v21 = vadd.f32 -0.02, %v1134_v8  ;;  %v5656_v26 = vadd.f32 -0.02, %v1089_v9  ;;  %v1118_v51 = vmax.f32 %v5653_v36, 0.0 }
 0x293   : > { %v1074_v48 = vsub.f32 %v7293_v50, %v1058_v17  ;;  %v1061_v24 = vmul.f32 0.5, %v6293_v42  ;;  %6333 = vmatmul.mubr.bf16.vlgmr.msra.gmra.mxu1 %v1313_v63  ;;  %v1135_v46 = vsub.f32 0.0, %v1087_v11  ;;  %v5672_v54 = vadd.f32 -0.02, %v1137_v10 }
 0x294   : > { %v1022_v13 = vpop.f32.mrf.mxu1  ;;  %v1092_v52 = vadd.f32 %v1076_v14, %v7216_v57  ;;  %v5654_v50 = vadd.f32 -0.02, %v1087_v11  ;;  %v1166_v53 = vmax.f32 %v5669_v21, 0.0  ;;  %v1121_v44 = vmax.f32 %v5656_v26, 0.0 }
 0x295   : > { %v1090_v20 = vadd.f32 %v1074_v48, %v7220_v2  ;;  %v1077_v38 = vsub.f32 %v7298_v12, %v1061_v24  ;;  %v1059_v29 = vmul.f32 0.5, %v1022_v13  ;;  %v5670_v19 = vadd.f32 -0.02, %v1135_v46 }
 0x296   : > { %v6296_v18 = vpop.f32.mrf.mxu1  ;;  %v1169_v47 = vmax.f32 %v5672_v54, 0.0  ;;  %v7366_v61 = vsub.f32 %v1120_v45, %v1168_v25  ;;  %v1140_v1 = vsub.f32 0.0, %v1092_v52  ;;  %v1119_v4 = vmax.f32 %v5654_v50, 0.0 }
 0x297   : > { %v1093_v56 = vadd.f32 %v1077_v38, %v7223_v6  ;;  %v1075_v33 = vsub.f32 %v7289_v59, %v1059_v29  ;;  %v1064_v58 = vmul.f32 0.5, %v6296_v18  ;;  %v1138_v2 = vsub.f32 0.0, %v1090_v20 }
 0x298   : > { %v1035_v62 = vpop.f32.mrf.mxu1  ;;  %v1167_v12 = vmax.f32 %v5670_v19, 0.0  ;;  %v5659_v7 = vadd.f32 -0.02, %v1092_v52  ;;  %v5657_v59 = vadd.f32 -0.02, %v1090_v20  ;;  %v7370_v0 = vsub.f32 %v1118_v51, %v1166_v53 }
 0x299   : > { %v1141_v28 = vsub.f32 0.0, %v1093_v56  ;;  %v1091_v57 = vadd.f32 %v1075_v33, %v7225_v15  ;;  %v1080_v39 = vsub.f32 %v7312_v40, %v1064_v58  ;;  %v1062_v49 = vmul.f32 0.5, %v1035_v62 }
 0x29a   : > { %v6297_v32 = vpop.f32.mrf.mxu1  ;;  %v5673_v16 = vadd.f32 -0.02, %v1138_v2  ;;  %v5675_v17 = vadd.f32 -0.02, %v1140_v1  ;;  %v7374_v11 = vsub.f32 %v1119_v4, %v1167_v12  ;;  %v5660_v36 = vadd.f32 -0.02, %v1093_v56 }
 0x29b   : > { %v1065_v6 = vmul.f32 0.5, %v6297_v32  ;;  %v1139_v8 = vsub.f32 0.0, %v1091_v57  ;;  %v1078_v37 = vsub.f32 %v7302_v60, %v1062_v49  ;;  %v5676_v15 = vadd.f32 -0.02, %v1141_v28 }
 0x29c   : > { %v1038_v9 = vpop.f32.mrf.mxu1  ;;  %v5658_v40 = vadd.f32 -0.02, %v1091_v57  ;;  %v1096_v14 = vadd.f32 %v1080_v39, %v7229_v43  ;;  %v1314_v60 = vpack.c.bf16 %v7374_v11, %v7370_v0  ;;  %v1122_v24 = vmax.f32 %v5657_v59, 0.0 }
 0x29d   : > { %v1081_v35 = vsub.f32 %v7310_v30, %v1065_v6  ;;  %v1063_v63 = vmul.f32 0.5, %v1038_v9  ;;  %v5674_v10 = vadd.f32 -0.02, %v1139_v8  ;;  %v1094_v42 = vadd.f32 %v1078_v37, %v7232_v27  ;;  %v6707_v37 = vld [vmem:[%s9884_s4 + $0x30] sm:$0xff]  }
 0x29e   : > { %v7382_v30 = vsub.f32 %v1121_v44, %v1169_v47  ;;  %v1170_v25 = vmax.f32 %v5673_v16, 0.0  ;;  %v1173_v46 = vmax.f32 %v5676_v15, 0.0  ;;  %6336 = vmatprep.mubr.bf16.mxu1 %v1314_v60  ;;  %v1123_v54 = vmax.f32 %v5658_v40, 0.0  ;;  %v6706_v16 = vld [vmem:[%s9884_s4 + $0x38] sm:$0xff]  }
 0x29f   : > { %v1097_v55 = vadd.f32 %v1081_v35, %v7236_v31  ;;  %v1079_v48 = vsub.f32 %v7304_v22, %v1063_v63  ;;  %v1171_v21 = vmax.f32 %v5674_v10, 0.0  ;;  %v1142_v26 = vsub.f32 0.0, %v1094_v42  ;;  %6380 = vmatprep.subr.bf16.mxu1 %v6706_v16  ;;  %v6708_v35 = vld [vmem:[%s9884_s4 + $0x28] sm:$0xff]   ;;  %v6302_v63 = vpop.f32.mrf.mxu0 }
 0x2a0   : > { %v1315_v27 = vpack.c.bf16 %v7382_v30, %v7366_v61  ;;  %v1172_v31 = vmax.f32 %v5675_v17, 0.0  ;;  %v1144_v22 = vsub.f32 0.0, %v1096_v14  ;;  %v1125_v38 = vmax.f32 %v5660_v36, 0.0  ;;  %6381 = vmatpush3.bf16.msra.mxu1 %v6706_v16 }
 0x2a1   : > { %v1145_v13 = vsub.f32 0.0, %v1097_v55  ;;  %v1095_v43 = vadd.f32 %v1079_v48, %v7240_v41  ;;  %v5677_v20 = vadd.f32 -0.02, %v1142_v26  ;;  %v5661_v29 = vadd.f32 -0.02, %v1094_v42  ;;  %6382 = vmatprep.subr.bf16.mxu1 %v6707_v37  ;;  %v1233_v17 = vpop.f32.mrf.mxu0 }
 0x2a2   : > { %6337 = vmatmul.mubr.bf16.gmra.mxu1 %v1315_v27  ;;  %v1124_v18 = vmax.f32 %v5659_v7, 0.0  ;;  %v7387_v45 = vsub.f32 %v1122_v24, %v1170_v25  ;;  %v7389_v51 = vsub.f32 %v1123_v54, %v1171_v21  ;;  %v7391_v56 = vsub.f32 %v1125_v38, %v1173_v46 }
 0x2a3   : > { %v5662_v19 = vadd.f32 -0.02, %v1095_v43  ;;  %v1143_v52 = vsub.f32 0.0, %v1095_v43  ;;  %v1174_v50 = vmax.f32 %v5677_v20, 0.0  ;;  %v5680_v41 = vadd.f32 -0.02, %v1145_v13  ;;  %v6303_v15 = vpop.f32.mrf.mxu0 }
 0x2a4   : > { %v5679_v33 = vadd.f32 -0.02, %v1144_v22  ;;  %v5664_v58 = vadd.f32 -0.02, %v1097_v55  ;;  %v1316_v62 = vpack.c.bf16 %v7389_v51, %v7387_v45  ;;  %v1126_v44 = vmax.f32 %v5661_v29, 0.0  ;;  %6383 = vmatpush3.bf16.msra.mxu1 %v6707_v37 }
 0x2a5   : > { %v5678_v53 = vadd.f32 -0.02, %v1143_v52  ;;  %v1127_v47 = vmax.f32 %v5662_v19, 0.0  ;;  %v7395_v12 = vsub.f32 %v1124_v18, %v1172_v31  ;;  %v5663_v1 = vadd.f32 -0.02, %v1096_v14  ;;  %6384 = vmatprep.subr.bf16.mxu1 %v6708_v35  ;;  %v1236_v10 = vpop.f32.mrf.mxu0 }
 0x2a6   : > { %6340 = vmatprep.mubr.bf16.mxu1 %v1316_v62  ;;  %v1177_v28 = vmax.f32 %v5680_v41, 0.0  ;;  %v7399_v32 = vsub.f32 %v1126_v44, %v1174_v50  ;;  %v1176_v39 = vmax.f32 %v5679_v33, 0.0  ;;  %v1129_v49 = vmax.f32 %v5664_v58, 0.0 }
 0x2a7   : > { %v1175_v2 = vmax.f32 %v5678_v53, 0.0  ;;  %v1317_v57 = vpack.c.bf16 %v7391_v56, %v7395_v12  ;;  %v1128_v7 = vmax.f32 %v5663_v1, 0.0  ;;  %v6306_v40 = vpop.f32.mrf.mxu0  ;;  %v7424_v48 = vmul.f32 0.5, %v6302_v63 }
 0x2a8   : > { %v7405_v59 = vsub.f32 %v1129_v49, %v1177_v28  ;;  %6385 = vmatpush3.bf16.msra.mxu1 %v6708_v35  ;;  %v7429_v13 = vmul.f32 0.5, %v1233_v17  ;;  %v7437_v29 = vmul.f32 0.5, %v6303_v15  ;;  %v7439_v18 = vmul.f32 0.5, %v1236_v10 }
 0x2a9   : > { %v7401_v4 = vsub.f32 %v1127_v47, %v1175_v2  ;;  %v7407_v8 = vsub.f32 %v1128_v7, %v1176_v39  ;;  %v1249_v14 = vpop.f32.mrf.mxu0 }
 0x2aa   : > { %6341 = vmatmul.mubr.bf16.gmra.mxu1 %v1317_v57 }
 0x2ab   : > { %v1318_v6 = vpack.c.bf16 %v7401_v4, %v7399_v32  ;;  %v1319_v9 = vpack.c.bf16 %v7405_v59, %v7407_v8  ;;  %v7420_v42 = vpop.f32.mrf.mxu0 }
 0x2ad   : > { %6344 = vmatprep.mubr.bf16.mxu1 %v1318_v6  ;;  %v7422_v55 = vpop.f32.mrf.mxu0 }
 0x2af   : > { %v7427_v26 = vpop.f32.mrf.mxu0 }
 0x2b1   : > { %v7435_v38 = vpop.f32.mrf.mxu0 }
 0x2b2   : > { %6345 = vmatmul.mubr.bf16.gmra.mxu1 %v1319_v9 }
 0x353   : > { %v6334_v36 = vpop.f32.mrf.mxu1 }
 0x354   : > { %v1484_v60 = vmul.f32 0.5, %v6334_v36 }
 0x355   : > { %v1419_v24 = vpop.f32.mrf.mxu1 }
 0x356   : > { %v1500_v25 = vsub.f32 %v7350_v23, %v1484_v60  ;;  %v1482_v21 = vmul.f32 0.5, %v1419_v24  ;;  %v7448_v60 = vmul.f32 0.5, %v1249_v14 }
 0x357   : > { %v6335_v46 = vpop.f32.mrf.mxu1 }
 0x358   : > { %v1516_v43 = vadd.f32 %v1500_v25, %v7424_v48  ;;  %v1498_v27 = vsub.f32 %v7346_v5, %v1482_v21  ;;  %v1485_v31 = vmul.f32 0.5, %v6335_v46  ;;  %v6311_v5 = vpop.f32.mrf.mxu0 }
 0x359   : > { %v1422_v54 = vpop.f32.mrf.mxu1 }
 0x35a   : > { %v1514_v22 = vadd.f32 %v1498_v27, %v7429_v13  ;;  %v1501_v20 = vsub.f32 %v7342_v3, %v1485_v31  ;;  %v1483_v23 = vmul.f32 0.5, %v1422_v54  ;;  %v1564_v19 = vsub.f32 0.0, %v1516_v43  ;;  %v1268_v57 = vpop.f32.mrf.mxu0 }
 0x35b   : > { %v5716_v28 = vadd.f32 -0.02, %v1516_v43 }
 0x35c   : > { %v1562_v52 = vsub.f32 0.0, %v1514_v22  ;;  %v1517_v50 = vadd.f32 %v1501_v20, %v7437_v29  ;;  %v1499_v41 = vsub.f32 %v7348_v34, %v1483_v23  ;;  %v5732_v62 = vadd.f32 -0.02, %v1564_v19  ;;  %v6314_v24 = vpop.f32.mrf.mxu0 }
 0x35d   : > { %v5714_v3 = vadd.f32 -0.02, %v1514_v22  ;;  %v7444_v34 = vmul.f32 0.5, %v6306_v40  ;;  %v1548_v15 = vmax.f32 %v5716_v28, 0.0  ;;  %v7477_v28 = vmul.f32 0.5, %v7435_v38 }
 0x35e   : > { %v5730_v53 = vadd.f32 -0.02, %v1562_v52  ;;  %v1565_v33 = vsub.f32 0.0, %v1517_v50  ;;  %v1515_v58 = vadd.f32 %v1499_v41, %v7439_v18  ;;  %v5717_v44 = vadd.f32 -0.02, %v1517_v50  ;;  %v1281_v19 = vpop.f32.mrf.mxu0 }
 0x35f   : > { %v1596_v7 = vmax.f32 %v5732_v62, 0.0  ;;  %v1546_v37 = vmax.f32 %v5714_v3, 0.0  ;;  %v7472_v62 = vmul.f32 0.5, %v7427_v26 }
 0x360   : > { %v5733_v47 = vadd.f32 -0.02, %v1565_v33  ;;  %v5715_v2 = vadd.f32 -0.02, %v1515_v58  ;;  %v1563_v1 = vsub.f32 0.0, %v1515_v58  ;;  %v1594_v39 = vmax.f32 %v5730_v53, 0.0 }
 0x361   : > { %v1549_v9 = vmax.f32 %v5717_v44, 0.0  ;;  %v7455_v40 = vsub.f32 %v1548_v15, %v1596_v7 }
 0x362   : > { %v1597_v49 = vmax.f32 %v5733_v47, 0.0  ;;  %v5731_v6 = vadd.f32 -0.02, %v1563_v1  ;;  %v6338_v16 = vpop.f32.mrf.mxu1  ;;  %v1547_v35 = vmax.f32 %v5715_v2, 0.0  ;;  %v7451_v46 = vsub.f32 %v1546_v37, %v1594_v39  ;;  %v6315_v1 = vpop.f32.mrf.mxu0 }
 0x363   : > { %v1488_v17 = vmul.f32 0.5, %v6338_v16  ;;  %v7481_v39 = vmul.f32 0.5, %v1268_v57 }
 0x364   : > { %v1595_v63 = vmax.f32 %v5731_v6, 0.0  ;;  %v7446_v10 = vsub.f32 %v1549_v9, %v1597_v49  ;;  %v1435_v36 = vpop.f32.mrf.mxu1  ;;  %v7485_v9 = vmul.f32 0.5, %v6314_v24  ;;  %v1284_v57 = vpop.f32.mrf.mxu0 }
 0x365   : > { %v1504_v25 = vsub.f32 %v7366_v61, %v1488_v17  ;;  %v1486_v21 = vmul.f32 0.5, %v1435_v36  ;;  %v7464_v61 = vmul.f32 0.5, %v7420_v42 }
 0x366   : > { %v7453_v43 = vsub.f32 %v1547_v35, %v1595_v63  ;;  %v6339_v27 = vpop.f32.mrf.mxu1  ;;  %v1627_v20 = vpack.c.bf16 %v7446_v10, %v7455_v40 }
 0x367   : > { %v1520_v31 = vadd.f32 %v1504_v25, %v7444_v34  ;;  %v1502_v54 = vsub.f32 %v7370_v0, %v1486_v21  ;;  %v1489_v22 = vmul.f32 0.5, %v6339_v27  ;;  %v7469_v0 = vmul.f32 0.5, %v7422_v55 }
 0x368   : > { %v1626_v14 = vpack.c.bf16 %v7453_v43, %v7451_v46  ;;  %v1438_v23 = vpop.f32.mrf.mxu1  ;;  %v7479_v55 = vmul.f32 0.5, %v6311_v5 }
 0x369   : > { %v1568_v52 = vsub.f32 0.0, %v1520_v31  ;;  %v1518_v50 = vadd.f32 %v1502_v54, %v7448_v60  ;;  %v1505_v41 = vsub.f32 %v7382_v30, %v1489_v22  ;;  %v1487_v53 = vmul.f32 0.5, %v1438_v23 }
 0x36a   : > { %6364 = vmatprep.mubr.bf16.mxu0 %v1626_v14  ;;  %v6342_v33 = vpop.f32.mrf.mxu1  ;;  %v7491_v54 = vmul.f32 0.5, %v1281_v19  ;;  %v7495_v23 = vmul.f32 0.5, %v1284_v57 }
 0x36b   : > { %6365 = vmatmul.mubr.bf16.vlgmr.msra.gmra.mxu0 %v1627_v20  ;;  %v5736_v58 = vadd.f32 -0.02, %v1568_v52  ;;  %v1566_v42 = vsub.f32 0.0, %v1518_v50  ;;  %v1521_v3 = vadd.f32 %v1505_v41, %v7464_v61  ;;  %v1503_v44 = vsub.f32 %v7374_v11, %v1487_v53 }
 0x36c   : > { %v1492_v47 = vmul.f32 0.5, %v6342_v33  ;;  %v1451_v2 = vpop.f32.mrf.mxu1  ;;  %v5720_v11 = vadd.f32 -0.02, %v1520_v31  ;;  %v5718_v16 = vadd.f32 -0.02, %v1518_v50 }
 0x36d   : > { %v1490_v30 = vmul.f32 0.5, %v1451_v2  ;;  %v1569_v49 = vsub.f32 0.0, %v1521_v3  ;;  %v1519_v26 = vadd.f32 %v1503_v44, %v7469_v0  ;;  %v1600_v63 = vmax.f32 %v5736_v58, 0.0 }
 0x36e   : > { %v1508_v6 = vsub.f32 %v7395_v12, %v1492_v47  ;;  %v6343_v7 = vpop.f32.mrf.mxu1  ;;  %v5734_v38 = vadd.f32 -0.02, %v1566_v42  ;;  %v5721_v17 = vadd.f32 -0.02, %v1521_v3  ;;  %v1552_v22 = vmax.f32 %v5720_v11, 0.0 }
 0x36f   : > { %v1506_v37 = vsub.f32 %v7387_v45, %v1490_v30  ;;  %v1493_v35 = vmul.f32 0.5, %v6343_v7  ;;  %v1567_v5 = vsub.f32 0.0, %v1519_v26  ;;  %v5737_v36 = vadd.f32 -0.02, %v1569_v49 }
 0x370   : > { %v1454_v15 = vpop.f32.mrf.mxu1  ;;  %v1524_v24 = vadd.f32 %v1508_v6, %v7472_v62  ;;  %v7493_v45 = vmul.f32 0.5, %v6315_v1  ;;  %v1550_v14 = vmax.f32 %v5718_v16, 0.0  ;;  %v5719_v20 = vadd.f32 -0.02, %v1519_v26 }
 0x371   : > { %v1522_v25 = vadd.f32 %v1506_v37, %v7477_v28  ;;  %v1509_v21 = vsub.f32 %v7391_v56, %v1493_v35  ;;  %v1491_v12 = vmul.f32 0.5, %v1454_v15  ;;  %v5735_v27 = vadd.f32 -0.02, %v1567_v5 }
 0x372   : > { %v6346_v31 = vpop.f32.mrf.mxu1  ;;  %v1598_v52 = vmax.f32 %v5734_v38, 0.0  ;;  %v1553_v33 = vmax.f32 %v5721_v17, 0.0  ;;  %v1601_v58 = vmax.f32 %v5737_v36, 0.0  ;;  %v7499_v3 = vsub.f32 %v1552_v22, %v1600_v63 }
 0x373   : > { %v1525_v50 = vadd.f32 %v1509_v21, %v7479_v55  ;;  %v1507_v41 = vsub.f32 %v7389_v51, %v1491_v12  ;;  %v1496_v56 = vmul.f32 0.5, %v6346_v31  ;;  %v1570_v42 = vsub.f32 0.0, %v1522_v25 }
 0x374   : > { %v1467_v53 = vpop.f32.mrf.mxu1  ;;  %v1599_v19 = vmax.f32 %v5735_v27, 0.0  ;;  %v1572_v44 = vsub.f32 0.0, %v1524_v24  ;;  %v1551_v30 = vmax.f32 %v5719_v20, 0.0  ;;  %v5724_v7 = vadd.f32 -0.02, %v1524_v24 }
 0x375   : > { %v1573_v47 = vsub.f32 0.0, %v1525_v50  ;;  %v1523_v2 = vadd.f32 %v1507_v41, %v7481_v39  ;;  %v1512_v49 = vsub.f32 %v7407_v8, %v1496_v56  ;;  %v1494_v26 = vmul.f32 0.5, %v1467_v53 }
 0x376   : > { %v6347_v1 = vpop.f32.mrf.mxu1  ;;  %v5722_v51 = vadd.f32 -0.02, %v1522_v25  ;;  %v7503_v37 = vsub.f32 %v1550_v14, %v1598_v52  ;;  %v5738_v35 = vadd.f32 -0.02, %v1570_v42  ;;  %v5740_v5 = vadd.f32 -0.02, %v1572_v44 }
 0x377   : > { %v1497_v6 = vmul.f32 0.5, %v6347_v1  ;;  %v1571_v11 = vsub.f32 0.0, %v1523_v2  ;;  %v1510_v63 = vsub.f32 %v7399_v32, %v1494_v26  ;;  %v5741_v15 = vadd.f32 -0.02, %v1573_v47 }
 0x378   : > { %v1470_v16 = vpop.f32.mrf.mxu1  ;;  %v7507_v36 = vsub.f32 %v1551_v30, %v1599_v19  ;;  %v5723_v8 = vadd.f32 -0.02, %v1523_v2  ;;  %v1528_v21 = vadd.f32 %v1512_v49, %v7485_v9  ;;  %v5725_v27 = vadd.f32 -0.02, %v1525_v50 }
 0x379   : > { %v1513_v38 = vsub.f32 %v7405_v59, %v1497_v6  ;;  %v1495_v17 = vmul.f32 0.5, %v1470_v16  ;;  %v5739_v57 = vadd.f32 -0.02, %v1571_v11  ;;  %v1526_v25 = vadd.f32 %v1510_v63, %v7491_v54 }
 0x37a   : > { %v1628_v32 = vpack.c.bf16 %v7507_v36, %v7503_v37  ;;  %v7515_v59 = vsub.f32 %v1553_v33, %v1601_v58  ;;  %v1554_v31 = vmax.f32 %v5722_v51, 0.0  ;;  %v1602_v22 = vmax.f32 %v5738_v35, 0.0 }
 0x37b   : > { %v1529_v12 = vadd.f32 %v1513_v38, %v7493_v45  ;;  %v1511_v24 = vsub.f32 %v7401_v4, %v1495_v17  ;;  %v1603_v14 = vmax.f32 %v5739_v57, 0.0  ;;  %v1574_v20 = vsub.f32 0.0, %v1526_v25 }
 0x37c   : > { %v1605_v52 = vmax.f32 %v5741_v15, 0.0  ;;  %6368 = vmatprep.mubr.bf16.mxu0 %v1628_v32  ;;  %v1629_v53 = vpack.c.bf16 %v7515_v59, %v7499_v3  ;;  %v1604_v50 = vmax.f32 %v5740_v5, 0.0  ;;  %v1555_v42 = vmax.f32 %v5723_v8, 0.0 }
 0x37d   : > { %v1577_v41 = vsub.f32 0.0, %v1529_v12  ;;  %v1527_v56 = vadd.f32 %v1511_v24, %v7495_v23  ;;  %v1576_v4 = vsub.f32 0.0, %v1528_v21  ;;  %v5742_v19 = vadd.f32 -0.02, %v1574_v20  ;;  %v6710_v20 = vld [vmem:[%s9884_s4 + $0x18] sm:$0xff]  }
 0x37e   : > { %v1557_v44 = vmax.f32 %v5725_v27, 0.0  ;;  %v5726_v47 = vadd.f32 -0.02, %v1526_v25  ;;  %6369 = vmatmul.mubr.bf16.gmra.mxu0 %v1629_v53  ;;  %v1556_v2 = vmax.f32 %v5724_v7, 0.0  ;;  %v7520_v1 = vsub.f32 %v1554_v31, %v1602_v22 }
 0x37f   : > { %v5727_v33 = vadd.f32 -0.02, %v1527_v56  ;;  %v1575_v58 = vsub.f32 0.0, %v1527_v56  ;;  %v7522_v30 = vsub.f32 %v1555_v42, %v1603_v14  ;;  %v1606_v49 = vmax.f32 %v5742_v19, 0.0  ;;  %v6709_v14 = vld [vmem:[%s9884_s4 + $0x20] sm:$0xff]  }
 0x380   : > { %v5745_v26 = vadd.f32 -0.02, %v1577_v41  ;;  %v7524_v51 = vsub.f32 %v1557_v44, %v1605_v52  ;;  %v5744_v11 = vadd.f32 -0.02, %v1576_v4  ;;  %v5729_v16 = vadd.f32 -0.02, %v1529_v12  ;;  %6386 = vmatprep.subr.bf16.mxu1 %v6709_v14 }
 0x381   : > { %v5743_v6 = vadd.f32 -0.02, %v1575_v58  ;;  %v1630_v35 = vpack.c.bf16 %v7522_v30, %v7520_v1  ;;  %v1558_v63 = vmax.f32 %v5726_v47, 0.0  ;;  %v1559_v38 = vmax.f32 %v5727_v33, 0.0  ;;  %6387 = vmatpush3.bf16.msra.mxu1 %v6709_v14  ;;  %v6711_v52 = vld [vmem:[%s9884_s4 + $0x10] sm:$0xff]   ;;  %v6712_v41 = vld [vmem:[%s9884_s4 + $0x8] sm:$0xff]  }
 0x382   : > { %v7528_v5 = vsub.f32 %v1556_v2, %v1604_v50  ;;  %v5728_v7 = vadd.f32 -0.02, %v1528_v21  ;;  %v1609_v15 = vmax.f32 %v5745_v26, 0.0  ;;  %v1608_v27 = vmax.f32 %v5744_v11, 0.0  ;;  %6388 = vmatprep.subr.bf16.mxu1 %v6710_v20  ;;  %v6713_v56 = vld [vmem:[%s9884_s4] sm:$0xff]  }
 0x383   : > { %v1607_v17 = vmax.f32 %v5743_v6, 0.0  ;;  %6372 = vmatprep.mubr.bf16.mxu0 %v1630_v35  ;;  %v7532_v8 = vsub.f32 %v1558_v63, %v1606_v49  ;;  %v1561_v12 = vmax.f32 %v5729_v16, 0.0 }
 0x384   : > { %v1631_v57 = vpack.c.bf16 %v7524_v51, %v7528_v5  ;;  %v1560_v32 = vmax.f32 %v5728_v7, 0.0 }
 0x385   : > { %v7534_v25 = vsub.f32 %v1559_v38, %v1607_v17  ;;  %v7538_v31 = vsub.f32 %v1561_v12, %v1609_v15  ;;  %6389 = vmatpush3.bf16.msra.mxu1 %v6710_v20 }
 0x386   : > { %6373 = vmatmul.mubr.bf16.gmra.mxu0 %v1631_v57  ;;  %v7540_v21 = vsub.f32 %v1560_v32, %v1608_v27  ;;  %6390 = vmatprep.subr.bf16.mxu1 %v6711_v52 }
 0x387   : > { %v1632_v24 = vpack.c.bf16 %v7534_v25, %v7532_v8 }
 0x388   : > { %v1633_v22 = vpack.c.bf16 %v7538_v31, %v7540_v21 }
 0x389   : > { %6376 = vmatprep.mubr.bf16.mxu0 %v1632_v24  ;;  %6391 = vmatpush3.bf16.msra.mxu1 %v6711_v52 }
 0x38a   : > { %6392 = vmatprep.subr.bf16.mxu1 %v6712_v41 }
 0x38d   : > { %6393 = vmatpush3.bf16.msra.mxu1 %v6712_v41 }
 0x38e   : > { %6377 = vmatmul.mubr.bf16.gmra.mxu0 %v1633_v22  ;;  %6394 = vmatprep.subr.bf16.mxu1 %v6713_v56 }
 0x391   : > { %6395 = vmatpush3.bf16.msra.mxu1 %v6713_v56 }
 0x42b   : > { %v6366_v53 = vpop.f32.mrf.mxu0 }
 0x42c   : > { %v1733_v50 = vmul.f32 0.5, %v6366_v53 }
 0x42d   : > { %v1668_v42 = vpop.f32.mrf.mxu0 }
 0x42e   : > { %v1749_v4 = vsub.f32 %v7455_v40, %v1733_v50  ;;  %v1731_v19 = vmul.f32 0.5, %v1668_v42 }
 0x42f   : > { %v6367_v44 = vpop.f32.mrf.mxu0 }
 0x430   : > { %v1765_v47 = vadd.f32 %v1749_v4, %v7424_v48  ;;  %v1747_v33 = vsub.f32 %v7451_v46, %v1731_v19  ;;  %v1734_v58 = vmul.f32 0.5, %v6367_v44 }
 0x431   : > { %v1671_v2 = vpop.f32.mrf.mxu0 }
 0x432   : > { %v1763_v49 = vadd.f32 %v1747_v33, %v7429_v13  ;;  %v1750_v26 = vsub.f32 %v7446_v10, %v1734_v58  ;;  %v1732_v6 = vmul.f32 0.5, %v1671_v2  ;;  %v1813_v11 = vsub.f32 0.0, %v1765_v47 }
 0x433   : > { %v5748_v13 = vadd.f32 -0.02, %v1765_v47 }
 0x434   : > { %v1811_v16 = vsub.f32 0.0, %v1763_v49  ;;  %v1766_v35 = vadd.f32 %v1750_v26, %v7437_v29  ;;  %v1748_v63 = vsub.f32 %v7453_v43, %v1732_v6  ;;  %v5764_v48 = vadd.f32 -0.02, %v1813_v11 }
 0x435   : > { %v5746_v7 = vadd.f32 -0.02, %v1763_v49  ;;  %v1797_v43 = vmax.f32 %v5748_v13, 0.0 }
 0x436   : > { %v5762_v40 = vadd.f32 -0.02, %v1811_v16  ;;  %v1814_v38 = vsub.f32 0.0, %v1766_v35  ;;  %v1764_v17 = vadd.f32 %v1748_v63, %v7439_v18  ;;  %v5749_v46 = vadd.f32 -0.02, %v1766_v35 }
 0x437   : > { %v1845_v32 = vmax.f32 %v5764_v48, 0.0  ;;  %v1795_v14 = vmax.f32 %v5746_v7, 0.0 }
 0x438   : > { %v5765_v15 = vadd.f32 -0.02, %v1814_v38  ;;  %v5747_v57 = vadd.f32 -0.02, %v1764_v17  ;;  %v1812_v27 = vsub.f32 0.0, %v1764_v17  ;;  %v1843_v12 = vmax.f32 %v5762_v40, 0.0 }
 0x439   : > { %v1798_v22 = vmax.f32 %v5749_v46, 0.0  ;;  %v7573_v56 = vsub.f32 %v1797_v43, %v1845_v32 }
 0x43a   : > { %v1846_v10 = vmax.f32 %v5765_v15, 0.0  ;;  %v5763_v24 = vadd.f32 -0.02, %v1812_v27  ;;  %v1796_v29 = vmax.f32 %v5747_v57, 0.0  ;;  %v7569_v41 = vsub.f32 %v1795_v14, %v1843_v12 }
 0x43c   : > { %v1844_v20 = vmax.f32 %v5763_v24, 0.0  ;;  %v7567_v52 = vsub.f32 %v1798_v22, %v1846_v10 }
 0x43e   : > { %v7571_v18 = vsub.f32 %v1796_v29, %v1844_v20  ;;  %v6370_v53 = vpop.f32.mrf.mxu0  ;;  %v1876_v42 = vpack.c.bf16 %v7567_v52, %v7573_v56 }
 0x43f   : > { %v1737_v4 = vmul.f32 0.5, %v6370_v53 }
 0x440   : > { %v1875_v50 = vpack.c.bf16 %v7571_v18, %v7569_v41  ;;  %v1684_v19 = vpop.f32.mrf.mxu0 }
 0x441   : > { %v1753_v44 = vsub.f32 %v7499_v3, %v1737_v4  ;;  %v1735_v47 = vmul.f32 0.5, %v1684_v19 }
 0x442   : > { %6396 = vmatprep.mubr.bf16.mxu1 %v1875_v50  ;;  %v6371_v33 = vpop.f32.mrf.mxu0 }
 0x443   : > { %6397 = vmatmul.mubr.bf16.vlgmr.msra.gmra.mxu1 %v1876_v42  ;;  %v1769_v58 = vadd.f32 %v1753_v44, %v7444_v34  ;;  %v1751_v2 = vsub.f32 %v7503_v37, %v1735_v47  ;;  %v1738_v49 = vmul.f32 0.5, %v6371_v33 }
 0x444   : > { %v1687_v26 = vpop.f32.mrf.mxu0 }
 0x445   : > { %v1817_v6 = vsub.f32 0.0, %v1769_v58  ;;  %v1767_v11 = vadd.f32 %v1751_v2, %v7448_v60  ;;  %v1754_v16 = vsub.f32 %v7515_v59, %v1738_v49  ;;  %v1736_v35 = vmul.f32 0.5, %v1687_v26 }
 0x446   : > { %v6374_v63 = vpop.f32.mrf.mxu0  ;;  %v5752_v60 = vadd.f32 -0.02, %v1769_v58 }
 0x447   : > { %v5768_v40 = vadd.f32 -0.02, %v1817_v6  ;;  %v1815_v38 = vsub.f32 0.0, %v1767_v11  ;;  %v1770_v3 = vadd.f32 %v1754_v16, %v7464_v61  ;;  %v1752_v17 = vsub.f32 %v7507_v36, %v1736_v35 }
 0x448   : > { %v1741_v48 = vmul.f32 0.5, %v6374_v63  ;;  %v1700_v7 = vpop.f32.mrf.mxu0  ;;  %v5750_v27 = vadd.f32 -0.02, %v1767_v11  ;;  %v1801_v43 = vmax.f32 %v5752_v60, 0.0 }
 0x449   : > { %v1739_v34 = vmul.f32 0.5, %v1700_v7  ;;  %v1818_v46 = vsub.f32 0.0, %v1770_v3  ;;  %v1768_v37 = vadd.f32 %v1752_v17, %v7469_v0  ;;  %v1849_v12 = vmax.f32 %v5768_v40, 0.0 }
 0x44a   : > { %v1757_v15 = vsub.f32 %v7528_v5, %v1741_v48  ;;  %v6375_v57 = vpop.f32.mrf.mxu0  ;;  %v5766_v10 = vadd.f32 -0.02, %v1815_v38  ;;  %v5753_v24 = vadd.f32 -0.02, %v1770_v3  ;;  %v1799_v53 = vmax.f32 %v5750_v27, 0.0 }
 0x44b   : > { %v1755_v59 = vsub.f32 %v7520_v1, %v1739_v34  ;;  %v1742_v13 = vmul.f32 0.5, %v6375_v57  ;;  %v1816_v61 = vsub.f32 0.0, %v1768_v37  ;;  %v5769_v36 = vadd.f32 -0.02, %v1818_v46 }
 0x44c   : > { %v1703_v32 = vpop.f32.mrf.mxu0  ;;  %v1773_v5 = vadd.f32 %v1757_v15, %v7472_v62  ;;  %v5751_v50 = vadd.f32 -0.02, %v1768_v37  ;;  %v1847_v1 = vmax.f32 %v5766_v10, 0.0  ;;  %v1802_v47 = vmax.f32 %v5753_v24, 0.0 }
 0x44d   : > { %v1771_v22 = vadd.f32 %v1755_v59, %v7477_v28  ;;  %v1758_v14 = vsub.f32 %v7524_v51, %v1742_v13  ;;  %v1740_v29 = vmul.f32 0.5, %v1703_v32  ;;  %v5767_v0 = vadd.f32 -0.02, %v1816_v61 }
 0x44e   : > { %v6378_v20 = vpop.f32.mrf.mxu0  ;;  %v1850_v33 = vmax.f32 %v5769_v36, 0.0  ;;  %v7594_v58 = vsub.f32 %v1801_v43, %v1849_v12  ;;  %v1821_v2 = vsub.f32 0.0, %v1773_v5  ;;  %v1800_v6 = vmax.f32 %v5751_v50, 0.0 }
 0x44f   : > { %v1774_v42 = vadd.f32 %v1758_v14, %v7479_v55  ;;  %v1756_v4 = vsub.f32 %v7522_v30, %v1740_v29  ;;  %v1745_v19 = vmul.f32 0.5, %v6378_v20  ;;  %v1819_v28 = vsub.f32 0.0, %v1771_v22 }
 0x450   : > { %v1716_v44 = vpop.f32.mrf.mxu0  ;;  %v1848_v51 = vmax.f32 %v5767_v0, 0.0  ;;  %v5756_v35 = vadd.f32 -0.02, %v1773_v5  ;;  %v5754_v30 = vadd.f32 -0.02, %v1771_v22  ;;  %v7598_v38 = vsub.f32 %v1799_v53, %v1847_v1 }
 0x451   : > { %v1822_v49 = vsub.f32 0.0, %v1774_v42  ;;  %v1772_v62 = vadd.f32 %v1756_v4, %v7481_v39  ;;  %v1761_v11 = vsub.f32 %v7540_v21, %v1745_v19  ;;  %v1743_v16 = vmul.f32 0.5, %v1716_v44 }
 0x452   : > { %v6379_v26 = vpop.f32.mrf.mxu0  ;;  %v5770_v3 = vadd.f32 -0.02, %v1819_v28  ;;  %v5772_v34 = vadd.f32 -0.02, %v1821_v2  ;;  %v7602_v37 = vsub.f32 %v1800_v6, %v1848_v51  ;;  %v5757_v27 = vadd.f32 -0.02, %v1774_v42 }
 0x453   : > { %v1746_v55 = vmul.f32 0.5, %v6379_v26  ;;  %v1820_v63 = vsub.f32 0.0, %v1772_v62  ;;  %v1759_v17 = vsub.f32 %v7532_v8, %v1743_v16  ;;  %v5773_v39 = vadd.f32 -0.02, %v1822_v49 }
 0x454   : > { %v1719_v40 = vpop.f32.mrf.mxu0  ;;  %v5755_v21 = vadd.f32 -0.02, %v1772_v62  ;;  %v1777_v15 = vadd.f32 %v1761_v11, %v7485_v9  ;;  %v1877_v8 = vpack.c.bf16 %v7602_v37, %v7598_v38  ;;  %v1803_v13 = vmax.f32 %v5754_v30, 0.0 }
 0x455   : > { %v1762_v48 = vsub.f32 %v7538_v31, %v1746_v55  ;;  %v1744_v7 = vmul.f32 0.5, %v1719_v40  ;;  %v5771_v46 = vadd.f32 -0.02, %v1820_v63  ;;  %v1775_v57 = vadd.f32 %v1759_v17, %v7491_v54  ;;  %v6715_v17 = vld [vmem:[%s9886_s6 + $0x30] sm:$0xff]  }
 0x456   : > { %v7610_v31 = vsub.f32 %v1802_v47, %v1850_v33  ;;  %v1851_v12 = vmax.f32 %v5770_v3, 0.0  ;;  %v1854_v61 = vmax.f32 %v5773_v39, 0.0  ;;  %6400 = vmatprep.mubr.bf16.mxu1 %v1877_v8  ;;  %v1804_v36 = vmax.f32 %v5755_v21, 0.0  ;;  %v6714_v3 = vld [vmem:[%s9886_s6 + $0x38] sm:$0xff]   ;;  %v6719_v39 = vld [vmem:[%s9886_s6 + $0x10] sm:$0xff]   ;;  %v6721_v21 = vld [vmem:[%s9886_s6] sm:$0xff]  }
 0x457   : > { %v1778_v60 = vadd.f32 %v1762_v48, %v7493_v45  ;;  %v1760_v59 = vsub.f32 %v7534_v25, %v1744_v7  ;;  %v1852_v10 = vmax.f32 %v5771_v46, 0.0  ;;  %v1823_v24 = vsub.f32 0.0, %v1775_v57  ;;  %6412 = vmatprep.subr.bf16.mxu0 %v6714_v3  ;;  %v6716_v48 = vld [vmem:[%s9886_s6 + $0x28] sm:$0xff]   ;;  %v6717_v7 = vld [vmem:[%s9886_s6 + $0x20] sm:$0xff]  }
 0x458   : > { %v1878_v54 = vpack.c.bf16 %v7610_v31, %v7594_v58  ;;  %v1853_v45 = vmax.f32 %v5772_v34, 0.0  ;;  %v1825_v25 = vsub.f32 0.0, %v1777_v15  ;;  %v1806_v14 = vmax.f32 %v5757_v27, 0.0  ;;  %6413 = vmatpush3.bf16.msra.mxu0 %v6714_v3  ;;  %v6718_v34 = vld [vmem:[%s9886_s6 + $0x18] sm:$0xff]   ;;  %v6720_v46 = vld [vmem:[%s9886_s6 + $0x8] sm:$0xff]   ;;  %v6725_v27 = vld [vmem:[%s9884_s4 + $0x60] sm:$0xff]  }
 0x459   : > { %v1826_v32 = vsub.f32 0.0, %v1778_v60  ;;  %v1776_v9 = vadd.f32 %v1760_v59, %v7495_v23  ;;  %v5774_v22 = vadd.f32 -0.02, %v1823_v24  ;;  %v5758_v29 = vadd.f32 -0.02, %v1775_v57  ;;  %6414 = vmatprep.subr.bf16.mxu0 %v6715_v17  ;;  %v6723_v57 = vld [vmem:[%s9884_s4 + $0x70] sm:$0xff]  }
 0x45a   : > { %6401 = vmatmul.mubr.bf16.gmra.mxu1 %v1878_v54  ;;  %v1805_v20 = vmax.f32 %v5756_v35, 0.0  ;;  %v7615_v43 = vsub.f32 %v1803_v13, %v1851_v12  ;;  %v7617_v53 = vsub.f32 %v1804_v36, %v1852_v10  ;;  %v7619_v42 = vsub.f32 %v1806_v14, %v1854_v61  ;;  %v6726_v59 = vld [vmem:[%s9884_s4 + $0x58] sm:$0xff]   ;;  %v7681_v8 = vld [vmem:[%s9885_s5] ss:$0 sm:$0xff] }
 0x45b   : > { %v5759_v0 = vadd.f32 -0.02, %v1776_v9  ;;  %v1824_v5 = vsub.f32 0.0, %v1776_v9  ;;  %v1855_v50 = vmax.f32 %v5774_v22, 0.0  ;;  %v5777_v23 = vadd.f32 -0.02, %v1826_v32 }
 0x45c   : > { %v5776_v4 = vadd.f32 -0.02, %v1825_v25  ;;  %v5761_v19 = vadd.f32 -0.02, %v1778_v60  ;;  %v1879_v44 = vpack.c.bf16 %v7617_v53, %v7615_v43  ;;  %v1807_v47 = vmax.f32 %v5758_v29, 0.0  ;;  %6415 = vmatpush3.bf16.msra.mxu0 %v6715_v17  ;;  %v6724_v60 = vld [vmem:[%s9884_s4 + $0x68] sm:$0xff]  }
 0x45d   : > { %v5775_v1 = vadd.f32 -0.02, %v1824_v5  ;;  %v1808_v33 = vmax.f32 %v5759_v0, 0.0  ;;  %v7623_v51 = vsub.f32 %v1805_v20, %v1853_v45  ;;  %v5760_v2 = vadd.f32 -0.02, %v1777_v15  ;;  %6416 = vmatprep.subr.bf16.mxu0 %v6716_v48  ;;  %v6722_v15 = vld [vmem:[%s9884_s4 + $0x78] sm:$0xff]  }
 0x45e   : > { %6404 = vmatprep.mubr.bf16.mxu1 %v1879_v44  ;;  %v1858_v49 = vmax.f32 %v5777_v23, 0.0  ;;  %v7627_v26 = vsub.f32 %v1807_v47, %v1855_v50  ;;  %v1857_v11 = vmax.f32 %v5776_v4, 0.0  ;;  %v1810_v16 = vmax.f32 %v5761_v19, 0.0  ;;  %6444 = vmatprep.subr.bf16.mxu1 %v6722_v15 }
 0x45f   : > { %v1856_v28 = vmax.f32 %v5775_v1, 0.0  ;;  %v1880_v62 = vpack.c.bf16 %v7619_v42, %v7623_v51  ;;  %v1809_v35 = vmax.f32 %v5760_v2, 0.0  ;;  %6445 = vmatpush3.bf16.msra.mxu1 %v6722_v15 }
 0x460   : > { %v7633_v30 = vsub.f32 %v1810_v16, %v1858_v49  ;;  %6417 = vmatpush3.bf16.msra.mxu0 %v6716_v48  ;;  %6446 = vmatprep.subr.bf16.mxu1 %v6723_v57 }
 0x461   : > { %v7629_v6 = vsub.f32 %v1808_v33, %v1856_v28  ;;  %v7635_v63 = vsub.f32 %v1809_v35, %v1857_v11  ;;  %6418 = vmatprep.subr.bf16.mxu0 %v6717_v7 }
 0x462   : > { %6405 = vmatmul.mubr.bf16.gmra.mxu1 %v1880_v62 }
 0x463   : > { %v1881_v55 = vpack.c.bf16 %v7629_v6, %v7627_v26  ;;  %v1882_v40 = vpack.c.bf16 %v7633_v30, %v7635_v63  ;;  %6447 = vmatpush3.bf16.msra.mxu1 %v6723_v57 }
 0x464   : > { %6419 = vmatpush3.bf16.msra.mxu0 %v6717_v7  ;;  %6448 = vmatprep.subr.bf16.mxu1 %v6724_v60 }
 0x465   : > { %6408 = vmatprep.mubr.bf16.mxu1 %v1881_v55  ;;  %6420 = vmatprep.subr.bf16.mxu0 %v6718_v34 }
 0x467   : > { %6449 = vmatpush3.bf16.msra.mxu1 %v6724_v60 }
 0x468   : > { %6421 = vmatpush3.bf16.msra.mxu0 %v6718_v34  ;;  %6450 = vmatprep.subr.bf16.mxu1 %v6725_v27 }
 0x469   : > { %6422 = vmatprep.subr.bf16.mxu0 %v6719_v39 }
 0x46a   : > { %6409 = vmatmul.mubr.bf16.gmra.mxu1 %v1882_v40 }
 0x46b   : > { %6451 = vmatpush3.bf16.msra.mxu1 %v6725_v27 }
 0x46c   : > { %6423 = vmatpush3.bf16.msra.mxu0 %v6719_v39  ;;  %6452 = vmatprep.subr.bf16.mxu1 %v6726_v59 }
 0x46d   : > { %6424 = vmatprep.subr.bf16.mxu0 %v6720_v46 }
 0x46f   : > { %6453 = vmatpush3.bf16.msra.mxu1 %v6726_v59 }
 0x470   : > { %6425 = vmatpush3.bf16.msra.mxu0 %v6720_v46 }
 0x471   : > { %6426 = vmatprep.subr.bf16.mxu0 %v6721_v21 }
 0x474   : > { %6427 = vmatpush3.bf16.msra.mxu0 %v6721_v21 }
 0x503   : > { %v6398_v13 = vpop.f32.mrf.mxu1 }
 0x504   : > { %v7684_v12 = vadd.f32 %v6398_v13, %v7681_v8 }
 0x505   : > { %v1988_v10 = vpop.f32.mrf.mxu1 }
 0x506   : > { %v2053_v24 = vmul.f32 %v7684_v12, %v7684_v12  ;;  %v7689_v61 = vadd.f32 %v7681_v8, %v1988_v10 }
 0x507   : > { %v6399_v32 = vpop.f32.mrf.mxu1 }
 0x508   : > { %v2069_v9 = vmul.f32 %v2053_v24, %v7684_v12  ;;  %v2051_v54 = vmul.f32 %v7689_v61, %v7689_v61  ;;  %v2000_v45 = vadd.f32 %v6399_v32, %v7681_v8 }
 0x509   : > { %v1991_v36 = vpop.f32.mrf.mxu1 }
 0x50a   : > { %v2085_v25 = vmul.f32 0.044715, %v2069_v9  ;;  %v2067_v22 = vmul.f32 %v2051_v54, %v7689_v61  ;;  %v2054_v14 = vmul.f32 %v2000_v45, %v2000_v45  ;;  %v1992_v29 = vadd.f32 %v7681_v8, %v1991_v36 }
 0x50c   : > { %v2101_v0 = vadd.f32 %v2085_v25, %v7684_v12  ;;  %v2083_v5 = vmul.f32 0.044715, %v2067_v22  ;;  %v2070_v20 = vmul.f32 %v2054_v14, %v2000_v45  ;;  %v2052_v50 = vmul.f32 %v1992_v29, %v1992_v29 }
 0x50e   : > { %v2117_v23 = vmul.f32 0.7978846, %v2101_v0  ;;  %v2099_v1 = vadd.f32 %v2083_v5, %v7689_v61  ;;  %v2086_v4 = vmul.f32 0.044715, %v2070_v20  ;;  %v2068_v19 = vmul.f32 %v2052_v50, %v1992_v29 }
 0x510   : > { %6778 = vtanh.f32 %v2117_v23  ;;  %v2115_v44 = vmul.f32 0.7978846, %v2099_v1  ;;  %v2102_v47 = vadd.f32 %v2086_v4, %v2000_v45  ;;  %v2084_v33 = vmul.f32 0.044715, %v2068_v19 }
 0x512   : > { %6780 = vtanh.f32 %v2115_v44  ;;  %v2118_v28 = vmul.f32 0.7978846, %v2102_v47  ;;  %v2100_v2 = vadd.f32 %v2084_v33, %v1992_v29 }
 0x514   : > { %6782 = vtanh.f32 %v2118_v28  ;;  %v2116_v49 = vmul.f32 0.7978846, %v2100_v2 }
 0x516   : > { %6784 = vtanh.f32 %v2116_v49 }
 0x51a   : > { %v6402_v11 = vpop.f32.mrf.mxu1 }
 0x51b   : > { %v7700_v55 = vadd.f32 %v6402_v11, %v7681_v8 }
 0x51c   : > { %v2004_v40 = vpop.f32.mrf.mxu1 }
 0x51d   : > { %v6779_v62 = vpop.eup %6778  ;;  %v2057_v48 = vmul.f32 %v7700_v55, %v7700_v55  ;;  %v7705_v7 = vadd.f32 %v7681_v8, %v2004_v40 }
 0x51e   : > { %v2149_v35 = vadd.f32 1.0, %v6779_v62  ;;  %v6403_v39 = vpop.f32.mrf.mxu1 }
 0x51f   : > { %v6781_v16 = vpop.eup %6780  ;;  %v2073_v21 = vmul.f32 %v2057_v48, %v7700_v55  ;;  %v2055_v15 = vmul.f32 %v7705_v7, %v7705_v7  ;;  %v7711_v57 = vadd.f32 %v6403_v39, %v7681_v8 }
 0x520   : > { %v2147_v3 = vadd.f32 1.0, %v6781_v16  ;;  %v2165_v60 = vmul.f32 0.5, %v2149_v35  ;;  %v2007_v59 = vpop.f32.mrf.mxu1 }
 0x521   : > { %v6783_v17 = vpop.eup %6782  ;;  %v2089_v24 = vmul.f32 0.044715, %v2073_v21  ;;  %v2071_v32 = vmul.f32 %v2055_v15, %v7705_v7  ;;  %v2058_v9 = vmul.f32 %v7711_v57, %v7711_v57  ;;  %v7717_v54 = vadd.f32 %v7681_v8, %v2007_v59 }
 0x522   : > { %v2150_v34 = vadd.f32 1.0, %v6783_v17  ;;  %v2163_v10 = vmul.f32 0.5, %v2147_v3  ;;  %v6406_v25 = vpop.f32.mrf.mxu1  ;;  %v2181_v50 = vmul.f32 %v2165_v60, %v7684_v12 }
 0x523   : > { %v6785_v46 = vpop.eup %6784  ;;  %v2105_v14 = vadd.f32 %v2089_v24, %v7700_v55  ;;  %v2087_v0 = vmul.f32 0.044715, %v2071_v32  ;;  %v2074_v5 = vmul.f32 %v2058_v9, %v7711_v57  ;;  %v2056_v20 = vmul.f32 %v7717_v54, %v7717_v54 }
 0x524   : > { %v2166_v27 = vmul.f32 0.5, %v2150_v34  ;;  %v2148_v13 = vadd.f32 1.0, %v6785_v46  ;;  %v7725_v23 = vadd.f32 %v6406_v25, %v7681_v8  ;;  %v2020_v1 = vpop.f32.mrf.mxu1  ;;  %v2179_v4 = vmul.f32 %v2163_v10, %v7689_v61 }
 0x525   : > { %v2103_v44 = vadd.f32 %v2087_v0, %v7705_v7  ;;  %v2090_v47 = vmul.f32 0.044715, %v2074_v5  ;;  %v2072_v33 = vmul.f32 %v2056_v20, %v7717_v54  ;;  %v7733_v2 = vadd.f32 %v7681_v8, %v2020_v1 }
 0x526   : > { %v2182_v36 = vmul.f32 %v2166_v27, %v2000_v45  ;;  %v2164_v22 = vmul.f32 0.5, %v2148_v13  ;;  %v2121_v45 = vmul.f32 0.7978846, %v2105_v14  ;;  %v2061_v28 = vmul.f32 %v7725_v23, %v7725_v23  ;;  %v6407_v12 = vpop.f32.mrf.mxu1 }
 0x527   : > { %v2119_v11 = vmul.f32 0.7978846, %v2103_v44  ;;  %v2106_v16 = vadd.f32 %v2090_v47, %v7711_v57  ;;  %v2088_v61 = vmul.f32 0.044715, %v2072_v33  ;;  %v2059_v35 = vmul.f32 %v7733_v2, %v7733_v2 }
 0x528   : > { %v2180_v19 = vmul.f32 %v2164_v22, %v1992_v29  ;;  %v2196_v62 = vpack.c.bf16 %v2182_v36, %v2181_v50  ;;  %6786 = vtanh.f32 %v2121_v45  ;;  %v2077_v29 = vmul.f32 %v2061_v28, %v7725_v23  ;;  %v2023_v3 = vpop.f32.mrf.mxu1 }
 0x529   : > { %v7740_v40 = vadd.f32 %v6407_v12, %v7681_v8  ;;  %6788 = vtanh.f32 %v2119_v11  ;;  %v2122_v17 = vmul.f32 0.7978846, %v2106_v16  ;;  %v2104_v48 = vadd.f32 %v2088_v61, %v7717_v54 }
 0x52a   : > { %v2195_v49 = vpack.c.bf16 %v2180_v19, %v2179_v4  ;;  %v7744_v34 = vadd.f32 %v7681_v8, %v2023_v3  ;;  %v2093_v39 = vmul.f32 0.044715, %v2077_v29  ;;  %v2075_v46 = vmul.f32 %v2059_v35, %v7733_v2  ;;  %v6410_v15 = vpop.f32.mrf.mxu1 }
 0x52b   : > { %v2062_v21 = vmul.f32 %v7740_v40, %v7740_v40  ;;  %6790 = vtanh.f32 %v2122_v17  ;;  %v2120_v60 = vmul.f32 0.7978846, %v2104_v48  ;;  %v7752_v59 = vadd.f32 %v6410_v15, %v7681_v8 }
 0x52c   : > { %6428 = vmatprep.mubr.bf16.mxu0 %v2195_v49  ;;  %v2060_v27 = vmul.f32 %v7744_v34, %v7744_v34  ;;  %v2109_v13 = vadd.f32 %v2093_v39, %v7725_v23  ;;  %v2091_v10 = vmul.f32 0.044715, %v2075_v46  ;;  %v2036_v32 = vpop.f32.mrf.mxu1 }
 0x52d   : > { %6429 = vmatmul.mubr.bf16.vlgmr.msra.gmra.mxu0 %v2196_v62  ;;  %v2078_v24 = vmul.f32 %v2062_v21, %v7740_v40  ;;  %6792 = vtanh.f32 %v2120_v60  ;;  %v2065_v36 = vmul.f32 %v7752_v59, %v7752_v59  ;;  %v7760_v25 = vadd.f32 %v7681_v8, %v2036_v32 }
 0x52e   : > { %v2076_v9 = vmul.f32 %v2060_v27, %v7744_v34  ;;  %v2125_v22 = vmul.f32 0.7978846, %v2109_v13  ;;  %v2107_v14 = vadd.f32 %v2091_v10, %v7733_v2  ;;  %v6411_v5 = vpop.f32.mrf.mxu1 }
 0x52f   : > { %v2094_v0 = vmul.f32 0.044715, %v2078_v24  ;;  %v2081_v50 = vmul.f32 %v2065_v36, %v7752_v59  ;;  %v2063_v1 = vmul.f32 %v7760_v25, %v7760_v25  ;;  %v7767_v4 = vadd.f32 %v6411_v5, %v7681_v8 }
 0x530   : > { %v2092_v20 = vmul.f32 0.044715, %v2076_v9  ;;  %6794 = vtanh.f32 %v2125_v22  ;;  %v2123_v19 = vmul.f32 0.7978846, %v2107_v14  ;;  %v2039_v44 = vpop.f32.mrf.mxu1 }
 0x531   : > { %v2110_v45 = vadd.f32 %v2094_v0, %v7740_v40  ;;  %v2097_v33 = vmul.f32 0.044715, %v2081_v50  ;;  %v2079_v28 = vmul.f32 %v2063_v1, %v7760_v25  ;;  %v2066_v12 = vmul.f32 %v7767_v4, %v7767_v4 }
 0x532   : > { %v2108_v47 = vadd.f32 %v2092_v20, %v7744_v34  ;;  %6796 = vtanh.f32 %v2123_v19  ;;  %v7775_v62 = vadd.f32 %v7681_v8, %v2039_v44 }
 0x533   : > { %v2126_v49 = vmul.f32 0.7978846, %v2110_v45  ;;  %v2113_v16 = vadd.f32 %v2097_v33, %v7752_v59  ;;  %v2095_v61 = vmul.f32 0.044715, %v2079_v28  ;;  %v2082_v29 = vmul.f32 %v2066_v12, %v7767_v4 }
 0x534   : > { %v2124_v11 = vmul.f32 0.7978846, %v2108_v47  ;;  %v2064_v35 = vmul.f32 %v7775_v62, %v7775_v62 }
 0x535   : > { %6798 = vtanh.f32 %v2126_v49  ;;  %v6787_v3 = vpop.eup %6786  ;;  %v2129_v17 = vmul.f32 0.7978846, %v2113_v16  ;;  %v2111_v48 = vadd.f32 %v2095_v61, %v7760_v25  ;;  %v2098_v39 = vmul.f32 0.044715, %v2082_v29 }
 0x536   : > { %6800 = vtanh.f32 %v2124_v11  ;;  %v6789_v46 = vpop.eup %6788  ;;  %v2080_v8 = vmul.f32 %v2064_v35, %v7775_v62  ;;  %v2153_v10 = vadd.f32 1.0, %v6787_v3 }
 0x537   : > { %v2127_v21 = vmul.f32 0.7978846, %v2111_v48  ;;  %v2114_v15 = vadd.f32 %v2098_v39, %v7767_v4  ;;  %v2151_v60 = vadd.f32 1.0, %v6789_v46  ;;  %6802 = vtanh.f32 %v2129_v17 }
 0x538   : > { %v6791_v27 = vpop.eup %6790  ;;  %v2096_v13 = vmul.f32 0.044715, %v2080_v8  ;;  %v2169_v20 = vmul.f32 0.5, %v2153_v10 }
 0x539   : > { %6804 = vtanh.f32 %v2127_v21  ;;  %v2130_v24 = vmul.f32 0.7978846, %v2114_v15  ;;  %v2154_v32 = vadd.f32 1.0, %v6791_v27  ;;  %v2167_v14 = vmul.f32 0.5, %v2151_v60 }
 0x53a   : > { %v6793_v9 = vpop.eup %6792  ;;  %v2112_v36 = vadd.f32 %v2096_v13, %v7775_v62  ;;  %v2185_v33 = vmul.f32 %v2169_v20, %v7700_v55  ;;  %v6727_v20 = vld [vmem:[%s9884_s4 + $0x50] sm:$0xff]  }
 0x53b   : > { %6806 = vtanh.f32 %v2130_v24  ;;  %v2152_v22 = vadd.f32 1.0, %v6793_v9  ;;  %v2170_v0 = vmul.f32 0.5, %v2154_v32  ;;  %v2183_v44 = vmul.f32 %v2167_v14, %v7705_v7  ;;  %6454 = vmatprep.subr.bf16.mxu1 %v6727_v20 }
 0x53c   : > { %v2128_v5 = vmul.f32 0.7978846, %v2112_v36  ;;  %6455 = vmatpush3.bf16.msra.mxu1 %v6727_v20  ;;  %v6734_v20 = vld [vmem:[%s9886_s6 + $0x58] sm:$0xff]  }
 0x53d   : > { %v6795_v50 = vpop.eup %6794  ;;  %v2168_v1 = vmul.f32 0.5, %v2152_v22  ;;  %v2186_v19 = vmul.f32 %v2170_v0, %v7711_v57 }
 0x53e   : > { %6808 = vtanh.f32 %v2128_v5  ;;  %v2157_v12 = vadd.f32 1.0, %v6795_v50 }
 0x53f   : > { %v6797_v45 = vpop.eup %6796  ;;  %v2184_v47 = vmul.f32 %v2168_v1, %v7717_v54  ;;  %v2198_v61 = vpack.c.bf16 %v2186_v19, %v2185_v33 }
 0x540   : > { %v2155_v28 = vadd.f32 1.0, %v6797_v45  ;;  %v2173_v17 = vmul.f32 0.5, %v2157_v12 }
 0x541   : > { %v2197_v11 = vpack.c.bf16 %v2184_v47, %v2183_v44  ;;  %v5795_v47 = vld [vmem:[%s9887_s7] ss:$0 sm:$0xff] }
 0x542   : > { %v6799_v49 = vpop.eup %6798  ;;  %v2171_v3 = vmul.f32 0.5, %v2155_v28  ;;  %v2189_v21 = vmul.f32 %v2173_v17, %v7725_v23 }
 0x543   : > { %v6801_v16 = vpop.eup %6800  ;;  %v2158_v29 = vadd.f32 1.0, %v6799_v49  ;;  %6432 = vmatprep.mubr.bf16.mxu0 %v2197_v11 }
 0x544   : > { %v2156_v35 = vadd.f32 1.0, %v6801_v16  ;;  %6433 = vmatmul.mubr.bf16.gmra.mxu0 %v2198_v61  ;;  %v6803_v48 = vpop.eup %6802  ;;  %v2187_v55 = vmul.f32 %v2171_v3, %v7733_v2 }
 0x545   : > { %v2174_v57 = vmul.f32 0.5, %v2158_v29  ;;  %v2161_v27 = vadd.f32 1.0, %v6803_v48 }
 0x546   : > { %v2172_v39 = vmul.f32 0.5, %v2156_v35  ;;  %v6805_v7 = vpop.eup %6804 }
 0x547   : > { %v2190_v54 = vmul.f32 %v2174_v57, %v7740_v40  ;;  %v2159_v15 = vadd.f32 1.0, %v6805_v7  ;;  %v2177_v22 = vmul.f32 0.5, %v2161_v27 }
 0x548   : > { %v2188_v46 = vmul.f32 %v2172_v39, %v7744_v34  ;;  %v6807_v8 = vpop.eup %6806 }
 0x549   : > { %v2162_v13 = vadd.f32 1.0, %v6807_v8  ;;  %v2200_v10 = vpack.c.bf16 %v2190_v54, %v2189_v21  ;;  %v2175_v36 = vmul.f32 0.5, %v2159_v15  ;;  %v2193_v23 = vmul.f32 %v2177_v22, %v7752_v59  ;;  %v6729_v59 = vld [vmem:[%s9884_s4 + $0x40] sm:$0xff]  }
 0x54a   : > { %v2199_v60 = vpack.c.bf16 %v2188_v46, %v2187_v55 }
 0x54b   : > { %v6809_v24 = vpop.eup %6808  ;;  %v2178_v32 = vmul.f32 0.5, %v2162_v13  ;;  %v2191_v34 = vmul.f32 %v2175_v36, %v7760_v25 }
 0x54c   : > { %6436 = vmatprep.mubr.bf16.mxu0 %v2199_v60  ;;  %v2160_v9 = vadd.f32 1.0, %v6809_v24 }
 0x54d   : > { %6437 = vmatmul.mubr.bf16.gmra.mxu0 %v2200_v10  ;;  %v2194_v2 = vmul.f32 %v2178_v32, %v7767_v4  ;;  %v6728_v4 = vld [vmem:[%s9884_s4 + $0x48] sm:$0xff]  }
 0x54e   : > { %v2176_v40 = vmul.f32 0.5, %v2160_v9  ;;  %6456 = vmatprep.subr.bf16.mxu1 %v6728_v4 }
 0x54f   : > { %v2202_v5 = vpack.c.bf16 %v2194_v2, %v2193_v23  ;;  %6457 = vmatpush3.bf16.msra.mxu1 %v6728_v4  ;;  %v6735_v4 = vld [vmem:[%s9886_s6 + $0x50] sm:$0xff]  }
 0x550   : > { %v2192_v14 = vmul.f32 %v2176_v40, %v7775_v62  ;;  %6458 = vmatprep.subr.bf16.mxu1 %v6729_v59 }
 0x552   : > { %v2201_v0 = vpack.c.bf16 %v2192_v14, %v2191_v34 }
 0x553   : > { %6459 = vmatpush3.bf16.msra.mxu1 %v6729_v59  ;;  %v6736_v59 = vld [vmem:[%s9886_s6 + $0x48] sm:$0xff]  }
 0x554   : > { %6440 = vmatprep.mubr.bf16.mxu0 %v2201_v0 }
 0x555   : > { %6441 = vmatmul.mubr.bf16.gmra.mxu0 %v2202_v5  ;;  %v6733_v5 = vld [vmem:[%s9886_s6 + $0x60] sm:$0xff]  }
 0x5ed   : > { %v6430_v25 = vpop.f32.mrf.mxu0 }
 0x5ee   : > { %v2366_v45 = vadd.f32 %v6430_v25, %v7573_v56  ;;  %v6737_v25 = vld [vmem:[%s9886_s6 + $0x40] sm:$0xff]  }
 0x5ef   : > { %v2301_v62 = vpop.f32.mrf.mxu0 }
 0x5f0   : > { %v2364_v1 = vadd.f32 %v2301_v62, %v7569_v41  ;;  %v7819_v11 = vadd.f32 %v5795_v47, %v2366_v45  ;;  %v6738_v62 = vld [vmem:[%s9884_s4 + $0xb8] sm:$0xff]  }
 0x5f1   : > { %v6431_v50 = vpop.f32.mrf.mxu0  ;;  %6508 = vmatprep.subr.bf16.mxu1 %v6738_v62  ;;  %v6742_v45 = vld [vmem:[%s9884_s4 + $0x98] sm:$0xff]  }
 0x5f2   : > { %v2367_v19 = vadd.f32 %v6431_v50, %v7567_v52  ;;  %v7815_v12 = vadd.f32 %v5795_v47, %v2364_v1  ;;  %v6739_v50 = vld [vmem:[%s9884_s4 + $0xb0] sm:$0xff]   ;;  %v6740_v1 = vld [vmem:[%s9884_s4 + $0xa8] sm:$0xff]  }
 0x5f3   : > { %v2304_v44 = vpop.f32.mrf.mxu0 }
 0x5f4   : > { %v2365_v33 = vadd.f32 %v2304_v44, %v7571_v18  ;;  %v7813_v28 = vadd.f32 %v5795_v47, %v2367_v19  ;;  %v6741_v19 = vld [vmem:[%s9884_s4 + $0xa0] sm:$0xff]  }
 0x5f5   : > { %v7915_v44 = vld [vmem:[%s9885_s5 + $0x1] ss:$0 sm:$0xff] }
 0x5f6   : > { %v7817_v49 = vadd.f32 %v5795_v47, %v2365_v33  ;;  %v2404_v41 = vpack.c.bf16 %v7813_v28, %v7819_v11 }
 0x5f8   : > { %v2403_v52 = vpack.c.bf16 %v7817_v49, %v7815_v12 }
 0x5fa   : > { %6460 = vmatprep.mubr.bf16.mxu1 %v2403_v52 }
 0x5fb   : > { %6461 = vmatmul.mubr.bf16.vlgmr.msra.gmra.mxu1 %v2404_v41 }
 0x5fc   : > { %6509 = vmatpush3.bf16.msra.mxu1 %v6738_v62 }
 0x5fd   : > { %6510 = vmatprep.subr.bf16.mxu1 %v6739_v50 }
 0x600   : > { %6511 = vmatpush3.bf16.msra.mxu1 %v6739_v50 }
 0x601   : > { %6512 = vmatprep.subr.bf16.mxu1 %v6740_v1 }
 0x604   : > { %v6434_v56 = vpop.f32.mrf.mxu0  ;;  %6513 = vmatpush3.bf16.msra.mxu1 %v6740_v1 }
 0x605   : > { %v2370_v35 = vadd.f32 %v6434_v56, %v7594_v58  ;;  %6514 = vmatprep.subr.bf16.mxu1 %v6741_v19 }
 0x606   : > { %v2317_v16 = vpop.f32.mrf.mxu0 }
 0x607   : > { %v2368_v18 = vadd.f32 %v2317_v16, %v7598_v38  ;;  %v7835_v54 = vadd.f32 %v5795_v47, %v2370_v35 }
 0x608   : > { %v6435_v61 = vpop.f32.mrf.mxu0  ;;  %6515 = vmatpush3.bf16.msra.mxu1 %v6741_v19 }
 0x609   : > { %v2371_v29 = vadd.f32 %v6435_v61, %v7610_v31  ;;  %v7831_v39 = vadd.f32 %v5795_v47, %v2368_v18  ;;  %6516 = vmatprep.subr.bf16.mxu1 %v6742_v45 }
 0x60a   : > { %v2320_v3 = vpop.f32.mrf.mxu0 }
 0x60b   : > { %v2369_v17 = vadd.f32 %v2320_v3, %v7602_v37  ;;  %v7829_v57 = vadd.f32 %v5795_v47, %v2371_v29 }
 0x60c   : > { %6517 = vmatpush3.bf16.msra.mxu1 %v6742_v45 }
 0x60d   : > { %v6438_v48 = vpop.f32.mrf.mxu0  ;;  %v7833_v7 = vadd.f32 %v5795_v47, %v2369_v17  ;;  %v2406_v58 = vpack.c.bf16 %v7829_v57, %v7835_v54 }
 0x60e   : > { %v2374_v8 = vadd.f32 %v6438_v48, %v7623_v51 }
 0x60f   : > { %v2333_v55 = vpop.f32.mrf.mxu0  ;;  %v2405_v38 = vpack.c.bf16 %v7833_v7, %v7831_v39 }
 0x610   : > { %v2372_v31 = vadd.f32 %v2333_v55, %v7615_v43  ;;  %v7851_v24 = vadd.f32 %v5795_v47, %v2374_v8 }
 0x611   : > { %v6439_v46 = vpop.f32.mrf.mxu0  ;;  %6464 = vmatprep.mubr.bf16.mxu1 %v2405_v38 }
 0x612   : > { %v2375_v37 = vadd.f32 %v6439_v46, %v7619_v42  ;;  %6465 = vmatmul.mubr.bf16.gmra.mxu1 %v2406_v58  ;;  %v7847_v27 = vadd.f32 %v5795_v47, %v2372_v31 }
 0x613   : > { %v2336_v21 = vpop.f32.mrf.mxu0 }
 0x614   : > { %v2373_v15 = vadd.f32 %v2336_v21, %v7617_v53  ;;  %v7845_v60 = vadd.f32 %v5795_v47, %v2375_v37 }
 0x615   : > { %v6442_v10 = vpop.f32.mrf.mxu0 }
 0x616   : > { %v7849_v13 = vadd.f32 %v5795_v47, %v2373_v15  ;;  %v2408_v42 = vpack.c.bf16 %v7845_v60, %v7851_v24  ;;  %v2378_v36 = vadd.f32 %v6442_v10, %v7635_v63  ;;  %v6732_v63 = vld [vmem:[%s9886_s6 + $0x68] sm:$0xff]  }
 0x617   : > { %v2349_v32 = vpop.f32.mrf.mxu0 }
 0x618   : > { %v2407_v43 = vpack.c.bf16 %v7849_v13, %v7847_v27  ;;  %v2376_v53 = vadd.f32 %v2349_v32, %v7627_v26  ;;  %v7867_v23 = vadd.f32 %v5795_v47, %v2378_v36 }
 0x619   : > { %v6443_v51 = vpop.f32.mrf.mxu0 }
 0x61a   : > { %6468 = vmatprep.mubr.bf16.mxu1 %v2407_v43  ;;  %v2379_v9 = vadd.f32 %v6443_v51, %v7633_v30  ;;  %v7863_v34 = vadd.f32 %v5795_v47, %v2376_v53  ;;  %v6731_v30 = vld [vmem:[%s9886_s6 + $0x70] sm:$0xff]  }
 0x61b   : > { %6469 = vmatmul.mubr.bf16.gmra.mxu1 %v2408_v42  ;;  %v2352_v22 = vpop.f32.mrf.mxu0 }
 0x61c   : > { %v2377_v40 = vadd.f32 %v2352_v22, %v7629_v6  ;;  %v7861_v2 = vadd.f32 %v5795_v47, %v2379_v9  ;;  %v6730_v6 = vld [vmem:[%s9886_s6 + $0x78] sm:$0xff]  }
 0x61d   : > { %6476 = vmatprep.subr.bf16.mxu0 %v6730_v6 }
 0x61e   : > { %v7865_v14 = vadd.f32 %v5795_v47, %v2377_v40  ;;  %v2410_v26 = vpack.c.bf16 %v7861_v2, %v7867_v23  ;;  %6477 = vmatpush3.bf16.msra.mxu0 %v6730_v6 }
 0x61f   : > { %6478 = vmatprep.subr.bf16.mxu0 %v6731_v30 }
 0x620   : > { %v2409_v0 = vpack.c.bf16 %v7865_v14, %v7863_v34 }
 0x622   : > { %6472 = vmatprep.mubr.bf16.mxu1 %v2409_v0  ;;  %6479 = vmatpush3.bf16.msra.mxu0 %v6731_v30 }
 0x623   : > { %6473 = vmatmul.mubr.bf16.gmra.mxu1 %v2410_v26  ;;  %6480 = vmatprep.subr.bf16.mxu0 %v6732_v63 }
 0x626   : > { %6481 = vmatpush3.bf16.msra.mxu0 %v6732_v63 }
 0x627   : > { %6482 = vmatprep.subr.bf16.mxu0 %v6733_v5 }
 0x62a   : > { %6483 = vmatpush3.bf16.msra.mxu0 %v6733_v5 }
 0x62b   : > { %6484 = vmatprep.subr.bf16.mxu0 %v6734_v20 }
 0x62e   : > { %6485 = vmatpush3.bf16.msra.mxu0 %v6734_v20 }
 0x62f   : > { %6486 = vmatprep.subr.bf16.mxu0 %v6735_v4 }
 0x632   : > { %6487 = vmatpush3.bf16.msra.mxu0 %v6735_v4 }
 0x633   : > { %6488 = vmatprep.subr.bf16.mxu0 %v6736_v59 }
 0x636   : > { %6489 = vmatpush3.bf16.msra.mxu0 %v6736_v59 }
 0x637   : > { %6490 = vmatprep.subr.bf16.mxu0 %v6737_v25 }
 0x63a   : > { %6491 = vmatpush3.bf16.msra.mxu0 %v6737_v25 }
 0x6bb   : > { %v6462_v47 = vpop.f32.mrf.mxu1 }
 0x6bc   : > { %v7918_v33 = vadd.f32 %v6462_v47, %v7915_v44 }
 0x6bd   : > { %v2518_v52 = vpop.f32.mrf.mxu1 }
 0x6be   : > { %v2583_v41 = vmul.f32 %v7918_v33, %v7918_v33  ;;  %v7923_v56 = vadd.f32 %v7915_v44, %v2518_v52 }
 0x6bf   : > { %v6463_v16 = vpop.f32.mrf.mxu1 }
 0x6c0   : > { %v2599_v61 = vmul.f32 %v2583_v41, %v7918_v33  ;;  %v2581_v18 = vmul.f32 %v7923_v56, %v7923_v56  ;;  %v2530_v29 = vadd.f32 %v6463_v16, %v7915_v44 }
 0x6c1   : > { %v2521_v35 = vpop.f32.mrf.mxu1 }
 0x6c2   : > { %v2615_v3 = vmul.f32 0.044715, %v2599_v61  ;;  %v2597_v17 = vmul.f32 %v2581_v18, %v7923_v56  ;;  %v2584_v48 = vmul.f32 %v2530_v29, %v2530_v29  ;;  %v2522_v55 = vadd.f32 %v7915_v44, %v2521_v35 }
 0x6c4   : > { %v2631_v38 = vadd.f32 %v2615_v3, %v7918_v33  ;;  %v2613_v46 = vmul.f32 0.044715, %v2597_v17  ;;  %v2600_v58 = vmul.f32 %v2584_v48, %v2530_v29  ;;  %v2582_v31 = vmul.f32 %v2522_v55, %v2522_v55 }
 0x6c6   : > { %v2647_v37 = vmul.f32 0.7978846, %v2631_v38  ;;  %v2629_v8 = vadd.f32 %v2613_v46, %v7923_v56  ;;  %v2616_v21 = vmul.f32 0.044715, %v2600_v58  ;;  %v2598_v15 = vmul.f32 %v2582_v31, %v2522_v55 }
 0x6c8   : > { %6810 = vtanh.f32 %v2647_v37  ;;  %v2645_v10 = vmul.f32 0.7978846, %v2629_v8  ;;  %v2632_v32 = vadd.f32 %v2616_v21, %v2530_v29  ;;  %v2614_v43 = vmul.f32 0.044715, %v2598_v15 }
 0x6ca   : > { %6812 = vtanh.f32 %v2645_v10  ;;  %v2648_v42 = vmul.f32 0.7978846, %v2632_v32  ;;  %v2630_v51 = vadd.f32 %v2614_v43, %v2522_v55 }
 0x6cc   : > { %6814 = vtanh.f32 %v2648_v42  ;;  %v2646_v53 = vmul.f32 0.7978846, %v2630_v51 }
 0x6ce   : > { %6816 = vtanh.f32 %v2646_v53 }
 0x6d2   : > { %v6466_v36 = vpop.f32.mrf.mxu1 }
 0x6d3   : > { %v7934_v40 = vadd.f32 %v6466_v36, %v7915_v44 }
 0x6d4   : > { %v2534_v26 = vpop.f32.mrf.mxu1 }
 0x6d5   : > { %v6811_v9 = vpop.eup %6810  ;;  %v2587_v63 = vmul.f32 %v7934_v40, %v7934_v40  ;;  %v7939_v5 = vadd.f32 %v7915_v44, %v2534_v26 }
 0x6d6   : > { %v2679_v0 = vadd.f32 1.0, %v6811_v9  ;;  %v6467_v4 = vpop.f32.mrf.mxu1 }
 0x6d7   : > { %v6813_v22 = vpop.eup %6812  ;;  %v2603_v25 = vmul.f32 %v2587_v63, %v7934_v40  ;;  %v2585_v62 = vmul.f32 %v7939_v5, %v7939_v5  ;;  %v7945_v50 = vadd.f32 %v6467_v4, %v7915_v44 }
 0x6d8   : > { %v2677_v6 = vadd.f32 1.0, %v6813_v22  ;;  %v2695_v1 = vmul.f32 0.5, %v2679_v0  ;;  %v2537_v45 = vpop.f32.mrf.mxu1 }
 0x6d9   : > { %v6815_v30 = vpop.eup %6814  ;;  %v2619_v41 = vmul.f32 0.044715, %v2603_v25  ;;  %v2601_v16 = vmul.f32 %v2585_v62, %v7939_v5  ;;  %v2588_v61 = vmul.f32 %v7945_v50, %v7945_v50  ;;  %v7951_v18 = vadd.f32 %v7915_v44, %v2537_v45 }
 0x6da   : > { %v2680_v20 = vadd.f32 1.0, %v6815_v30  ;;  %v2693_v52 = vmul.f32 0.5, %v2677_v6  ;;  %v2711_v31 = vmul.f32 %v2695_v1, %v7918_v33 }
 0x6db   : > { %v6817_v59 = vpop.eup %6816  ;;  %v6470_v3 = vpop.f32.mrf.mxu1  ;;  %v2635_v48 = vadd.f32 %v2619_v41, %v7934_v40  ;;  %v2617_v38 = vmul.f32 0.044715, %v2601_v16  ;;  %v2604_v46 = vmul.f32 %v2588_v61, %v7945_v50  ;;  %v2586_v58 = vmul.f32 %v7951_v18, %v7951_v18 }
 0x6dc   : > { %v2696_v19 = vmul.f32 0.5, %v2680_v20  ;;  %v2678_v47 = vadd.f32 1.0, %v6817_v59  ;;  %v7959_v37 = vadd.f32 %v6470_v3, %v7915_v44  ;;  %v2709_v21 = vmul.f32 %v2693_v52, %v7923_v56 }
 0x6dd   : > { %v2550_v8 = vpop.f32.mrf.mxu1  ;;  %v2633_v10 = vadd.f32 %v2617_v38, %v7939_v5  ;;  %v2620_v32 = vmul.f32 0.044715, %v2604_v46  ;;  %v2602_v43 = vmul.f32 %v2586_v58, %v7951_v18 }
 0x6de   : > { %v2712_v35 = vmul.f32 %v2696_v19, %v2530_v29  ;;  %v2694_v17 = vmul.f32 0.5, %v2678_v47  ;;  %v2651_v29 = vmul.f32 0.7978846, %v2635_v48  ;;  %v2591_v42 = vmul.f32 %v7959_v37, %v7959_v37 }
 0x6df   : > { %v7967_v51 = vadd.f32 %v7915_v44, %v2550_v8  ;;  %v6471_v33 = vpop.f32.mrf.mxu1  ;;  %v2649_v36 = vmul.f32 0.7978846, %v2633_v10  ;;  %v2636_v22 = vadd.f32 %v2620_v32, %v7945_v50  ;;  %v2618_v56 = vmul.f32 0.044715, %v2602_v43 }
 0x6e0   : > { %v2710_v15 = vmul.f32 %v2694_v17, %v2522_v55  ;;  %v2726_v9 = vpack.c.bf16 %v2712_v35, %v2711_v31  ;;  %6818 = vtanh.f32 %v2651_v29  ;;  %v2607_v55 = vmul.f32 %v2591_v42, %v7959_v37 }
 0x6e1   : > { %v2589_v0 = vmul.f32 %v7967_v51, %v7967_v51  ;;  %v7974_v26 = vadd.f32 %v6471_v33, %v7915_v44  ;;  %v2553_v6 = vpop.f32.mrf.mxu1  ;;  %6820 = vtanh.f32 %v2649_v36  ;;  %v2652_v30 = vmul.f32 0.7978846, %v2636_v22 }
 0x6e2   : > { %v2725_v53 = vpack.c.bf16 %v2710_v15, %v2709_v21  ;;  %v2634_v63 = vadd.f32 %v2618_v56, %v7951_v18  ;;  %v7978_v20 = vadd.f32 %v7915_v44, %v2553_v6  ;;  %v2623_v4 = vmul.f32 0.044715, %v2607_v55 }
 0x6e3   : > { %v2605_v59 = vmul.f32 %v2589_v0, %v7967_v51  ;;  %v2592_v25 = vmul.f32 %v7974_v26, %v7974_v26  ;;  %6822 = vtanh.f32 %v2652_v30  ;;  %v6474_v19 = vpop.f32.mrf.mxu1 }
 0x6e4   : > { %6492 = vmatprep.mubr.bf16.mxu0 %v2725_v53  ;;  %v2650_v62 = vmul.f32 0.7978846, %v2634_v63  ;;  %v2590_v1 = vmul.f32 %v7978_v20, %v7978_v20  ;;  %v2639_v45 = vadd.f32 %v2623_v4, %v7959_v37  ;;  %v7988_v41 = vadd.f32 %v6474_v19, %v7915_v44 }
 0x6e5   : > { %6493 = vmatmul.mubr.bf16.vlgmr.msra.gmra.mxu0 %v2726_v9  ;;  %v2621_v47 = vmul.f32 0.044715, %v2605_v59  ;;  %v2608_v52 = vmul.f32 %v2592_v25, %v7974_v26  ;;  %v2566_v61 = vpop.f32.mrf.mxu1 }
 0x6e6   : > { %6824 = vtanh.f32 %v2650_v62  ;;  %v2606_v16 = vmul.f32 %v2590_v1, %v7978_v20  ;;  %v2655_v35 = vmul.f32 0.7978846, %v2639_v45  ;;  %v2595_v48 = vmul.f32 %v7988_v41, %v7988_v41 }
 0x6e7   : > { %v2637_v3 = vadd.f32 %v2621_v47, %v7967_v51  ;;  %v2624_v17 = vmul.f32 0.044715, %v2608_v52  ;;  %v7995_v46 = vadd.f32 %v7915_v44, %v2566_v61  ;;  %v6475_v58 = vpop.f32.mrf.mxu1 }
 0x6e8   : > { %v2622_v38 = vmul.f32 0.044715, %v2606_v16  ;;  %6826 = vtanh.f32 %v2655_v35  ;;  %v2611_v21 = vmul.f32 %v2595_v48, %v7988_v41  ;;  %v8003_v10 = vadd.f32 %v6475_v58, %v7915_v44 }
 0x6e9   : > { %v2653_v31 = vmul.f32 0.7978846, %v2637_v3  ;;  %v2640_v8 = vadd.f32 %v2624_v17, %v7974_v26  ;;  %v2593_v29 = vmul.f32 %v7995_v46, %v7995_v46  ;;  %v2569_v32 = vpop.f32.mrf.mxu1 }
 0x6ea   : > { %v2638_v15 = vadd.f32 %v2622_v38, %v7978_v20  ;;  %v2627_v42 = vmul.f32 0.044715, %v2611_v21  ;;  %v8006_v33 = vadd.f32 %v7915_v44, %v2569_v32  ;;  %v2596_v36 = vmul.f32 %v8003_v10, %v8003_v10 }
 0x6eb   : > { %6828 = vtanh.f32 %v2653_v31  ;;  %v2656_v43 = vmul.f32 0.7978846, %v2640_v8  ;;  %v2609_v9 = vmul.f32 %v2593_v29, %v7995_v46 }
 0x6ec   : > { %v2654_v53 = vmul.f32 0.7978846, %v2638_v15  ;;  %v2643_v22 = vadd.f32 %v2627_v42, %v7988_v41  ;;  %v2594_v56 = vmul.f32 %v8006_v33, %v8006_v33  ;;  %v2612_v6 = vmul.f32 %v2596_v36, %v8003_v10 }
 0x6ed   : > { %6830 = vtanh.f32 %v2656_v43  ;;  %v6819_v55 = vpop.eup %6818  ;;  %v2625_v0 = vmul.f32 0.044715, %v2609_v9 }
 0x6ee   : > { %6832 = vtanh.f32 %v2654_v53  ;;  %v6821_v30 = vpop.eup %6820  ;;  %v2659_v44 = vmul.f32 0.7978846, %v2643_v22  ;;  %v2610_v63 = vmul.f32 %v2594_v56, %v8006_v33  ;;  %v2628_v59 = vmul.f32 0.044715, %v2612_v6 }
 0x6ef   : > { %v2641_v4 = vadd.f32 %v2625_v0, %v7995_v46  ;;  %v2681_v25 = vadd.f32 1.0, %v6821_v30  ;;  %v2683_v19 = vadd.f32 1.0, %v6819_v55 }
 0x6f0   : > { %v6823_v62 = vpop.eup %6822  ;;  %v2626_v1 = vmul.f32 0.044715, %v2610_v63  ;;  %6834 = vtanh.f32 %v2659_v44  ;;  %v2644_v47 = vadd.f32 %v2628_v59, %v8003_v10 }
 0x6f1   : > { %v2657_v45 = vmul.f32 0.7978846, %v2641_v4  ;;  %v2684_v52 = vadd.f32 1.0, %v6823_v62  ;;  %v2697_v17 = vmul.f32 0.5, %v2681_v25  ;;  %v2699_v38 = vmul.f32 0.5, %v2683_v19 }
 0x6f2   : > { %v2642_v61 = vadd.f32 %v2626_v1, %v8006_v33  ;;  %v2660_v35 = vmul.f32 0.7978846, %v2644_v47 }
 0x6f3   : > { %v6825_v16 = vpop.eup %6824  ;;  %6836 = vtanh.f32 %v2657_v45  ;;  %v2700_v58 = vmul.f32 0.5, %v2684_v52  ;;  %v2713_v29 = vmul.f32 %v2697_v17, %v7939_v5  ;;  %v2715_v43 = vmul.f32 %v2699_v38, %v7934_v40 }
 0x6f4   : > { %v2682_v3 = vadd.f32 1.0, %v6825_v16  ;;  %v2658_v48 = vmul.f32 0.7978846, %v2642_v61  ;;  %6838 = vtanh.f32 %v2660_v35 }
 0x6f5   : > { %v6827_v31 = vpop.eup %6826  ;;  %v2716_v21 = vmul.f32 %v2700_v58, %v7945_v50  ;;  %v6743_v58 = vld [vmem:[%s9884_s4 + $0x90] sm:$0xff]  }
 0x6f6   : > { %v2698_v8 = vmul.f32 0.5, %v2682_v3  ;;  %6840 = vtanh.f32 %v2658_v48  ;;  %v2687_v53 = vadd.f32 1.0, %v6827_v31  ;;  %6518 = vmatprep.subr.bf16.mxu1 %v6743_v58 }
 0x6f7   : > { %v2728_v56 = vpack.c.bf16 %v2716_v21, %v2715_v43  ;;  %6519 = vmatpush3.bf16.msra.mxu1 %v6743_v58  ;;  %v6750_v58 = vld [vmem:[%s9886_s6 + $0x98] sm:$0xff]  }
 0x6f8   : > { %v6829_v15 = vpop.eup %6828  ;;  %v2714_v32 = vmul.f32 %v2698_v8, %v7951_v18  ;;  %v2703_v30 = vmul.f32 0.5, %v2687_v53 }
 0x6f9   : > { %v2685_v42 = vadd.f32 1.0, %v6829_v15 }
 0x6fa   : > { %v6831_v9 = vpop.eup %6830  ;;  %v2727_v36 = vpack.c.bf16 %v2714_v32, %v2713_v29  ;;  %v2719_v59 = vmul.f32 %v2703_v30, %v7959_v37  ;;  %v5847_v32 = vld [vmem:[%s9887_s7 + $0x1] ss:$0 sm:$0xff] }
 0x6fb   : > { %v6833_v22 = vpop.eup %6832  ;;  %v2688_v55 = vadd.f32 1.0, %v6831_v9  ;;  %v2701_v6 = vmul.f32 0.5, %v2685_v42 }
 0x6fc   : > { %6496 = vmatprep.mubr.bf16.mxu0 %v2727_v36  ;;  %v2686_v0 = vadd.f32 1.0, %v6833_v22 }
 0x6fd   : > { %6497 = vmatmul.mubr.bf16.gmra.mxu0 %v2728_v56  ;;  %v2704_v50 = vmul.f32 0.5, %v2688_v55  ;;  %v6835_v63 = vpop.eup %6834  ;;  %v2717_v18 = vmul.f32 %v2701_v6, %v7967_v51 }
 0x6fe   : > { %v2702_v44 = vmul.f32 0.5, %v2686_v0  ;;  %v2691_v1 = vadd.f32 1.0, %v6835_v63 }
 0x6ff   : > { %v2720_v5 = vmul.f32 %v2704_v50, %v7974_v26 }
 0x700   : > { %v2718_v40 = vmul.f32 %v2702_v44, %v7978_v20  ;;  %v6837_v4 = vpop.eup %6836  ;;  %v2707_v35 = vmul.f32 0.5, %v2691_v1 }
 0x701   : > { %v2689_v62 = vadd.f32 1.0, %v6837_v4  ;;  %v6839_v19 = vpop.eup %6838  ;;  %v2730_v45 = vpack.c.bf16 %v2720_v5, %v2719_v59 }
 0x702   : > { %v2729_v25 = vpack.c.bf16 %v2718_v40, %v2717_v18  ;;  %v2692_v52 = vadd.f32 1.0, %v6839_v19  ;;  %v2723_v17 = vmul.f32 %v2707_v35, %v7988_v41  ;;  %v6745_v41 = vld [vmem:[%s9884_s4 + $0x80] sm:$0xff]  }
 0x703   : > { %v6841_v47 = vpop.eup %6840  ;;  %v2705_v61 = vmul.f32 0.5, %v2689_v62 }
 0x704   : > { %6500 = vmatprep.mubr.bf16.mxu0 %v2729_v25  ;;  %v2690_v16 = vadd.f32 1.0, %v6841_v47  ;;  %v2708_v26 = vmul.f32 0.5, %v2692_v52 }
 0x705   : > { %6501 = vmatmul.mubr.bf16.gmra.mxu0 %v2730_v45  ;;  %v2721_v20 = vmul.f32 %v2705_v61, %v7995_v46 }
 0x706   : > { %v2706_v3 = vmul.f32 0.5, %v2690_v16  ;;  %v2724_v51 = vmul.f32 %v2708_v26, %v8003_v10  ;;  %v6744_v10 = vld [vmem:[%s9884_s4 + $0x88] sm:$0xff]  }
 0x707   : > { %6520 = vmatprep.subr.bf16.mxu1 %v6744_v10 }
 0x708   : > { %v2722_v37 = vmul.f32 %v2706_v3, %v8006_v33  ;;  %v2732_v38 = vpack.c.bf16 %v2724_v51, %v2723_v17  ;;  %6521 = vmatpush3.bf16.msra.mxu1 %v6744_v10  ;;  %v6751_v10 = vld [vmem:[%s9886_s6 + $0x90] sm:$0xff]  }
 0x709   : > { %6522 = vmatprep.subr.bf16.mxu1 %v6745_v41 }
 0x70a   : > { %v2731_v48 = vpack.c.bf16 %v2722_v37, %v2721_v20 }
 0x70c   : > { %6504 = vmatprep.mubr.bf16.mxu0 %v2731_v48  ;;  %6523 = vmatpush3.bf16.msra.mxu1 %v6745_v41  ;;  %v6752_v41 = vld [vmem:[%s9886_s6 + $0x88] sm:$0xff]  }
 0x70d   : > { %6505 = vmatmul.mubr.bf16.gmra.mxu0 %v2732_v38  ;;  %v6749_v38 = vld [vmem:[%s9886_s6 + $0xa0] sm:$0xff]  }
 0x7a5   : > { %v6494_v46 = vpop.f32.mrf.mxu0 }
 0x7a6   : > { %v2897_v15 = vadd.f32 %v6494_v46, %v7819_v11  ;;  %v6753_v46 = vld [vmem:[%s9886_s6 + $0x80] sm:$0xff]  }
 0x7a7   : > { %v2832_v33 = vpop.f32.mrf.mxu0 }
 0x7a8   : > { %v2895_v8 = vadd.f32 %v2832_v33, %v7815_v12  ;;  %v8053_v36 = vadd.f32 %v5847_v32, %v2897_v15  ;;  %v6754_v33 = vld [vmem:[%s9884_s4 + $0xf8] sm:$0xff]  }
 0x7a9   : > { %v6495_v31 = vpop.f32.mrf.mxu0  ;;  %6572 = vmatprep.subr.bf16.mxu1 %v6754_v33  ;;  %v6758_v15 = vld [vmem:[%s9884_s4 + $0xd8] sm:$0xff]  }
 0x7aa   : > { %v2898_v21 = vadd.f32 %v6495_v31, %v7813_v28  ;;  %v8049_v53 = vadd.f32 %v5847_v32, %v2895_v8  ;;  %v6755_v31 = vld [vmem:[%s9884_s4 + $0xf0] sm:$0xff]   ;;  %v6756_v8 = vld [vmem:[%s9884_s4 + $0xe8] sm:$0xff]  }
 0x7ab   : > { %v2835_v29 = vpop.f32.mrf.mxu0 }
 0x7ac   : > { %v2896_v43 = vadd.f32 %v2835_v29, %v7817_v49  ;;  %v8047_v42 = vadd.f32 %v5847_v32, %v2898_v21  ;;  %v6757_v21 = vld [vmem:[%s9884_s4 + $0xe0] sm:$0xff]  }
 0x7ad   : > { %v8149_v29 = vld [vmem:[%s9885_s5 + $0x2] ss:$0 sm:$0xff] }
 0x7ae   : > { %v8051_v9 = vadd.f32 %v5847_v32, %v2896_v43  ;;  %v2936_v12 = vpack.c.bf16 %v8047_v42, %v8053_v36 }
 0x7b0   : > { %v2935_v28 = vpack.c.bf16 %v8051_v9, %v8049_v53 }
 0x7b2   : > { %6524 = vmatprep.mubr.bf16.mxu1 %v2935_v28 }
 0x7b3   : > { %6525 = vmatmul.mubr.bf16.vlgmr.msra.gmra.mxu1 %v2936_v12 }
 0x7b4   : > { %6573 = vmatpush3.bf16.msra.mxu1 %v6754_v33 }
 0x7b5   : > { %6574 = vmatprep.subr.bf16.mxu1 %v6755_v31 }
 0x7b8   : > { %6575 = vmatpush3.bf16.msra.mxu1 %v6755_v31 }
 0x7b9   : > { %6576 = vmatprep.subr.bf16.mxu1 %v6756_v8 }
 0x7bc   : > { %6577 = vmatpush3.bf16.msra.mxu1 %v6756_v8 }
 0x7bd   : > { %v6498_v11 = vpop.f32.mrf.mxu0  ;;  %6578 = vmatprep.subr.bf16.mxu1 %v6757_v21 }
 0x7be   : > { %v2901_v0 = vadd.f32 %v6498_v11, %v7835_v54 }
 0x7bf   : > { %v2848_v22 = vpop.f32.mrf.mxu0 }
 0x7c0   : > { %v2899_v49 = vadd.f32 %v2848_v22, %v7831_v39  ;;  %v8069_v18 = vadd.f32 %v5847_v32, %v2901_v0  ;;  %6579 = vmatpush3.bf16.msra.mxu1 %v6757_v21 }
 0x7c1   : > { %v6499_v56 = vpop.f32.mrf.mxu0  ;;  %6580 = vmatprep.subr.bf16.mxu1 %v6758_v15 }
 0x7c2   : > { %v2902_v55 = vadd.f32 %v6499_v56, %v7829_v57  ;;  %v8065_v63 = vadd.f32 %v5847_v32, %v2899_v49 }
 0x7c3   : > { %v2851_v6 = vpop.f32.mrf.mxu0 }
 0x7c4   : > { %v2900_v30 = vadd.f32 %v2851_v6, %v7833_v7  ;;  %v8063_v50 = vadd.f32 %v5847_v32, %v2902_v55  ;;  %6581 = vmatpush3.bf16.msra.mxu1 %v6758_v15 }
 0x7c5   : > { %v6502_v44 = vpop.f32.mrf.mxu0 }
 0x7c6   : > { %v8067_v5 = vadd.f32 %v5847_v32, %v2900_v30  ;;  %v2938_v57 = vpack.c.bf16 %v8063_v50, %v8069_v18  ;;  %v2905_v59 = vadd.f32 %v6502_v44, %v7851_v24 }
 0x7c7   : > { %v2864_v40 = vpop.f32.mrf.mxu0 }
 0x7c8   : > { %v2937_v39 = vpack.c.bf16 %v8067_v5, %v8065_v63  ;;  %v2903_v54 = vadd.f32 %v2864_v40, %v7847_v27  ;;  %v8085_v52 = vadd.f32 %v5847_v32, %v2905_v59 }
 0x7c9   : > { %v6503_v4 = vpop.f32.mrf.mxu0 }
 0x7ca   : > { %v2906_v7 = vadd.f32 %v6503_v4, %v7845_v60  ;;  %6528 = vmatprep.mubr.bf16.mxu1 %v2937_v39  ;;  %v8081_v19 = vadd.f32 %v5847_v32, %v2903_v54 }
 0x7cb   : > { %v2867_v25 = vpop.f32.mrf.mxu0  ;;  %6529 = vmatmul.mubr.bf16.gmra.mxu1 %v2938_v57 }
 0x7cc   : > { %v2904_v62 = vadd.f32 %v2867_v25, %v7849_v13  ;;  %v8079_v1 = vadd.f32 %v5847_v32, %v2906_v7 }
 0x7cd   : > { %v6506_v47 = vpop.f32.mrf.mxu0 }
 0x7ce   : > { %v8083_v45 = vadd.f32 %v5847_v32, %v2904_v62  ;;  %v2940_v27 = vpack.c.bf16 %v8079_v1, %v8085_v52  ;;  %v2909_v35 = vadd.f32 %v6506_v47, %v7867_v23  ;;  %v6748_v23 = vld [vmem:[%s9886_s6 + $0xa8] sm:$0xff]  }
 0x7cf   : > { %v2880_v16 = vpop.f32.mrf.mxu0 }
 0x7d0   : > { %v2939_v60 = vpack.c.bf16 %v8083_v45, %v8081_v19  ;;  %v2907_v13 = vadd.f32 %v2880_v16, %v7863_v34  ;;  %v8101_v17 = vadd.f32 %v5847_v32, %v2909_v35  ;;  %v6746_v34 = vld [vmem:[%s9886_s6 + $0xb8] sm:$0xff]  }
 0x7d1   : > { %v6507_v24 = vpop.f32.mrf.mxu0  ;;  %6540 = vmatprep.subr.bf16.mxu0 %v6746_v34 }
 0x7d2   : > { %6532 = vmatprep.mubr.bf16.mxu1 %v2939_v60  ;;  %v2910_v61 = vadd.f32 %v6507_v24, %v7861_v2  ;;  %v8097_v20 = vadd.f32 %v5847_v32, %v2907_v13  ;;  %6541 = vmatpush3.bf16.msra.mxu0 %v6746_v34 }
 0x7d3   : > { %6533 = vmatmul.mubr.bf16.gmra.mxu1 %v2940_v27  ;;  %v2883_v26 = vpop.f32.mrf.mxu0 }
 0x7d4   : > { %v2908_v3 = vadd.f32 %v2883_v26, %v7865_v14  ;;  %v8095_v51 = vadd.f32 %v5847_v32, %v2910_v61  ;;  %v6747_v14 = vld [vmem:[%s9886_s6 + $0xb0] sm:$0xff]  }
 0x7d5   : > { %6542 = vmatprep.subr.bf16.mxu0 %v6747_v14 }
 0x7d6   : > { %v8099_v37 = vadd.f32 %v5847_v32, %v2908_v3  ;;  %v2942_v2 = vpack.c.bf16 %v8095_v51, %v8101_v17  ;;  %6543 = vmatpush3.bf16.msra.mxu0 %v6747_v14 }
 0x7d7   : > { %6544 = vmatprep.subr.bf16.mxu0 %v6748_v23 }
 0x7d8   : > { %v2941_v48 = vpack.c.bf16 %v8099_v37, %v8097_v20 }
 0x7da   : > { %6536 = vmatprep.mubr.bf16.mxu1 %v2941_v48  ;;  %6545 = vmatpush3.bf16.msra.mxu0 %v6748_v23 }
 0x7db   : > { %6537 = vmatmul.mubr.bf16.gmra.mxu1 %v2942_v2  ;;  %6546 = vmatprep.subr.bf16.mxu0 %v6749_v38 }
 0x7de   : > { %6547 = vmatpush3.bf16.msra.mxu0 %v6749_v38 }
 0x7df   : > { %6548 = vmatprep.subr.bf16.mxu0 %v6750_v58 }
 0x7e2   : > { %6549 = vmatpush3.bf16.msra.mxu0 %v6750_v58 }
 0x7e3   : > { %6550 = vmatprep.subr.bf16.mxu0 %v6751_v10 }
 0x7e6   : > { %6551 = vmatpush3.bf16.msra.mxu0 %v6751_v10 }
 0x7e7   : > { %6552 = vmatprep.subr.bf16.mxu0 %v6752_v41 }
 0x7ea   : > { %6553 = vmatpush3.bf16.msra.mxu0 %v6752_v41 }
 0x7eb   : > { %6554 = vmatprep.subr.bf16.mxu0 %v6753_v46 }
 0x7ee   : > { %6555 = vmatpush3.bf16.msra.mxu0 %v6753_v46 }
 0x873   : > { %v6526_v32 = vpop.f32.mrf.mxu1 }
 0x874   : > { %v8152_v43 = vadd.f32 %v6526_v32, %v8149_v29 }
 0x875   : > { %v3050_v28 = vpop.f32.mrf.mxu1 }
 0x876   : > { %v3115_v12 = vmul.f32 %v8152_v43, %v8152_v43  ;;  %v8157_v11 = vadd.f32 %v8149_v29, %v3050_v28 }
 0x877   : > { %v6527_v22 = vpop.f32.mrf.mxu1 }
 0x878   : > { %v3131_v56 = vmul.f32 %v3115_v12, %v8152_v43  ;;  %v3113_v49 = vmul.f32 %v8157_v11, %v8157_v11  ;;  %v3062_v55 = vadd.f32 %v6527_v22, %v8149_v29 }
 0x879   : > { %v3053_v0 = vpop.f32.mrf.mxu1 }
 0x87a   : > { %v3147_v6 = vmul.f32 0.044715, %v3131_v56  ;;  %v3129_v30 = vmul.f32 %v3113_v49, %v8157_v11  ;;  %v3116_v44 = vmul.f32 %v3062_v55, %v3062_v55  ;;  %v3054_v40 = vadd.f32 %v8149_v29, %v3053_v0 }
 0x87c   : > { %v3163_v39 = vadd.f32 %v3147_v6, %v8152_v43  ;;  %v3145_v4 = vmul.f32 0.044715, %v3129_v30  ;;  %v3132_v57 = vmul.f32 %v3116_v44, %v3062_v55  ;;  %v3114_v54 = vmul.f32 %v3054_v40, %v3054_v40 }
 0x87e   : > { %v3179_v7 = vmul.f32 0.7978846, %v3163_v39  ;;  %v3161_v59 = vadd.f32 %v3145_v4, %v8157_v11  ;;  %v3148_v25 = vmul.f32 0.044715, %v3132_v57  ;;  %v3130_v62 = vmul.f32 %v3114_v54, %v3054_v40 }
 0x880   : > { %6842 = vtanh.f32 %v3179_v7  ;;  %v3177_v47 = vmul.f32 0.7978846, %v3161_v59  ;;  %v3164_v16 = vadd.f32 %v3148_v25, %v3062_v55  ;;  %v3146_v60 = vmul.f32 0.044715, %v3130_v62 }
 0x882   : > { %6844 = vtanh.f32 %v3177_v47  ;;  %v3180_v27 = vmul.f32 0.7978846, %v3164_v16  ;;  %v3162_v24 = vadd.f32 %v3146_v60, %v3054_v40 }
 0x884   : > { %6846 = vtanh.f32 %v3180_v27  ;;  %v3178_v13 = vmul.f32 0.7978846, %v3162_v24 }
 0x886   : > { %6848 = vtanh.f32 %v3178_v13 }
 0x88b   : > { %v6530_v35 = vpop.f32.mrf.mxu1 }
 0x88c   : > { %v8168_v3 = vadd.f32 %v6530_v35, %v8149_v29 }
 0x88d   : > { %v6843_v61 = vpop.eup %6842  ;;  %v3066_v2 = vpop.f32.mrf.mxu1 }
 0x88e   : > { %v3211_v48 = vadd.f32 1.0, %v6843_v61  ;;  %v3119_v23 = vmul.f32 %v8168_v3, %v8168_v3  ;;  %v8173_v38 = vadd.f32 %v8149_v29, %v3066_v2 }
 0x88f   : > { %v6845_v26 = vpop.eup %6844  ;;  %v6531_v10 = vpop.f32.mrf.mxu1 }
 0x890   : > { %v3209_v34 = vadd.f32 1.0, %v6845_v26  ;;  %v3135_v46 = vmul.f32 %v3119_v23, %v8168_v3  ;;  %v3117_v33 = vmul.f32 %v8173_v38, %v8173_v38  ;;  %v8179_v31 = vadd.f32 %v6531_v10, %v8149_v29 }
 0x891   : > { %v6847_v14 = vpop.eup %6846  ;;  %v3227_v8 = vmul.f32 0.5, %v3211_v48  ;;  %v3069_v15 = vpop.f32.mrf.mxu1 }
 0x892   : > { %v3212_v58 = vadd.f32 1.0, %v6847_v14  ;;  %v3225_v28 = vmul.f32 0.5, %v3209_v34  ;;  %v3151_v12 = vmul.f32 0.044715, %v3135_v46  ;;  %v3133_v22 = vmul.f32 %v3117_v33, %v8173_v38 }
 0x893   : > { %v6849_v41 = vpop.eup %6848  ;;  %v3120_v56 = vmul.f32 %v8179_v31, %v8179_v31  ;;  %v8185_v49 = vadd.f32 %v8149_v29, %v3069_v15  ;;  %v6534_v6 = vpop.f32.mrf.mxu1  ;;  %v3243_v54 = vmul.f32 %v3227_v8, %v8152_v43 }
 0x894   : > { %v3228_v21 = vmul.f32 0.5, %v3212_v58  ;;  %v3210_v32 = vadd.f32 1.0, %v6849_v41  ;;  %v3167_v44 = vadd.f32 %v3151_v12, %v8168_v3  ;;  %v3149_v39 = vmul.f32 0.044715, %v3133_v22 }
 0x895   : > { %v3136_v4 = vmul.f32 %v3120_v56, %v8179_v31  ;;  %v3118_v57 = vmul.f32 %v8185_v49, %v8185_v49  ;;  %v8193_v7 = vadd.f32 %v6534_v6, %v8149_v29  ;;  %v3082_v59 = vpop.f32.mrf.mxu1  ;;  %v3241_v25 = vmul.f32 %v3225_v28, %v8157_v11 }
 0x896   : > { %v3244_v0 = vmul.f32 %v3228_v21, %v3062_v55  ;;  %v3226_v30 = vmul.f32 0.5, %v3210_v32  ;;  %v3183_v55 = vmul.f32 0.7978846, %v3167_v44  ;;  %v3165_v47 = vadd.f32 %v3149_v39, %v8173_v38 }
 0x897   : > { %v3152_v16 = vmul.f32 0.044715, %v3136_v4  ;;  %v3134_v60 = vmul.f32 %v3118_v57, %v8185_v49  ;;  %v3123_v27 = vmul.f32 %v8193_v7, %v8193_v7  ;;  %v8201_v24 = vadd.f32 %v8149_v29, %v3082_v59  ;;  %v6535_v43 = vpop.f32.mrf.mxu1 }
 0x898   : > { %v3242_v62 = vmul.f32 %v3226_v30, %v3054_v40  ;;  %v3258_v61 = vpack.c.bf16 %v3244_v0, %v3243_v54  ;;  %v3181_v35 = vmul.f32 0.7978846, %v3165_v47  ;;  %6850 = vtanh.f32 %v3183_v55 }
 0x899   : > { %v3168_v26 = vadd.f32 %v3152_v16, %v8179_v31  ;;  %v3150_v11 = vmul.f32 0.044715, %v3134_v60  ;;  %v3139_v40 = vmul.f32 %v3123_v27, %v8193_v7  ;;  %v3121_v48 = vmul.f32 %v8201_v24, %v8201_v24  ;;  %v3085_v34 = vpop.f32.mrf.mxu1 }
 0x89a   : > { %v3257_v13 = vpack.c.bf16 %v3242_v62, %v3241_v25  ;;  %v8208_v2 = vadd.f32 %v6535_v43, %v8149_v29  ;;  %6852 = vtanh.f32 %v3181_v35  ;;  %v8212_v58 = vadd.f32 %v8149_v29, %v3085_v34 }
 0x89b   : > { %v3184_v14 = vmul.f32 0.7978846, %v3168_v26  ;;  %v3166_v23 = vadd.f32 %v3150_v11, %v8185_v49  ;;  %v3155_v10 = vmul.f32 0.044715, %v3139_v40  ;;  %v3137_v41 = vmul.f32 %v3121_v48, %v8201_v24  ;;  %v6538_v21 = vpop.f32.mrf.mxu1 }
 0x89c   : > { %6556 = vmatprep.mubr.bf16.mxu0 %v3257_v13  ;;  %v3124_v46 = vmul.f32 %v8208_v2, %v8208_v2  ;;  %v3122_v8 = vmul.f32 %v8212_v58, %v8212_v58  ;;  %v8222_v12 = vadd.f32 %v6538_v21, %v8149_v29 }
 0x89d   : > { %6557 = vmatmul.mubr.bf16.vlgmr.msra.gmra.mxu0 %v3258_v61  ;;  %6854 = vtanh.f32 %v3184_v14  ;;  %v3182_v33 = vmul.f32 0.7978846, %v3166_v23  ;;  %v3171_v15 = vadd.f32 %v3155_v10, %v8193_v7  ;;  %v3153_v32 = vmul.f32 0.044715, %v3137_v41  ;;  %v3098_v56 = vpop.f32.mrf.mxu1 }
 0x89e   : > { %v3140_v28 = vmul.f32 %v3124_v46, %v8208_v2  ;;  %v3138_v22 = vmul.f32 %v3122_v8, %v8212_v58  ;;  %v3127_v44 = vmul.f32 %v8222_v12, %v8222_v12  ;;  %v8229_v4 = vadd.f32 %v8149_v29, %v3098_v56 }
 0x89f   : > { %6856 = vtanh.f32 %v3182_v33  ;;  %v3187_v0 = vmul.f32 0.7978846, %v3171_v15  ;;  %v3169_v6 = vadd.f32 %v3153_v32, %v8201_v24  ;;  %v6539_v57 = vpop.f32.mrf.mxu1 }
 0x8a0   : > { %v3156_v30 = vmul.f32 0.044715, %v3140_v28  ;;  %v3154_v39 = vmul.f32 0.044715, %v3138_v22  ;;  %v3143_v25 = vmul.f32 %v3127_v44, %v8222_v12  ;;  %v3125_v55 = vmul.f32 %v8229_v4, %v8229_v4 }
 0x8a1   : > { %6858 = vtanh.f32 %v3187_v0  ;;  %v3185_v54 = vmul.f32 0.7978846, %v3169_v6  ;;  %v8237_v47 = vadd.f32 %v6539_v57, %v8149_v29  ;;  %v3101_v16 = vpop.f32.mrf.mxu1 }
 0x8a2   : > { %v3172_v59 = vadd.f32 %v3156_v30, %v8208_v2  ;;  %v3170_v62 = vadd.f32 %v3154_v39, %v8212_v58  ;;  %v3159_v27 = vmul.f32 0.044715, %v3143_v25  ;;  %v8240_v43 = vadd.f32 %v8149_v29, %v3101_v16 }
 0x8a3   : > { %6860 = vtanh.f32 %v3185_v54  ;;  %v3141_v61 = vmul.f32 %v3125_v55, %v8229_v4  ;;  %v3128_v35 = vmul.f32 %v8237_v47, %v8237_v47 }
 0x8a4   : > { %v3188_v60 = vmul.f32 0.7978846, %v3172_v59  ;;  %v3186_v13 = vmul.f32 0.7978846, %v3170_v62  ;;  %v3175_v26 = vadd.f32 %v3159_v27, %v8222_v12  ;;  %v3126_v11 = vmul.f32 %v8240_v43, %v8240_v43 }
 0x8a5   : > { %v6851_v40 = vpop.eup %6850  ;;  %v3157_v48 = vmul.f32 0.044715, %v3141_v61  ;;  %v3144_v34 = vmul.f32 %v3128_v35, %v8237_v47 }
 0x8a6   : > { %6862 = vtanh.f32 %v3188_v60  ;;  %v3191_v29 = vmul.f32 0.7978846, %v3175_v26  ;;  %v3142_v23 = vmul.f32 %v3126_v11, %v8240_v43  ;;  %v3215_v21 = vadd.f32 1.0, %v6851_v40 }
 0x8a7   : > { %6864 = vtanh.f32 %v3186_v13  ;;  %v6853_v14 = vpop.eup %6852  ;;  %v3173_v10 = vadd.f32 %v3157_v48, %v8229_v4  ;;  %v3160_v41 = vmul.f32 0.044715, %v3144_v34 }
 0x8a8   : > { %v3213_v46 = vadd.f32 1.0, %v6853_v14  ;;  %v3158_v8 = vmul.f32 0.044715, %v3142_v23  ;;  %6866 = vtanh.f32 %v3191_v29  ;;  %v3231_v39 = vmul.f32 0.5, %v3215_v21 }
 0x8a9   : > { %v3189_v15 = vmul.f32 0.7978846, %v3173_v10  ;;  %v3176_v32 = vadd.f32 %v3160_v41, %v8237_v47 }
 0x8aa   : > { %v6855_v33 = vpop.eup %6854  ;;  %v3174_v56 = vadd.f32 %v3158_v8, %v8240_v43  ;;  %v3229_v30 = vmul.f32 0.5, %v3213_v46  ;;  %v3247_v60 = vmul.f32 %v3231_v39, %v8168_v3 }
 0x8ab   : > { %v3216_v28 = vadd.f32 1.0, %v6855_v33  ;;  %6868 = vtanh.f32 %v3189_v15  ;;  %v3192_v0 = vmul.f32 0.7978846, %v3176_v32 }
 0x8ac   : > { %v6857_v22 = vpop.eup %6856  ;;  %v3190_v44 = vmul.f32 0.7978846, %v3174_v56  ;;  %v3245_v55 = vmul.f32 %v3229_v30, %v8173_v38 }
 0x8ad   : > { %v3214_v6 = vadd.f32 1.0, %v6857_v22  ;;  %v3232_v57 = vmul.f32 0.5, %v3216_v28  ;;  %6870 = vtanh.f32 %v3192_v0 }
 0x8ae   : > { %v6859_v54 = vpop.eup %6858  ;;  %6872 = vtanh.f32 %v3190_v44 }
 0x8af   : > { %v3230_v59 = vmul.f32 0.5, %v3214_v6  ;;  %v3248_v25 = vmul.f32 %v3232_v57, %v8179_v31  ;;  %v3219_v13 = vadd.f32 1.0, %v6859_v54  ;;  %v6759_v57 = vld [vmem:[%s9884_s4 + $0xd0] sm:$0xff]  }
 0x8b0   : > { %v6861_v62 = vpop.eup %6860  ;;  %6582 = vmatprep.subr.bf16.mxu1 %v6759_v57 }
 0x8b1   : > { %v3246_v16 = vmul.f32 %v3230_v59, %v8185_v49  ;;  %v3217_v27 = vadd.f32 1.0, %v6861_v62  ;;  %v3260_v11 = vpack.c.bf16 %v3248_v25, %v3247_v60  ;;  %v3235_v14 = vmul.f32 0.5, %v3219_v13  ;;  %6583 = vmatpush3.bf16.msra.mxu1 %v6759_v57  ;;  %v6766_v57 = vld [vmem:[%s9886_s6 + $0xd8] sm:$0xff]  }
 0x8b3   : > { %v6863_v61 = vpop.eup %6862  ;;  %v3259_v35 = vpack.c.bf16 %v3246_v16, %v3245_v55  ;;  %v3233_v34 = vmul.f32 0.5, %v3217_v27  ;;  %v3251_v41 = vmul.f32 %v3235_v14, %v8193_v7  ;;  %v5899_v16 = vld [vmem:[%s9887_s7 + $0x2] ss:$0 sm:$0xff] }
 0x8b4   : > { %v6865_v26 = vpop.eup %6864  ;;  %v3220_v40 = vadd.f32 1.0, %v6863_v61 }
 0x8b5   : > { %6560 = vmatprep.mubr.bf16.mxu0 %v3259_v35  ;;  %v3218_v48 = vadd.f32 1.0, %v6865_v26  ;;  %v6867_v23 = vpop.eup %6866  ;;  %v3249_v49 = vmul.f32 %v3233_v34, %v8201_v24 }
 0x8b6   : > { %6561 = vmatmul.mubr.bf16.gmra.mxu0 %v3260_v11  ;;  %v3236_v31 = vmul.f32 0.5, %v3220_v40  ;;  %v3223_v8 = vadd.f32 1.0, %v6867_v23 }
 0x8b7   : > { %v3234_v29 = vmul.f32 0.5, %v3218_v48 }
 0x8b8   : > { %v3252_v38 = vmul.f32 %v3236_v31, %v8208_v2  ;;  %v6869_v10 = vpop.eup %6868  ;;  %v3239_v0 = vmul.f32 0.5, %v3223_v8 }
 0x8b9   : > { %v3250_v3 = vmul.f32 %v3234_v29, %v8212_v58  ;;  %v3221_v33 = vadd.f32 1.0, %v6869_v10 }
 0x8ba   : > { %v6871_v21 = vpop.eup %6870  ;;  %v3262_v15 = vpack.c.bf16 %v3252_v38, %v3251_v41  ;;  %v3255_v30 = vmul.f32 %v3239_v0, %v8222_v12  ;;  %v6761_v12 = vld [vmem:[%s9884_s4 + $0xc0] sm:$0xff]  }
 0x8bb   : > { %v3261_v46 = vpack.c.bf16 %v3250_v3, %v3249_v49  ;;  %v6873_v32 = vpop.eup %6872  ;;  %v3224_v28 = vadd.f32 1.0, %v6871_v21  ;;  %v3237_v56 = vmul.f32 0.5, %v3221_v33 }
 0x8bc   : > { %v3222_v22 = vadd.f32 1.0, %v6873_v32 }
 0x8bd   : > { %6564 = vmatprep.mubr.bf16.mxu0 %v3261_v46  ;;  %v3240_v2 = vmul.f32 0.5, %v3224_v28  ;;  %v3253_v58 = vmul.f32 %v3237_v56, %v8229_v4 }
 0x8be   : > { %6565 = vmatmul.mubr.bf16.gmra.mxu0 %v3262_v15  ;;  %v3238_v6 = vmul.f32 0.5, %v3222_v22 }
 0x8bf   : > { %v3256_v24 = vmul.f32 %v3240_v2, %v8237_v47  ;;  %v6760_v47 = vld [vmem:[%s9884_s4 + $0xc8] sm:$0xff]  }
 0x8c0   : > { %v3254_v7 = vmul.f32 %v3238_v6, %v8240_v43  ;;  %6584 = vmatprep.subr.bf16.mxu1 %v6760_v47 }
 0x8c1   : > { %v3264_v39 = vpack.c.bf16 %v3256_v24, %v3255_v30  ;;  %6585 = vmatpush3.bf16.msra.mxu1 %v6760_v47  ;;  %v6767_v47 = vld [vmem:[%s9886_s6 + $0xd0] sm:$0xff]  }
 0x8c2   : > { %v3263_v44 = vpack.c.bf16 %v3254_v7, %v3253_v58  ;;  %6586 = vmatprep.subr.bf16.mxu1 %v6761_v12 }
 0x8c4   : > { %6568 = vmatprep.mubr.bf16.mxu0 %v3263_v44 }
 0x8c5   : > { %6587 = vmatpush3.bf16.msra.mxu1 %v6761_v12  ;;  %v6768_v12 = vld [vmem:[%s9886_s6 + $0xc8] sm:$0xff]  }
 0x8c6   : > { %6569 = vmatmul.mubr.bf16.gmra.mxu0 %v3264_v39  ;;  %v6765_v39 = vld [vmem:[%s9886_s6 + $0xe0] sm:$0xff]  }
 0x95d   : > { %v6558_v4 = vpop.f32.mrf.mxu0 }
 0x95e   : > { %v3429_v62 = vadd.f32 %v6558_v4, %v8053_v36  ;;  %v6769_v4 = vld [vmem:[%s9886_s6 + $0xc0] sm:$0xff]  }
 0x95f   : > { %v3364_v43 = vpop.f32.mrf.mxu0 }
 0x960   : > { %v3427_v59 = vadd.f32 %v3364_v43, %v8049_v53  ;;  %v8287_v35 = vadd.f32 %v5899_v16, %v3429_v62  ;;  %v6770_v43 = vld [vmem:[%s9888_s8 + $0x38] sm:$0xff]  }
 0x961   : > { %v6559_v54 = vpop.f32.mrf.mxu0  ;;  %6636 = vmatprep.subr.bf16.mxu1 %v6770_v43  ;;  %v6774_v62 = vld [vmem:[%s9888_s8 + $0x18] sm:$0xff]  }
 0x962   : > { %v3430_v25 = vadd.f32 %v6559_v54, %v8047_v42  ;;  %v8283_v13 = vadd.f32 %v5899_v16, %v3427_v59  ;;  %v6771_v54 = vld [vmem:[%s9888_s8 + $0x30] sm:$0xff]   ;;  %v6772_v59 = vld [vmem:[%s9888_s8 + $0x28] sm:$0xff]  }
 0x963   : > { %v3367_v55 = vpop.f32.mrf.mxu0 }
 0x964   : > { %v3428_v60 = vadd.f32 %v3367_v55, %v8051_v9  ;;  %v8281_v27 = vadd.f32 %v5899_v16, %v3430_v25  ;;  %v6773_v25 = vld [vmem:[%s9888_s8 + $0x20] sm:$0xff]  }
 0x965   : > { %v8383_v55 = vld [vmem:[%s9885_s5 + $0x3] ss:$0 sm:$0xff] }
 0x966   : > { %v8285_v61 = vadd.f32 %v5899_v16, %v3428_v60  ;;  %v3468_v53 = vpack.c.bf16 %v8281_v27, %v8287_v35 }
 0x968   : > { %v3467_v42 = vpack.c.bf16 %v8285_v61, %v8283_v13 }
 0x96a   : > { %6588 = vmatprep.mubr.bf16.mxu1 %v3467_v42 }
 0x96b   : > { %6589 = vmatmul.mubr.bf16.vlgmr.msra.gmra.mxu1 %v3468_v53 }
 0x96c   : > { %6637 = vmatpush3.bf16.msra.mxu1 %v6770_v43 }
 0x96d   : > { %6638 = vmatprep.subr.bf16.mxu1 %v6771_v54 }
 0x970   : > { %6639 = vmatpush3.bf16.msra.mxu1 %v6771_v54 }
 0x971   : > { %6640 = vmatprep.subr.bf16.mxu1 %v6772_v59 }
 0x974   : > { %6641 = vmatpush3.bf16.msra.mxu1 %v6772_v59 }
 0x975   : > { %6642 = vmatprep.subr.bf16.mxu1 %v6773_v25 }
 0x976   : > { %v6562_v36 = vpop.f32.mrf.mxu0 }
 0x977   : > { %v3433_v48 = vadd.f32 %v6562_v36, %v8069_v18 }
 0x978   : > { %v3380_v26 = vpop.f32.mrf.mxu0  ;;  %6643 = vmatpush3.bf16.msra.mxu1 %v6773_v25 }
 0x979   : > { %v3431_v9 = vadd.f32 %v3380_v26, %v8065_v63  ;;  %v8303_v49 = vadd.f32 %v5899_v16, %v3433_v48  ;;  %6644 = vmatprep.subr.bf16.mxu1 %v6774_v62 }
 0x97a   : > { %v6563_v11 = vpop.f32.mrf.mxu0 }
 0x97b   : > { %v3434_v40 = vadd.f32 %v6563_v11, %v8063_v50  ;;  %v8299_v23 = vadd.f32 %v5899_v16, %v3431_v9 }
 0x97c   : > { %v3383_v34 = vpop.f32.mrf.mxu0  ;;  %6645 = vmatpush3.bf16.msra.mxu1 %v6774_v62 }
 0x97d   : > { %v3432_v14 = vadd.f32 %v3383_v34, %v8067_v5  ;;  %v8297_v31 = vadd.f32 %v5899_v16, %v3434_v40 }
 0x97e   : > { %v6566_v29 = vpop.f32.mrf.mxu0 }
 0x97f   : > { %v8301_v38 = vadd.f32 %v5899_v16, %v3432_v14  ;;  %v3470_v50 = vpack.c.bf16 %v8297_v31, %v8303_v49  ;;  %v3437_v41 = vadd.f32 %v6566_v29, %v8085_v52 }
 0x980   : > { %v3396_v3 = vpop.f32.mrf.mxu0 }
 0x981   : > { %v3469_v63 = vpack.c.bf16 %v8301_v38, %v8299_v23  ;;  %v3435_v18 = vadd.f32 %v3396_v3, %v8081_v19  ;;  %v8319_v28 = vadd.f32 %v5899_v16, %v3437_v41 }
 0x982   : > { %v6567_v10 = vpop.f32.mrf.mxu0 }
 0x983   : > { %v3438_v5 = vadd.f32 %v6567_v10, %v8079_v1  ;;  %6592 = vmatprep.mubr.bf16.mxu1 %v3469_v63  ;;  %v8315_v21 = vadd.f32 %v5899_v16, %v3435_v18 }
 0x984   : > { %v3399_v46 = vpop.f32.mrf.mxu0  ;;  %6593 = vmatmul.mubr.bf16.gmra.mxu1 %v3470_v50 }
 0x985   : > { %v3436_v33 = vadd.f32 %v3399_v46, %v8083_v45  ;;  %v8313_v8 = vadd.f32 %v5899_v16, %v3438_v5 }
 0x986   : > { %v6570_v32 = vpop.f32.mrf.mxu0 }
 0x987   : > { %v8317_v15 = vadd.f32 %v5899_v16, %v3436_v33  ;;  %v3472_v19 = vpack.c.bf16 %v8313_v8, %v8319_v28  ;;  %v3441_v0 = vadd.f32 %v6570_v32, %v8101_v17  ;;  %v6764_v17 = vld [vmem:[%s9886_s6 + $0xe8] sm:$0xff]  }
 0x988   : > { %v3412_v22 = vpop.f32.mrf.mxu0 }
 0x989   : > { %v3471_v1 = vpack.c.bf16 %v8317_v15, %v8315_v21  ;;  %v3439_v45 = vadd.f32 %v3412_v22, %v8097_v20  ;;  %v8335_v30 = vadd.f32 %v5899_v16, %v3441_v0  ;;  %v6762_v20 = vld [vmem:[%s9886_s6 + $0xf8] sm:$0xff]  }
 0x98a   : > { %v6571_v52 = vpop.f32.mrf.mxu0  ;;  %6604 = vmatprep.subr.bf16.mxu0 %v6762_v20 }
 0x98b   : > { %6596 = vmatprep.mubr.bf16.mxu1 %v3471_v1  ;;  %v3442_v56 = vadd.f32 %v6571_v52, %v8095_v51  ;;  %v8331_v58 = vadd.f32 %v5899_v16, %v3439_v45  ;;  %6605 = vmatpush3.bf16.msra.mxu0 %v6762_v20 }
 0x98c   : > { %6597 = vmatmul.mubr.bf16.gmra.mxu1 %v3472_v19  ;;  %v3415_v2 = vpop.f32.mrf.mxu0 }
 0x98d   : > { %v3440_v6 = vadd.f32 %v3415_v2, %v8099_v37  ;;  %v8329_v24 = vadd.f32 %v5899_v16, %v3442_v56  ;;  %v6763_v37 = vld [vmem:[%s9886_s6 + $0xf0] sm:$0xff]  }
 0x98e   : > { %6606 = vmatprep.subr.bf16.mxu0 %v6763_v37 }
 0x98f   : > { %v8333_v7 = vadd.f32 %v5899_v16, %v3440_v6  ;;  %v3474_v51 = vpack.c.bf16 %v8329_v24, %v8335_v30  ;;  %6607 = vmatpush3.bf16.msra.mxu0 %v6763_v37 }
 0x990   : > { %6608 = vmatprep.subr.bf16.mxu0 %v6764_v17 }
 0x991   : > { %v3473_v44 = vpack.c.bf16 %v8333_v7, %v8331_v58 }
 0x993   : > { %6600 = vmatprep.mubr.bf16.mxu1 %v3473_v44  ;;  %6609 = vmatpush3.bf16.msra.mxu0 %v6764_v17 }
 0x994   : > { %6601 = vmatmul.mubr.bf16.gmra.mxu1 %v3474_v51  ;;  %6610 = vmatprep.subr.bf16.mxu0 %v6765_v39 }
 0x997   : > { %6611 = vmatpush3.bf16.msra.mxu0 %v6765_v39 }
 0x998   : > { %6612 = vmatprep.subr.bf16.mxu0 %v6766_v57 }
 0x99b   : > { %6613 = vmatpush3.bf16.msra.mxu0 %v6766_v57 }
 0x99c   : > { %6614 = vmatprep.subr.bf16.mxu0 %v6767_v47 }
 0x99f   : > { %6615 = vmatpush3.bf16.msra.mxu0 %v6767_v47 }
 0x9a0   : > { %6616 = vmatprep.subr.bf16.mxu0 %v6768_v12 }
 0x9a3   : > { %6617 = vmatpush3.bf16.msra.mxu0 %v6768_v12 }
 0x9a4   : > { %6618 = vmatprep.subr.bf16.mxu0 %v6769_v4 }
 0x9a7   : > { %6619 = vmatpush3.bf16.msra.mxu0 %v6769_v4 }
 0xa2b   : > { %v6590_v16 = vpop.f32.mrf.mxu1 }
 0xa2c   : > { %v8386_v60 = vadd.f32 %v6590_v16, %v8383_v55 }
 0xa2d   : > { %v3582_v42 = vpop.f32.mrf.mxu1 }
 0xa2e   : > { %v3647_v53 = vmul.f32 %v8386_v60, %v8386_v60  ;;  %v8391_v36 = vadd.f32 %v8383_v55, %v3582_v42 }
 0xa2f   : > { %v6591_v26 = vpop.f32.mrf.mxu1 }
 0xa30   : > { %v3663_v11 = vmul.f32 %v3647_v53, %v8386_v60  ;;  %v3645_v9 = vmul.f32 %v8391_v36, %v8391_v36  ;;  %v3594_v40 = vadd.f32 %v6591_v26, %v8383_v55 }
 0xa31   : > { %v3585_v48 = vpop.f32.mrf.mxu1 }
 0xa32   : > { %v3679_v34 = vmul.f32 0.044715, %v3663_v11  ;;  %v3661_v14 = vmul.f32 %v3645_v9, %v8391_v36  ;;  %v3648_v29 = vmul.f32 %v3594_v40, %v3594_v40  ;;  %v3586_v3 = vadd.f32 %v8383_v55, %v3585_v48 }
 0xa34   : > { %v3695_v63 = vadd.f32 %v3679_v34, %v8386_v60  ;;  %v3677_v10 = vmul.f32 0.044715, %v3661_v14  ;;  %v3664_v50 = vmul.f32 %v3648_v29, %v3594_v40  ;;  %v3646_v18 = vmul.f32 %v3586_v3, %v3586_v3 }
 0xa36   : > { %v3711_v5 = vmul.f32 0.7978846, %v3695_v63  ;;  %v3693_v41 = vadd.f32 %v3677_v10, %v8391_v36  ;;  %v3680_v46 = vmul.f32 0.044715, %v3664_v50  ;;  %v3662_v33 = vmul.f32 %v3646_v18, %v3586_v3 }
 0xa38   : > { %6874 = vtanh.f32 %v3711_v5  ;;  %v3709_v32 = vmul.f32 0.7978846, %v3693_v41  ;;  %v3696_v22 = vadd.f32 %v3680_v46, %v3594_v40  ;;  %v3678_v1 = vmul.f32 0.044715, %v3662_v33 }
 0xa3a   : > { %6876 = vtanh.f32 %v3709_v32  ;;  %v3712_v19 = vmul.f32 0.7978846, %v3696_v22  ;;  %v3694_v52 = vadd.f32 %v3678_v1, %v3586_v3 }
 0xa3c   : > { %6878 = vtanh.f32 %v3712_v19  ;;  %v3710_v45 = vmul.f32 0.7978846, %v3694_v52 }
 0xa3e   : > { %6880 = vtanh.f32 %v3710_v45 }
 0xa44   : > { %v6594_v0 = vpop.f32.mrf.mxu1 }
 0xa45   : > { %v6875_v56 = vpop.eup %6874  ;;  %v8402_v6 = vadd.f32 %v6594_v0, %v8383_v55 }
 0xa46   : > { %v3743_v44 = vadd.f32 1.0, %v6875_v56  ;;  %v3598_v51 = vpop.f32.mrf.mxu1 }
 0xa47   : > { %v6877_v2 = vpop.eup %6876  ;;  %v3651_v17 = vmul.f32 %v8402_v6, %v8402_v6  ;;  %v8407_v39 = vadd.f32 %v8383_v55, %v3598_v51 }
 0xa48   : > { %v3741_v20 = vadd.f32 1.0, %v6877_v2  ;;  %v6595_v47 = vpop.f32.mrf.mxu1  ;;  %v3759_v59 = vmul.f32 0.5, %v3743_v44 }
 0xa49   : > { %v6879_v37 = vpop.eup %6878  ;;  %v3667_v4 = vmul.f32 %v3651_v17, %v8402_v6  ;;  %v3649_v43 = vmul.f32 %v8407_v39, %v8407_v39  ;;  %v8413_v54 = vadd.f32 %v6595_v47, %v8383_v55 }
 0xa4a   : > { %v3744_v57 = vadd.f32 1.0, %v6879_v37  ;;  %v3601_v62 = vpop.f32.mrf.mxu1  ;;  %v3757_v42 = vmul.f32 0.5, %v3741_v20  ;;  %v3775_v18 = vmul.f32 %v3759_v59, %v8386_v60 }
 0xa4b   : > { %v6881_v12 = vpop.eup %6880  ;;  %v3683_v53 = vmul.f32 0.044715, %v3667_v4  ;;  %v3665_v26 = vmul.f32 %v3649_v43, %v8407_v39  ;;  %v3652_v11 = vmul.f32 %v8413_v54, %v8413_v54  ;;  %v8419_v9 = vadd.f32 %v8383_v55, %v3601_v62 }
 0xa4c   : > { %v3760_v25 = vmul.f32 0.5, %v3744_v57  ;;  %v3742_v16 = vadd.f32 1.0, %v6881_v12  ;;  %v6598_v34 = vpop.f32.mrf.mxu1  ;;  %v3773_v46 = vmul.f32 %v3757_v42, %v8391_v36 }
 0xa4d   : > { %v3699_v29 = vadd.f32 %v3683_v53, %v8402_v6  ;;  %v3681_v63 = vmul.f32 0.044715, %v3665_v26  ;;  %v3668_v10 = vmul.f32 %v3652_v11, %v8413_v54  ;;  %v3650_v50 = vmul.f32 %v8419_v9, %v8419_v9 }
 0xa4e   : > { %v3776_v48 = vmul.f32 %v3760_v25, %v3594_v40  ;;  %v3758_v14 = vmul.f32 0.5, %v3742_v16  ;;  %v8427_v5 = vadd.f32 %v6598_v34, %v8383_v55  ;;  %v3614_v41 = vpop.f32.mrf.mxu1 }
 0xa4f   : > { %v3715_v40 = vmul.f32 0.7978846, %v3699_v29  ;;  %v3697_v32 = vadd.f32 %v3681_v63, %v8407_v39  ;;  %v3684_v22 = vmul.f32 0.044715, %v3668_v10  ;;  %v3666_v1 = vmul.f32 %v3650_v50, %v8419_v9 }
 0xa50   : > { %v3774_v33 = vmul.f32 %v3758_v14, %v3586_v3  ;;  %v3655_v19 = vmul.f32 %v8427_v5, %v8427_v5  ;;  %v8435_v52 = vadd.f32 %v8383_v55, %v3614_v41  ;;  %v6599_v60 = vpop.f32.mrf.mxu1  ;;  %v3790_v56 = vpack.c.bf16 %v3776_v48, %v3775_v18 }
 0xa51   : > { %v3713_v0 = vmul.f32 0.7978846, %v3697_v32  ;;  %v3700_v2 = vadd.f32 %v3684_v22, %v8413_v54  ;;  %v3682_v36 = vmul.f32 0.044715, %v3666_v1  ;;  %6882 = vtanh.f32 %v3715_v40 }
 0xa52   : > { %v3789_v45 = vpack.c.bf16 %v3774_v33, %v3773_v46  ;;  %v3671_v3 = vmul.f32 %v3655_v19, %v8427_v5  ;;  %v3653_v44 = vmul.f32 %v8435_v52, %v8435_v52  ;;  %v8442_v51 = vadd.f32 %v6599_v60, %v8383_v55  ;;  %v3617_v20 = vpop.f32.mrf.mxu1 }
 0xa53   : > { %6884 = vtanh.f32 %v3713_v0  ;;  %v3716_v37 = vmul.f32 0.7978846, %v3700_v2  ;;  %v3698_v17 = vadd.f32 %v3682_v36, %v8419_v9  ;;  %v8446_v57 = vadd.f32 %v8383_v55, %v3617_v20 }
 0xa54   : > { %6620 = vmatprep.mubr.bf16.mxu0 %v3789_v45  ;;  %v3687_v47 = vmul.f32 0.044715, %v3671_v3  ;;  %v3669_v12 = vmul.f32 %v3653_v44, %v8435_v52  ;;  %v3656_v4 = vmul.f32 %v8442_v51, %v8442_v51  ;;  %v6602_v25 = vpop.f32.mrf.mxu1 }
 0xa55   : > { %6621 = vmatmul.mubr.bf16.vlgmr.msra.gmra.mxu0 %v3790_v56  ;;  %6886 = vtanh.f32 %v3716_v37  ;;  %v3714_v43 = vmul.f32 0.7978846, %v3698_v17  ;;  %v3654_v59 = vmul.f32 %v8446_v57, %v8446_v57  ;;  %v8456_v53 = vadd.f32 %v6602_v25, %v8383_v55 }
 0xa56   : > { %v3703_v62 = vadd.f32 %v3687_v47, %v8427_v5  ;;  %v3685_v16 = vmul.f32 0.044715, %v3669_v12  ;;  %v3672_v42 = vmul.f32 %v3656_v4, %v8442_v51  ;;  %v3630_v11 = vpop.f32.mrf.mxu1 }
 0xa57   : > { %6888 = vtanh.f32 %v3714_v43  ;;  %v3670_v26 = vmul.f32 %v3654_v59, %v8446_v57  ;;  %v3659_v29 = vmul.f32 %v8456_v53, %v8456_v53  ;;  %v8463_v10 = vadd.f32 %v8383_v55, %v3630_v11 }
 0xa58   : > { %v3719_v48 = vmul.f32 0.7978846, %v3703_v62  ;;  %v3701_v34 = vadd.f32 %v3685_v16, %v8435_v52  ;;  %v3688_v14 = vmul.f32 0.044715, %v3672_v42  ;;  %v6603_v50 = vpop.f32.mrf.mxu1 }
 0xa59   : > { %v3686_v63 = vmul.f32 0.044715, %v3670_v26  ;;  %v3675_v46 = vmul.f32 %v3659_v29, %v8456_v53  ;;  %v3657_v40 = vmul.f32 %v8463_v10, %v8463_v10  ;;  %v8471_v32 = vadd.f32 %v6603_v50, %v8383_v55 }
 0xa5a   : > { %6890 = vtanh.f32 %v3719_v48  ;;  %v3717_v18 = vmul.f32 0.7978846, %v3701_v34  ;;  %v3704_v41 = vadd.f32 %v3688_v14, %v8442_v51  ;;  %v3633_v22 = vpop.f32.mrf.mxu1 }
 0xa5b   : > { %v3702_v33 = vadd.f32 %v3686_v63, %v8446_v57  ;;  %v3691_v19 = vmul.f32 0.044715, %v3675_v46  ;;  %v8474_v60 = vadd.f32 %v8383_v55, %v3633_v22  ;;  %v3673_v56 = vmul.f32 %v3657_v40, %v8463_v10 }
 0xa5c   : > { %6892 = vtanh.f32 %v3717_v18  ;;  %v3720_v1 = vmul.f32 0.7978846, %v3704_v41  ;;  %v3660_v0 = vmul.f32 %v8471_v32, %v8471_v32 }
 0xa5d   : > { %v3718_v45 = vmul.f32 0.7978846, %v3702_v33  ;;  %v3707_v2 = vadd.f32 %v3691_v19, %v8456_v53  ;;  %v3658_v36 = vmul.f32 %v8474_v60, %v8474_v60  ;;  %v3689_v44 = vmul.f32 0.044715, %v3673_v56 }
 0xa5e   : > { %6894 = vtanh.f32 %v3720_v1  ;;  %v6883_v3 = vpop.eup %6882  ;;  %v3676_v20 = vmul.f32 %v3660_v0, %v8471_v32 }
 0xa5f   : > { %6896 = vtanh.f32 %v3718_v45  ;;  %v3723_v55 = vmul.f32 0.7978846, %v3707_v2  ;;  %v3674_v17 = vmul.f32 %v3658_v36, %v8474_v60  ;;  %v3705_v47 = vadd.f32 %v3689_v44, %v8463_v10 }
 0xa60   : > { %v6885_v37 = vpop.eup %6884  ;;  %v3692_v12 = vmul.f32 0.044715, %v3676_v20  ;;  %v3747_v59 = vadd.f32 1.0, %v6883_v3 }
 0xa61   : > { %v3745_v4 = vadd.f32 1.0, %v6885_v37  ;;  %v3690_v25 = vmul.f32 0.044715, %v3674_v17  ;;  %6898 = vtanh.f32 %v3723_v55  ;;  %v3721_v16 = vmul.f32 0.7978846, %v3705_v47 }
 0xa62   : > { %v6887_v43 = vpop.eup %6886  ;;  %v3708_v42 = vadd.f32 %v3692_v12, %v8471_v32  ;;  %v3763_v63 = vmul.f32 0.5, %v3747_v59 }
 0xa63   : > { %v3748_v62 = vadd.f32 1.0, %v6887_v43  ;;  %v3706_v11 = vadd.f32 %v3690_v25, %v8474_v60  ;;  %v3761_v48 = vmul.f32 0.5, %v3745_v4  ;;  %6900 = vtanh.f32 %v3721_v16 }
 0xa64   : > { %v6889_v26 = vpop.eup %6888  ;;  %v3724_v14 = vmul.f32 0.7978846, %v3708_v42  ;;  %v3779_v1 = vmul.f32 %v3763_v63, %v8402_v6 }
 0xa65   : > { %v3764_v34 = vmul.f32 0.5, %v3748_v62  ;;  %v3746_v29 = vadd.f32 1.0, %v6889_v26  ;;  %v3722_v50 = vmul.f32 0.7978846, %v3706_v11  ;;  %v3777_v40 = vmul.f32 %v3761_v48, %v8407_v39 }
 0xa66   : > { %6902 = vtanh.f32 %v3724_v14 }
 0xa67   : > { %v6891_v18 = vpop.eup %6890  ;;  %v3762_v41 = vmul.f32 0.5, %v3746_v29  ;;  %v3780_v46 = vmul.f32 %v3764_v34, %v8413_v54  ;;  %6904 = vtanh.f32 %v3722_v50  ;;  %v6775_v50 = vld [vmem:[%s9888_s8 + $0x10] sm:$0xff]  }
 0xa68   : > { %v3751_v19 = vadd.f32 1.0, %v6891_v18  ;;  %6646 = vmatprep.subr.bf16.mxu1 %v6775_v50 }
 0xa69   : > { %v6893_v33 = vpop.eup %6892  ;;  %v3778_v22 = vmul.f32 %v3762_v41, %v8419_v9  ;;  %v3792_v3 = vpack.c.bf16 %v3780_v46, %v3779_v1  ;;  %6647 = vmatpush3.bf16.msra.mxu1 %v6775_v50 }
 0xa6a   : > { %v3749_v45 = vadd.f32 1.0, %v6893_v33  ;;  %v3767_v37 = vmul.f32 0.5, %v3751_v19 }
 0xa6b   : > { %v6895_v56 = vpop.eup %6894  ;;  %v3791_v0 = vpack.c.bf16 %v3778_v22, %v3777_v40  ;;  %v5951_v22 = vld [vmem:[%s9887_s7 + $0x3] ss:$0 sm:$0xff] }
 0xa6c   : > { %v6897_v2 = vpop.eup %6896  ;;  %v3752_v36 = vadd.f32 1.0, %v6895_v56  ;;  %v3765_v20 = vmul.f32 0.5, %v3749_v45  ;;  %v3783_v12 = vmul.f32 %v3767_v37, %v8427_v5 }
 0xa6d   : > { %6624 = vmatprep.mubr.bf16.mxu0 %v3791_v0  ;;  %v3750_v44 = vadd.f32 1.0, %v6897_v2 }
 0xa6e   : > { %v3768_v54 = vmul.f32 0.5, %v3752_v36  ;;  %6625 = vmatmul.mubr.bf16.gmra.mxu0 %v3792_v3  ;;  %v6899_v17 = vpop.eup %6898  ;;  %v3781_v9 = vmul.f32 %v3765_v20, %v8435_v52 }
 0xa6f   : > { %v3766_v55 = vmul.f32 0.5, %v3750_v44  ;;  %v3755_v4 = vadd.f32 1.0, %v6899_v17 }
 0xa70   : > { %v3784_v39 = vmul.f32 %v3768_v54, %v8442_v51  ;;  %v6901_v47 = vpop.eup %6900 }
 0xa71   : > { %v3782_v6 = vmul.f32 %v3766_v55, %v8446_v57  ;;  %v3753_v59 = vadd.f32 1.0, %v6901_v47  ;;  %v3771_v48 = vmul.f32 0.5, %v3755_v4 }
 0xa72   : > { %v3794_v62 = vpack.c.bf16 %v3784_v39, %v3783_v12 }
 0xa73   : > { %v3793_v43 = vpack.c.bf16 %v3782_v6, %v3781_v9  ;;  %v6903_v25 = vpop.eup %6902  ;;  %v3769_v11 = vmul.f32 0.5, %v3753_v59  ;;  %v3787_v14 = vmul.f32 %v3771_v48, %v8456_v53  ;;  %v6777_v53 = vld [vmem:[%s9888_s8] sm:$0xff]  }
 0xa74   : > { %v6905_v16 = vpop.eup %6904  ;;  %v3756_v42 = vadd.f32 1.0, %v6903_v25 }
 0xa75   : > { %6628 = vmatprep.mubr.bf16.mxu0 %v3793_v43  ;;  %v3754_v26 = vadd.f32 1.0, %v6905_v16  ;;  %v3785_v57 = vmul.f32 %v3769_v11, %v8463_v10 }
 0xa76   : > { %6629 = vmatmul.mubr.bf16.gmra.mxu0 %v3794_v62  ;;  %v3772_v51 = vmul.f32 0.5, %v3756_v42 }
 0xa77   : > { %v3770_v34 = vmul.f32 0.5, %v3754_v26 }
 0xa78   : > { %v3788_v52 = vmul.f32 %v3772_v51, %v8471_v32  ;;  %v6776_v32 = vld [vmem:[%s9888_s8 + $0x8] sm:$0xff]  }
 0xa79   : > { %v3786_v5 = vmul.f32 %v3770_v34, %v8474_v60  ;;  %6648 = vmatprep.subr.bf16.mxu1 %v6776_v32 }
 0xa7a   : > { %v3796_v63 = vpack.c.bf16 %v3788_v52, %v3787_v14  ;;  %6649 = vmatpush3.bf16.msra.mxu1 %v6776_v32 }
 0xa7b   : > { %v3795_v29 = vpack.c.bf16 %v3786_v5, %v3785_v57  ;;  %6650 = vmatprep.subr.bf16.mxu1 %v6777_v53 }
 0xa7d   : > { %6632 = vmatprep.mubr.bf16.mxu0 %v3795_v29 }
 0xa7e   : > { %6633 = vmatmul.mubr.bf16.gmra.mxu0 %v3796_v63  ;;  %6651 = vmatpush3.bf16.msra.mxu1 %v6777_v53 }
 0xb15   : > { %v6622_v10 = vpop.f32.mrf.mxu0 }
 0xb16   : > { %v3961_v33 = vadd.f32 %v6622_v10, %v8287_v35 }
 0xb17   : > { %v3896_v60 = vpop.f32.mrf.mxu0 }
 0xb18   : > { %v3959_v41 = vadd.f32 %v3896_v60, %v8283_v13  ;;  %v3985_v0 = vadd.f32 %v5951_v22, %v3961_v33 }
 0xb19   : > { %v6623_v18 = vpop.f32.mrf.mxu0 }
 0xb1a   : > { %v3962_v46 = vadd.f32 %v6623_v18, %v8281_v27  ;;  %v3983_v45 = vadd.f32 %v5951_v22, %v3959_v41 }
 0xb1b   : > { %v3899_v40 = vpop.f32.mrf.mxu0 }
 0xb1c   : > { %v3960_v1 = vadd.f32 %v3899_v40, %v8285_v61  ;;  %v3986_v19 = vadd.f32 %v5951_v22, %v3962_v46 }
 0xb1e   : > { %v3984_v56 = vadd.f32 %v5951_v22, %v3960_v1  ;;  %v4000_v36 = vpack.c.bf16 %v3986_v19, %v3985_v0 }
 0xb20   : > { %v3999_v2 = vpack.c.bf16 %v3984_v56, %v3983_v45 }
 0xb22   : > { %6652 = vmatprep.mubr.bf16.mxu1 %v3999_v2 }
 0xb23   : > { %6653 = vmatmul.mubr.bf16.vlgmr.msra.gmra.mxu1 %v4000_v36 }
 0xb2e   : > { %v6626_v13 = vpop.f32.mrf.mxu0 }
 0xb2f   : > { %v3965_v20 = vadd.f32 %v6626_v13, %v8303_v49 }
 0xb30   : > { %v3912_v3 = vpop.f32.mrf.mxu0 }
 0xb31   : > { %v3963_v35 = vadd.f32 %v3912_v3, %v8299_v23  ;;  %v3989_v9 = vadd.f32 %v5951_v22, %v3965_v20 }
 0xb32   : > { %v6627_v27 = vpop.f32.mrf.mxu0 }
 0xb33   : > { %v3966_v44 = vadd.f32 %v6627_v27, %v8297_v31  ;;  %v3987_v17 = vadd.f32 %v5951_v22, %v3963_v35 }
 0xb34   : > { %v3915_v37 = vpop.f32.mrf.mxu0 }
 0xb35   : > { %v3964_v61 = vadd.f32 %v3915_v37, %v8301_v38  ;;  %v3990_v54 = vadd.f32 %v5951_v22, %v3966_v44 }
 0xb36   : > { %v6630_v55 = vpop.f32.mrf.mxu0 }
 0xb37   : > { %v3988_v39 = vadd.f32 %v5951_v22, %v3964_v61  ;;  %v4002_v12 = vpack.c.bf16 %v3990_v54, %v3989_v9  ;;  %v3969_v31 = vadd.f32 %v6630_v55, %v8319_v28 }
 0xb38   : > { %v3928_v6 = vpop.f32.mrf.mxu0 }
 0xb39   : > { %v4001_v47 = vpack.c.bf16 %v3988_v39, %v3987_v17  ;;  %v3967_v43 = vadd.f32 %v3928_v6, %v8315_v21  ;;  %v3993_v42 = vadd.f32 %v5951_v22, %v3969_v31 }
 0xb3a   : > { %v6631_v4 = vpop.f32.mrf.mxu0 }
 0xb3b   : > { %v3970_v23 = vadd.f32 %v6631_v4, %v8313_v8  ;;  %6656 = vmatprep.mubr.bf16.mxu1 %v4001_v47  ;;  %v3991_v25 = vadd.f32 %v5951_v22, %v3967_v43 }
 0xb3c   : > { %v3931_v49 = vpop.f32.mrf.mxu0  ;;  %6657 = vmatmul.mubr.bf16.gmra.mxu1 %v4002_v12 }
 0xb3d   : > { %v3968_v38 = vadd.f32 %v3931_v49, %v8317_v15  ;;  %v3994_v59 = vadd.f32 %v5951_v22, %v3970_v23 }
 0xb3e   : > { %v6634_v16 = vpop.f32.mrf.mxu0 }
 0xb3f   : > { %v3992_v62 = vadd.f32 %v5951_v22, %v3968_v38  ;;  %v4004_v48 = vpack.c.bf16 %v3994_v59, %v3993_v42  ;;  %v3973_v28 = vadd.f32 %v6634_v16, %v8335_v30 }
 0xb40   : > { %v3944_v26 = vpop.f32.mrf.mxu0 }
 0xb41   : > { %v4003_v11 = vpack.c.bf16 %v3992_v62, %v3991_v25  ;;  %v3971_v21 = vadd.f32 %v3944_v26, %v8331_v58  ;;  %v3997_v14 = vadd.f32 %v5951_v22, %v3973_v28  ;;  %v5952_v58 = vld [vmem:[%s9889_s9] ss:$0 sm:$0xff] }
 0xb42   : > { %v6635_v51 = vpop.f32.mrf.mxu0 }
 0xb43   : > { %6660 = vmatprep.mubr.bf16.mxu1 %v4003_v11  ;;  %v3974_v8 = vadd.f32 %v6635_v51, %v8329_v24  ;;  %v3995_v57 = vadd.f32 %v5951_v22, %v3971_v21 }
 0xb44   : > { %6661 = vmatmul.mubr.bf16.gmra.mxu1 %v4004_v48  ;;  %v3947_v34 = vpop.f32.mrf.mxu0 }
 0xb45   : > { %v3972_v15 = vadd.f32 %v3947_v34, %v8333_v7  ;;  %v3998_v52 = vadd.f32 %v5951_v22, %v3974_v8 }
 0xb47   : > { %v3996_v5 = vadd.f32 %v5951_v22, %v3972_v15  ;;  %v4006_v63 = vpack.c.bf16 %v3998_v52, %v3997_v14 }
 0xb49   : > { %v4005_v29 = vpack.c.bf16 %v3996_v5, %v3995_v57 }
 0xb4b   : > { %6664 = vmatprep.mubr.bf16.mxu1 %v4005_v29 }
 0xb4c   : > { %6665 = vmatmul.mubr.bf16.gmra.mxu1 %v4006_v63 }
 0xbe3   : > { %v6654_v50 = vpop.f32.mrf.mxu1 }
 0xbe4   : > { %v8530_v24 = vadd.f32 %v6654_v50, %v5952_v58 }
 0xbe5   : > { %v4112_v32 = vpop.f32.mrf.mxu1 }
 0xbe6   : > { %9967 = vst [vmem:[#allocation2_spill] sm:$0xff] %v8530_v24  ;;  %v8532_v30 = vadd.f32 %v5952_v58, %v4112_v32  ;;  %4195 = vrot.lane.b32.xlu1 %v8530_v24, %s6914_s14 }
 0xbe7   : > { %v6655_v7 = vpop.f32.mrf.mxu1 }
 0xbe8   : > { %9968 = vst [vmem:[#allocation3_spill] sm:$0xff] %v8532_v30  ;;  %v8536_v53 = vadd.f32 %v6655_v7, %v5952_v58  ;;  %4191 = vrot.lane.b32.xlu0 %v8532_v30, %s6914_s14 }
 0xbe9   : > { %v4115_v10 = vpop.f32.mrf.mxu1 }
 0xbea   : > { %9969 = vst [vmem:[#allocation4_spill] sm:$0xff] %v8536_v53  ;;  %v8540_v60 = vadd.f32 %v5952_v58, %v4115_v10  ;;  %4197 = vrot.lane.b32.xlu1 %v8536_v53, %s6914_s14 }
 0xbec   : > { %9970 = vst [vmem:[#allocation5_spill] sm:$0xff] %v8540_v60  ;;  %4193 = vrot.lane.b32.xlu0 %v8540_v60, %s6914_s14 }
 0xbfc   : > { %v6658_v18 = vpop.f32.mrf.mxu1 }
 0xbfd   : > { %v8546_v41 = vadd.f32 %v6658_v18, %v5952_v58 }
 0xbfe   : > { %v4128_v46 = vpop.f32.mrf.mxu1 }
 0xbff   : > { %9971 = vst [vmem:[#allocation6_spill] sm:$0xff] %v8546_v41  ;;  %4203 = vrot.lane.b32.xlu0 %v8546_v41, %s6914_s14  ;;  %v8550_v40 = vadd.f32 %v5952_v58, %v4128_v46 }
 0xc00   : > { %v6659_v33 = vpop.f32.mrf.mxu1 }
 0xc01   : > { %9972 = vst [vmem:[#allocation7_spill] sm:$0xff] %v8550_v40  ;;  %v8552_v22 = vadd.f32 %v6659_v33, %v5952_v58 }
 0xc02   : > { %v4131_v1 = vpop.f32.mrf.mxu1 }
 0xc03   : > { %9973 = vst [vmem:[#allocation8_spill] sm:$0xff] %v8552_v22  ;;  %4205 = vrot.lane.b32.xlu1 %v8552_v22, %s6914_s14  ;;  %4199 = vrot.lane.b32.xlu0 %v8550_v40, %s6914_s14  ;;  %v8558_v45 = vadd.f32 %v5952_v58, %v4131_v1 }
 0xc04   : > { %v6662_v19 = vpop.f32.mrf.mxu1 }
 0xc05   : > { %9974 = vst [vmem:[#allocation9_spill] sm:$0xff] %v8558_v45  ;;  %v8560_v56 = vadd.f32 %v6662_v19, %v5952_v58 }
 0xc06   : > { %v4144_v0 = vpop.f32.mrf.mxu1 }
 0xc07   : > { %9975 = vst [vmem:[#allocation10_spill] sm:$0xff] %v8560_v56  ;;  %4201 = vrot.lane.b32.xlu1 %v8558_v45, %s6914_s14  ;;  %4211 = vrot.lane.b32.xlu0 %v8560_v56, %s6914_s14  ;;  %v8566_v36 = vadd.f32 %v5952_v58, %v4144_v0 }
 0xc08   : > { %v6663_v2 = vpop.f32.mrf.mxu1 }
 0xc09   : > { %9976 = vst [vmem:[#allocation11_spill] sm:$0xff] %v8566_v36  ;;  %v8568_v13 = vadd.f32 %v6663_v2, %v5952_v58 }
 0xc0a   : > { %v4147_v3 = vpop.f32.mrf.mxu1 }
 0xc0b   : > { %9977 = vst [vmem:[#allocation12_spill] sm:$0xff] %v8568_v13  ;;  %4213 = vrot.lane.b32.xlu1 %v8568_v13, %s6914_s14  ;;  %4207 = vrot.lane.b32.xlu0 %v8566_v36, %s6914_s14  ;;  %v8574_v27 = vadd.f32 %v5952_v58, %v4147_v3 }
 0xc0c   : > { %v6666_v35 = vpop.f32.mrf.mxu1 }
 0xc0d   : > { %9978 = vst [vmem:[#allocation13_spill] sm:$0xff] %v8574_v27  ;;  %v8576_v44 = vadd.f32 %v6666_v35, %v5952_v58 }
 0xc0e   : > { %v4160_v20 = vpop.f32.mrf.mxu1 }
 0xc0f   : > { %9979 = vst [vmem:[#allocation14_spill] sm:$0xff] %v8576_v44  ;;  %4209 = vrot.lane.b32.xlu1 %v8574_v27, %s6914_s14  ;;  %4219 = vrot.lane.b32.xlu0 %v8576_v44, %s6914_s14  ;;  %v8582_v61 = vadd.f32 %v5952_v58, %v4160_v20 }
 0xc10   : > { %v6667_v37 = vpop.f32.mrf.mxu1 }
 0xc11   : > { %9980 = vst [vmem:[#allocation15_spill] sm:$0xff] %v8582_v61  ;;  %v8584_v54 = vadd.f32 %v6667_v37, %v5952_v58 }
 0xc12   : > { %v4163_v55 = vpop.f32.mrf.mxu1 }
 0xc13   : > { %9981 = vst [vmem:[#allocation16_spill] sm:$0xff] %v8584_v54  ;;  %4221 = vrot.lane.b32.xlu1 %v8584_v54, %s6914_s14  ;;  %4215 = vrot.lane.b32.xlu0 %v8582_v61, %s6914_s14  ;;  %v8590_v17 = vadd.f32 %v5952_v58, %v4163_v55 }
 0xc15   : > { %9982 = vst [vmem:[#allocation17_spill] sm:$0xff] %v8590_v17 }
 0xc17   : > { %4217 = vrot.lane.b32.xlu1 %v8590_v17, %s6914_s14 }
 0xc58   : > { %v4196_v39 = vpop.permute.xlu1 %4195 }
 0xc59   : > { %v8595_v9 = vadd.f32 %v4196_v39, %v8530_v24  ;;  %v8600_v12 = vsub.f32 %v8530_v24, %v4196_v39 }
 0xc5a   : > { %v4192_v6 = vpop.permute.xlu0 %4191 }
 0xc5b   : > { %4291 = vrot.lane.b32.xlu0 %v8595_v9, %s6915_s15  ;;  %v8610_v43 = vadd.f32 %v4192_v6, %v8532_v30  ;;  %v8620_v49 = vsub.f32 %v8532_v30, %v4192_v6 }
 0xc5c   : > { %v4198_v47 = vpop.permute.xlu1 %4197 }
 0xc5d   : > { %v8603_v4 = vadd.f32 %v4198_v47, %v8536_v53  ;;  %v8613_v23 = vsub.f32 %v8536_v53, %v4198_v47 }
 0xc5e   : > { %v4194_v31 = vpop.permute.xlu0 %4193 }
 0xc5f   : > { %4293 = vrot.lane.b32.xlu1 %v8603_v4, %s6915_s15  ;;  %4387 = vrot.lane.b32.xlu0 %v8600_v12, %s6915_s15  ;;  %v8623_v38 = vadd.f32 %v4194_v31, %v8540_v60  ;;  %v8630_v59 = vsub.f32 %v8540_v60, %v4194_v31 }
 0xc63   : > { %4389 = vrot.lane.b32.xlu1 %v8613_v23, %s6915_s15  ;;  %4287 = vrot.lane.b32.xlu0 %v8610_v43, %s6915_s15 }
 0xc67   : > { %4289 = vrot.lane.b32.xlu1 %v8623_v38, %s6915_s15  ;;  %4383 = vrot.lane.b32.xlu0 %v8620_v49, %s6915_s15 }
 0xc6b   : > { %4385 = vrot.lane.b32.xlu1 %v8630_v59, %s6915_s15 }
 0xc71   : > { %v4204_v25 = vpop.permute.xlu0 %4203 }
 0xc72   : > { %v8635_v62 = vadd.f32 %v4204_v25, %v8546_v41  ;;  %v8640_v42 = vsub.f32 %v8546_v41, %v4204_v25 }
 0xc74   : > { %4299 = vrot.lane.b32.xlu0 %v8635_v62, %s6915_s15 }
 0xc75   : > { %v4206_v16 = vpop.permute.xlu1 %4205  ;;  %v4200_v11 = vpop.permute.xlu0 %4199 }
 0xc76   : > { %v8643_v26 = vadd.f32 %v4206_v16, %v8552_v22  ;;  %v8650_v48 = vsub.f32 %v8552_v22, %v4206_v16  ;;  %v8653_v51 = vadd.f32 %v4200_v11, %v8550_v40  ;;  %v8660_v8 = vsub.f32 %v8550_v40, %v4200_v11 }
 0xc78   : > { %4301 = vrot.lane.b32.xlu1 %v8643_v26, %s6915_s15  ;;  %4395 = vrot.lane.b32.xlu0 %v8640_v42, %s6915_s15 }
 0xc79   : > { %v4202_v21 = vpop.permute.xlu1 %4201  ;;  %v4212_v34 = vpop.permute.xlu0 %4211 }
 0xc7a   : > { %v8663_v28 = vadd.f32 %v4202_v21, %v8558_v45  ;;  %v8670_v15 = vsub.f32 %v8558_v45, %v4202_v21  ;;  %v8673_v52 = vadd.f32 %v4212_v34, %v8560_v56  ;;  %v8680_v5 = vsub.f32 %v8560_v56, %v4212_v34 }
 0xc7c   : > { %4397 = vrot.lane.b32.xlu1 %v8650_v48, %s6915_s15  ;;  %4295 = vrot.lane.b32.xlu0 %v8653_v51, %s6915_s15 }
 0xc7d   : > { %v4214_v57 = vpop.permute.xlu1 %4213  ;;  %v4208_v29 = vpop.permute.xlu0 %4207 }
 0xc7e   : > { %v8683_v14 = vadd.f32 %v4214_v57, %v8568_v13  ;;  %v8690_v63 = vsub.f32 %v8568_v13, %v4214_v57  ;;  %v8693_v58 = vadd.f32 %v4208_v29, %v8566_v36  ;;  %v8700_v32 = vsub.f32 %v8566_v36, %v4208_v29 }
 0xc80   : > { %4297 = vrot.lane.b32.xlu1 %v8663_v28, %s6915_s15  ;;  %4391 = vrot.lane.b32.xlu0 %v8660_v8, %s6915_s15 }
 0xc81   : > { %v4210_v50 = vpop.permute.xlu1 %4209  ;;  %v4220_v10 = vpop.permute.xlu0 %4219 }
 0xc82   : > { %v8703_v7 = vadd.f32 %v4210_v50, %v8574_v27  ;;  %v8710_v18 = vsub.f32 %v8574_v27, %v4210_v50  ;;  %v8713_v46 = vadd.f32 %v4220_v10, %v8576_v44  ;;  %v8720_v1 = vsub.f32 %v8576_v44, %v4220_v10 }
 0xc84   : > { %4393 = vrot.lane.b32.xlu1 %v8670_v15, %s6915_s15  ;;  %4307 = vrot.lane.b32.xlu0 %v8673_v52, %s6915_s15 }
 0xc85   : > { %v4222_v33 = vpop.permute.xlu1 %4221  ;;  %v4216_v0 = vpop.permute.xlu0 %4215 }
 0xc86   : > { %v8723_v19 = vadd.f32 %v4222_v33, %v8584_v54  ;;  %v8730_v2 = vsub.f32 %v8584_v54, %v4222_v33  ;;  %v8733_v3 = vadd.f32 %v4216_v0, %v8582_v61  ;;  %v8740_v20 = vsub.f32 %v8582_v61, %v4216_v0 }
 0xc88   : > { %4309 = vrot.lane.b32.xlu1 %v8683_v14, %s6915_s15  ;;  %4403 = vrot.lane.b32.xlu0 %v8680_v5, %s6915_s15 }
 0xc89   : > { %v4218_v35 = vpop.permute.xlu1 %4217 }
 0xc8a   : > { %v8743_v37 = vadd.f32 %v4218_v35, %v8590_v17  ;;  %v8750_v55 = vsub.f32 %v8590_v17, %v4218_v35 }
 0xc8c   : > { %4405 = vrot.lane.b32.xlu1 %v8690_v63, %s6915_s15  ;;  %4303 = vrot.lane.b32.xlu0 %v8693_v58, %s6915_s15 }
 0xc90   : > { %4305 = vrot.lane.b32.xlu1 %v8703_v7, %s6915_s15  ;;  %4399 = vrot.lane.b32.xlu0 %v8700_v32, %s6915_s15 }
 0xc94   : > { %4401 = vrot.lane.b32.xlu1 %v8710_v18, %s6915_s15  ;;  %4315 = vrot.lane.b32.xlu0 %v8713_v46, %s6915_s15 }
 0xc98   : > { %4317 = vrot.lane.b32.xlu1 %v8723_v19, %s6915_s15  ;;  %4411 = vrot.lane.b32.xlu0 %v8720_v1, %s6915_s15 }
 0xc9c   : > { %4413 = vrot.lane.b32.xlu1 %v8730_v2, %s6915_s15  ;;  %4311 = vrot.lane.b32.xlu0 %v8733_v3, %s6915_s15 }
 0xca0   : > { %4313 = vrot.lane.b32.xlu1 %v8743_v37, %s6915_s15  ;;  %4407 = vrot.lane.b32.xlu0 %v8740_v20, %s6915_s15 }
 0xca4   : > { %4409 = vrot.lane.b32.xlu1 %v8750_v55, %s6915_s15 }
 0xccd   : > { %v4292_v39 = vpop.permute.xlu0 %4291 }
 0xcce   : > { %v8755_v6 = vadd.f32 %v4292_v39, %v8595_v9  ;;  %v8770_v21 = vsub.f32 %v8595_v9, %v4292_v39 }
 0xcd0   : > { %9983 = vst [vmem:[#allocation18_spill] sm:$0xff] %v8755_v6  ;;  %4483 = vrot.lane.b32.xlu0 %v8755_v6, %s6916_s16 }
 0xcd1   : > { %v4294_v47 = vpop.permute.xlu1 %4293  ;;  %v4388_v31 = vpop.permute.xlu0 %4387 }
 0xcd2   : > { %v8760_v25 = vadd.f32 %v4294_v47, %v8603_v4  ;;  %v8763_v16 = vadd.f32 %v4388_v31, %v8600_v12  ;;  %v8780_v29 = vsub.f32 %v8603_v4, %v4294_v47  ;;  %v8783_v50 = vsub.f32 %v8600_v12, %v4388_v31 }
 0xcd4   : > { %4485 = vrot.lane.b32.xlu1 %v8760_v25, %s6916_s16  ;;  %4579 = vrot.lane.b32.xlu0 %v8763_v16, %s6916_s16 }
 0xcd5   : > { %v4390_v11 = vpop.permute.xlu1 %4389  ;;  %v4288_v57 = vpop.permute.xlu0 %4287 }
 0xcd6   : > { %v8773_v34 = vadd.f32 %v4390_v11, %v8613_v23  ;;  %v8790_v10 = vsub.f32 %v8613_v23, %v4390_v11  ;;  %v8793_v33 = vadd.f32 %v4288_v57, %v8610_v43  ;;  %v8810_v23 = vsub.f32 %v8610_v43, %v4288_v57 }
 0xcd8   : > { %4581 = vrot.lane.b32.xlu1 %v8773_v34, %s6916_s16  ;;  %4675 = vrot.lane.b32.xlu0 %v8770_v21, %s6916_s16 }
 0xcd9   : > { %v4290_v9 = vpop.permute.xlu1 %4289  ;;  %v4384_v0 = vpop.permute.xlu0 %4383 }
 0xcda   : > { %v8800_v12 = vadd.f32 %v4290_v9, %v8623_v38  ;;  %v8803_v4 = vadd.f32 %v4384_v0, %v8620_v49  ;;  %v8820_v31 = vsub.f32 %v8623_v38, %v4290_v9  ;;  %v8823_v11 = vsub.f32 %v8620_v49, %v4384_v0 }
 0xcdc   : > { %4677 = vrot.lane.b32.xlu1 %v8780_v29, %s6916_s16  ;;  %4771 = vrot.lane.b32.xlu0 %v8783_v50, %s6916_s16 }
 0xcdd   : > { %v4386_v35 = vpop.permute.xlu1 %4385 }
 0xcde   : > { %v8813_v39 = vadd.f32 %v4386_v35, %v8630_v59  ;;  %v8830_v57 = vsub.f32 %v8630_v59, %v4386_v35 }
 0xce0   : > { %4773 = vrot.lane.b32.xlu1 %v8790_v10, %s6916_s16  ;;  %4479 = vrot.lane.b32.xlu0 %v8793_v33, %s6916_s16 }
 0xce4   : > { %4481 = vrot.lane.b32.xlu1 %v8800_v12, %s6916_s16  ;;  %4575 = vrot.lane.b32.xlu0 %v8803_v4, %s6916_s16 }
 0xce6   : > { %v4300_v47 = vpop.permute.xlu0 %4299 }
 0xce7   : > { %v8833_v54 = vadd.f32 %v4300_v47, %v8635_v62  ;;  %v8850_v59 = vsub.f32 %v8635_v62, %v4300_v47 }
 0xce8   : > { %4577 = vrot.lane.b32.xlu1 %v8813_v39, %s6916_s16  ;;  %4671 = vrot.lane.b32.xlu0 %v8810_v23, %s6916_s16 }
 0xcea   : > { %v4302_v43 = vpop.permute.xlu1 %4301  ;;  %v4396_v44 = vpop.permute.xlu0 %4395 }
 0xceb   : > { %v8840_v49 = vadd.f32 %v4302_v43, %v8643_v26  ;;  %v8843_v38 = vadd.f32 %v4396_v44, %v8640_v42  ;;  %v8860_v17 = vsub.f32 %v8643_v26, %v4302_v43  ;;  %v8863_v61 = vsub.f32 %v8640_v42, %v4396_v44 }
 0xcec   : > { %4673 = vrot.lane.b32.xlu1 %v8820_v31, %s6916_s16  ;;  %4767 = vrot.lane.b32.xlu0 %v8823_v11, %s6916_s16 }
 0xced   : > { %9984 = vst [vmem:[#allocation19_spill] sm:$0xff] %v8840_v49 }
 0xcee   : > { %v4398_v9 = vpop.permute.xlu1 %4397  ;;  %v4296_v35 = vpop.permute.xlu0 %4295 }
 0xcef   : > { %v8853_v0 = vadd.f32 %v4398_v9, %v8650_v48  ;;  %v8870_v47 = vsub.f32 %v8650_v48, %v4398_v9  ;;  %v8873_v27 = vadd.f32 %v4296_v35, %v8653_v51  ;;  %v8890_v48 = vsub.f32 %v8653_v51, %v4296_v35 }
 0xcf0   : > { %4769 = vrot.lane.b32.xlu1 %v8830_v57, %s6916_s16  ;;  %4491 = vrot.lane.b32.xlu0 %v8833_v54, %s6916_s16 }
 0xcf1   : > { %9985 = vst [vmem:[#allocation20_spill] sm:$0xff] %v8873_v27 }
 0xcf2   : > { %v4298_v62 = vpop.permute.xlu1 %4297  ;;  %v4392_v36 = vpop.permute.xlu0 %4391 }
 0xcf3   : > { %v8880_v44 = vadd.f32 %v4298_v62, %v8663_v28  ;;  %v8883_v42 = vadd.f32 %v4392_v36, %v8660_v8  ;;  %v8900_v13 = vsub.f32 %v8663_v28, %v4298_v62  ;;  %v8903_v56 = vsub.f32 %v8660_v8, %v4392_v36 }
 0xcf4   : > { %4493 = vrot.lane.b32.xlu1 %v8840_v49, %s6916_s16  ;;  %4587 = vrot.lane.b32.xlu0 %v8843_v38, %s6916_s16 }
 0xcf5   : > { %9986 = vst [vmem:[#allocation21_spill] sm:$0xff] %v8880_v44 }
 0xcf6   : > { %v4394_v26 = vpop.permute.xlu1 %4393  ;;  %v4308_v9 = vpop.permute.xlu0 %4307 }
 0xcf7   : > { %v8893_v43 = vadd.f32 %v4394_v26, %v8670_v15  ;;  %v8910_v35 = vsub.f32 %v8670_v15, %v4394_v26  ;;  %v8913_v45 = vadd.f32 %v4308_v9, %v8673_v52  ;;  %v8930_v15 = vsub.f32 %v8673_v52, %v4308_v9 }
 0xcf8   : > { %4589 = vrot.lane.b32.xlu1 %v8853_v0, %s6916_s16  ;;  %4683 = vrot.lane.b32.xlu0 %v8850_v59, %s6916_s16 }
 0xcf9   : > { %9987 = vst [vmem:[#allocation22_spill] sm:$0xff] %v8913_v45 }
 0xcfa   : > { %v4310_v51 = vpop.permute.xlu1 %4309  ;;  %v4404_v40 = vpop.permute.xlu0 %4403 }
 0xcfb   : > { %v8920_v36 = vadd.f32 %v4310_v51, %v8683_v14  ;;  %v8923_v8 = vadd.f32 %v4404_v40, %v8680_v5  ;;  %v8940_v22 = vsub.f32 %v8683_v14, %v4310_v51  ;;  %v8943_v41 = vsub.f32 %v8680_v5, %v4404_v40 }
 0xcfc   : > { %4685 = vrot.lane.b32.xlu1 %v8860_v17, %s6916_s16  ;;  %4779 = vrot.lane.b32.xlu0 %v8863_v61, %s6916_s16 }
 0xcfd   : > { %9988 = vst [vmem:[#allocation23_spill] sm:$0xff] %v8920_v36 }
 0xcfe   : > { %v4406_v28 = vpop.permute.xlu1 %4405  ;;  %v4304_v26 = vpop.permute.xlu0 %4303 }
 0xcff   : > { %v8933_v62 = vadd.f32 %v4406_v28, %v8690_v63  ;;  %v8950_v9 = vsub.f32 %v8690_v63, %v4406_v28  ;;  %v8953_v60 = vadd.f32 %v4304_v26, %v8693_v58  ;;  %v8970_v63 = vsub.f32 %v8693_v58, %v4304_v26 }
 0xd00   : > { %4781 = vrot.lane.b32.xlu1 %v8870_v47, %s6916_s16  ;;  %4487 = vrot.lane.b32.xlu0 %v8873_v27, %s6916_s16 }
 0xd01   : > { %9989 = vst [vmem:[#allocation24_spill] sm:$0xff] %v8953_v60 }
 0xd02   : > { %v4306_v52 = vpop.permute.xlu1 %4305  ;;  %v4400_v30 = vpop.permute.xlu0 %4399 }
 0xd03   : > { %v8960_v40 = vadd.f32 %v4306_v52, %v8703_v7  ;;  %v8963_v5 = vadd.f32 %v4400_v30, %v8700_v32  ;;  %v8980_v53 = vsub.f32 %v8703_v7, %v4306_v52  ;;  %v8983_v24 = vsub.f32 %v8700_v32, %v4400_v30 }
 0xd04   : > { %4489 = vrot.lane.b32.xlu1 %v8880_v44, %s6916_s16  ;;  %4583 = vrot.lane.b32.xlu0 %v8883_v42, %s6916_s16 }
 0xd05   : > { %9990 = vst [vmem:[#allocation25_spill] sm:$0xff] %v8960_v40  ;;  %9991 = vst [vmem:[#allocation26_spill] sm:$0xff] %v8983_v24 }
 0xd06   : > { %v4402_v14 = vpop.permute.xlu1 %4401  ;;  %v4316_v28 = vpop.permute.xlu0 %4315 }
 0xd07   : > { %v8973_v51 = vadd.f32 %v4402_v14, %v8710_v18  ;;  %v8990_v26 = vsub.f32 %v8710_v18, %v4402_v14  ;;  %v9010_v18 = vsub.f32 %v8713_v46, %v4316_v28 }
 0xd08   : > { %4585 = vrot.lane.b32.xlu1 %v8893_v43, %s6916_s16  ;;  %4679 = vrot.lane.b32.xlu0 %v8890_v48, %s6916_s16 }
 0xd09   : > { %9992 = vst [vmem:[#allocation27_spill] sm:$0xff] %v8990_v26  ;;  %9996 = vst [vmem:[#allocation31_spill] sm:$0xff] %v9010_v18 }
 0xd0a   : > { %v4318_v58 = vpop.permute.xlu1 %4317 }
 0xd0b   : > { %v9000_v30 = vadd.f32 %v4318_v58, %v8723_v19 }
 0xd0c   : > { %4681 = vrot.lane.b32.xlu1 %v8900_v13, %s6916_s16  ;;  %4775 = vrot.lane.b32.xlu0 %v8903_v56, %s6916_s16 }
 0xd0d   : > { %9994 = vst [vmem:[#allocation29_spill] sm:$0xff] %v9000_v30 }
 0xd0e   : > { %v4414_v7 = vpop.permute.xlu1 %4413 }
 0xd0f   : > { %v9013_v52 = vadd.f32 %v4414_v7, %v8730_v2 }
 0xd10   : > { %4777 = vrot.lane.b32.xlu1 %v8910_v35, %s6916_s16  ;;  %4499 = vrot.lane.b32.xlu0 %v8913_v45, %s6916_s16 }
 0xd11   : > { %9997 = vst [vmem:[#allocation32_spill] sm:$0xff] %v9013_v52 }
 0xd14   : > { %4501 = vrot.lane.b32.xlu1 %v8920_v36, %s6916_s16  ;;  %4595 = vrot.lane.b32.xlu0 %v8923_v8, %s6916_s16 }
 0xd18   : > { %4597 = vrot.lane.b32.xlu1 %v8933_v62, %s6916_s16  ;;  %4691 = vrot.lane.b32.xlu0 %v8930_v15, %s6916_s16 }
 0xd1c   : > { %4693 = vrot.lane.b32.xlu1 %v8940_v22, %s6916_s16  ;;  %4787 = vrot.lane.b32.xlu0 %v8943_v41, %s6916_s16 }
 0xd20   : > { %4789 = vrot.lane.b32.xlu1 %v8950_v9, %s6916_s16  ;;  %4495 = vrot.lane.b32.xlu0 %v8953_v60, %s6916_s16  ;;  %v4412_v60 = vpop.permute.xlu0 %4411 }
 0xd21   : > { %v9003_v32 = vadd.f32 %v4412_v60, %v8720_v1 }
 0xd23   : > { %9995 = vst [vmem:[#allocation30_spill] sm:$0xff] %v9003_v32 }
 0xd24   : > { %4497 = vrot.lane.b32.xlu1 %v8960_v40, %s6916_s16  ;;  %4591 = vrot.lane.b32.xlu0 %v8963_v5, %s6916_s16  ;;  %v8993_v40 = vadd.f32 %v4316_v28, %v8713_v46  ;;  %v4312_v14 = vpop.permute.xlu0 %4311  ;;  %v9030_v46 = vsub.f32 %v8730_v2, %v4414_v7 }
 0xd25   : > { %v9033_v28 = vadd.f32 %v4312_v14, %v8733_v3  ;;  %v9052_v2 = vsub.f32 %v8733_v3, %v4312_v14 }
 0xd26   : > { %9993 = vst [vmem:[#allocation28_spill] sm:$0xff] %v8993_v40  ;;  %10000 = vst [vmem:[#allocation35_spill] sm:$0xff] %v9030_v46 }
 0xd27   : > { %10001 = vst [vmem:[#allocation36_spill] sm:$0xff] %v9033_v28  ;;  %10005 = vst [vmem:[#allocation40_spill] sm:$0xff] %v9052_v2 }
 0xd28   : > { %4593 = vrot.lane.b32.xlu1 %v8973_v51, %s6916_s16  ;;  %4687 = vrot.lane.b32.xlu0 %v8970_v63, %s6916_s16 }
 0xd2c   : > { %4689 = vrot.lane.b32.xlu1 %v8980_v53, %s6916_s16  ;;  %4783 = vrot.lane.b32.xlu0 %v8983_v24, %s6916_s16 }
 0xd30   : > { %4785 = vrot.lane.b32.xlu1 %v8990_v26, %s6916_s16  ;;  %4507 = vrot.lane.b32.xlu0 %v8993_v40, %s6916_s16  ;;  %v9020_v40 = vsub.f32 %v8723_v19, %v4318_v58 }
 0xd32   : > { %9998 = vst [vmem:[#allocation33_spill] sm:$0xff] %v9020_v40 }
 0xd34   : > { %4509 = vrot.lane.b32.xlu1 %v9000_v30, %s6916_s16  ;;  %4603 = vrot.lane.b32.xlu0 %v9003_v32, %s6916_s16  ;;  %v9023_v30 = vsub.f32 %v8720_v1, %v4412_v60  ;;  %v4314_v32 = vpop.permute.xlu1 %4313 }
 0xd35   : > { %v9040_v60 = vadd.f32 %v4314_v32, %v8743_v37 }
 0xd36   : > { %9999 = vst [vmem:[#allocation34_spill] sm:$0xff] %v9023_v30 }
 0xd37   : > { %10002 = vst [vmem:[#allocation37_spill] sm:$0xff] %v9040_v60 }
 0xd38   : > { %4605 = vrot.lane.b32.xlu1 %v9013_v52, %s6916_s16  ;;  %4699 = vrot.lane.b32.xlu0 %v9010_v18, %s6916_s16  ;;  %v4408_v18 = vpop.permute.xlu0 %4407  ;;  %v4410_v19 = vpop.permute.xlu1 %4409 }
 0xd39   : > { %v9043_v1 = vadd.f32 %v4408_v18, %v8740_v20  ;;  %v9055_v7 = vadd.f32 %v4410_v19, %v8750_v55 }
 0xd3b   : > { %10003 = vst [vmem:[#allocation38_spill] sm:$0xff] %v9043_v1  ;;  %10006 = vst [vmem:[#allocation41_spill] sm:$0xff] %v9055_v7 }
 0xd3c   : > { %4701 = vrot.lane.b32.xlu1 %v9020_v40, %s6916_s16  ;;  %4795 = vrot.lane.b32.xlu0 %v9023_v30, %s6916_s16  ;;  %v9074_v30 = vsub.f32 %v8750_v55, %v4410_v19 }
 0xd3e   : > { %10009 = vst [vmem:[#allocation44_spill] sm:$0xff] %v9074_v30 }
 0xd40   : > { %4797 = vrot.lane.b32.xlu1 %v9030_v46, %s6916_s16  ;;  %4503 = vrot.lane.b32.xlu0 %v9033_v28, %s6916_s16 }
 0xd42   : > { %v9045_v58 = vpop.permute.xlu0 %4483 }
 0xd43   : > { %10004 = vst [vmem:[#allocation39_spill] sm:$0xff] %v9045_v58 }
 0xd44   : > { %4505 = vrot.lane.b32.xlu1 %v9040_v60, %s6916_s16  ;;  %4599 = vrot.lane.b32.xlu0 %v9043_v1, %s6916_s16  ;;  %v9064_v60 = vsub.f32 %v8743_v37, %v4314_v32  ;;  %v9067_v1 = vsub.f32 %v8740_v20, %v4408_v18 }
 0xd46   : > { %v9057_v28 = vpop.permute.xlu1 %4485  ;;  %v4580_v46 = vpop.permute.xlu0 %4579  ;;  %10007 = vst [vmem:[#allocation42_spill] sm:$0xff] %v9064_v60  ;;  %10008 = vst [vmem:[#allocation43_spill] sm:$0xff] %v9067_v1 }
 0xd48   : > { %4601 = vrot.lane.b32.xlu1 %v9055_v7, %s6916_s16  ;;  %4695 = vrot.lane.b32.xlu0 %v9052_v2, %s6916_s16  ;;  %v4625_v7 = vadd.f32 %v4580_v46, %v8763_v16 }
 0xd4a   : > { %v4582_v3 = vpop.permute.xlu1 %4581  ;;  %v4676_v14 = vpop.permute.xlu0 %4675 }
 0xd4b   : > { %v4626_v20 = vadd.f32 %v4582_v3, %v8773_v34  ;;  %v4721_v37 = vadd.f32 %v4676_v14, %v8770_v21 }
 0xd4c   : > { %4697 = vrot.lane.b32.xlu1 %v9064_v60, %s6916_s16  ;;  %4791 = vrot.lane.b32.xlu0 %v9067_v1, %s6916_s16 }
 0xd4e   : > { %v4678_v2 = vpop.permute.xlu1 %4677  ;;  %v4772_v40 = vpop.permute.xlu0 %4771 }
 0xd4f   : > { %v4722_v55 = vadd.f32 %v4678_v2, %v8780_v29  ;;  %v4817_v19 = vadd.f32 %v4772_v40, %v8783_v50 }
 0xd50   : > { %4793 = vrot.lane.b32.xlu1 %v9074_v30, %s6916_s16  ;;  %4867 = vrot.lane.b32.xlu0 %v4625_v7, %s6917_s18  ;;  %v4545_v7 = vsub.f32 %v8755_v6, %v9045_v58  ;;  %v4737_v58 = vsub.f32 %v8770_v21, %v4676_v14 }
 0xd52   : > { %v4774_v32 = vpop.permute.xlu1 %4773  ;;  %v9082_v18 = vpop.permute.xlu0 %4479 }
 0xd53   : > { %10010 = vst [vmem:[#allocation45_spill] sm:$0xff] %v9082_v18  ;;  %v4834_v21 = vsub.f32 %v8790_v10, %v4774_v32 }
 0xd54   : > { %4869 = vrot.lane.b32.xlu1 %v4626_v20, %s6917_s18  ;;  %4931 = vrot.lane.b32.xlu0 %v4721_v37, %s6918_s19  ;;  %v4818_v20 = vadd.f32 %v4774_v32, %v8790_v10  ;;  %v4546_v37 = vsub.f32 %v8760_v25, %v9057_v28 }
 0xd56   : > { %v9088_v30 = vpop.permute.xlu1 %4481  ;;  %v4576_v1 = vpop.permute.xlu0 %4575 }
 0xd57   : > { %10011 = vst [vmem:[#allocation46_spill] sm:$0xff] %v9088_v30 }
 0xd58   : > { %4933 = vrot.lane.b32.xlu1 %v4722_v55, %s6918_s19  ;;  %4995 = vrot.lane.b32.xlu0 %v4817_v19, %s6919_s21  ;;  %v4641_v55 = vsub.f32 %v8763_v16, %v4580_v46  ;;  %v4642_v19 = vsub.f32 %v8773_v34, %v4582_v3  ;;  %v4738_v16 = vsub.f32 %v8780_v29, %v4678_v2 }
 0xd59   : > { %v4833_v46 = vsub.f32 %v8783_v50, %v4772_v40  ;;  %v4623_v34 = vadd.f32 %v4576_v1, %v8803_v4 }
 0xd5a   : > { %v4578_v60 = vpop.permute.xlu1 %4577  ;;  %v4672_v52 = vpop.permute.xlu0 %4671 }
 0xd5b   : > { %v4624_v29 = vadd.f32 %v4578_v60, %v8813_v39  ;;  %v4719_v50 = vadd.f32 %v4672_v52, %v8810_v23 }
 0xd5c   : > { %4997 = vrot.lane.b32.xlu1 %v4818_v20, %s6919_s21  ;;  %5059 = vrot.lane.b32.xlu0 %v4545_v7, %s6920_s22 }
 0xd5e   : > { %v4674_v26 = vpop.permute.xlu1 %4673  ;;  %v4768_v24 = vpop.permute.xlu0 %4767 }
 0xd5f   : > { %v4720_v10 = vadd.f32 %v4674_v26, %v8820_v31  ;;  %v4815_v14 = vadd.f32 %v4768_v24, %v8823_v11 }
 0xd60   : > { %5061 = vrot.lane.b32.xlu1 %v4546_v37, %s6920_s22  ;;  %5123 = vrot.lane.b32.xlu0 %v4641_v55, %s6921_s23 }
 0xd62   : > { %v4770_v20 = vpop.permute.xlu1 %4769  ;;  %v9104_v6 = vpop.permute.xlu0 %4491 }
 0xd64   : > { %5125 = vrot.lane.b32.xlu1 %v4642_v19, %s6921_s23  ;;  %5187 = vrot.lane.b32.xlu0 %v4737_v58, %s6922_s24  ;;  %v4543_v19 = vsub.f32 %v8793_v33, %v9082_v18  ;;  %v4735_v18 = vsub.f32 %v8810_v23, %v4672_v52  ;;  %v4832_v23 = vsub.f32 %v8830_v57, %v4770_v20 }
 0xd66   : > { %v9110_v7 = vpop.permute.xlu1 %4493  ;;  %v9112_v37 = vpop.permute.xlu0 %4587 }
 0xd67   : > { %10012 = vst [vmem:[#allocation47_spill] sm:$0xff] %v9110_v7 }
 0xd68   : > { %5189 = vrot.lane.b32.xlu1 %v4738_v16, %s6922_s24  ;;  %5251 = vrot.lane.b32.xlu0 %v4833_v46, %s6923_s25  ;;  %v4816_v16 = vadd.f32 %v4770_v20, %v8830_v57 }
 0xd6a   : > { %v9118_v3 = vpop.permute.xlu1 %4589  ;;  %v9120_v58 = vpop.permute.xlu0 %4683 }
 0xd6c   : > { %5253 = vrot.lane.b32.xlu1 %v4834_v21, %s6923_s25  ;;  %4863 = vrot.lane.b32.xlu0 %v4623_v34, %s6917_s18  ;;  %v4544_v34 = vsub.f32 %v8800_v12, %v9088_v30 }
 0xd6e   : > { %v9126_v40 = vpop.permute.xlu1 %4685  ;;  %v9128_v2 = vpop.permute.xlu0 %4779 }
 0xd70   : > { %4865 = vrot.lane.b32.xlu1 %v4624_v29, %s6917_s18  ;;  %4927 = vrot.lane.b32.xlu0 %v4719_v50, %s6918_s19  ;;  %v4639_v29 = vsub.f32 %v8803_v4, %v4576_v1  ;;  %v4736_v4 = vsub.f32 %v8820_v31, %v4674_v26  ;;  %v4831_v1 = vsub.f32 %v8823_v11, %v4768_v24 }
 0xd71   : > { %v4630_v24 = vadd.f32 %v9118_v3, %v8853_v0  ;;  %v4725_v31 = vadd.f32 %v9120_v58, %v8850_v59  ;;  %v4726_v26 = vadd.f32 %v9126_v40, %v8860_v17 }
 0xd72   : > { %v9134_v32 = vpop.permute.xlu1 %4781  ;;  %v9136_v55 = vpop.permute.xlu0 %4487 }
 0xd73   : > { %10013 = vst [vmem:[#allocation48_spill] sm:$0xff] %v9136_v55 }
 0xd74   : > { %4929 = vrot.lane.b32.xlu1 %v4720_v10, %s6918_s19  ;;  %4991 = vrot.lane.b32.xlu0 %v4815_v14, %s6919_s21  ;;  %v4640_v14 = vsub.f32 %v8813_v39, %v4578_v60  ;;  %v4629_v39 = vadd.f32 %v9112_v37, %v8843_v38 }
 0xd76   : > { %v9143_v46 = vpop.permute.xlu1 %4489  ;;  %v9145_v21 = vpop.permute.xlu0 %4583 }
 0xd77   : > { %10014 = vst [vmem:[#allocation49_spill] sm:$0xff] %v9143_v46 }
 0xd78   : > { %4993 = vrot.lane.b32.xlu1 %v4816_v16, %s6919_s21  ;;  %5055 = vrot.lane.b32.xlu0 %v4543_v19, %s6920_s22 }
 0xd7a   : > { %v9152_v50 = vpop.permute.xlu1 %4585  ;;  %v9154_v10 = vpop.permute.xlu0 %4679 }
 0xd7c   : > { %5057 = vrot.lane.b32.xlu1 %v4544_v34, %s6920_s22  ;;  %5119 = vrot.lane.b32.xlu0 %v4639_v29, %s6921_s23 }
 0xd7e   : > { %v9160_v16 = vpop.permute.xlu1 %4681  ;;  %v9162_v19 = vpop.permute.xlu0 %4775 }
 0xd80   : > { %5121 = vrot.lane.b32.xlu1 %v4640_v14, %s6921_s23  ;;  %5183 = vrot.lane.b32.xlu0 %v4735_v18, %s6922_s24  ;;  %v4821_v18 = vadd.f32 %v9128_v2, %v8863_v61  ;;  %v4549_v14 = vsub.f32 %v8833_v54, %v9104_v6 }
 0xd82   : > { %v9168_v30 = vpop.permute.xlu1 %4777  ;;  %v9170_v34 = vpop.permute.xlu0 %4499 }
 0xd83   : > { %10015 = vst [vmem:[#allocation50_spill] sm:$0xff] %v9170_v34 }
 0xd84   : > { %5185 = vrot.lane.b32.xlu1 %v4736_v4, %s6922_s24  ;;  %5247 = vrot.lane.b32.xlu0 %v4831_v1, %s6923_s25  ;;  %v4822_v4 = vadd.f32 %v9134_v32, %v8870_v47 }
 0xd86   : > { %v9177_v52 = vpop.permute.xlu1 %4501  ;;  %v9179_v60 = vpop.permute.xlu0 %4595 }
 0xd87   : > { %10016 = vst [vmem:[#allocation51_spill] sm:$0xff] %v9177_v52 }
 0xd88   : > { %5249 = vrot.lane.b32.xlu1 %v4832_v23, %s6923_s25  ;;  %4875 = vrot.lane.b32.xlu0 %v4629_v39, %s6917_s18  ;;  %v4550_v39 = vsub.f32 %v8840_v49, %v9110_v7 }
 0xd8a   : > { %v9187_v11 = vpop.permute.xlu1 %4597  ;;  %v9189_v57 = vpop.permute.xlu0 %4691 }
 0xd8c   : > { %4877 = vrot.lane.b32.xlu1 %v4630_v24, %s6917_s18  ;;  %4939 = vrot.lane.b32.xlu0 %v4725_v31, %s6918_s19  ;;  %v4645_v24 = vsub.f32 %v8843_v38, %v9112_v37  ;;  %v4742_v38 = vsub.f32 %v8860_v17, %v9126_v40  ;;  %v4837_v37 = vsub.f32 %v8863_v61, %v9128_v2 }
 0xd8d   : > { %v4628_v61 = vadd.f32 %v9152_v50, %v8893_v43  ;;  %v4723_v40 = vadd.f32 %v9154_v10, %v8890_v48 }
 0xd8e   : > { %v9197_v20 = vpop.permute.xlu1 %4693  ;;  %v9199_v29 = vpop.permute.xlu0 %4787 }
 0xd90   : > { %4941 = vrot.lane.b32.xlu1 %v4726_v26, %s6918_s19  ;;  %5003 = vrot.lane.b32.xlu0 %v4821_v18, %s6919_s21  ;;  %v4646_v18 = vsub.f32 %v8853_v0, %v9118_v3  ;;  %v4627_v3 = vadd.f32 %v9145_v21, %v8883_v42 }
 0xd92   : > { %v9207_v1 = vpop.permute.xlu1 %4789  ;;  %v9209_v23 = vpop.permute.xlu0 %4495 }
 0xd93   : > { %10017 = vst [vmem:[#allocation52_spill] sm:$0xff] %v9209_v23 }
 0xd94   : > { %5005 = vrot.lane.b32.xlu1 %v4822_v4, %s6919_s21  ;;  %5067 = vrot.lane.b32.xlu0 %v4549_v14, %s6920_s22  ;;  %v4741_v14 = vsub.f32 %v8850_v59, %v9120_v58  ;;  %v4838_v59 = vsub.f32 %v8870_v47, %v9134_v32  ;;  %v4724_v32 = vadd.f32 %v9160_v16, %v8900_v13 }
 0xd96   : > { %v9217_v31 = vpop.permute.xlu1 %4497  ;;  %v9219_v26 = vpop.permute.xlu0 %4591 }
 0xd97   : > { %10018 = vst [vmem:[#allocation53_spill] sm:$0xff] %v9217_v31 }
 0xd98   : > { %5069 = vrot.lane.b32.xlu1 %v4550_v39, %s6920_s22  ;;  %5131 = vrot.lane.b32.xlu0 %v4645_v24, %s6921_s23  ;;  %v4819_v24 = vadd.f32 %v9162_v19, %v8903_v56 }
 0xd9a   : > { %v9227_v4 = vpop.permute.xlu1 %4593  ;;  %v9229_v7 = vpop.permute.xlu0 %4687 }
 0xd9c   : > { %5133 = vrot.lane.b32.xlu1 %v4646_v18, %s6921_s23  ;;  %5195 = vrot.lane.b32.xlu0 %v4741_v14, %s6922_s24 }
 0xd9e   : > { %v9237_v39 = vpop.permute.xlu1 %4689  ;;  %v9239_v0 = vpop.permute.xlu0 %4783 }
 0xda0   : > { %5197 = vrot.lane.b32.xlu1 %v4742_v38, %s6922_s24  ;;  %5259 = vrot.lane.b32.xlu0 %v4837_v37, %s6923_s25  ;;  %v4547_v38 = vsub.f32 %v8873_v27, %v9136_v55  ;;  %v4820_v37 = vadd.f32 %v9168_v30, %v8910_v35  ;;  %v4644_v55 = vsub.f32 %v8893_v43, %v9152_v50 }
 0xda2   : > { %v9247_v58 = vpop.permute.xlu1 %4785  ;;  %v9249_v17 = vpop.permute.xlu0 %4507 }
 0xda3   : > { %10019 = vst [vmem:[#allocation54_spill] sm:$0xff] %v9249_v17 }
 0xda4   : > { %5261 = vrot.lane.b32.xlu1 %v4838_v59, %s6923_s25  ;;  %4871 = vrot.lane.b32.xlu0 %v4627_v3, %s6917_s18 }
 0xda6   : > { %v9257_v2 = vpop.permute.xlu1 %4509  ;;  %v9259_v47 = vpop.permute.xlu0 %4603 }
 0xda7   : > { %10020 = vst [vmem:[#allocation55_spill] sm:$0xff] %v9257_v2 }
 0xda8   : > { %4873 = vrot.lane.b32.xlu1 %v4628_v61, %s6917_s18  ;;  %4935 = vrot.lane.b32.xlu0 %v4723_v40, %s6918_s19  ;;  %v4548_v61 = vsub.f32 %v8880_v44, %v9143_v46  ;;  %v4643_v40 = vsub.f32 %v8883_v42, %v9145_v21  ;;  %v4740_v42 = vsub.f32 %v8900_v13, %v9160_v16 }
 0xda9   : > { %v4835_v21 = vsub.f32 %v8903_v56, %v9162_v19  ;;  %v4634_v56 = vadd.f32 %v9187_v11, %v8933_v62  ;;  %v4825_v19 = vadd.f32 %v9199_v29, %v8943_v41 }
 0xdaa   : > { %v9267_v18 = vpop.permute.xlu1 %4605  ;;  %v9269_v14 = vpop.permute.xlu0 %4699 }
 0xdac   : > { %4937 = vrot.lane.b32.xlu1 %v4724_v32, %s6918_s19  ;;  %4999 = vrot.lane.b32.xlu0 %v4819_v24, %s6919_s21 }
 0xdae   : > { %v9277_v59 = vpop.permute.xlu1 %4701  ;;  %v9279_v3 = vpop.permute.xlu0 %4795 }
 0xdb0   : > { %5001 = vrot.lane.b32.xlu1 %v4820_v37, %s6919_s21  ;;  %5063 = vrot.lane.b32.xlu0 %v4547_v38, %s6920_s22  ;;  %v4739_v38 = vsub.f32 %v8890_v48, %v9154_v10  ;;  %v4836_v48 = vsub.f32 %v8910_v35, %v9168_v30  ;;  %v4729_v10 = vadd.f32 %v9189_v57, %v8930_v15 }
 0xdb1   : > { %v4730_v30 = vadd.f32 %v9197_v20, %v8940_v22 }
 0xdb2   : > { %v9287_v32 = vpop.permute.xlu1 %4797  ;;  %v9289_v24 = vpop.permute.xlu0 %4503 }
 0xdb3   : > { %10021 = vst [vmem:[#allocation56_spill] sm:$0xff] %v9289_v24 }
 0xdb4   : > { %5065 = vrot.lane.b32.xlu1 %v4548_v61, %s6920_s22  ;;  %5127 = vrot.lane.b32.xlu0 %v4643_v40, %s6921_s23 }
 0xdb6   : > { %v9297_v37 = vpop.permute.xlu1 %4505  ;;  %v9299_v46 = vpop.permute.xlu0 %4599 }
 0xdb7   : > { %10022 = vst [vmem:[#allocation57_spill] sm:$0xff] %v9297_v37 }
 0xdb8   : > { %5129 = vrot.lane.b32.xlu1 %v4644_v55, %s6921_s23  ;;  %5191 = vrot.lane.b32.xlu0 %v4739_v38, %s6922_s24  ;;  %v4633_v55 = vadd.f32 %v9179_v60, %v8923_v8 }
 0xdba   : > { %v9307_v61 = vpop.permute.xlu1 %4601  ;;  %v9309_v43 = vpop.permute.xlu0 %4695 }
 0xdbc   : > { %5193 = vrot.lane.b32.xlu1 %v4740_v42, %s6922_s24  ;;  %5255 = vrot.lane.b32.xlu0 %v4835_v21, %s6923_s25  ;;  %v4553_v42 = vsub.f32 %v8913_v45, %v9170_v34  ;;  %v4826_v21 = vadd.f32 %v9207_v1, %v8950_v9  ;;  %v4650_v34 = vsub.f32 %v8933_v62, %v9187_v11  ;;  %v10026_v45 = vld [vmem:[#allocation25_spill] sm:$0xff] }
 0xdbd   : > { %v4552_v44 = vsub.f32 %v10026_v45, %v9217_v31 }
 0xdbe   : > { %v9317_v50 = vpop.permute.xlu1 %4697  ;;  %v9319_v13 = vpop.permute.xlu0 %4791 }
 0xdc0   : > { %5257 = vrot.lane.b32.xlu1 %v4836_v48, %s6923_s25  ;;  %4883 = vrot.lane.b32.xlu0 %v4633_v55, %s6917_s18 }
 0xdc2   : > { %v9327_v16 = vpop.permute.xlu1 %4793  ;;  %v9329_v35 = vpop.permute.xlu0 %4867 }
 0xdc4   : > { %4885 = vrot.lane.b32.xlu1 %v4634_v56, %s6917_s18  ;;  %4947 = vrot.lane.b32.xlu0 %v4729_v10, %s6918_s19  ;;  %v4554_v56 = vsub.f32 %v8920_v36, %v9177_v52  ;;  %v4649_v10 = vsub.f32 %v8923_v8, %v9179_v60  ;;  %v4746_v8 = vsub.f32 %v8940_v22, %v9197_v20 }
 0xdc5   : > { %v4841_v60 = vsub.f32 %v8943_v41, %v9199_v29  ;;  %v4632_v41 = vadd.f32 %v9227_v4, %v8973_v51  ;;  %v4728_v29 = vadd.f32 %v9237_v39, %v8980_v53 }
 0xdc6   : > { %v9337_v40 = vpop.permute.xlu1 %4869  ;;  %v9339_v38 = vpop.permute.xlu0 %4931 }
 0xdc8   : > { %4949 = vrot.lane.b32.xlu1 %v4730_v30, %s6918_s19  ;;  %5011 = vrot.lane.b32.xlu0 %v4825_v19, %s6919_s21 }
 0xdca   : > { %v9347_v48 = vpop.permute.xlu1 %4933  ;;  %v9349_v55 = vpop.permute.xlu0 %4995 }
 0xdcc   : > { %5013 = vrot.lane.b32.xlu1 %v4826_v21, %s6919_s21  ;;  %5075 = vrot.lane.b32.xlu0 %v4553_v42, %s6920_s22  ;;  %v4745_v42 = vsub.f32 %v8930_v15, %v9189_v57  ;;  %v4842_v15 = vsub.f32 %v8950_v9, %v9207_v1  ;;  %v4727_v57 = vadd.f32 %v9229_v7, %v8970_v63  ;;  %v10023_v1 = vld [vmem:[#allocation26_spill] sm:$0xff] }
 0xdce   : > { %v9357_v30 = vpop.permute.xlu1 %4997  ;;  %v9359_v19 = vpop.permute.xlu0 %5059 }
 0xdd0   : > { %5077 = vrot.lane.b32.xlu1 %v4554_v56, %s6920_s22  ;;  %5139 = vrot.lane.b32.xlu0 %v4649_v10, %s6921_s23  ;;  %v4823_v10 = vadd.f32 %v9239_v0, %v10023_v1 }
 0xdd2   : > { %v9367_v21 = vpop.permute.xlu1 %5061  ;;  %v9369_v52 = vpop.permute.xlu0 %5123 }
 0xdd4   : > { %5141 = vrot.lane.b32.xlu1 %v4650_v34, %s6921_s23  ;;  %5203 = vrot.lane.b32.xlu0 %v4745_v42, %s6922_s24  ;;  %v4631_v34 = vadd.f32 %v9219_v26, %v8963_v5 }
 0xdd6   : > { %v9377_v56 = vpop.permute.xlu1 %5125  ;;  %v9379_v62 = vpop.permute.xlu0 %5187 }
 0xdd8   : > { %5205 = vrot.lane.b32.xlu1 %v4746_v8, %s6922_s24  ;;  %5267 = vrot.lane.b32.xlu0 %v4841_v60, %s6923_s25  ;;  %v10024_v60 = vld [vmem:[#allocation24_spill] sm:$0xff] }
 0xdda   : > { %v9387_v11 = vpop.permute.xlu1 %5189  ;;  %v9389_v22 = vpop.permute.xlu0 %5251 }
 0xddc   : > { %5269 = vrot.lane.b32.xlu1 %v4842_v15, %s6923_s25  ;;  %4879 = vrot.lane.b32.xlu0 %v4631_v34, %s6917_s18  ;;  %v4551_v15 = vsub.f32 %v10024_v60, %v9209_v23  ;;  %v10025_v34 = vld [vmem:[#allocation27_spill] sm:$0xff]  ;;  %v4648_v60 = vsub.f32 %v8973_v51, %v9227_v4 }
 0xdde   : > { %v9397_v20 = vpop.permute.xlu1 %5253  ;;  %v9399_v9 = vpop.permute.xlu0 %4863 }
 0xde0   : > { %4881 = vrot.lane.b32.xlu1 %v4632_v41, %s6917_s18  ;;  %4943 = vrot.lane.b32.xlu0 %v4727_v57, %s6918_s19  ;;  %v4824_v41 = vadd.f32 %v9247_v58, %v10025_v34 }
 0xde2   : > { %v9407_v42 = vpop.permute.xlu1 %4865  ;;  %v9409_v8 = vpop.permute.xlu0 %4927 }
 0xde4   : > { %4945 = vrot.lane.b32.xlu1 %v4728_v29, %s6918_s19  ;;  %5007 = vrot.lane.b32.xlu0 %v4823_v10, %s6919_s21  ;;  %v4647_v29 = vsub.f32 %v8963_v5, %v9219_v26  ;;  %v4744_v5 = vsub.f32 %v8980_v53, %v9237_v39  ;;  %v10030_v39 = vld [vmem:[#allocation32_spill] sm:$0xff] }
 0xde6   : > { %v9417_v57 = vpop.permute.xlu1 %4929  ;;  %v9419_v36 = vpop.permute.xlu0 %4991 }
 0xde8   : > { %5009 = vrot.lane.b32.xlu1 %v4824_v41, %s6919_s21  ;;  %5071 = vrot.lane.b32.xlu0 %v4551_v15, %s6920_s22  ;;  %v4743_v15 = vsub.f32 %v8970_v63, %v9229_v7  ;;  %v4840_v63 = vsub.f32 %v10025_v34, %v9247_v58  ;;  %v10028_v7 = vld [vmem:[#allocation30_spill] sm:$0xff]  ;;  %v10033_v34 = vld [vmem:[#allocation33_spill] sm:$0xff] }
 0xde9   : > { %v4637_v4 = vadd.f32 %v9259_v47, %v10028_v7 }
 0xdea   : > { %v9427_v10 = vpop.permute.xlu1 %4993  ;;  %v9429_v23 = vpop.permute.xlu0 %5055 }
 0xdec   : > { %5073 = vrot.lane.b32.xlu1 %v4552_v44, %s6920_s22  ;;  %5135 = vrot.lane.b32.xlu0 %v4647_v29, %s6921_s23  ;;  %v4839_v44 = vsub.f32 %v10023_v1, %v9239_v0  ;;  %v4638_v0 = vadd.f32 %v9267_v18, %v10030_v39  ;;  %v10031_v1 = vld [vmem:[#allocation31_spill] sm:$0xff] }
 0xded   : > { %v4733_v29 = vadd.f32 %v9269_v14, %v10031_v1 }
 0xdee   : > { %v9437_v41 = vpop.permute.xlu1 %5057  ;;  %v9439_v31 = vpop.permute.xlu0 %5119 }
 0xdf0   : > { %5137 = vrot.lane.b32.xlu1 %v4648_v60, %s6921_s23  ;;  %5199 = vrot.lane.b32.xlu0 %v4743_v15, %s6922_s24 }
 0xdf2   : > { %v9447_v26 = vpop.permute.xlu1 %5121  ;;  %v9449_v51 = vpop.permute.xlu0 %5183 }
 0xdf3   : > { %10027 = vst [vmem:[#allocation26_spill] sm:$0xff] %v9447_v26 }
 0xdf4   : > { %5201 = vrot.lane.b32.xlu1 %v4744_v5, %s6922_s24  ;;  %5263 = vrot.lane.b32.xlu0 %v4839_v44, %s6923_s25  ;;  %v4734_v5 = vadd.f32 %v9277_v59, %v10033_v34  ;;  %v10034_v44 = vld [vmem:[#allocation34_spill] sm:$0xff] }
 0xdf6   : > { %v9457_v60 = vpop.permute.xlu1 %5185  ;;  %v9459_v53 = vpop.permute.xlu0 %5247 }
 0xdf7   : > { %10029 = vst [vmem:[#allocation27_spill] sm:$0xff] %v9457_v60 }
 0xdf8   : > { %5265 = vrot.lane.b32.xlu1 %v4840_v63, %s6923_s25  ;;  %4891 = vrot.lane.b32.xlu0 %v4637_v4, %s6917_s18  ;;  %v4829_v63 = vadd.f32 %v9279_v3, %v10034_v44 }
 0xdfa   : > { %v9467_v15 = vpop.permute.xlu1 %5249  ;;  %v9469_v58 = vpop.permute.xlu0 %4875 }
 0xdfb   : > { %10032 = vst [vmem:[#allocation30_spill] sm:$0xff] %v9467_v15  ;;  %v10036_v15 = vld [vmem:[#allocation28_spill] sm:$0xff] }
 0xdfc   : > { %4893 = vrot.lane.b32.xlu1 %v4638_v0, %s6917_s18  ;;  %4955 = vrot.lane.b32.xlu0 %v4733_v29, %s6918_s19  ;;  %v4557_v60 = vsub.f32 %v10036_v15, %v9249_v17  ;;  %v10037_v0 = vld [vmem:[#allocation35_spill] sm:$0xff]  ;;  %v4654_v15 = vsub.f32 %v10030_v39, %v9267_v18 }
 0xdfd   : > { %v4830_v29 = vadd.f32 %v9287_v32, %v10037_v0 }
 0xdfe   : > { %v9477_v4 = vpop.permute.xlu1 %4877  ;;  %v9479_v45 = vpop.permute.xlu0 %4939 }
 0xdff   : > { %10035 = vst [vmem:[#allocation32_spill] sm:$0xff] %v9477_v4  ;;  %v10039_v4 = vld [vmem:[#allocation29_spill] sm:$0xff] }
 0xe00   : > { %4957 = vrot.lane.b32.xlu1 %v4734_v5, %s6918_s19  ;;  %5019 = vrot.lane.b32.xlu0 %v4829_v63, %s6919_s21  ;;  %v4558_v49 = vsub.f32 %v10039_v4, %v9257_v2  ;;  %v4653_v5 = vsub.f32 %v10028_v7, %v9259_v47  ;;  %v4750_v47 = vsub.f32 %v10033_v34, %v9277_v59  ;;  %v10049_v34 = vld [vmem:[#allocation42_spill] sm:$0xff] }
 0xe01   : > { %v4732_v4 = vadd.f32 %v9317_v50, %v10049_v34 }
 0xe02   : > { %v9487_v26 = vpop.permute.xlu1 %4941  ;;  %v9489_v27 = vpop.permute.xlu0 %5003 }
 0xe03   : > { %10038 = vst [vmem:[#allocation31_spill] sm:$0xff] %v9487_v26 }
 0xe04   : > { %5021 = vrot.lane.b32.xlu1 %v4830_v29, %s6919_s21  ;;  %5083 = vrot.lane.b32.xlu0 %v4557_v60, %s6920_s22  ;;  %v4749_v60 = vsub.f32 %v10031_v1, %v9269_v14  ;;  %v10045_v14 = vld [vmem:[#allocation41_spill] sm:$0xff]  ;;  %v10046_v1 = vld [vmem:[#allocation40_spill] sm:$0xff] }
 0xe05   : > { %v4636_v39 = vadd.f32 %v9307_v61, %v10045_v14 }
 0xe06   : > { %v9497_v63 = vpop.permute.xlu1 %5005  ;;  %v9499_v17 = vpop.permute.xlu0 %5067 }
 0xe07   : > { %10040 = vst [vmem:[#allocation33_spill] sm:$0xff] %v9497_v63 }
 0xe08   : > { %5085 = vrot.lane.b32.xlu1 %v4558_v49, %s6920_s22  ;;  %5147 = vrot.lane.b32.xlu0 %v4653_v5, %s6921_s23  ;;  %v10042_v49 = vld [vmem:[#allocation38_spill] sm:$0xff] }
 0xe09   : > { %v4635_v7 = vadd.f32 %v9299_v46, %v10042_v49 }
 0xe0a   : > { %v9507_v29 = vpop.permute.xlu1 %5069  ;;  %v9509_v2 = vpop.permute.xlu0 %5131 }
 0xe0b   : > { %10041 = vst [vmem:[#allocation34_spill] sm:$0xff] %v9507_v29 }
 0xe0c   : > { %5149 = vrot.lane.b32.xlu1 %v4654_v15, %s6921_s23  ;;  %5211 = vrot.lane.b32.xlu0 %v4749_v60, %s6922_s24  ;;  %v4731_v15 = vadd.f32 %v9309_v43, %v10046_v1 }
 0xe0e   : > { %v9517_v5 = vpop.permute.xlu1 %5133  ;;  %v9519_v18 = vpop.permute.xlu0 %5195 }
 0xe0f   : > { %10043 = vst [vmem:[#allocation35_spill] sm:$0xff] %v9517_v5  ;;  %10044 = vst [vmem:[#allocation38_spill] sm:$0xff] %v9519_v18 }
 0xe10   : > { %5213 = vrot.lane.b32.xlu1 %v4750_v47, %s6922_s24  ;;  %4887 = vrot.lane.b32.xlu0 %v4635_v7, %s6917_s18  ;;  %v10050_v47 = vld [vmem:[#allocation43_spill] sm:$0xff] }
 0xe11   : > { %v4827_v7 = vadd.f32 %v9319_v13, %v10050_v47 }
 0xe12   : > { %v9527_v60 = vpop.permute.xlu1 %5197  ;;  %v9529_v59 = vpop.permute.xlu0 %5259 }
 0xe13   : > { %10047 = vst [vmem:[#allocation41_spill] sm:$0xff] %v9527_v60  ;;  %10048 = vst [vmem:[#allocation40_spill] sm:$0xff] %v9529_v59  ;;  %v10052_v60 = vld [vmem:[#allocation36_spill] sm:$0xff] }
 0xe14   : > { %4889 = vrot.lane.b32.xlu1 %v4636_v39, %s6917_s18  ;;  %4951 = vrot.lane.b32.xlu0 %v4731_v15, %s6918_s19  ;;  %v4555_v59 = vsub.f32 %v10052_v60, %v9289_v24  ;;  %v10053_v39 = vld [vmem:[#allocation44_spill] sm:$0xff]  ;;  %v4652_v60 = vsub.f32 %v10045_v14, %v9307_v61  ;;  %v10057_v61 = vld [vmem:[#allocation45_spill] sm:$0xff]  ;;  %v10058_v14 = vld [vmem:[#allocation46_spill] sm:$0xff] }
 0xe15   : > { %v4828_v15 = vadd.f32 %v9327_v16, %v10053_v39 }
 0xe16   : > { %v9537_v5 = vpop.permute.xlu1 %5261  ;;  %v9539_v29 = vpop.permute.xlu0 %4871 }
 0xe17   : > { %10051 = vst [vmem:[#allocation42_spill] sm:$0xff] %v9537_v5  ;;  %v10054_v5 = vld [vmem:[#allocation37_spill] sm:$0xff] }
 0xe18   : > { %4953 = vrot.lane.b32.xlu1 %v4732_v4, %s6918_s19  ;;  %5015 = vrot.lane.b32.xlu0 %v4827_v7, %s6919_s21  ;;  %v4556_v26 = vsub.f32 %v10054_v5, %v9297_v37  ;;  %v4651_v4 = vsub.f32 %v10042_v49, %v9299_v46  ;;  %v10055_v46 = vld [vmem:[#allocation18_spill] sm:$0xff]  ;;  %v10056_v49 = vld [vmem:[#allocation39_spill] sm:$0xff] }
 0xe19   : > { %v4529_v5 = vadd.f32 %v10056_v49, %v10055_v46  ;;  %v4748_v46 = vsub.f32 %v10049_v34, %v9317_v50  ;;  %v10061_v49 = vld [vmem:[#allocation20_spill] sm:$0xff] }
 0xe1a   : > { %v9547_v63 = vpop.permute.xlu1 %4873  ;;  %v9549_v18 = vpop.permute.xlu0 %4935 }
 0xe1c   : > { %5017 = vrot.lane.b32.xlu1 %v4828_v15, %s6919_s21  ;;  %5079 = vrot.lane.b32.xlu0 %v4555_v59, %s6920_s22  ;;  %v4747_v59 = vsub.f32 %v10046_v1, %v9309_v43  ;;  %v4527_v43 = vadd.f32 %v10057_v61, %v8793_v33  ;;  %v4528_v1 = vadd.f32 %v10058_v14, %v8800_v12  ;;  %v10063_v61 = vld [vmem:[#allocation26_spill] sm:$0xff]  ;;  %v10064_v14 = vld [vmem:[#allocation27_spill] sm:$0xff] }
 0xe1d   : > { %v4533_v12 = vadd.f32 %v9104_v6, %v8833_v54  ;;  %v4846_v54 = vsub.f32 %v10037_v0, %v9287_v32 }
 0xe1e   : > { %v9557_v7 = vpop.permute.xlu1 %4937  ;;  %v9559_v24 = vpop.permute.xlu0 %4999  ;;  %v5296_v34 = vsel %vm5295_vm2, %v4527_v43, %v9399_v9 }
 0xe20   : > { %5081 = vrot.lane.b32.xlu1 %v4556_v26, %s6920_s22  ;;  %5143 = vrot.lane.b32.xlu0 %v4651_v4, %s6921_s23  ;;  %v4530_v26 = vadd.f32 %v9057_v28, %v8760_v25  ;;  %v5298_v4 = vsel %vm5295_vm2, %v4529_v5, %v9329_v35  ;;  %v4843_v25 = vsub.f32 %v10050_v47, %v9319_v13 }
 0xe21   : > { %v5315_v28 = vsel %vm5312_vm3, %v5298_v4, %v9339_v38  ;;  %v4845_v35 = vsub.f32 %v10034_v44, %v9279_v3  ;;  %v10065_v4 = vld [vmem:[#allocation32_spill] sm:$0xff] }
 0xe22   : > { %v9567_v15 = vpop.permute.xlu1 %5001  ;;  %v9569_v37 = vpop.permute.xlu0 %5063  ;;  %v5299_v50 = vsel %vm5295_vm2, %v4530_v26, %v9337_v40  ;;  %v5332_v13 = vsel %vm5329_vm4, %v5315_v28, %v9349_v55  ;;  %v5313_v40 = vsel %vm5312_vm3, %v5296_v34, %v9409_v8  ;;  %v10066_v28 = vld [vmem:[#allocation30_spill] sm:$0xff] }
 0xe23   : > { %v5316_v38 = vsel %vm5312_vm3, %v5299_v50, %v9347_v48  ;;  %v5349_v5 = vsel %vm5346_vm5, %v5332_v13, %v9359_v19  ;;  %v4844_v48 = vsub.f32 %v10053_v39, %v9327_v16  ;;  %v5330_v32 = vsel %vm5329_vm4, %v5313_v40, %v9419_v36  ;;  %v10059_v39 = vld [vmem:[#allocation19_spill] sm:$0xff]  ;;  %v10068_v50 = vld [vmem:[#allocation38_spill] sm:$0xff]  ;;  %v10072_v40 = vld [vmem:[#allocation40_spill] sm:$0xff] }
 0xe24   : > { %5145 = vrot.lane.b32.xlu1 %v4652_v60, %s6921_s23  ;;  %5207 = vrot.lane.b32.xlu0 %v4747_v59, %s6922_s24  ;;  %v5333_v6 = vsel %vm5329_vm4, %v5316_v38, %v9357_v30  ;;  %v5366_v3 = vsel %vm5363_vm6, %v5349_v5, %v9369_v52  ;;  %v5297_v16 = vsel %vm5295_vm2, %v4528_v1, %v9407_v42 }
 0xe25   : > { %v5350_v55 = vsel %vm5346_vm5, %v5333_v6, %v9367_v21  ;;  %v5383_v19 = vsel %vm5380_vm7, %v5366_v3, %v9379_v62  ;;  %v5347_v21 = vsel %vm5346_vm5, %v5330_v32, %v9429_v23  ;;  %v5314_v36 = vsel %vm5312_vm3, %v5297_v16, %v9417_v57  ;;  %v10070_v6 = vld [vmem:[#allocation49_spill] sm:$0xff] }
 0xe26   : > { %v9589_v60 = vpop.permute.xlu1 %5065  ;;  %v9591_v33 = vpop.permute.xlu0 %5127  ;;  %v5367_v52 = vsel %vm5363_vm6, %v5350_v55, %v9377_v56  ;;  %v5400_v8 = vsel %vm5397_vm8, %v5383_v19, %v9389_v22  ;;  %v5364_v44 = vsel %vm5363_vm6, %v5347_v21, %v9439_v31  ;;  %v5331_v22 = vsel %vm5329_vm4, %v5314_v36, %v9427_v10  ;;  %v10060_v10 = vld [vmem:[#allocation47_spill] sm:$0xff]  ;;  %v10071_v3 = vld [vmem:[#allocation33_spill] sm:$0xff]  ;;  %v10073_v19 = vld [vmem:[#allocation34_spill] sm:$0xff] }
 0xe27   : > { %v5384_v62 = vsel %vm5380_vm7, %v5367_v52, %v9387_v11  ;;  %v5381_v23 = vsel %vm5380_vm7, %v5364_v44, %v9449_v51  ;;  %v5302_v11 = vsel %vm5295_vm2, %v4533_v12, %v9469_v58  ;;  %v5416_v42 = vmul.f32 0.35355338, %v5400_v8  ;;  %v10062_v51 = vld [vmem:[#allocation48_spill] sm:$0xff]  ;;  %v10074_v8 = vld [vmem:[#allocation35_spill] sm:$0xff] }
 0xe28   : > { %5209 = vrot.lane.b32.xlu1 %v4748_v46, %s6922_s24  ;;  %5271 = vrot.lane.b32.xlu0 %v4843_v25, %s6923_s25  ;;  %v5401_v56 = vsel %vm5397_vm8, %v5384_v62, %v9397_v20  ;;  %v5348_v31 = vsel %vm5346_vm5, %v5331_v22, %v9437_v41  ;;  %v5398_v57 = vsel %vm5397_vm8, %v5381_v23, %v9459_v53  ;;  %v10075_v62 = vld [vmem:[#allocation41_spill] sm:$0xff] }
 0xe29   : > { %v5319_v0 = vsel %vm5312_vm3, %v5302_v11, %v9479_v45  ;;  %v4534_v59 = vadd.f32 %v10060_v10, %v10059_v39  ;;  %v4531_v26 = vadd.f32 %v10062_v51, %v10061_v49  ;;  %v5365_v58 = vsel %vm5363_vm6, %v5348_v31, %v10063_v61  ;;  %v10076_v11 = vld [vmem:[#allocation42_spill] sm:$0xff] }
 0xe2a   : > { %v9625_v9 = vpop.permute.xlu1 %5129  ;;  %v5192_v30 = vpop.permute.xlu0 %5191  ;;  %v5336_v41 = vsel %vm5329_vm4, %v5319_v0, %v9489_v27  ;;  %v5417_v43 = vmul.f32 0.35355338, %v5401_v56  ;;  %v5382_v53 = vsel %vm5380_vm7, %v5365_v58, %v10064_v14  ;;  %v5414_v1 = vmul.f32 0.35355338, %v5398_v57  ;;  %v10079_v14 = vld [vmem:[#allocation23_spill] sm:$0xff] }
 0xe2b   : > { %v5353_v45 = vsel %vm5346_vm5, %v5336_v41, %v9499_v17  ;;  %v5303_v46 = vsel %vm5295_vm2, %v4534_v59, %v10065_v4  ;;  %v5300_v27 = vsel %vm5295_vm2, %v4531_v26, %v9539_v29  ;;  %v5399_v12 = vsel %vm5397_vm8, %v5382_v53, %v10066_v28  ;;  %v10078_v26 = vld [vmem:[#allocation50_spill] sm:$0xff]  ;;  %v10080_v53 = vld [vmem:[#allocation51_spill] sm:$0xff] }
 0xe2c   : > { %5273 = vrot.lane.b32.xlu1 %v4844_v48, %s6923_s25  ;;  %5275 = vrot.lane.b32.xlu0 %v4845_v35, %s6923_s25  ;;  %v5370_v25 = vsel %vm5363_vm6, %v5353_v45, %v9509_v2  ;;  %v10067_v35 = vld [vmem:[#allocation31_spill] sm:$0xff]  ;;  %v5317_v38 = vsel %vm5312_vm3, %v5300_v27, %v9549_v18  ;;  %v5415_v52 = vmul.f32 0.35355338, %v5399_v12  ;;  %v4538_v45 = vadd.f32 %v10080_v53, %v10079_v14 }
 0xe2d   : > { %v5320_v17 = vsel %vm5312_vm3, %v5303_v46, %v10067_v35  ;;  %v5387_v13 = vsel %vm5380_vm7, %v5370_v25, %v10068_v50  ;;  %v5334_v55 = vsel %vm5329_vm4, %v5317_v38, %v9559_v24 }
 0xe2e   : > { %v5194_v20 = vpop.permute.xlu1 %5193  ;;  %v5256_v47 = vpop.permute.xlu0 %5255  ;;  %v5337_v29 = vsel %vm5329_vm4, %v5320_v17, %v10071_v3  ;;  %v5404_v48 = vsel %vm5397_vm8, %v5387_v13, %v10072_v40  ;;  %v5351_v18 = vsel %vm5346_vm5, %v5334_v55, %v9569_v37 }
 0xe2f   : > { %v5354_v32 = vsel %vm5346_vm5, %v5337_v29, %v10073_v19  ;;  %v5368_v24 = vsel %vm5363_vm6, %v5351_v18, %v9591_v33  ;;  %v5420_v44 = vmul.f32 0.35355338, %v5404_v48 }
 0xe30   : > { %5277 = vrot.lane.b32.xlu1 %v4846_v54, %s6923_s25  ;;  %5450 = vrot.lane.b32.xlu0 %v5416_v42, %s6924_s26  ;;  %v10069_v54 = vld [vmem:[#allocation21_spill] sm:$0xff]  ;;  %v5371_v16 = vsel %vm5363_vm6, %v5354_v32, %v10074_v8  ;;  %v5385_v56 = vsel %vm5380_vm7, %v5368_v24, %v5192_v30  ;;  %v10081_v8 = vld [vmem:[#allocation24_spill] sm:$0xff] }
 0xe31   : > { %v4532_v2 = vadd.f32 %v10070_v6, %v10069_v54  ;;  %v5388_v36 = vsel %vm5380_vm7, %v5371_v16, %v10075_v62  ;;  %v5402_v31 = vsel %vm5397_vm8, %v5385_v56, %v5256_v47  ;;  %v10082_v16 = vld [vmem:[#allocation52_spill] sm:$0xff]  ;;  %v10084_v56 = vld [vmem:[#allocation53_spill] sm:$0xff] }
 0xe32   : > { %v5258_v5 = vpop.permute.xlu1 %5257  ;;  %v4884_v34 = vpop.permute.xlu0 %4883  ;;  %v5405_v42 = vsel %vm5397_vm8, %v5388_v36, %v10076_v11  ;;  %v5418_v0 = vmul.f32 0.35355338, %v5402_v31 }
 0xe33   : > { %v5301_v21 = vsel %vm5295_vm2, %v4532_v2, %v9547_v63  ;;  %v5421_v30 = vmul.f32 0.35355338, %v5405_v42 }
 0xe34   : > { %5452 = vrot.lane.b32.xlu1 %v5417_v43, %s6924_s26  ;;  %5446 = vrot.lane.b32.xlu0 %v5414_v1, %s6924_s26  ;;  %v5318_v37 = vsel %vm5312_vm3, %v5301_v21, %v9557_v7  ;;  %v4535_v21 = vadd.f32 %v10082_v16, %v10081_v8 }
 0xe35   : > { %v5335_v63 = vsel %vm5329_vm4, %v5318_v37, %v9567_v15  ;;  %v10083_v37 = vld [vmem:[#allocation25_spill] sm:$0xff] }
 0xe36   : > { %v4886_v22 = vpop.permute.xlu1 %4885  ;;  %v4948_v23 = vpop.permute.xlu0 %4947  ;;  %v5352_v33 = vsel %vm5346_vm5, %v5335_v63, %v9589_v60 }
 0xe37   : > { %v5369_v7 = vsel %vm5363_vm6, %v5352_v33, %v9625_v9  ;;  %v10077_v9 = vld [vmem:[#allocation22_spill] sm:$0xff]  ;;  %v5307_v46 = vsel %vm5295_vm2, %v4538_v45, %v4886_v22  ;;  %v4536_v22 = vadd.f32 %v10084_v56, %v10083_v37  ;;  %v10091_v37 = vld [vmem:[#allocation29_spill] sm:$0xff]  ;;  %v10092_v56 = vld [vmem:[#allocation55_spill] sm:$0xff] }
 0xe38   : > { %5448 = vrot.lane.b32.xlu1 %v5415_v52, %s6924_s26  ;;  %5458 = vrot.lane.b32.xlu0 %v5420_v44, %s6924_s26  ;;  %v5386_v57 = vsel %vm5380_vm7, %v5369_v7, %v5194_v20  ;;  %v4537_v61 = vadd.f32 %v10078_v26, %v10077_v9 }
 0xe39   : > { %v5403_v15 = vsel %vm5397_vm8, %v5386_v57, %v5258_v5 }
 0xe3a   : > { %v4950_v39 = vpop.permute.xlu1 %4949  ;;  %v5012_v10 = vpop.permute.xlu0 %5011  ;;  %v5419_v60 = vmul.f32 0.35355338, %v5403_v15  ;;  %v5306_v20 = vsel %vm5295_vm2, %v4537_v61, %v4884_v34 }
 0xe3b   : > { %v5323_v58 = vsel %vm5312_vm3, %v5306_v20, %v4948_v23  ;;  %v5324_v27 = vsel %vm5312_vm3, %v5307_v46, %v4950_v39 }
 0xe3c   : > { %5460 = vrot.lane.b32.xlu1 %v5421_v30, %s6924_s26  ;;  %5454 = vrot.lane.b32.xlu0 %v5418_v0, %s6924_s26  ;;  %v5340_v1 = vsel %vm5329_vm4, %v5323_v58, %v5012_v10 }
 0xe3e   : > { %v5014_v47 = vpop.permute.xlu1 %5013  ;;  %v5076_v59 = vpop.permute.xlu0 %5075 }
 0xe3f   : > { %v5357_v4 = vsel %vm5346_vm5, %v5340_v1, %v5076_v59  ;;  %v5341_v17 = vsel %vm5329_vm4, %v5324_v27, %v5014_v47 }
 0xe40   : > { %5456 = vrot.lane.b32.xlu1 %v5419_v60, %s6924_s26 }
 0xe42   : > { %v5078_v49 = vpop.permute.xlu1 %5077  ;;  %v5140_v51 = vpop.permute.xlu0 %5139 }
 0xe43   : > { %v5374_v25 = vsel %vm5363_vm6, %v5357_v4, %v5140_v51  ;;  %v5358_v13 = vsel %vm5346_vm5, %v5341_v17, %v5078_v49 }
 0xe46   : > { %v5142_v41 = vpop.permute.xlu1 %5141  ;;  %v5204_v43 = vpop.permute.xlu0 %5203 }
 0xe47   : > { %v5391_v28 = vsel %vm5380_vm7, %v5374_v25, %v5204_v43  ;;  %v5375_v5 = vsel %vm5363_vm6, %v5358_v13, %v5142_v41  ;;  %v10085_v13 = vld [vmem:[#allocation36_spill] sm:$0xff] }
 0xe4a   : > { %v5206_v12 = vpop.permute.xlu1 %5205  ;;  %v5268_v35 = vpop.permute.xlu0 %5267 }
 0xe4b   : > { %v5408_v50 = vsel %vm5397_vm8, %v5391_v28, %v5268_v35  ;;  %v5392_v34 = vsel %vm5380_vm7, %v5375_v5, %v5206_v12 }
 0xe4c   : > { %v5424_v38 = vmul.f32 0.35355338, %v5408_v50 }
 0xe4e   : > { %v5270_v54 = vpop.permute.xlu1 %5269  ;;  %5466 = vrot.lane.b32.xlu0 %v5424_v38, %s6924_s26  ;;  %v4880_v6 = vpop.permute.xlu0 %4879  ;;  %v10086_v38 = vld [vmem:[#allocation56_spill] sm:$0xff] }
 0xe4f   : > { %v5409_v2 = vsel %vm5397_vm8, %v5392_v34, %v5270_v54  ;;  %v5304_v24 = vsel %vm5295_vm2, %v4535_v21, %v4880_v6  ;;  %v4539_v5 = vadd.f32 %v10086_v38, %v10085_v13  ;;  %v10097_v13 = vld [vmem:[#allocation6_spill] sm:$0xff] }
 0xe50   : > { %v5425_v3 = vmul.f32 0.35355338, %v5409_v2 }
 0xe52   : > { %5468 = vrot.lane.b32.xlu1 %v5425_v3, %s6924_s26  ;;  %v4882_v29 = vpop.permute.xlu1 %4881  ;;  %v4944_v40 = vpop.permute.xlu0 %4943  ;;  %v10087_v3 = vld [vmem:[#allocation28_spill] sm:$0xff] }
 0xe53   : > { %v5321_v62 = vsel %vm5312_vm3, %v5304_v24, %v4944_v40  ;;  %v5305_v42 = vsel %vm5295_vm2, %v4536_v22, %v4882_v29  ;;  %v10088_v29 = vld [vmem:[#allocation54_spill] sm:$0xff]  ;;  %v4542_v22 = vadd.f32 %v10092_v56, %v10091_v37  ;;  %v10105_v56 = vld [vmem:[#allocation15_spill] sm:$0xff] }
 0xe54   : > { %v4541_v40 = vadd.f32 %v10088_v29, %v10087_v3 }
 0xe56   : > { %v4946_v48 = vpop.permute.xlu1 %4945  ;;  %v5008_v55 = vpop.permute.xlu0 %5007 }
 0xe57   : > { %v5338_v23 = vsel %vm5329_vm4, %v5321_v62, %v5008_v55  ;;  %v5322_v31 = vsel %vm5312_vm3, %v5305_v42, %v4946_v48  ;;  %v10089_v48 = vld [vmem:[#allocation37_spill] sm:$0xff] }
 0xe58   : > { %v10090_v55 = vld [vmem:[#allocation57_spill] sm:$0xff] }
 0xe5a   : > { %v5010_v19 = vpop.permute.xlu1 %5009  ;;  %v5072_v32 = vpop.permute.xlu0 %5071 }
 0xe5b   : > { %v5355_v11 = vsel %vm5346_vm5, %v5338_v23, %v5072_v32  ;;  %v5339_v57 = vsel %vm5329_vm4, %v5322_v31, %v5010_v19  ;;  %v4540_v19 = vadd.f32 %v10090_v55, %v10089_v48 }
 0xe5e   : > { %v5074_v18 = vpop.permute.xlu1 %5073  ;;  %v5136_v52 = vpop.permute.xlu0 %5135 }
 0xe5f   : > { %v5372_v63 = vsel %vm5363_vm6, %v5355_v11, %v5136_v52  ;;  %v5356_v39 = vsel %vm5346_vm5, %v5339_v57, %v5074_v18 }
 0xe62   : > { %v5138_v36 = vpop.permute.xlu1 %5137  ;;  %v5200_v44 = vpop.permute.xlu0 %5199 }
 0xe63   : > { %v5389_v33 = vsel %vm5380_vm7, %v5372_v63, %v5200_v44  ;;  %v5373_v15 = vsel %vm5363_vm6, %v5356_v39, %v5138_v36 }
 0xe66   : > { %v5202_v7 = vpop.permute.xlu1 %5201  ;;  %v5264_v30 = vpop.permute.xlu0 %5263 }
 0xe67   : > { %v5406_v0 = vsel %vm5397_vm8, %v5389_v33, %v5264_v30  ;;  %v5390_v60 = vsel %vm5380_vm7, %v5373_v15, %v5202_v7 }
 0xe68   : > { %v5422_v10 = vmul.f32 0.35355338, %v5406_v0 }
 0xe6a   : > { %v5266_v47 = vpop.permute.xlu1 %5265  ;;  %5462 = vrot.lane.b32.xlu0 %v5422_v10, %s6924_s26  ;;  %v4892_v59 = vpop.permute.xlu0 %4891 }
 0xe6b   : > { %v5407_v49 = vsel %vm5397_vm8, %v5390_v60, %v5266_v47  ;;  %v5310_v52 = vsel %vm5295_vm2, %v4541_v40, %v4892_v59  ;;  %v10100_v40 = vld [vmem:[#allocation9_spill] sm:$0xff] }
 0xe6c   : > { %v5423_v51 = vmul.f32 0.35355338, %v5407_v49 }
 0xe6e   : > { %5464 = vrot.lane.b32.xlu1 %v5423_v51, %s6924_s26  ;;  %v4894_v9 = vpop.permute.xlu1 %4893  ;;  %v4956_v26 = vpop.permute.xlu0 %4955 }
 0xe6f   : > { %v5327_v21 = vsel %vm5312_vm3, %v5310_v52, %v4956_v26  ;;  %v5311_v7 = vsel %vm5295_vm2, %v4542_v22, %v4894_v9  ;;  %v10102_v52 = vld [vmem:[#allocation12_spill] sm:$0xff] }
 0xe72   : > { %v4958_v61 = vpop.permute.xlu1 %4957  ;;  %v5020_v20 = vpop.permute.xlu0 %5019 }
 0xe73   : > { %v5344_v23 = vsel %vm5329_vm4, %v5327_v21, %v5020_v20  ;;  %v5328_v0 = vsel %vm5312_vm3, %v5311_v7, %v4958_v61  ;;  %v10103_v21 = vld [vmem:[#allocation11_spill] sm:$0xff] }
 0xe76   : > { %v5022_v58 = vpop.permute.xlu1 %5021  ;;  %v5084_v41 = vpop.permute.xlu0 %5083 }
 0xe77   : > { %v5361_v63 = vsel %vm5346_vm5, %v5344_v23, %v5084_v41  ;;  %v5345_v47 = vsel %vm5329_vm4, %v5328_v0, %v5022_v58 }
 0xe7a   : > { %v5086_v43 = vpop.permute.xlu1 %5085  ;;  %v5148_v14 = vpop.permute.xlu0 %5147 }
 0xe7b   : > { %v5378_v30 = vsel %vm5363_vm6, %v5361_v63, %v5148_v14  ;;  %v5362_v51 = vsel %vm5346_vm5, %v5345_v47, %v5086_v43  ;;  %v10093_v14 = vld [vmem:[#allocation2_spill] sm:$0xff] }
 0xe7e   : > { %v5150_v53 = vpop.permute.xlu1 %5149  ;;  %v5212_v45 = vpop.permute.xlu0 %5211 }
 0xe7f   : > { %v5395_v39 = vsel %vm5380_vm7, %v5378_v30, %v5212_v45  ;;  %v5379_v61 = vsel %vm5363_vm6, %v5362_v51, %v5150_v53  ;;  %v10108_v30 = vld [vmem:[#allocation16_spill] sm:$0xff] }
 0xe82   : > { %v5214_v1 = vpop.permute.xlu1 %5213  ;;  %v4888_v4 = vpop.permute.xlu0 %4887 }
 0xe83   : > { %v5308_v34 = vsel %vm5295_vm2, %v4539_v5, %v4888_v4  ;;  %v5396_v20 = vsel %vm5380_vm7, %v5379_v61, %v5214_v1 }
 0xe86   : > { %v4890_v46 = vpop.permute.xlu1 %4889  ;;  %v4952_v25 = vpop.permute.xlu0 %4951 }
 0xe87   : > { %v5325_v54 = vsel %vm5312_vm3, %v5308_v34, %v4952_v25  ;;  %v5309_v8 = vsel %vm5295_vm2, %v4540_v19, %v4890_v46  ;;  %v10094_v46 = vld [vmem:[#allocation4_spill] sm:$0xff]  ;;  %v10101_v19 = vld [vmem:[#allocation10_spill] sm:$0xff] }
 0xe8a   : > { %v4954_v27 = vpop.permute.xlu1 %4953  ;;  %v5016_v28 = vpop.permute.xlu0 %5015 }
 0xe8b   : > { %v5342_v32 = vsel %vm5329_vm4, %v5325_v54, %v5016_v28  ;;  %v5326_v24 = vsel %vm5312_vm3, %v5309_v8, %v4954_v27  ;;  %v10095_v27 = vld [vmem:[#allocation3_spill] sm:$0xff]  ;;  %v10098_v54 = vld [vmem:[#allocation8_spill] sm:$0xff] }
 0xe8e   : > { %v5018_v12 = vpop.permute.xlu1 %5017  ;;  %v5080_v35 = vpop.permute.xlu0 %5079 }
 0xe8f   : > { %v5359_v18 = vsel %vm5346_vm5, %v5342_v32, %v5080_v35  ;;  %v5343_v11 = vsel %vm5329_vm4, %v5326_v24, %v5018_v12 }
 0xe92   : > { %v5082_v17 = vpop.permute.xlu1 %5081  ;;  %v5144_v50 = vpop.permute.xlu0 %5143 }
 0xe93   : > { %v5376_v16 = vsel %vm5363_vm6, %v5359_v18, %v5144_v50  ;;  %v5360_v31 = vsel %vm5346_vm5, %v5343_v11, %v5082_v17  ;;  %v10096_v17 = vld [vmem:[#allocation5_spill] sm:$0xff] }
 0xe96   : > { %v5146_v6 = vpop.permute.xlu1 %5145  ;;  %v5208_v2 = vpop.permute.xlu0 %5207 }
 0xe97   : > { %v5393_v62 = vsel %vm5380_vm7, %v5376_v16, %v5208_v2  ;;  %v5377_v57 = vsel %vm5363_vm6, %v5360_v31, %v5146_v6  ;;  %v10099_v2 = vld [vmem:[#allocation7_spill] sm:$0xff]  ;;  %v10107_v31 = vld [vmem:[#allocation14_spill] sm:$0xff] }
 0xe9a   : > { %v5210_v36 = vpop.permute.xlu1 %5209  ;;  %v5272_v44 = vpop.permute.xlu0 %5271 }
 0xe9b   : > { %v5410_v42 = vsel %vm5397_vm8, %v5393_v62, %v5272_v44  ;;  %v5394_v10 = vsel %vm5380_vm7, %v5377_v57, %v5210_v36  ;;  %v10104_v36 = vld [vmem:[#allocation13_spill] sm:$0xff] }
 0xe9c   : > { %v5426_v33 = vmul.f32 0.35355338, %v5410_v42  ;;  %v10106_v42 = vld [vmem:[#allocation17_spill] sm:$0xff] }
 0xe9e   : > { %v5274_v15 = vpop.permute.xlu1 %5273  ;;  %5470 = vrot.lane.b32.xlu0 %v5426_v33, %s6924_s26  ;;  %v5276_v60 = vpop.permute.xlu0 %5275 }
 0xe9f   : > { %v5411_v59 = vsel %vm5397_vm8, %v5394_v10, %v5274_v15  ;;  %v5412_v49 = vsel %vm5397_vm8, %v5395_v39, %v5276_v60 }
 0xea0   : > { %v5427_v9 = vmul.f32 0.35355338, %v5411_v59  ;;  %v5428_v26 = vmul.f32 0.35355338, %v5412_v49 }
 0xea2   : > { %5472 = vrot.lane.b32.xlu1 %v5427_v9, %s6924_s26  ;;  %v5278_v58 = vpop.permute.xlu1 %5277  ;;  %5474 = vrot.lane.b32.xlu0 %v5428_v26, %s6924_s26  ;;  %v5451_v41 = vpop.permute.xlu0 %5450 }
 0xea3   : > { %v5413_v43 = vsel %vm5397_vm8, %v5396_v20, %v5278_v58  ;;  %v5497_v53 = vsel %vm5494_vm9, %v10093_v14, %v5451_v41 }
 0xea4   : > { %v5429_v45 = vmul.f32 0.35355338, %v5413_v43  ;;  %5514 = vst.msk [vmem:[%s9806_s29 + $0x10] sm:$0xff] %vm5511_vm10, %v5497_v53 }
 0xea6   : > { %5476 = vrot.lane.b32.xlu1 %v5429_v45, %s6924_s26  ;;  %v5453_v4 = vpop.permute.xlu1 %5452  ;;  %v5447_v1 = vpop.permute.xlu0 %5446 }
 0xea7   : > { %v5498_v25 = vsel %vm5494_vm9, %v10094_v46, %v5453_v4  ;;  %v5495_v28 = vsel %vm5494_vm9, %v10095_v27, %v5447_v1 }
 0xea8   : > { %5515 = vst.msk [vmem:[%s9806_s29 + $0x18] sm:$0xff] %vm5511_vm10, %v5498_v25  ;;  %5512 = vst.msk [vmem:[%s9806_s29] sm:$0xff] %vm5511_vm10, %v5495_v28 }
 0xeaa   : > { %v5449_v12 = vpop.permute.xlu1 %5448  ;;  %v5459_v35 = vpop.permute.xlu0 %5458 }
 0xeab   : > { %v5496_v50 = vsel %vm5494_vm9, %v10096_v17, %v5449_v12  ;;  %v5501_v38 = vsel %vm5494_vm9, %v10097_v13, %v5459_v35 }
 0xeac   : > { %5513 = vst.msk [vmem:[%s9806_s29 + $0x8] sm:$0xff] %vm5511_vm10, %v5496_v50  ;;  %5518 = vst.msk [vmem:[%s9806_s29 + $0x30] sm:$0xff] %vm5511_vm10, %v5501_v38 }
 0xeae   : > { %v5461_v5 = vpop.permute.xlu1 %5460  ;;  %v5455_v34 = vpop.permute.xlu0 %5454 }
 0xeaf   : > { %v5502_v6 = vsel %vm5494_vm9, %v10098_v54, %v5461_v5  ;;  %v5499_v3 = vsel %vm5494_vm9, %v10099_v2, %v5455_v34 }
 0xeb0   : > { %5519 = vst.msk [vmem:[%s9806_s29 + $0x38] sm:$0xff] %vm5511_vm10, %v5502_v6  ;;  %5516 = vst.msk [vmem:[%s9806_s29 + $0x20] sm:$0xff] %vm5511_vm10, %v5499_v3 }
 0xeb2   : > { %v5457_v29 = vpop.permute.xlu1 %5456 }
 0xeb3   : > { %v5500_v48 = vsel %vm5494_vm9, %v10100_v40, %v5457_v29 }
 0xeb4   : > { %5517 = vst.msk [vmem:[%s9806_s29 + $0x28] sm:$0xff] %vm5511_vm10, %v5500_v48 }
 0xec0   : > { %v5467_v55 = vpop.permute.xlu0 %5466 }
 0xec1   : > { %v5505_v32 = vsel %vm5494_vm9, %v10101_v19, %v5467_v55 }
 0xec2   : > { %5522 = vst.msk [vmem:[%s9806_s29 + $0x50] sm:$0xff] %vm5511_vm10, %v5505_v32 }
 0xec4   : > { %v5469_v18 = vpop.permute.xlu1 %5468 }
 0xec5   : > { %v5506_v8 = vsel %vm5494_vm9, %v10102_v52, %v5469_v18 }
 0xec6   : > { %5523 = vst.msk [vmem:[%s9806_s29 + $0x58] sm:$0xff] %vm5511_vm10, %v5506_v8 }
 0xedc   : > { %v5463_v16 = vpop.permute.xlu0 %5462 }
 0xedd   : > { %v5503_v24 = vsel %vm5494_vm9, %v10103_v21, %v5463_v16 }
 0xede   : > { %5520 = vst.msk [vmem:[%s9806_s29 + $0x40] sm:$0xff] %vm5511_vm10, %v5503_v24 }
 0xee0   : > { %v5465_v62 = vpop.permute.xlu1 %5464 }
 0xee1   : > { %v5504_v44 = vsel %vm5494_vm9, %v10104_v36, %v5465_v62 }
 0xee2   : > { %5521 = vst.msk [vmem:[%s9806_s29 + $0x48] sm:$0xff] %vm5511_vm10, %v5504_v44 }
 0xf10   : > { %v5471_v37 = vpop.permute.xlu0 %5470 }
 0xf11   : > { %v5507_v22 = vsel %vm5494_vm9, %v10105_v56, %v5471_v37 }
 0xf12   : > { %5524 = vst.msk [vmem:[%s9806_s29 + $0x60] sm:$0xff] %vm5511_vm10, %v5507_v22 }
 0xf14   : > { %v5473_v23 = vpop.permute.xlu1 %5472  ;;  %v5475_v11 = vpop.permute.xlu0 %5474 }
 0xf15   : > { %v5508_v63 = vsel %vm5494_vm9, %v10106_v42, %v5473_v23  ;;  %v5509_v33 = vsel %vm5494_vm9, %v10107_v31, %v5475_v11 }
 0xf16   : > { %5525 = vst.msk [vmem:[%s9806_s29 + $0x68] sm:$0xff] %vm5511_vm10, %v5508_v63  ;;  %5526 = vst.msk [vmem:[%s9806_s29 + $0x70] sm:$0xff] %vm5511_vm10, %v5509_v33 }
 0xf18   : > { %v5477_v7 = vpop.permute.xlu1 %5476 }
 0xf19   : > { %v5510_v57 = vsel %vm5494_vm9, %v10108_v30, %v5477_v7 }
 0xf1a   : > { %5527 = vst.msk [vmem:[%s9806_s29 + $0x78] sm:$0xff] %vm5511_vm10, %v5510_v57 }
 0xf1b PF: > { %s20_s13 = sadd.s32 1, %s6912_s13  }
 0xf1c   : > { %p17_p4 = scmp.ge.s32.totalorder %s20_s13, 10  }
 0xf1e   :  { %19 = sbr.rel (!%p17_p4) target bundleno = 1 (0x1), region = 104 }

</bundles_post_ra>
